<compile_context>
chip_gen: v7x
topology: tpu7x:2x2x1
jax: 0.10.0
libtpu: 0.0.40
codegen_flags: <defaults>
</compile_context>

<pallas_src>
import jax
import jax.numpy as jnp
from jax.experimental import pallas as pl
from jax.experimental.pallas import tpu as pltpu

_BN_EPS = 1e-5


# ---------------------------------------------------------------------------
# Generation-aware VMEM budgets (perf-review item: v5e/v6e 128 MiB, v7x 64 MiB)
# ---------------------------------------------------------------------------
def _vmem_limit_bytes():
    phys = 64 * 1024 * 1024
    try:
        info = pltpu.get_tpu_info()
        phys = int(getattr(info, "vmem_capacity_bytes", phys))
    except Exception:
        pass
    return max(32 * 1024 * 1024, min(int(phys * 3 // 4), 100 * 1024 * 1024))


_VMEM_LIMIT = _vmem_limit_bytes()
_BLOCK_BUDGET = _VMEM_LIMIT // 2


# ---------------------------------------------------------------------------
# Kernels
# ---------------------------------------------------------------------------
def _l0_matmul_kernel(x_ref, w_ref, y_ref):
    # Layer 0: ConvTranspose2d(k=4, s=1, p=0) on a 1x1 input == plain matmul.
    y_ref[...] = jnp.dot(w_ref[...], x_ref[...],
                         preferred_element_type=jnp.float32)


def _make_conv2x_kernel(h, w, final):
    """ConvTranspose2d(k=4, s=2, p=1) via in-kernel 9-tap shifted-window matmuls.

    Input ref holds the zero-padded image flattened with row stride (w + 2);
    output columns keep 2 junk columns per image row (cropped in XLA glue and
    excluded from the BN statistics by the valid-column mask).
    """
    wp = w + 2
    l_out = h * wp

    def _accumulate(x_ref, w_ref):
        x = x_ref[0]                                  # [Cin, (h+3)*(w+2)] bf16
        tr = w_ref.shape[1]
        acc = jnp.zeros((tr, l_out), jnp.float32)
        for t in range(9):                            # static 3x3 tap loop
            u, v = divmod(t, 3)
            off = u * wp + v
            a = x[:, off:off + l_out]                 # contiguous shifted window
            acc = acc + jnp.dot(w_ref[t], a,
                                preferred_element_type=jnp.float32)
        return acc

    if final:
        def kernel(x_ref, w_ref, b_ref, y_ref):
            acc = _accumulate(x_ref, w_ref)
            y_ref[...] = jnp.tanh(acc + b_ref[...]).astype(y_ref.dtype)[None]
        return kernel

    def kernel(x_ref, w_ref, m_ref, y_ref, s_ref):
        acc = _accumulate(x_ref, w_ref)
        y_ref[...] = acc.astype(y_ref.dtype)[None]
        m = m_ref[...].astype(jnp.float32)            # [1, l_out] valid-col mask
        ym = acc * m
        s = jnp.sum(ym, axis=1, keepdims=True)        # [TR, 1]
        q = jnp.sum(ym * acc, axis=1, keepdims=True)  # [TR, 1]
        s_ref[...] = jnp.concatenate([s, q], axis=1)[None, None]
    return kernel


# ---------------------------------------------------------------------------
# Pallas wrappers
# ---------------------------------------------------------------------------
def _row_tile(rows, cin, l_in, l_out, budget):
    """Largest multiple-of-8 divisor of `rows` whose VMEM footprint fits."""
    def need(tr):
        return (2 * cin * l_in * 2 +        # x block (bf16, double-buffered)
                2 * 9 * tr * cin * 2 +      # phase-tap weight block
                2 * tr * l_out * 2 +        # y block
                tr * l_out * 4 +            # f32 accumulator
                cin * l_out * 2 +           # per-tap shifted-window slice
                2 * tr * 2 * 4)             # stats partials
    if need(rows) <= budget:
        return rows
    for tr in range(8 * (rows // 8), 0, -8):
        if rows % tr == 0 and need(tr) <= budget:
            return tr
    return rows


def l0_matmul(w0r, x0):
    rows, cin = w0r.shape
    n = x0.shape[1]
    return pl.pallas_call(
        _l0_matmul_kernel,
        out_shape=jax.ShapeDtypeStruct((rows, n), jnp.float32),
        grid_spec=pltpu.PrefetchScalarGridSpec(
            num_scalar_prefetch=0, grid=(1,),
            in_specs=[pl.BlockSpec((cin, n), lambda i: (0, 0)),
                      pl.BlockSpec((rows, cin), lambda i: (0, 0))],
            out_specs=pl.BlockSpec((rows, n), lambda i: (0, 0))),
        compiler_params=pltpu.CompilerParams(
            dimension_semantics=("arbitrary",),
            vmem_limit_bytes=_VMEM_LIMIT),
    )(x0, w0r)


def conv_transpose_2x(x_flat, w_taps, h, w, *, mask=None, bias=None):
    """x_flat: [N, Cin, (h+3)*(w+2)] bf16; w_taps: [9, 4*Cout, Cin] bf16."""
    n, cin, l_in = x_flat.shape
    rows = w_taps.shape[1]
    l_out = h * (w + 2)
    final = bias is not None
    tr = _row_tile(rows, cin, l_in, l_out, _BLOCK_BUDGET)
    rt = rows // tr

    x_spec = pl.BlockSpec((1, cin, l_in), lambda i, r: (i, 0, 0))
    w_spec = pl.BlockSpec((9, tr, cin), lambda i, r: (0, r, 0))
    y_spec = pl.BlockSpec((1, tr, l_out), lambda i, r: (i, r, 0))
    cparams = pltpu.CompilerParams(
        dimension_semantics=("parallel", "parallel"),
        vmem_limit_bytes=_VMEM_LIMIT)
    kernel = _make_conv2x_kernel(h, w, final)

    if final:
        return pl.pallas_call(
            kernel,
            out_shape=jax.ShapeDtypeStruct((n, rows, l_out), jnp.bfloat16),
            grid_spec=pltpu.PrefetchScalarGridSpec(
                num_scalar_prefetch=0, grid=(n, rt),
                in_specs=[x_spec, w_spec,
                          pl.BlockSpec((tr, 1), lambda i, r: (r, 0))],
                out_specs=y_spec),
            compiler_params=cparams,
        )(x_flat, w_taps, bias)

    return pl.pallas_call(
        kernel,
        out_shape=(jax.ShapeDtypeStruct((n, rows, l_out), jnp.bfloat16),
                   jax.ShapeDtypeStruct((n, rt, tr, 2), jnp.float32)),
        grid_spec=pltpu.PrefetchScalarGridSpec(
            num_scalar_prefetch=0, grid=(n, rt),
            in_specs=[x_spec, w_spec,
                      pl.BlockSpec((1, l_out), lambda i, r: (0, 0))],
            out_specs=(y_spec,
                       pl.BlockSpec((1, 1, tr, 2), lambda i, r: (i, r, 0, 0)))),
        compiler_params=cparams,
    )(x_flat, w_taps, mask)


# ---------------------------------------------------------------------------
# XLA glue (fused BN apply + ReLU + pixel shuffle + pad; one pass per layer)
# ---------------------------------------------------------------------------
def _pad_flatten(img):
    """[N, C, H, W] -> [N, C, (H+3)*(W+2)] bf16 zero-padded for the 3x3 window."""
    x = jnp.pad(img, ((0, 0), (0, 0), (1, 2), (1, 1))).astype(jnp.bfloat16)
    n, c, hp, wp = x.shape
    return x.reshape(n, c, hp * wp)


def _bn_scale_shift(tot_sum, tot_sq, count):
    mean = tot_sum / count
    var = jnp.maximum(tot_sq / count - mean * mean, 0.0)   # clamp (review note)
    inv = jax.lax.rsqrt(var + _BN_EPS)
    return inv, -mean * inv


def _l0_to_padded_image(y0, cout, n):
    # y0: [cout*16, N] f32, rows ordered (co, a, b)
    yr = y0.reshape(cout, 16, n)
    mean = jnp.mean(yr, axis=(1, 2))
    var = jnp.maximum(jnp.mean(yr * yr, axis=(1, 2)) - mean * mean, 0.0)
    inv = jax.lax.rsqrt(var + _BN_EPS)
    yq = y0.astype(jnp.bfloat16).astype(jnp.float32).reshape(cout, 16, n)
    z = jnp.maximum((yq - mean[:, None, None]) * inv[:, None, None], 0.0)
    img = jnp.transpose(z.reshape(cout, 4, 4, n), (3, 0, 1, 2))   # [N, C, 4, 4]
    return _pad_flatten(img)


def _bn_relu_shuffle_pad(y, stats, cout, h, w):
    # y: [N, 4*cout, h*(w+2)] bf16 ; stats: [N, RT, TR, 2] f32
    n = y.shape[0]
    tot = stats.sum(axis=0).reshape(4 * cout, 2)
    s4 = tot[:, 0].reshape(4, cout).sum(axis=0)
    q4 = tot[:, 1].reshape(4, cout).sum(axis=0)
    inv, shift = _bn_scale_shift(s4, q4, 4.0 * n * h * w)
    y6 = y.reshape(n, 2, 2, cout, h, w + 2)[..., :w].astype(jnp.float32)
    y6 = (y6 * inv[None, None, None, :, None, None]
          + shift[None, None, None, :, None, None])
    y6 = jnp.maximum(y6, 0.0)
    img = jnp.transpose(y6, (0, 3, 4, 1, 5, 2)).reshape(n, cout, 2 * h, 2 * w)
    return _pad_flatten(img)


def _shuffle_crop(y, cout, h, w):
    n = y.shape[0]
    y6 = y.reshape(n, 2, 2, cout, h, w + 2)[..., :w]
    return jnp.transpose(y6, (0, 3, 4, 1, 5, 2)).reshape(n, cout, 2 * h, 2 * w)


# ---------------------------------------------------------------------------
# One-time weight marshalling (hoisted out of the forward pass)
# ---------------------------------------------------------------------------
def _phase_taps(w_pt):
    """PyTorch ConvTranspose2d weight [Cin, Cout, 4, 4] -> [9, 4*Cout, Cin] bf16."""
    cin, cout = w_pt.shape[0], w_pt.shape[1]
    wt = jnp.zeros((3, 3, 2, 2, cout, cin), jnp.float32)
    for r in range(2):
        for c in range(2):
            for a in range(2):
                for b in range(2):
                    u, v = r + a, c + b
                    kh, kw = 3 - (2 * a + r), 3 - (2 * b + c)
                    wt = wt.at[u, v, r, c].set(w_pt[:, :, kh, kw].T)
    return wt.reshape(9, 4 * cout, cin).astype(jnp.bfloat16)


def _col_mask(h, w):
    m = jnp.pad(jnp.ones((h, w), jnp.float32), ((0, 0), (0, 2)))
    return m.reshape(1, h * (w + 2)).astype(jnp.bfloat16)


def prepare_params(params):
    prep = {}
    w0 = params["w0"]                                    # [Cin, Cout, 4, 4]
    cout0 = w0.shape[1]
    prep["w0"] = jnp.transpose(w0, (1, 2, 3, 0)).reshape(
        cout0 * 16, w0.shape[0]).astype(jnp.bfloat16)
    for i in range(1, 6):
        prep[f"w{i}"] = _phase_taps(params[f"w{i}"])
    h = 4
    for i in range(1, 5):
        prep[f"mask{i}"] = _col_mask(h, h)
        h *= 2
    cimg = params["w5"].shape[1]
    prep["b5"] = jnp.tile(params["b5"].astype(jnp.float32), 4).reshape(
        4 * cimg, 1)
    return prep


# ---------------------------------------------------------------------------
# Generator forward
# ---------------------------------------------------------------------------
def generator_forward(x_nchw, prep):
    n = x_nchw.shape[0]
    cin0 = x_nchw.shape[1]

    # layer 0: 1x1 noise -> 4x4 (plain matmul) + BN + ReLU
    x0 = x_nchw.reshape(n, cin0).T.astype(jnp.bfloat16)          # [Cin, N]
    w0 = prep["w0"]
    cout0 = w0.shape[0] // 16
    y0 = l0_matmul(w0, x0)                                       # [Cout0*16, N]
    x_flat = _l0_to_padded_image(y0, cout0, n)

    # layers 1-4: ConvT(4,2,1) + BN + ReLU   (4 -> 8 -> 16 -> 32 -> 64)
    h = 4
    for i in range(1, 5):
        w_t = prep[f"w{i}"]
        cout = w_t.shape[1] // 4
        y, stats = conv_transpose_2x(x_flat, w_t, h, h, mask=prep[f"mask{i}"])
        x_flat = _bn_relu_shuffle_pad(y, stats, cout, h, h)
        h *= 2

    # final layer: ConvT(4,2,1) + bias + tanh   (64 -> 128)
    w_t = prep["w5"]
    cimg = w_t.shape[1] // 4
    y = conv_transpose_2x(x_flat, w_t, h, h, bias=prep["b5"])
    out = _shuffle_crop(y, cimg, h, h)
    return out.astype(jnp.float32)


# ---------------------------------------------------------------------------
# Pure-XLA reference (validates flip/phase mapping, pixel shuffle and BN)
# ---------------------------------------------------------------------------
def reference_forward(x_nchw, params):
    def conv_t(x, w, stride, padding):
        k = w.shape[2]
        wf = jnp.transpose(jnp.flip(w, (2, 3)), (1, 0, 2, 3))     # [Cout,Cin,k,k]
        q = k - 1 - padding
        return jax.lax.conv_general_dilated(
            x.astype(jnp.bfloat16), wf.astype(jnp.bfloat16),
            window_strides=(1, 1), padding=[(q, q), (q, q)],
            lhs_dilation=(stride, stride),
            dimension_numbers=("NCHW", "OIHW", "NCHW"),
            preferred_element_type=jnp.float32)

    h = x_nchw.astype(jnp.float32)
    strides = [1, 2, 2, 2, 2]
    pads = [0, 1, 1, 1, 1]
    for i in range(5):
        y = conv_t(h, params[f"w{i}"], strides[i], pads[i])
        mean = jnp.mean(y, axis=(0, 2, 3))
        var = jnp.maximum(jnp.mean(y * y, axis=(0, 2, 3)) - mean * mean, 0.0)
        inv = jax.lax.rsqrt(var + _BN_EPS)
        yq = y.astype(jnp.bfloat16).astype(jnp.float32)   # mirror bf16 Y store
        h = jnp.maximum((yq - mean[None, :, None, None])
                        * inv[None, :, None, None], 0.0)
        h = h.astype(jnp.bfloat16).astype(jnp.float32)    # mirror bf16 activation
    y = conv_t(h, params["w5"], 2, 1) + params["b5"][None, :, None, None]
    return jnp.tanh(y)


def init_params(key, channel_noise, channel_image, feature_g):
    chans = [channel_noise, feature_g * 16, feature_g * 8, feature_g * 4,
             feature_g * 2, feature_g, channel_image]
    keys = jax.random.split(key, 7)
    params = {}
    for i in range(6):
        cin, cout = chans[i], chans[i + 1]
        # PyTorch ConvTranspose2d weight layout: [in_channels, out_channels, kH, kW]
        params[f"w{i}"] = 0.05 * jax.random.normal(keys[i], (cin, cout, 4, 4),
                                                   jnp.float32)
    params["b5"] = 0.05 * jax.random.normal(keys[6], (channel_image,),
                                            jnp.float32)
    return params


if __name__ == "__main__":
    channel_noise, channel_image, feature_g = 8, 3, 4
    batch = 2
    key = jax.random.PRNGKey(0)
    kp, kx = jax.random.split(key)

    params = init_params(kp, channel_noise, channel_image, feature_g)
    x = jax.random.normal(kx, (batch, channel_noise, 1, 1), jnp.float32)

    prep = prepare_params(params)                 # one-time weight marshalling
    out = jax.jit(generator_forward)(x, prep)
    out = jax.block_until_ready(out)

    assert out.shape == (batch, channel_image, 128, 128), out.shape
    assert bool(jnp.all(jnp.isfinite(out)))
    assert float(jnp.max(jnp.abs(out))) <= 1.0 + 1e-5   # tanh output range

    ref = jax.jit(reference_forward)(x, params)
    err = float(jnp.max(jnp.abs(out - ref.astype(jnp.float32))))
    assert err < 3e-2, f"mismatch vs conv_transpose reference: {err}"
    print("KERNEL_OK")
</pallas_src>

<mosaic_0001>
module attributes {stable_mosaic.version = 11 : i64} {
  func.func @_l0_matmul_kernel(%arg0: i32, %arg1: memref<8x2xbf16, #tpu.memory_space<vmem>>, %arg2: memref<1024x8xbf16, #tpu.memory_space<vmem>>, %arg3: memref<1024x2xf32, #tpu.memory_space<vmem>>) attributes {dimension_semantics = [#tpu.dimension_semantics<arbitrary>], iteration_bounds = array<i64: 1>, scalar_prefetch = 0 : i64, scratch_operands = 0 : i64, tpu.core_type = #tpu.core_type<tc>, window_params = [{pipeline_mode = #tpu.pipeline_mode<synchronous>, transform_indices = @transform_0, window_bounds = array<i64: 8, 2>}, {pipeline_mode = #tpu.pipeline_mode<synchronous>, transform_indices = @transform_1, window_bounds = array<i64: 1024, 8>}, {pipeline_mode = #tpu.pipeline_mode<synchronous>, transform_indices = @transform_2, window_bounds = array<i64: 1024, 2>}]} {
    %c0 = arith.constant 0 : index
    %c0_0 = arith.constant 0 : index
    %0 = vector.load %arg2[%c0, %c0_0] : memref<1024x8xbf16, #tpu.memory_space<vmem>>, vector<1024x8xbf16>
    %c0_1 = arith.constant 0 : index
    %c0_2 = arith.constant 0 : index
    %1 = vector.load %arg1[%c0_1, %c0_2] : memref<8x2xbf16, #tpu.memory_space<vmem>>, vector<8x2xbf16>
    %cst = arith.constant dense<0.000000e+00> : vector<1024x2xf32>
    %2 = tpu.matmul %0, %1, %cst {dimension_numbers = #tpu.dot_dimension_numbers<[1], [0], [0], [1], [0, 0, 1, 1], [], []>} : vector<1024x8xbf16>, vector<8x2xbf16>, vector<1024x2xf32> -> vector<1024x2xf32>
    %c0_3 = arith.constant 0 : index
    %c0_4 = arith.constant 0 : index
    %3 = vector.load %arg3[%c0_3, %c0_4] : memref<1024x2xf32, #tpu.memory_space<vmem>>, vector<1024x2xf32>
    tpu.vector_store %arg3[%c0_3, %c0_4], %2 {strides = array<i32>} : memref<1024x2xf32, #tpu.memory_space<vmem>>, vector<1024x2xf32>,
    return
  }
  func.func @transform_0(%arg0: i32) -> (i32, i32) {
    %c0_i32 = arith.constant 0 : i32
    %c0_i32_0 = arith.constant 0 : i32
    %c0_i32_1 = arith.constant 0 : i32
    return %c0_i32, %c0_i32_0 : i32, i32
  }
  func.func @transform_1(%arg0: i32) -> (i32, i32) {
    %c0_i32 = arith.constant 0 : i32
    %c0_i32_0 = arith.constant 0 : i32
    %c0_i32_1 = arith.constant 0 : i32
    return %c0_i32, %c0_i32_0 : i32, i32
  }
  func.func @transform_2(%arg0: i32) -> (i32, i32) {
    %c0_i32 = arith.constant 0 : i32
    %c0_i32_0 = arith.constant 0 : i32
    %c0_i32_1 = arith.constant 0 : i32
    return %c0_i32, %c0_i32_0 : i32, i32
  }
}

module attributes {stable_mosaic.version = 11 : i64} {
  func.func @kernel(%arg0: i32, %arg1: i32, %arg2: memref<1x64x42xbf16, #tpu.memory_space<vmem>>, %arg3: memref<9x128x64xbf16, #tpu.memory_space<vmem>>, %arg4: memref<1x24xbf16, #tpu.memory_space<vmem>>, %arg5: memref<1x128x24xbf16, #tpu.memory_space<vmem>>, %arg6: memref<1x1x128x2xf32, #tpu.memory_space<vmem>>) attributes {dimension_semantics = [#tpu.dimension_semantics<parallel>, #tpu.dimension_semantics<parallel>], iteration_bounds = array<i64: 2, 1>, scalar_prefetch = 0 : i64, scratch_operands = 0 : i64, tpu.core_type = #tpu.core_type<tc>, window_params = [{transform_indices = @transform_0, window_bounds = array<i64: 1, 64, 42>}, {transform_indices = @transform_1, window_bounds = array<i64: 9, 128, 64>}, {pipeline_mode = #tpu.pipeline_mode<synchronous>, transform_indices = @transform_2, window_bounds = array<i64: 1, 24>}, {transform_indices = @transform_3, window_bounds = array<i64: 1, 128, 24>}, {transform_indices = @transform_4, window_bounds = array<i64: 1, 1, 128, 2>}]} {
    %c0 = arith.constant 0 : index
    %c0_0 = arith.constant 0 : index
    %c0_1 = arith.constant 0 : index
    %0 = vector.load %arg2[%c0, %c0_0, %c0_1] : memref<1x64x42xbf16, #tpu.memory_space<vmem>>, vector<1x64x42xbf16>
    %1 = vector.shape_cast %0 : vector<1x64x42xbf16> to vector<64x42xbf16>
    %cst = arith.constant 0.000000e+00 : f32
    %2 = vector.broadcast %cst : f32 to vector<128x24xf32>
    %3 = vector.extract_strided_slice %1 {offsets = [0, 0], sizes = [64, 24], strides = [1, 1]} : vector<64x42xbf16> to vector<64x24xbf16>
    %c0_2 = arith.constant 0 : index
    %c0_3 = arith.constant 0 : index
    %c0_4 = arith.constant 0 : index
    %4 = vector.load %arg3[%c0_2, %c0_3, %c0_4] : memref<9x128x64xbf16, #tpu.memory_space<vmem>>, vector<1x128x64xbf16>
    %5 = vector.shape_cast %4 : vector<1x128x64xbf16> to vector<128x64xbf16>
    %cst_5 = arith.constant dense<0.000000e+00> : vector<128x24xf32>
    %6 = tpu.matmul %5, %3, %cst_5 {dimension_numbers = #tpu.dot_dimension_numbers<[1], [0], [0], [1], [0, 0, 1, 1], [], []>} : vector<128x64xbf16>, vector<64x24xbf16>, vector<128x24xf32> -> vector<128x24xf32>
    %7 = arith.addf %2, %6 : vector<128x24xf32>
    %8 = vector.extract_strided_slice %1 {offsets = [0, 1], sizes = [64, 24], strides = [1, 1]} : vector<64x42xbf16> to vector<64x24xbf16>
    %c1 = arith.constant 1 : index
    %c0_6 = arith.constant 0 : index
    %c0_7 = arith.constant 0 : index
    %9 = vector.load %arg3[%c1, %c0_6, %c0_7] : memref<9x128x64xbf16, #tpu.memory_space<vmem>>, vector<1x128x64xbf16>
    %10 = vector.shape_cast %9 : vector<1x128x64xbf16> to vector<128x64xbf16>
    %cst_8 = arith.constant dense<0.000000e+00> : vector<128x24xf32>
    %11 = tpu.matmul %10, %8, %cst_8 {dimension_numbers = #tpu.dot_dimension_numbers<[1], [0], [0], [1], [0, 0, 1, 1], [], []>} : vector<128x64xbf16>, vector<64x24xbf16>, vector<128x24xf32> -> vector<128x24xf32>
    %12 = arith.addf %7, %11 : vector<128x24xf32>
    %13 = vector.extract_strided_slice %1 {offsets = [0, 2], sizes = [64, 24], strides = [1, 1]} : vector<64x42xbf16> to vector<64x24xbf16>
    %c2 = arith.constant 2 : index
    %c0_9 = arith.constant 0 : index
    %c0_10 = arith.constant 0 : index
    %14 = vector.load %arg3[%c2, %c0_9, %c0_10] : memref<9x128x64xbf16, #tpu.memory_space<vmem>>, vector<1x128x64xbf16>
    %15 = vector.shape_cast %14 : vector<1x128x64xbf16> to vector<128x64xbf16>
    %cst_11 = arith.constant dense<0.000000e+00> : vector<128x24xf32>
    %16 = tpu.matmul %15, %13, %cst_11 {dimension_numbers = #tpu.dot_dimension_numbers<[1], [0], [0], [1], [0, 0, 1, 1], [], []>} : vector<128x64xbf16>, vector<64x24xbf16>, vector<128x24xf32> -> vector<128x24xf32>
    %17 = arith.addf %12, %16 : vector<128x24xf32>
    %18 = vector.extract_strided_slice %1 {offsets = [0, 6], sizes = [64, 24], strides = [1, 1]} : vector<64x42xbf16> to vector<64x24xbf16>
    %c3 = arith.constant 3 : index
    %c0_12 = arith.constant 0 : index
    %c0_13 = arith.constant 0 : index
    %19 = vector.load %arg3[%c3, %c0_12, %c0_13] : memref<9x128x64xbf16, #tpu.memory_space<vmem>>, vector<1x128x64xbf16>
    %20 = vector.shape_cast %19 : vector<1x128x64xbf16> to vector<128x64xbf16>
    %cst_14 = arith.constant dense<0.000000e+00> : vector<128x24xf32>
    %21 = tpu.matmul %20, %18, %cst_14 {dimension_numbers = #tpu.dot_dimension_numbers<[1], [0], [0], [1], [0, 0, 1, 1], [], []>} : vector<128x64xbf16>, vector<64x24xbf16>, vector<128x24xf32> -> vector<128x24xf32>
    %22 = arith.addf %17, %21 : vector<128x24xf32>
    %23 = vector.extract_strided_slice %1 {offsets = [0, 7], sizes = [64, 24], strides = [1, 1]} : vector<64x42xbf16> to vector<64x24xbf16>
    %c4 = arith.constant 4 : index
    %c0_15 = arith.constant 0 : index
    %c0_16 = arith.constant 0 : index
    %24 = vector.load %arg3[%c4, %c0_15, %c0_16] : memref<9x128x64xbf16, #tpu.memory_space<vmem>>, vector<1x128x64xbf16>
    %25 = vector.shape_cast %24 : vector<1x128x64xbf16> to vector<128x64xbf16>
    %cst_17 = arith.constant dense<0.000000e+00> : vector<128x24xf32>
    %26 = tpu.matmul %25, %23, %cst_17 {dimension_numbers = #tpu.dot_dimension_numbers<[1], [0], [0], [1], [0, 0, 1, 1], [], []>} : vector<128x64xbf16>, vector<64x24xbf16>, vector<128x24xf32> -> vector<128x24xf32>
    %27 = arith.addf %22, %26 : vector<128x24xf32>
    %28 = vector.extract_strided_slice %1 {offsets = [0, 8], sizes = [64, 24], strides = [1, 1]} : vector<64x42xbf16> to vector<64x24xbf16>
    %c5 = arith.constant 5 : index
    %c0_18 = arith.constant 0 : index
    %c0_19 = arith.constant 0 : index
    %29 = vector.load %arg3[%c5, %c0_18, %c0_19] : memref<9x128x64xbf16, #tpu.memory_space<vmem>>, vector<1x128x64xbf16>
    %30 = vector.shape_cast %29 : vector<1x128x64xbf16> to vector<128x64xbf16>
    %cst_20 = arith.constant dense<0.000000e+00> : vector<128x24xf32>
    %31 = tpu.matmul %30, %28, %cst_20 {dimension_numbers = #tpu.dot_dimension_numbers<[1], [0], [0], [1], [0, 0, 1, 1], [], []>} : vector<128x64xbf16>, vector<64x24xbf16>, vector<128x24xf32> -> vector<128x24xf32>
    %32 = arith.addf %27, %31 : vector<128x24xf32>
    %33 = vector.extract_strided_slice %1 {offsets = [0, 12], sizes = [64, 24], strides = [1, 1]} : vector<64x42xbf16> to vector<64x24xbf16>
    %c6 = arith.constant 6 : index
    %c0_21 = arith.constant 0 : index
    %c0_22 = arith.constant 0 : index
    %34 = vector.load %arg3[%c6, %c0_21, %c0_22] : memref<9x128x64xbf16, #tpu.memory_space<vmem>>, vector<1x128x64xbf16>
    %35 = vector.shape_cast %34 : vector<1x128x64xbf16> to vector<128x64xbf16>
    %cst_23 = arith.constant dense<0.000000e+00> : vector<128x24xf32>
    %36 = tpu.matmul %35, %33, %cst_23 {dimension_numbers = #tpu.dot_dimension_numbers<[1], [0], [0], [1], [0, 0, 1, 1], [], []>} : vector<128x64xbf16>, vector<64x24xbf16>, vector<128x24xf32> -> vector<128x24xf32>
    %37 = arith.addf %32, %36 : vector<128x24xf32>
    %38 = vector.extract_strided_slice %1 {offsets = [0, 13], sizes = [64, 24], strides = [1, 1]} : vector<64x42xbf16> to vector<64x24xbf16>
    %c7 = arith.constant 7 : index
    %c0_24 = arith.constant 0 : index
    %c0_25 = arith.constant 0 : index
    %39 = vector.load %arg3[%c7, %c0_24, %c0_25] : memref<9x128x64xbf16, #tpu.memory_space<vmem>>, vector<1x128x64xbf16>
    %40 = vector.shape_cast %39 : vector<1x128x64xbf16> to vector<128x64xbf16>
    %cst_26 = arith.constant dense<0.000000e+00> : vector<128x24xf32>
    %41 = tpu.matmul %40, %38, %cst_26 {dimension_numbers = #tpu.dot_dimension_numbers<[1], [0], [0], [1], [0, 0, 1, 1], [], []>} : vector<128x64xbf16>, vector<64x24xbf16>, vector<128x24xf32> -> vector<128x24xf32>
    %42 = arith.addf %37, %41 : vector<128x24xf32>
    %43 = vector.extract_strided_slice %1 {offsets = [0, 14], sizes = [64, 24], strides = [1, 1]} : vector<64x42xbf16> to vector<64x24xbf16>
    %c8 = arith.constant 8 : index
    %c0_27 = arith.constant 0 : index
    %c0_28 = arith.constant 0 : index
    %44 = vector.load %arg3[%c8, %c0_27, %c0_28] : memref<9x128x64xbf16, #tpu.memory_space<vmem>>, vector<1x128x64xbf16>
    %45 = vector.shape_cast %44 : vector<1x128x64xbf16> to vector<128x64xbf16>
    %cst_29 = arith.constant dense<0.000000e+00> : vector<128x24xf32>
    %46 = tpu.matmul %45, %43, %cst_29 {dimension_numbers = #tpu.dot_dimension_numbers<[1], [0], [0], [1], [0, 0, 1, 1], [], []>} : vector<128x64xbf16>, vector<64x24xbf16>, vector<128x24xf32> -> vector<128x24xf32>
    %47 = arith.addf %42, %46 : vector<128x24xf32>
    %48 = arith.truncf %47 : vector<128x24xf32> to vector<128x24xbf16>
    %49 = vector.shape_cast %48 : vector<128x24xbf16> to vector<1x128x24xbf16>
    %c0_30 = arith.constant 0 : index
    %c0_31 = arith.constant 0 : index
    %c0_32 = arith.constant 0 : index
    %50 = vector.load %arg5[%c0_30, %c0_31, %c0_32] : memref<1x128x24xbf16, #tpu.memory_space<vmem>>, vector<1x128x24xbf16>
    tpu.vector_store %arg5[%c0_30, %c0_31, %c0_32], %49 {strides = array<i32>} : memref<1x128x24xbf16, #tpu.memory_space<vmem>>, vector<1x128x24xbf16>,
    %c0_33 = arith.constant 0 : index
    %c0_34 = arith.constant 0 : index
    %51 = vector.load %arg4[%c0_33, %c0_34] : memref<1x24xbf16, #tpu.memory_space<vmem>>, vector<1x24xbf16>
    %52 = arith.extf %51 : vector<1x24xbf16> to vector<1x24xf32>
    %53 = vector.broadcast %52 : vector<1x24xf32> to vector<128x24xf32>
    %54 = arith.mulf %47, %53 : vector<128x24xf32>
    %cst_35 = arith.constant dense<0.000000e+00> : vector<128xf32>
    %55 = vector.multi_reduction <add>, %54, %cst_35 [1] : vector<128x24xf32> to vector<128xf32>
    %56 = vector.shape_cast %55 : vector<128xf32> to vector<128x1xf32>
    %57 = arith.mulf %54, %47 : vector<128x24xf32>
    %cst_36 = arith.constant dense<0.000000e+00> : vector<128xf32>
    %58 = vector.multi_reduction <add>, %57, %cst_36 [1] : vector<128x24xf32> to vector<128xf32>
    %59 = vector.shape_cast %58 : vector<128xf32> to vector<128x1xf32>
    %60 = tpu.concatenate %56, %59 in 1 : vector<128x1xf32>, vector<128x1xf32> -> vector<128x2xf32>
    %61 = vector.shape_cast %60 : vector<128x2xf32> to vector<1x1x128x2xf32>
    %c0_37 = arith.constant 0 : index
    %c0_38 = arith.constant 0 : index
    %c0_39 = arith.constant 0 : index
    %c0_40 = arith.constant 0 : index
    %62 = vector.load %arg6[%c0_37, %c0_38, %c0_39, %c0_40] : memref<1x1x128x2xf32, #tpu.memory_space<vmem>>, vector<1x1x128x2xf32>
    tpu.vector_store %arg6[%c0_37, %c0_38, %c0_39, %c0_40], %61 {strides = array<i32>} : memref<1x1x128x2xf32, #tpu.memory_space<vmem>>, vector<1x1x128x2xf32>,
    return
  }
  func.func @transform_0(%arg0: i32, %arg1: i32) -> (i32, i32, i32) {
    %c0_i32 = arith.constant 0 : i32
    %c0_i32_0 = arith.constant 0 : i32
    %c0_i32_1 = arith.constant 0 : i32
    return %arg0, %c0_i32, %c0_i32_0 : i32, i32, i32
  }
  func.func @transform_1(%arg0: i32, %arg1: i32) -> (i32, i32, i32) {
    %c0_i32 = arith.constant 0 : i32
    %c0_i32_0 = arith.constant 0 : i32
    %c0_i32_1 = arith.constant 0 : i32
    return %c0_i32, %arg1, %c0_i32_0 : i32, i32, i32
  }
  func.func @transform_2(%arg0: i32, %arg1: i32) -> (i32, i32) {
    %c0_i32 = arith.constant 0 : i32
    %c0_i32_0 = arith.constant 0 : i32
    %c0_i32_1 = arith.constant 0 : i32
    return %c0_i32, %c0_i32_0 : i32, i32
  }
  func.func @transform_3(%arg0: i32, %arg1: i32) -> (i32, i32, i32) {
    %c0_i32 = arith.constant 0 : i32
    %c0_i32_0 = arith.constant 0 : i32
    return %arg0, %arg1, %c0_i32 : i32, i32, i32
  }
  func.func @transform_4(%arg0: i32, %arg1: i32) -> (i32, i32, i32, i32) {
    %c0_i32 = arith.constant 0 : i32
    %c0_i32_0 = arith.constant 0 : i32
    %c0_i32_1 = arith.constant 0 : i32
    return %arg0, %arg1, %c0_i32, %c0_i32_0 : i32, i32, i32, i32
  }
}

module attributes {stable_mosaic.version = 11 : i64} {
  func.func @kernel(%arg0: i32, %arg1: i32, %arg2: memref<1x32x110xbf16, #tpu.memory_space<vmem>>, %arg3: memref<9x64x32xbf16, #tpu.memory_space<vmem>>, %arg4: memref<1x80xbf16, #tpu.memory_space<vmem>>, %arg5: memref<1x64x80xbf16, #tpu.memory_space<vmem>>, %arg6: memref<1x1x64x2xf32, #tpu.memory_space<vmem>>) attributes {dimension_semantics = [#tpu.dimension_semantics<parallel>, #tpu.dimension_semantics<parallel>], iteration_bounds = array<i64: 2, 1>, scalar_prefetch = 0 : i64, scratch_operands = 0 : i64, tpu.core_type = #tpu.core_type<tc>, window_params = [{transform_indices = @transform_0, window_bounds = array<i64: 1, 32, 110>}, {transform_indices = @transform_1, window_bounds = array<i64: 9, 64, 32>}, {pipeline_mode = #tpu.pipeline_mode<synchronous>, transform_indices = @transform_2, window_bounds = array<i64: 1, 80>}, {transform_indices = @transform_3, window_bounds = array<i64: 1, 64, 80>}, {transform_indices = @transform_4, window_bounds = array<i64: 1, 1, 64, 2>}]} {
    %c0 = arith.constant 0 : index
    %c0_0 = arith.constant 0 : index
    %c0_1 = arith.constant 0 : index
    %0 = vector.load %arg2[%c0, %c0_0, %c0_1] : memref<1x32x110xbf16, #tpu.memory_space<vmem>>, vector<1x32x110xbf16>
    %1 = vector.shape_cast %0 : vector<1x32x110xbf16> to vector<32x110xbf16>
    %cst = arith.constant 0.000000e+00 : f32
    %2 = vector.broadcast %cst : f32 to vector<64x80xf32>
    %3 = vector.extract_strided_slice %1 {offsets = [0, 0], sizes = [32, 80], strides = [1, 1]} : vector<32x110xbf16> to vector<32x80xbf16>
    %c0_2 = arith.constant 0 : index
    %c0_3 = arith.constant 0 : index
    %c0_4 = arith.constant 0 : index
    %4 = vector.load %arg3[%c0_2, %c0_3, %c0_4] : memref<9x64x32xbf16, #tpu.memory_space<vmem>>, vector<1x64x32xbf16>
    %5 = vector.shape_cast %4 : vector<1x64x32xbf16> to vector<64x32xbf16>
    %cst_5 = arith.constant dense<0.000000e+00> : vector<64x80xf32>
    %6 = tpu.matmul %5, %3, %cst_5 {dimension_numbers = #tpu.dot_dimension_numbers<[1], [0], [0], [1], [0, 0, 1, 1], [], []>} : vector<64x32xbf16>, vector<32x80xbf16>, vector<64x80xf32> -> vector<64x80xf32>
    %7 = arith.addf %2, %6 : vector<64x80xf32>
    %8 = vector.extract_strided_slice %1 {offsets = [0, 1], sizes = [32, 80], strides = [1, 1]} : vector<32x110xbf16> to vector<32x80xbf16>
    %c1 = arith.constant 1 : index
    %c0_6 = arith.constant 0 : index
    %c0_7 = arith.constant 0 : index
    %9 = vector.load %arg3[%c1, %c0_6, %c0_7] : memref<9x64x32xbf16, #tpu.memory_space<vmem>>, vector<1x64x32xbf16>
    %10 = vector.shape_cast %9 : vector<1x64x32xbf16> to vector<64x32xbf16>
    %cst_8 = arith.constant dense<0.000000e+00> : vector<64x80xf32>
    %11 = tpu.matmul %10, %8, %cst_8 {dimension_numbers = #tpu.dot_dimension_numbers<[1], [0], [0], [1], [0, 0, 1, 1], [], []>} : vector<64x32xbf16>, vector<32x80xbf16>, vector<64x80xf32> -> vector<64x80xf32>
    %12 = arith.addf %7, %11 : vector<64x80xf32>
    %13 = vector.extract_strided_slice %1 {offsets = [0, 2], sizes = [32, 80], strides = [1, 1]} : vector<32x110xbf16> to vector<32x80xbf16>
    %c2 = arith.constant 2 : index
    %c0_9 = arith.constant 0 : index
    %c0_10 = arith.constant 0 : index
    %14 = vector.load %arg3[%c2, %c0_9, %c0_10] : memref<9x64x32xbf16, #tpu.memory_space<vmem>>, vector<1x64x32xbf16>
    %15 = vector.shape_cast %14 : vector<1x64x32xbf16> to vector<64x32xbf16>
    %cst_11 = arith.constant dense<0.000000e+00> : vector<64x80xf32>
    %16 = tpu.matmul %15, %13, %cst_11 {dimension_numbers = #tpu.dot_dimension_numbers<[1], [0], [0], [1], [0, 0, 1, 1], [], []>} : vector<64x32xbf16>, vector<32x80xbf16>, vector<64x80xf32> -> vector<64x80xf32>
    %17 = arith.addf %12, %16 : vector<64x80xf32>
    %18 = vector.extract_strided_slice %1 {offsets = [0, 10], sizes = [32, 80], strides = [1, 1]} : vector<32x110xbf16> to vector<32x80xbf16>
    %c3 = arith.constant 3 : index
    %c0_12 = arith.constant 0 : index
    %c0_13 = arith.constant 0 : index
    %19 = vector.load %arg3[%c3, %c0_12, %c0_13] : memref<9x64x32xbf16, #tpu.memory_space<vmem>>, vector<1x64x32xbf16>
    %20 = vector.shape_cast %19 : vector<1x64x32xbf16> to vector<64x32xbf16>
    %cst_14 = arith.constant dense<0.000000e+00> : vector<64x80xf32>
    %21 = tpu.matmul %20, %18, %cst_14 {dimension_numbers = #tpu.dot_dimension_numbers<[1], [0], [0], [1], [0, 0, 1, 1], [], []>} : vector<64x32xbf16>, vector<32x80xbf16>, vector<64x80xf32> -> vector<64x80xf32>
    %22 = arith.addf %17, %21 : vector<64x80xf32>
    %23 = vector.extract_strided_slice %1 {offsets = [0, 11], sizes = [32, 80], strides = [1, 1]} : vector<32x110xbf16> to vector<32x80xbf16>
    %c4 = arith.constant 4 : index
    %c0_15 = arith.constant 0 : index
    %c0_16 = arith.constant 0 : index
    %24 = vector.load %arg3[%c4, %c0_15, %c0_16] : memref<9x64x32xbf16, #tpu.memory_space<vmem>>, vector<1x64x32xbf16>
    %25 = vector.shape_cast %24 : vector<1x64x32xbf16> to vector<64x32xbf16>
    %cst_17 = arith.constant dense<0.000000e+00> : vector<64x80xf32>
    %26 = tpu.matmul %25, %23, %cst_17 {dimension_numbers = #tpu.dot_dimension_numbers<[1], [0], [0], [1], [0, 0, 1, 1], [], []>} : vector<64x32xbf16>, vector<32x80xbf16>, vector<64x80xf32> -> vector<64x80xf32>
    %27 = arith.addf %22, %26 : vector<64x80xf32>
    %28 = vector.extract_strided_slice %1 {offsets = [0, 12], sizes = [32, 80], strides = [1, 1]} : vector<32x110xbf16> to vector<32x80xbf16>
    %c5 = arith.constant 5 : index
    %c0_18 = arith.constant 0 : index
    %c0_19 = arith.constant 0 : index
    %29 = vector.load %arg3[%c5, %c0_18, %c0_19] : memref<9x64x32xbf16, #tpu.memory_space<vmem>>, vector<1x64x32xbf16>
    %30 = vector.shape_cast %29 : vector<1x64x32xbf16> to vector<64x32xbf16>
    %cst_20 = arith.constant dense<0.000000e+00> : vector<64x80xf32>
    %31 = tpu.matmul %30, %28, %cst_20 {dimension_numbers = #tpu.dot_dimension_numbers<[1], [0], [0], [1], [0, 0, 1, 1], [], []>} : vector<64x32xbf16>, vector<32x80xbf16>, vector<64x80xf32> -> vector<64x80xf32>
    %32 = arith.addf %27, %31 : vector<64x80xf32>
    %33 = vector.extract_strided_slice %1 {offsets = [0, 20], sizes = [32, 80], strides = [1, 1]} : vector<32x110xbf16> to vector<32x80xbf16>
    %c6 = arith.constant 6 : index
    %c0_21 = arith.constant 0 : index
    %c0_22 = arith.constant 0 : index
    %34 = vector.load %arg3[%c6, %c0_21, %c0_22] : memref<9x64x32xbf16, #tpu.memory_space<vmem>>, vector<1x64x32xbf16>
    %35 = vector.shape_cast %34 : vector<1x64x32xbf16> to vector<64x32xbf16>
    %cst_23 = arith.constant dense<0.000000e+00> : vector<64x80xf32>
    %36 = tpu.matmul %35, %33, %cst_23 {dimension_numbers = #tpu.dot_dimension_numbers<[1], [0], [0], [1], [0, 0, 1, 1], [], []>} : vector<64x32xbf16>, vector<32x80xbf16>, vector<64x80xf32> -> vector<64x80xf32>
    %37 = arith.addf %32, %36 : vector<64x80xf32>
    %38 = vector.extract_strided_slice %1 {offsets = [0, 21], sizes = [32, 80], strides = [1, 1]} : vector<32x110xbf16> to vector<32x80xbf16>
    %c7 = arith.constant 7 : index
    %c0_24 = arith.constant 0 : index
    %c0_25 = arith.constant 0 : index
    %39 = vector.load %arg3[%c7, %c0_24, %c0_25] : memref<9x64x32xbf16, #tpu.memory_space<vmem>>, vector<1x64x32xbf16>
    %40 = vector.shape_cast %39 : vector<1x64x32xbf16> to vector<64x32xbf16>
    %cst_26 = arith.constant dense<0.000000e+00> : vector<64x80xf32>
    %41 = tpu.matmul %40, %38, %cst_26 {dimension_numbers = #tpu.dot_dimension_numbers<[1], [0], [0], [1], [0, 0, 1, 1], [], []>} : vector<64x32xbf16>, vector<32x80xbf16>, vector<64x80xf32> -> vector<64x80xf32>
    %42 = arith.addf %37, %41 : vector<64x80xf32>
    %43 = vector.extract_strided_slice %1 {offsets = [0, 22], sizes = [32, 80], strides = [1, 1]} : vector<32x110xbf16> to vector<32x80xbf16>
    %c8 = arith.constant 8 : index
    %c0_27 = arith.constant 0 : index
    %c0_28 = arith.constant 0 : index
    %44 = vector.load %arg3[%c8, %c0_27, %c0_28] : memref<9x64x32xbf16, #tpu.memory_space<vmem>>, vector<1x64x32xbf16>
    %45 = vector.shape_cast %44 : vector<1x64x32xbf16> to vector<64x32xbf16>
    %cst_29 = arith.constant dense<0.000000e+00> : vector<64x80xf32>
    %46 = tpu.matmul %45, %43, %cst_29 {dimension_numbers = #tpu.dot_dimension_numbers<[1], [0], [0], [1], [0, 0, 1, 1], [], []>} : vector<64x32xbf16>, vector<32x80xbf16>, vector<64x80xf32> -> vector<64x80xf32>
    %47 = arith.addf %42, %46 : vector<64x80xf32>
    %48 = arith.truncf %47 : vector<64x80xf32> to vector<64x80xbf16>
    %49 = vector.shape_cast %48 : vector<64x80xbf16> to vector<1x64x80xbf16>
    %c0_30 = arith.constant 0 : index
    %c0_31 = arith.constant 0 : index
    %c0_32 = arith.constant 0 : index
    %50 = vector.load %arg5[%c0_30, %c0_31, %c0_32] : memref<1x64x80xbf16, #tpu.memory_space<vmem>>, vector<1x64x80xbf16>
    tpu.vector_store %arg5[%c0_30, %c0_31, %c0_32], %49 {strides = array<i32>} : memref<1x64x80xbf16, #tpu.memory_space<vmem>>, vector<1x64x80xbf16>,
    %c0_33 = arith.constant 0 : index
    %c0_34 = arith.constant 0 : index
    %51 = vector.load %arg4[%c0_33, %c0_34] : memref<1x80xbf16, #tpu.memory_space<vmem>>, vector<1x80xbf16>
    %52 = arith.extf %51 : vector<1x80xbf16> to vector<1x80xf32>
    %53 = vector.broadcast %52 : vector<1x80xf32> to vector<64x80xf32>
    %54 = arith.mulf %47, %53 : vector<64x80xf32>
    %cst_35 = arith.constant dense<0.000000e+00> : vector<64xf32>
    %55 = vector.multi_reduction <add>, %54, %cst_35 [1] : vector<64x80xf32> to vector<64xf32>
    %56 = vector.shape_cast %55 : vector<64xf32> to vector<64x1xf32>
    %57 = arith.mulf %54, %47 : vector<64x80xf32>
    %cst_36 = arith.constant dense<0.000000e+00> : vector<64xf32>
    %58 = vector.multi_reduction <add>, %57, %cst_36 [1] : vector<64x80xf32> to vector<64xf32>
    %59 = vector.shape_cast %58 : vector<64xf32> to vector<64x1xf32>
    %60 = tpu.concatenate %56, %59 in 1 : vector<64x1xf32>, vector<64x1xf32> -> vector<64x2xf32>
    %61 = vector.shape_cast %60 : vector<64x2xf32> to vector<1x1x64x2xf32>
    %c0_37 = arith.constant 0 : index
    %c0_38 = arith.constant 0 : index
    %c0_39 = arith.constant 0 : index
    %c0_40 = arith.constant 0 : index
    %62 = vector.load %arg6[%c0_37, %c0_38, %c0_39, %c0_40] : memref<1x1x64x2xf32, #tpu.memory_space<vmem>>, vector<1x1x64x2xf32>
    tpu.vector_store %arg6[%c0_37, %c0_38, %c0_39, %c0_40], %61 {strides = array<i32>} : memref<1x1x64x2xf32, #tpu.memory_space<vmem>>, vector<1x1x64x2xf32>,
    return
  }
  func.func @transform_0(%arg0: i32, %arg1: i32) -> (i32, i32, i32) {
    %c0_i32 = arith.constant 0 : i32
    %c0_i32_0 = arith.constant 0 : i32
    %c0_i32_1 = arith.constant 0 : i32
    return %arg0, %c0_i32, %c0_i32_0 : i32, i32, i32
  }
  func.func @transform_1(%arg0: i32, %arg1: i32) -> (i32, i32, i32) {
    %c0_i32 = arith.constant 0 : i32
    %c0_i32_0 = arith.constant 0 : i32
    %c0_i32_1 = arith.constant 0 : i32
    return %c0_i32, %arg1, %c0_i32_0 : i32, i32, i32
  }
  func.func @transform_2(%arg0: i32, %arg1: i32) -> (i32, i32) {
    %c0_i32 = arith.constant 0 : i32
    %c0_i32_0 = arith.constant 0 : i32
    %c0_i32_1 = arith.constant 0 : i32
    return %c0_i32, %c0_i32_0 : i32, i32
  }
  func.func @transform_3(%arg0: i32, %arg1: i32) -> (i32, i32, i32) {
    %c0_i32 = arith.constant 0 : i32
    %c0_i32_0 = arith.constant 0 : i32
    return %arg0, %arg1, %c0_i32 : i32, i32, i32
  }
  func.func @transform_4(%arg0: i32, %arg1: i32) -> (i32, i32, i32, i32) {
    %c0_i32 = arith.constant 0 : i32
    %c0_i32_0 = arith.constant 0 : i32
    %c0_i32_1 = arith.constant 0 : i32
    return %arg0, %arg1, %c0_i32, %c0_i32_0 : i32, i32, i32, i32
  }
}

module attributes {stable_mosaic.version = 11 : i64} {
  func.func @kernel(%arg0: i32, %arg1: i32, %arg2: memref<1x16x342xbf16, #tpu.memory_space<vmem>>, %arg3: memref<9x32x16xbf16, #tpu.memory_space<vmem>>, %arg4: memref<1x288xbf16, #tpu.memory_space<vmem>>, %arg5: memref<1x32x288xbf16, #tpu.memory_space<vmem>>, %arg6: memref<1x1x32x2xf32, #tpu.memory_space<vmem>>) attributes {dimension_semantics = [#tpu.dimension_semantics<parallel>, #tpu.dimension_semantics<parallel>], iteration_bounds = array<i64: 2, 1>, scalar_prefetch = 0 : i64, scratch_operands = 0 : i64, tpu.core_type = #tpu.core_type<tc>, window_params = [{transform_indices = @transform_0, window_bounds = array<i64: 1, 16, 342>}, {transform_indices = @transform_1, window_bounds = array<i64: 9, 32, 16>}, {pipeline_mode = #tpu.pipeline_mode<synchronous>, transform_indices = @transform_2, window_bounds = array<i64: 1, 288>}, {transform_indices = @transform_3, window_bounds = array<i64: 1, 32, 288>}, {transform_indices = @transform_4, window_bounds = array<i64: 1, 1, 32, 2>}]} {
    %c0 = arith.constant 0 : index
    %c0_0 = arith.constant 0 : index
    %c0_1 = arith.constant 0 : index
    %0 = vector.load %arg2[%c0, %c0_0, %c0_1] : memref<1x16x342xbf16, #tpu.memory_space<vmem>>, vector<1x16x342xbf16>
    %1 = vector.shape_cast %0 : vector<1x16x342xbf16> to vector<16x342xbf16>
    %cst = arith.constant 0.000000e+00 : f32
    %2 = vector.broadcast %cst : f32 to vector<32x288xf32>
    %3 = vector.extract_strided_slice %1 {offsets = [0, 0], sizes = [16, 288], strides = [1, 1]} : vector<16x342xbf16> to vector<16x288xbf16>
    %c0_2 = arith.constant 0 : index
    %c0_3 = arith.constant 0 : index
    %c0_4 = arith.constant 0 : index
    %4 = vector.load %arg3[%c0_2, %c0_3, %c0_4] : memref<9x32x16xbf16, #tpu.memory_space<vmem>>, vector<1x32x16xbf16>
    %5 = vector.shape_cast %4 : vector<1x32x16xbf16> to vector<32x16xbf16>
    %cst_5 = arith.constant dense<0.000000e+00> : vector<32x288xf32>
    %6 = tpu.matmul %5, %3, %cst_5 {dimension_numbers = #tpu.dot_dimension_numbers<[1], [0], [0], [1], [0, 0, 1, 1], [], []>} : vector<32x16xbf16>, vector<16x288xbf16>, vector<32x288xf32> -> vector<32x288xf32>
    %7 = arith.addf %2, %6 : vector<32x288xf32>
    %8 = vector.extract_strided_slice %1 {offsets = [0, 1], sizes = [16, 288], strides = [1, 1]} : vector<16x342xbf16> to vector<16x288xbf16>
    %c1 = arith.constant 1 : index
    %c0_6 = arith.constant 0 : index
    %c0_7 = arith.constant 0 : index
    %9 = vector.load %arg3[%c1, %c0_6, %c0_7] : memref<9x32x16xbf16, #tpu.memory_space<vmem>>, vector<1x32x16xbf16>
    %10 = vector.shape_cast %9 : vector<1x32x16xbf16> to vector<32x16xbf16>
    %cst_8 = arith.constant dense<0.000000e+00> : vector<32x288xf32>
    %11 = tpu.matmul %10, %8, %cst_8 {dimension_numbers = #tpu.dot_dimension_numbers<[1], [0], [0], [1], [0, 0, 1, 1], [], []>} : vector<32x16xbf16>, vector<16x288xbf16>, vector<32x288xf32> -> vector<32x288xf32>
    %12 = arith.addf %7, %11 : vector<32x288xf32>
    %13 = vector.extract_strided_slice %1 {offsets = [0, 2], sizes = [16, 288], strides = [1, 1]} : vector<16x342xbf16> to vector<16x288xbf16>
    %c2 = arith.constant 2 : index
    %c0_9 = arith.constant 0 : index
    %c0_10 = arith.constant 0 : index
    %14 = vector.load %arg3[%c2, %c0_9, %c0_10] : memref<9x32x16xbf16, #tpu.memory_space<vmem>>, vector<1x32x16xbf16>
    %15 = vector.shape_cast %14 : vector<1x32x16xbf16> to vector<32x16xbf16>
    %cst_11 = arith.constant dense<0.000000e+00> : vector<32x288xf32>
    %16 = tpu.matmul %15, %13, %cst_11 {dimension_numbers = #tpu.dot_dimension_numbers<[1], [0], [0], [1], [0, 0, 1, 1], [], []>} : vector<32x16xbf16>, vector<16x288xbf16>, vector<32x288xf32> -> vector<32x288xf32>
    %17 = arith.addf %12, %16 : vector<32x288xf32>
    %18 = vector.extract_strided_slice %1 {offsets = [0, 18], sizes = [16, 288], strides = [1, 1]} : vector<16x342xbf16> to vector<16x288xbf16>
    %c3 = arith.constant 3 : index
    %c0_12 = arith.constant 0 : index
    %c0_13 = arith.constant 0 : index
    %19 = vector.load %arg3[%c3, %c0_12, %c0_13] : memref<9x32x16xbf16, #tpu.memory_space<vmem>>, vector<1x32x16xbf16>
    %20 = vector.shape_cast %19 : vector<1x32x16xbf16> to vector<32x16xbf16>
    %cst_14 = arith.constant dense<0.000000e+00> : vector<32x288xf32>
    %21 = tpu.matmul %20, %18, %cst_14 {dimension_numbers = #tpu.dot_dimension_numbers<[1], [0], [0], [1], [0, 0, 1, 1], [], []>} : vector<32x16xbf16>, vector<16x288xbf16>, vector<32x288xf32> -> vector<32x288xf32>
    %22 = arith.addf %17, %21 : vector<32x288xf32>
    %23 = vector.extract_strided_slice %1 {offsets = [0, 19], sizes = [16, 288], strides = [1, 1]} : vector<16x342xbf16> to vector<16x288xbf16>
    %c4 = arith.constant 4 : index
    %c0_15 = arith.constant 0 : index
    %c0_16 = arith.constant 0 : index
    %24 = vector.load %arg3[%c4, %c0_15, %c0_16] : memref<9x32x16xbf16, #tpu.memory_space<vmem>>, vector<1x32x16xbf16>
    %25 = vector.shape_cast %24 : vector<1x32x16xbf16> to vector<32x16xbf16>
    %cst_17 = arith.constant dense<0.000000e+00> : vector<32x288xf32>
    %26 = tpu.matmul %25, %23, %cst_17 {dimension_numbers = #tpu.dot_dimension_numbers<[1], [0], [0], [1], [0, 0, 1, 1], [], []>} : vector<32x16xbf16>, vector<16x288xbf16>, vector<32x288xf32> -> vector<32x288xf32>
    %27 = arith.addf %22, %26 : vector<32x288xf32>
    %28 = vector.extract_strided_slice %1 {offsets = [0, 20], sizes = [16, 288], strides = [1, 1]} : vector<16x342xbf16> to vector<16x288xbf16>
    %c5 = arith.constant 5 : index
    %c0_18 = arith.constant 0 : index
    %c0_19 = arith.constant 0 : index
    %29 = vector.load %arg3[%c5, %c0_18, %c0_19] : memref<9x32x16xbf16, #tpu.memory_space<vmem>>, vector<1x32x16xbf16>
    %30 = vector.shape_cast %29 : vector<1x32x16xbf16> to vector<32x16xbf16>
    %cst_20 = arith.constant dense<0.000000e+00> : vector<32x288xf32>
    %31 = tpu.matmul %30, %28, %cst_20 {dimension_numbers = #tpu.dot_dimension_numbers<[1], [0], [0], [1], [0, 0, 1, 1], [], []>} : vector<32x16xbf16>, vector<16x288xbf16>, vector<32x288xf32> -> vector<32x288xf32>
    %32 = arith.addf %27, %31 : vector<32x288xf32>
    %33 = vector.extract_strided_slice %1 {offsets = [0, 36], sizes = [16, 288], strides = [1, 1]} : vector<16x342xbf16> to vector<16x288xbf16>
    %c6 = arith.constant 6 : index
    %c0_21 = arith.constant 0 : index
    %c0_22 = arith.constant 0 : index
    %34 = vector.load %arg3[%c6, %c0_21, %c0_22] : memref<9x32x16xbf16, #tpu.memory_space<vmem>>, vector<1x32x16xbf16>
    %35 = vector.shape_cast %34 : vector<1x32x16xbf16> to vector<32x16xbf16>
    %cst_23 = arith.constant dense<0.000000e+00> : vector<32x288xf32>
    %36 = tpu.matmul %35, %33, %cst_23 {dimension_numbers = #tpu.dot_dimension_numbers<[1], [0], [0], [1], [0, 0, 1, 1], [], []>} : vector<32x16xbf16>, vector<16x288xbf16>, vector<32x288xf32> -> vector<32x288xf32>
    %37 = arith.addf %32, %36 : vector<32x288xf32>
    %38 = vector.extract_strided_slice %1 {offsets = [0, 37], sizes = [16, 288], strides = [1, 1]} : vector<16x342xbf16> to vector<16x288xbf16>
    %c7 = arith.constant 7 : index
    %c0_24 = arith.constant 0 : index
    %c0_25 = arith.constant 0 : index
    %39 = vector.load %arg3[%c7, %c0_24, %c0_25] : memref<9x32x16xbf16, #tpu.memory_space<vmem>>, vector<1x32x16xbf16>
    %40 = vector.shape_cast %39 : vector<1x32x16xbf16> to vector<32x16xbf16>
    %cst_26 = arith.constant dense<0.000000e+00> : vector<32x288xf32>
    %41 = tpu.matmul %40, %38, %cst_26 {dimension_numbers = #tpu.dot_dimension_numbers<[1], [0], [0], [1], [0, 0, 1, 1], [], []>} : vector<32x16xbf16>, vector<16x288xbf16>, vector<32x288xf32> -> vector<32x288xf32>
    %42 = arith.addf %37, %41 : vector<32x288xf32>
    %43 = vector.extract_strided_slice %1 {offsets = [0, 38], sizes = [16, 288], strides = [1, 1]} : vector<16x342xbf16> to vector<16x288xbf16>
    %c8 = arith.constant 8 : index
    %c0_27 = arith.constant 0 : index
    %c0_28 = arith.constant 0 : index
    %44 = vector.load %arg3[%c8, %c0_27, %c0_28] : memref<9x32x16xbf16, #tpu.memory_space<vmem>>, vector<1x32x16xbf16>
    %45 = vector.shape_cast %44 : vector<1x32x16xbf16> to vector<32x16xbf16>
    %cst_29 = arith.constant dense<0.000000e+00> : vector<32x288xf32>
    %46 = tpu.matmul %45, %43, %cst_29 {dimension_numbers = #tpu.dot_dimension_numbers<[1], [0], [0], [1], [0, 0, 1, 1], [], []>} : vector<32x16xbf16>, vector<16x288xbf16>, vector<32x288xf32> -> vector<32x288xf32>
    %47 = arith.addf %42, %46 : vector<32x288xf32>
    %48 = arith.truncf %47 : vector<32x288xf32> to vector<32x288xbf16>
    %49 = vector.shape_cast %48 : vector<32x288xbf16> to vector<1x32x288xbf16>
    %c0_30 = arith.constant 0 : index
    %c0_31 = arith.constant 0 : index
    %c0_32 = arith.constant 0 : index
    %50 = vector.load %arg5[%c0_30, %c0_31, %c0_32] : memref<1x32x288xbf16, #tpu.memory_space<vmem>>, vector<1x32x288xbf16>
    tpu.vector_store %arg5[%c0_30, %c0_31, %c0_32], %49 {strides = array<i32>} : memref<1x32x288xbf16, #tpu.memory_space<vmem>>, vector<1x32x288xbf16>,
    %c0_33 = arith.constant 0 : index
    %c0_34 = arith.constant 0 : index
    %51 = vector.load %arg4[%c0_33, %c0_34] : memref<1x288xbf16, #tpu.memory_space<vmem>>, vector<1x288xbf16>
    %52 = arith.extf %51 : vector<1x288xbf16> to vector<1x288xf32>
    %53 = vector.broadcast %52 : vector<1x288xf32> to vector<32x288xf32>
    %54 = arith.mulf %47, %53 : vector<32x288xf32>
    %cst_35 = arith.constant dense<0.000000e+00> : vector<32xf32>
    %55 = vector.multi_reduction <add>, %54, %cst_35 [1] : vector<32x288xf32> to vector<32xf32>
    %56 = vector.shape_cast %55 : vector<32xf32> to vector<32x1xf32>
    %57 = arith.mulf %54, %47 : vector<32x288xf32>
    %cst_36 = arith.constant dense<0.000000e+00> : vector<32xf32>
    %58 = vector.multi_reduction <add>, %57, %cst_36 [1] : vector<32x288xf32> to vector<32xf32>
    %59 = vector.shape_cast %58 : vector<32xf32> to vector<32x1xf32>
    %60 = tpu.concatenate %56, %59 in 1 : vector<32x1xf32>, vector<32x1xf32> -> vector<32x2xf32>
    %61 = vector.shape_cast %60 : vector<32x2xf32> to vector<1x1x32x2xf32>
    %c0_37 = arith.constant 0 : index
    %c0_38 = arith.constant 0 : index
    %c0_39 = arith.constant 0 : index
    %c0_40 = arith.constant 0 : index
    %62 = vector.load %arg6[%c0_37, %c0_38, %c0_39, %c0_40] : memref<1x1x32x2xf32, #tpu.memory_space<vmem>>, vector<1x1x32x2xf32>
    tpu.vector_store %arg6[%c0_37, %c0_38, %c0_39, %c0_40], %61 {strides = array<i32>} : memref<1x1x32x2xf32, #tpu.memory_space<vmem>>, vector<1x1x32x2xf32>,
    return
  }
  func.func @transform_0(%arg0: i32, %arg1: i32) -> (i32, i32, i32) {
    %c0_i32 = arith.constant 0 : i32
    %c0_i32_0 = arith.constant 0 : i32
    %c0_i32_1 = arith.constant 0 : i32
    return %arg0, %c0_i32, %c0_i32_0 : i32, i32, i32
  }
  func.func @transform_1(%arg0: i32, %arg1: i32) -> (i32, i32, i32) {
    %c0_i32 = arith.constant 0 : i32
    %c0_i32_0 = arith.constant 0 : i32
    %c0_i32_1 = arith.constant 0 : i32
    return %c0_i32, %arg1, %c0_i32_0 : i32, i32, i32
  }
  func.func @transform_2(%arg0: i32, %arg1: i32) -> (i32, i32) {
    %c0_i32 = arith.constant 0 : i32
    %c0_i32_0 = arith.constant 0 : i32
    %c0_i32_1 = arith.constant 0 : i32
    return %c0_i32, %c0_i32_0 : i32, i32
  }
  func.func @transform_3(%arg0: i32, %arg1: i32) -> (i32, i32, i32) {
    %c0_i32 = arith.constant 0 : i32
    %c0_i32_0 = arith.constant 0 : i32
    return %arg0, %arg1, %c0_i32 : i32, i32, i32
  }
  func.func @transform_4(%arg0: i32, %arg1: i32) -> (i32, i32, i32, i32) {
    %c0_i32 = arith.constant 0 : i32
    %c0_i32_0 = arith.constant 0 : i32
    %c0_i32_1 = arith.constant 0 : i32
    return %arg0, %arg1, %c0_i32, %c0_i32_0 : i32, i32, i32, i32
  }
}

module attributes {stable_mosaic.version = 11 : i64} {
  func.func @kernel(%arg0: i32, %arg1: i32, %arg2: memref<1x8x1190xbf16, #tpu.memory_space<vmem>>, %arg3: memref<9x16x8xbf16, #tpu.memory_space<vmem>>, %arg4: memref<1x1088xbf16, #tpu.memory_space<vmem>>, %arg5: memref<1x16x1088xbf16, #tpu.memory_space<vmem>>, %arg6: memref<1x1x16x2xf32, #tpu.memory_space<vmem>>) attributes {dimension_semantics = [#tpu.dimension_semantics<parallel>, #tpu.dimension_semantics<parallel>], iteration_bounds = array<i64: 2, 1>, scalar_prefetch = 0 : i64, scratch_operands = 0 : i64, tpu.core_type = #tpu.core_type<tc>, window_params = [{transform_indices = @transform_0, window_bounds = array<i64: 1, 8, 1190>}, {transform_indices = @transform_1, window_bounds = array<i64: 9, 16, 8>}, {pipeline_mode = #tpu.pipeline_mode<synchronous>, transform_indices = @transform_2, window_bounds = array<i64: 1, 1088>}, {transform_indices = @transform_3, window_bounds = array<i64: 1, 16, 1088>}, {transform_indices = @transform_4, window_bounds = array<i64: 1, 1, 16, 2>}]} {
    %c0 = arith.constant 0 : index
    %c0_0 = arith.constant 0 : index
    %c0_1 = arith.constant 0 : index
    %0 = vector.load %arg2[%c0, %c0_0, %c0_1] : memref<1x8x1190xbf16, #tpu.memory_space<vmem>>, vector<1x8x1190xbf16>
    %1 = vector.shape_cast %0 : vector<1x8x1190xbf16> to vector<8x1190xbf16>
    %cst = arith.constant 0.000000e+00 : f32
    %2 = vector.broadcast %cst : f32 to vector<16x1088xf32>
    %3 = vector.extract_strided_slice %1 {offsets = [0, 0], sizes = [8, 1088], strides = [1, 1]} : vector<8x1190xbf16> to vector<8x1088xbf16>
    %c0_2 = arith.constant 0 : index
    %c0_3 = arith.constant 0 : index
    %c0_4 = arith.constant 0 : index
    %4 = vector.load %arg3[%c0_2, %c0_3, %c0_4] : memref<9x16x8xbf16, #tpu.memory_space<vmem>>, vector<1x16x8xbf16>
    %5 = vector.shape_cast %4 : vector<1x16x8xbf16> to vector<16x8xbf16>
    %cst_5 = arith.constant dense<0.000000e+00> : vector<16x1088xf32>
    %6 = tpu.matmul %5, %3, %cst_5 {dimension_numbers = #tpu.dot_dimension_numbers<[1], [0], [0], [1], [0, 0, 1, 1], [], []>} : vector<16x8xbf16>, vector<8x1088xbf16>, vector<16x1088xf32> -> vector<16x1088xf32>
    %7 = arith.addf %2, %6 : vector<16x1088xf32>
    %8 = vector.extract_strided_slice %1 {offsets = [0, 1], sizes = [8, 1088], strides = [1, 1]} : vector<8x1190xbf16> to vector<8x1088xbf16>
    %c1 = arith.constant 1 : index
    %c0_6 = arith.constant 0 : index
    %c0_7 = arith.constant 0 : index
    %9 = vector.load %arg3[%c1, %c0_6, %c0_7] : memref<9x16x8xbf16, #tpu.memory_space<vmem>>, vector<1x16x8xbf16>
    %10 = vector.shape_cast %9 : vector<1x16x8xbf16> to vector<16x8xbf16>
    %cst_8 = arith.constant dense<0.000000e+00> : vector<16x1088xf32>
    %11 = tpu.matmul %10, %8, %cst_8 {dimension_numbers = #tpu.dot_dimension_numbers<[1], [0], [0], [1], [0, 0, 1, 1], [], []>} : vector<16x8xbf16>, vector<8x1088xbf16>, vector<16x1088xf32> -> vector<16x1088xf32>
    %12 = arith.addf %7, %11 : vector<16x1088xf32>
    %13 = vector.extract_strided_slice %1 {offsets = [0, 2], sizes = [8, 1088], strides = [1, 1]} : vector<8x1190xbf16> to vector<8x1088xbf16>
    %c2 = arith.constant 2 : index
    %c0_9 = arith.constant 0 : index
    %c0_10 = arith.constant 0 : index
    %14 = vector.load %arg3[%c2, %c0_9, %c0_10] : memref<9x16x8xbf16, #tpu.memory_space<vmem>>, vector<1x16x8xbf16>
    %15 = vector.shape_cast %14 : vector<1x16x8xbf16> to vector<16x8xbf16>
    %cst_11 = arith.constant dense<0.000000e+00> : vector<16x1088xf32>
    %16 = tpu.matmul %15, %13, %cst_11 {dimension_numbers = #tpu.dot_dimension_numbers<[1], [0], [0], [1], [0, 0, 1, 1], [], []>} : vector<16x8xbf16>, vector<8x1088xbf16>, vector<16x1088xf32> -> vector<16x1088xf32>
    %17 = arith.addf %12, %16 : vector<16x1088xf32>
    %18 = vector.extract_strided_slice %1 {offsets = [0, 34], sizes = [8, 1088], strides = [1, 1]} : vector<8x1190xbf16> to vector<8x1088xbf16>
    %c3 = arith.constant 3 : index
    %c0_12 = arith.constant 0 : index
    %c0_13 = arith.constant 0 : index
    %19 = vector.load %arg3[%c3, %c0_12, %c0_13] : memref<9x16x8xbf16, #tpu.memory_space<vmem>>, vector<1x16x8xbf16>
    %20 = vector.shape_cast %19 : vector<1x16x8xbf16> to vector<16x8xbf16>
    %cst_14 = arith.constant dense<0.000000e+00> : vector<16x1088xf32>
    %21 = tpu.matmul %20, %18, %cst_14 {dimension_numbers = #tpu.dot_dimension_numbers<[1], [0], [0], [1], [0, 0, 1, 1], [], []>} : vector<16x8xbf16>, vector<8x1088xbf16>, vector<16x1088xf32> -> vector<16x1088xf32>
    %22 = arith.addf %17, %21 : vector<16x1088xf32>
    %23 = vector.extract_strided_slice %1 {offsets = [0, 35], sizes = [8, 1088], strides = [1, 1]} : vector<8x1190xbf16> to vector<8x1088xbf16>
    %c4 = arith.constant 4 : index
    %c0_15 = arith.constant 0 : index
    %c0_16 = arith.constant 0 : index
    %24 = vector.load %arg3[%c4, %c0_15, %c0_16] : memref<9x16x8xbf16, #tpu.memory_space<vmem>>, vector<1x16x8xbf16>
    %25 = vector.shape_cast %24 : vector<1x16x8xbf16> to vector<16x8xbf16>
    %cst_17 = arith.constant dense<0.000000e+00> : vector<16x1088xf32>
    %26 = tpu.matmul %25, %23, %cst_17 {dimension_numbers = #tpu.dot_dimension_numbers<[1], [0], [0], [1], [0, 0, 1, 1], [], []>} : vector<16x8xbf16>, vector<8x1088xbf16>, vector<16x1088xf32> -> vector<16x1088xf32>
    %27 = arith.addf %22, %26 : vector<16x1088xf32>
    %28 = vector.extract_strided_slice %1 {offsets = [0, 36], sizes = [8, 1088], strides = [1, 1]} : vector<8x1190xbf16> to vector<8x1088xbf16>
    %c5 = arith.constant 5 : index
    %c0_18 = arith.constant 0 : index
    %c0_19 = arith.constant 0 : index
    %29 = vector.load %arg3[%c5, %c0_18, %c0_19] : memref<9x16x8xbf16, #tpu.memory_space<vmem>>, vector<1x16x8xbf16>
    %30 = vector.shape_cast %29 : vector<1x16x8xbf16> to vector<16x8xbf16>
    %cst_20 = arith.constant dense<0.000000e+00> : vector<16x1088xf32>
    %31 = tpu.matmul %30, %28, %cst_20 {dimension_numbers = #tpu.dot_dimension_numbers<[1], [0], [0], [1], [0, 0, 1, 1], [], []>} : vector<16x8xbf16>, vector<8x1088xbf16>, vector<16x1088xf32> -> vector<16x1088xf32>
    %32 = arith.addf %27, %31 : vector<16x1088xf32>
    %33 = vector.extract_strided_slice %1 {offsets = [0, 68], sizes = [8, 1088], strides = [1, 1]} : vector<8x1190xbf16> to vector<8x1088xbf16>
    %c6 = arith.constant 6 : index
    %c0_21 = arith.constant 0 : index
    %c0_22 = arith.constant 0 : index
    %34 = vector.load %arg3[%c6, %c0_21, %c0_22] : memref<9x16x8xbf16, #tpu.memory_space<vmem>>, vector<1x16x8xbf16>
    %35 = vector.shape_cast %34 : vector<1x16x8xbf16> to vector<16x8xbf16>
    %cst_23 = arith.constant dense<0.000000e+00> : vector<16x1088xf32>
    %36 = tpu.matmul %35, %33, %cst_23 {dimension_numbers = #tpu.dot_dimension_numbers<[1], [0], [0], [1], [0, 0, 1, 1], [], []>} : vector<16x8xbf16>, vector<8x1088xbf16>, vector<16x1088xf32> -> vector<16x1088xf32>
    %37 = arith.addf %32, %36 : vector<16x1088xf32>
    %38 = vector.extract_strided_slice %1 {offsets = [0, 69], sizes = [8, 1088], strides = [1, 1]} : vector<8x1190xbf16> to vector<8x1088xbf16>
    %c7 = arith.constant 7 : index
    %c0_24 = arith.constant 0 : index
    %c0_25 = arith.constant 0 : index
    %39 = vector.load %arg3[%c7, %c0_24, %c0_25] : memref<9x16x8xbf16, #tpu.memory_space<vmem>>, vector<1x16x8xbf16>
    %40 = vector.shape_cast %39 : vector<1x16x8xbf16> to vector<16x8xbf16>
    %cst_26 = arith.constant dense<0.000000e+00> : vector<16x1088xf32>
    %41 = tpu.matmul %40, %38, %cst_26 {dimension_numbers = #tpu.dot_dimension_numbers<[1], [0], [0], [1], [0, 0, 1, 1], [], []>} : vector<16x8xbf16>, vector<8x1088xbf16>, vector<16x1088xf32> -> vector<16x1088xf32>
    %42 = arith.addf %37, %41 : vector<16x1088xf32>
    %43 = vector.extract_strided_slice %1 {offsets = [0, 70], sizes = [8, 1088], strides = [1, 1]} : vector<8x1190xbf16> to vector<8x1088xbf16>
    %c8 = arith.constant 8 : index
    %c0_27 = arith.constant 0 : index
    %c0_28 = arith.constant 0 : index
    %44 = vector.load %arg3[%c8, %c0_27, %c0_28] : memref<9x16x8xbf16, #tpu.memory_space<vmem>>, vector<1x16x8xbf16>
    %45 = vector.shape_cast %44 : vector<1x16x8xbf16> to vector<16x8xbf16>
    %cst_29 = arith.constant dense<0.000000e+00> : vector<16x1088xf32>
    %46 = tpu.matmul %45, %43, %cst_29 {dimension_numbers = #tpu.dot_dimension_numbers<[1], [0], [0], [1], [0, 0, 1, 1], [], []>} : vector<16x8xbf16>, vector<8x1088xbf16>, vector<16x1088xf32> -> vector<16x1088xf32>
    %47 = arith.addf %42, %46 : vector<16x1088xf32>
    %48 = arith.truncf %47 : vector<16x1088xf32> to vector<16x1088xbf16>
    %49 = vector.shape_cast %48 : vector<16x1088xbf16> to vector<1x16x1088xbf16>
    %c0_30 = arith.constant 0 : index
    %c0_31 = arith.constant 0 : index
    %c0_32 = arith.constant 0 : index
    %50 = vector.load %arg5[%c0_30, %c0_31, %c0_32] : memref<1x16x1088xbf16, #tpu.memory_space<vmem>>, vector<1x16x1088xbf16>
    tpu.vector_store %arg5[%c0_30, %c0_31, %c0_32], %49 {strides = array<i32>} : memref<1x16x1088xbf16, #tpu.memory_space<vmem>>, vector<1x16x1088xbf16>,
    %c0_33 = arith.constant 0 : index
    %c0_34 = arith.constant 0 : index
    %51 = vector.load %arg4[%c0_33, %c0_34] : memref<1x1088xbf16, #tpu.memory_space<vmem>>, vector<1x1088xbf16>
    %52 = arith.extf %51 : vector<1x1088xbf16> to vector<1x1088xf32>
    %53 = vector.broadcast %52 : vector<1x1088xf32> to vector<16x1088xf32>
    %54 = arith.mulf %47, %53 : vector<16x1088xf32>
    %cst_35 = arith.constant dense<0.000000e+00> : vector<16xf32>
    %55 = vector.multi_reduction <add>, %54, %cst_35 [1] : vector<16x1088xf32> to vector<16xf32>
    %56 = vector.shape_cast %55 : vector<16xf32> to vector<16x1xf32>
    %57 = arith.mulf %54, %47 : vector<16x1088xf32>
    %cst_36 = arith.constant dense<0.000000e+00> : vector<16xf32>
    %58 = vector.multi_reduction <add>, %57, %cst_36 [1] : vector<16x1088xf32> to vector<16xf32>
    %59 = vector.shape_cast %58 : vector<16xf32> to vector<16x1xf32>
    %60 = tpu.concatenate %56, %59 in 1 : vector<16x1xf32>, vector<16x1xf32> -> vector<16x2xf32>
    %61 = vector.shape_cast %60 : vector<16x2xf32> to vector<1x1x16x2xf32>
    %c0_37 = arith.constant 0 : index
    %c0_38 = arith.constant 0 : index
    %c0_39 = arith.constant 0 : index
    %c0_40 = arith.constant 0 : index
    %62 = vector.load %arg6[%c0_37, %c0_38, %c0_39, %c0_40] : memref<1x1x16x2xf32, #tpu.memory_space<vmem>>, vector<1x1x16x2xf32>
    tpu.vector_store %arg6[%c0_37, %c0_38, %c0_39, %c0_40], %61 {strides = array<i32>} : memref<1x1x16x2xf32, #tpu.memory_space<vmem>>, vector<1x1x16x2xf32>,
    return
  }
  func.func @transform_0(%arg0: i32, %arg1: i32) -> (i32, i32, i32) {
    %c0_i32 = arith.constant 0 : i32
    %c0_i32_0 = arith.constant 0 : i32
    %c0_i32_1 = arith.constant 0 : i32
    return %arg0, %c0_i32, %c0_i32_0 : i32, i32, i32
  }
  func.func @transform_1(%arg0: i32, %arg1: i32) -> (i32, i32, i32) {
    %c0_i32 = arith.constant 0 : i32
    %c0_i32_0 = arith.constant 0 : i32
    %c0_i32_1 = arith.constant 0 : i32
    return %c0_i32, %arg1, %c0_i32_0 : i32, i32, i32
  }
  func.func @transform_2(%arg0: i32, %arg1: i32) -> (i32, i32) {
    %c0_i32 = arith.constant 0 : i32
    %c0_i32_0 = arith.constant 0 : i32
    %c0_i32_1 = arith.constant 0 : i32
    return %c0_i32, %c0_i32_0 : i32, i32
  }
  func.func @transform_3(%arg0: i32, %arg1: i32) -> (i32, i32, i32) {
    %c0_i32 = arith.constant 0 : i32
    %c0_i32_0 = arith.constant 0 : i32
    return %arg0, %arg1, %c0_i32 : i32, i32, i32
  }
  func.func @transform_4(%arg0: i32, %arg1: i32) -> (i32, i32, i32, i32) {
    %c0_i32 = arith.constant 0 : i32
    %c0_i32_0 = arith.constant 0 : i32
    %c0_i32_1 = arith.constant 0 : i32
    return %arg0, %arg1, %c0_i32, %c0_i32_0 : i32, i32, i32, i32
  }
}

module attributes {stable_mosaic.version = 11 : i64} {
  func.func @kernel(%arg0: i32, %arg1: i32, %arg2: memref<1x4x4422xbf16, #tpu.memory_space<vmem>>, %arg3: memref<9x12x4xbf16, #tpu.memory_space<vmem>>, %arg4: memref<12x1xf32, #tpu.memory_space<vmem>>, %arg5: memref<1x12x4224xbf16, #tpu.memory_space<vmem>>) attributes {dimension_semantics = [#tpu.dimension_semantics<parallel>, #tpu.dimension_semantics<parallel>], iteration_bounds = array<i64: 2, 1>, scalar_prefetch = 0 : i64, scratch_operands = 0 : i64, tpu.core_type = #tpu.core_type<tc>, window_params = [{transform_indices = @transform_0, window_bounds = array<i64: 1, 4, 4422>}, {transform_indices = @transform_1, window_bounds = array<i64: 9, 12, 4>}, {transform_indices = @transform_2, window_bounds = array<i64: 12, 1>}, {transform_indices = @transform_3, window_bounds = array<i64: 1, 12, 4224>}]} {
    %c0 = arith.constant 0 : index
    %c0_0 = arith.constant 0 : index
    %c0_1 = arith.constant 0 : index
    %0 = vector.load %arg2[%c0, %c0_0, %c0_1] : memref<1x4x4422xbf16, #tpu.memory_space<vmem>>, vector<1x4x4422xbf16>
    %1 = vector.shape_cast %0 : vector<1x4x4422xbf16> to vector<4x4422xbf16>
    %cst = arith.constant 0.000000e+00 : f32
    %2 = vector.broadcast %cst : f32 to vector<12x4224xf32>
    %3 = vector.extract_strided_slice %1 {offsets = [0, 0], sizes = [4, 4224], strides = [1, 1]} : vector<4x4422xbf16> to vector<4x4224xbf16>
    %c0_2 = arith.constant 0 : index
    %c0_3 = arith.constant 0 : index
    %c0_4 = arith.constant 0 : index
    %4 = vector.load %arg3[%c0_2, %c0_3, %c0_4] : memref<9x12x4xbf16, #tpu.memory_space<vmem>>, vector<1x12x4xbf16>
    %5 = vector.shape_cast %4 : vector<1x12x4xbf16> to vector<12x4xbf16>
    %cst_5 = arith.constant dense<0.000000e+00> : vector<12x4224xf32>
    %6 = tpu.matmul %5, %3, %cst_5 {dimension_numbers = #tpu.dot_dimension_numbers<[1], [0], [0], [1], [0, 0, 1, 1], [], []>} : vector<12x4xbf16>, vector<4x4224xbf16>, vector<12x4224xf32> -> vector<12x4224xf32>
    %7 = arith.addf %2, %6 : vector<12x4224xf32>
    %8 = vector.extract_strided_slice %1 {offsets = [0, 1], sizes = [4, 4224], strides = [1, 1]} : vector<4x4422xbf16> to vector<4x4224xbf16>
    %c1 = arith.constant 1 : index
    %c0_6 = arith.constant 0 : index
    %c0_7 = arith.constant 0 : index
    %9 = vector.load %arg3[%c1, %c0_6, %c0_7] : memref<9x12x4xbf16, #tpu.memory_space<vmem>>, vector<1x12x4xbf16>
    %10 = vector.shape_cast %9 : vector<1x12x4xbf16> to vector<12x4xbf16>
    %cst_8 = arith.constant dense<0.000000e+00> : vector<12x4224xf32>
    %11 = tpu.matmul %10, %8, %cst_8 {dimension_numbers = #tpu.dot_dimension_numbers<[1], [0], [0], [1], [0, 0, 1, 1], [], []>} : vector<12x4xbf16>, vector<4x4224xbf16>, vector<12x4224xf32> -> vector<12x4224xf32>
    %12 = arith.addf %7, %11 : vector<12x4224xf32>
    %13 = vector.extract_strided_slice %1 {offsets = [0, 2], sizes = [4, 4224], strides = [1, 1]} : vector<4x4422xbf16> to vector<4x4224xbf16>
    %c2 = arith.constant 2 : index
    %c0_9 = arith.constant 0 : index
    %c0_10 = arith.constant 0 : index
    %14 = vector.load %arg3[%c2, %c0_9, %c0_10] : memref<9x12x4xbf16, #tpu.memory_space<vmem>>, vector<1x12x4xbf16>
    %15 = vector.shape_cast %14 : vector<1x12x4xbf16> to vector<12x4xbf16>
    %cst_11 = arith.constant dense<0.000000e+00> : vector<12x4224xf32>
    %16 = tpu.matmul %15, %13, %cst_11 {dimension_numbers = #tpu.dot_dimension_numbers<[1], [0], [0], [1], [0, 0, 1, 1], [], []>} : vector<12x4xbf16>, vector<4x4224xbf16>, vector<12x4224xf32> -> vector<12x4224xf32>
    %17 = arith.addf %12, %16 : vector<12x4224xf32>
    %18 = vector.extract_strided_slice %1 {offsets = [0, 66], sizes = [4, 4224], strides = [1, 1]} : vector<4x4422xbf16> to vector<4x4224xbf16>
    %c3 = arith.constant 3 : index
    %c0_12 = arith.constant 0 : index
    %c0_13 = arith.constant 0 : index
    %19 = vector.load %arg3[%c3, %c0_12, %c0_13] : memref<9x12x4xbf16, #tpu.memory_space<vmem>>, vector<1x12x4xbf16>
    %20 = vector.shape_cast %19 : vector<1x12x4xbf16> to vector<12x4xbf16>
    %cst_14 = arith.constant dense<0.000000e+00> : vector<12x4224xf32>
    %21 = tpu.matmul %20, %18, %cst_14 {dimension_numbers = #tpu.dot_dimension_numbers<[1], [0], [0], [1], [0, 0, 1, 1], [], []>} : vector<12x4xbf16>, vector<4x4224xbf16>, vector<12x4224xf32> -> vector<12x4224xf32>
    %22 = arith.addf %17, %21 : vector<12x4224xf32>
    %23 = vector.extract_strided_slice %1 {offsets = [0, 67], sizes = [4, 4224], strides = [1, 1]} : vector<4x4422xbf16> to vector<4x4224xbf16>
    %c4 = arith.constant 4 : index
    %c0_15 = arith.constant 0 : index
    %c0_16 = arith.constant 0 : index
    %24 = vector.load %arg3[%c4, %c0_15, %c0_16] : memref<9x12x4xbf16, #tpu.memory_space<vmem>>, vector<1x12x4xbf16>
    %25 = vector.shape_cast %24 : vector<1x12x4xbf16> to vector<12x4xbf16>
    %cst_17 = arith.constant dense<0.000000e+00> : vector<12x4224xf32>
    %26 = tpu.matmul %25, %23, %cst_17 {dimension_numbers = #tpu.dot_dimension_numbers<[1], [0], [0], [1], [0, 0, 1, 1], [], []>} : vector<12x4xbf16>, vector<4x4224xbf16>, vector<12x4224xf32> -> vector<12x4224xf32>
    %27 = arith.addf %22, %26 : vector<12x4224xf32>
    %28 = vector.extract_strided_slice %1 {offsets = [0, 68], sizes = [4, 4224], strides = [1, 1]} : vector<4x4422xbf16> to vector<4x4224xbf16>
    %c5 = arith.constant 5 : index
    %c0_18 = arith.constant 0 : index
    %c0_19 = arith.constant 0 : index
    %29 = vector.load %arg3[%c5, %c0_18, %c0_19] : memref<9x12x4xbf16, #tpu.memory_space<vmem>>, vector<1x12x4xbf16>
    %30 = vector.shape_cast %29 : vector<1x12x4xbf16> to vector<12x4xbf16>
    %cst_20 = arith.constant dense<0.000000e+00> : vector<12x4224xf32>
    %31 = tpu.matmul %30, %28, %cst_20 {dimension_numbers = #tpu.dot_dimension_numbers<[1], [0], [0], [1], [0, 0, 1, 1], [], []>} : vector<12x4xbf16>, vector<4x4224xbf16>, vector<12x4224xf32> -> vector<12x4224xf32>
    %32 = arith.addf %27, %31 : vector<12x4224xf32>
    %33 = vector.extract_strided_slice %1 {offsets = [0, 132], sizes = [4, 4224], strides = [1, 1]} : vector<4x4422xbf16> to vector<4x4224xbf16>
    %c6 = arith.constant 6 : index
    %c0_21 = arith.constant 0 : index
    %c0_22 = arith.constant 0 : index
    %34 = vector.load %arg3[%c6, %c0_21, %c0_22] : memref<9x12x4xbf16, #tpu.memory_space<vmem>>, vector<1x12x4xbf16>
    %35 = vector.shape_cast %34 : vector<1x12x4xbf16> to vector<12x4xbf16>
    %cst_23 = arith.constant dense<0.000000e+00> : vector<12x4224xf32>
    %36 = tpu.matmul %35, %33, %cst_23 {dimension_numbers = #tpu.dot_dimension_numbers<[1], [0], [0], [1], [0, 0, 1, 1], [], []>} : vector<12x4xbf16>, vector<4x4224xbf16>, vector<12x4224xf32> -> vector<12x4224xf32>
    %37 = arith.addf %32, %36 : vector<12x4224xf32>
    %38 = vector.extract_strided_slice %1 {offsets = [0, 133], sizes = [4, 4224], strides = [1, 1]} : vector<4x4422xbf16> to vector<4x4224xbf16>
    %c7 = arith.constant 7 : index
    %c0_24 = arith.constant 0 : index
    %c0_25 = arith.constant 0 : index
    %39 = vector.load %arg3[%c7, %c0_24, %c0_25] : memref<9x12x4xbf16, #tpu.memory_space<vmem>>, vector<1x12x4xbf16>
    %40 = vector.shape_cast %39 : vector<1x12x4xbf16> to vector<12x4xbf16>
    %cst_26 = arith.constant dense<0.000000e+00> : vector<12x4224xf32>
    %41 = tpu.matmul %40, %38, %cst_26 {dimension_numbers = #tpu.dot_dimension_numbers<[1], [0], [0], [1], [0, 0, 1, 1], [], []>} : vector<12x4xbf16>, vector<4x4224xbf16>, vector<12x4224xf32> -> vector<12x4224xf32>
    %42 = arith.addf %37, %41 : vector<12x4224xf32>
    %43 = vector.extract_strided_slice %1 {offsets = [0, 134], sizes = [4, 4224], strides = [1, 1]} : vector<4x4422xbf16> to vector<4x4224xbf16>
    %c8 = arith.constant 8 : index
    %c0_27 = arith.constant 0 : index
    %c0_28 = arith.constant 0 : index
    %44 = vector.load %arg3[%c8, %c0_27, %c0_28] : memref<9x12x4xbf16, #tpu.memory_space<vmem>>, vector<1x12x4xbf16>
    %45 = vector.shape_cast %44 : vector<1x12x4xbf16> to vector<12x4xbf16>
    %cst_29 = arith.constant dense<0.000000e+00> : vector<12x4224xf32>
    %46 = tpu.matmul %45, %43, %cst_29 {dimension_numbers = #tpu.dot_dimension_numbers<[1], [0], [0], [1], [0, 0, 1, 1], [], []>} : vector<12x4xbf16>, vector<4x4224xbf16>, vector<12x4224xf32> -> vector<12x4224xf32>
    %47 = arith.addf %42, %46 : vector<12x4224xf32>
    %c0_30 = arith.constant 0 : index
    %c0_31 = arith.constant 0 : index
    %48 = vector.load %arg4[%c0_30, %c0_31] : memref<12x1xf32, #tpu.memory_space<vmem>>, vector<12x1xf32>
    %49 = vector.broadcast %48 : vector<12x1xf32> to vector<12x4224xf32>
    %50 = arith.addf %47, %49 : vector<12x4224xf32>
    %51 = math.tanh %50 : vector<12x4224xf32>
    %52 = arith.truncf %51 : vector<12x4224xf32> to vector<12x4224xbf16>
    %53 = vector.shape_cast %52 : vector<12x4224xbf16> to vector<1x12x4224xbf16>
    %c0_32 = arith.constant 0 : index
    %c0_33 = arith.constant 0 : index
    %c0_34 = arith.constant 0 : index
    %54 = vector.load %arg5[%c0_32, %c0_33, %c0_34] : memref<1x12x4224xbf16, #tpu.memory_space<vmem>>, vector<1x12x4224xbf16>
    tpu.vector_store %arg5[%c0_32, %c0_33, %c0_34], %53 {strides = array<i32>} : memref<1x12x4224xbf16, #tpu.memory_space<vmem>>, vector<1x12x4224xbf16>,
    return
  }
  func.func @transform_0(%arg0: i32, %arg1: i32) -> (i32, i32, i32) {
    %c0_i32 = arith.constant 0 : i32
    %c0_i32_0 = arith.constant 0 : i32
    %c0_i32_1 = arith.constant 0 : i32
    return %arg0, %c0_i32, %c0_i32_0 : i32, i32, i32
  }
  func.func @transform_1(%arg0: i32, %arg1: i32) -> (i32, i32, i32) {
    %c0_i32 = arith.constant 0 : i32
    %c0_i32_0 = arith.constant 0 : i32
    %c0_i32_1 = arith.constant 0 : i32
    return %c0_i32, %arg1, %c0_i32_0 : i32, i32, i32
  }
  func.func @transform_2(%arg0: i32, %arg1: i32) -> (i32, i32) {
    %c0_i32 = arith.constant 0 : i32
    %c0_i32_0 = arith.constant 0 : i32
    return %arg1, %c0_i32 : i32, i32
  }
  func.func @transform_3(%arg0: i32, %arg1: i32) -> (i32, i32, i32) {
    %c0_i32 = arith.constant 0 : i32
    %c0_i32_0 = arith.constant 0 : i32
    return %arg0, %arg1, %c0_i32 : i32, i32, i32
  }
}

</mosaic_0001>

<bundles_post_ra>
// kernel: generator_forward.6
= control target key start
LH: loop header
LB: loop body
LE: loop exit
PB: predicated region body
PF: predicated region fallthrough
CT: control target
= control target key end

     0   :  { %vm654_vm0 = vcmask 1043456   ;;  %vm461_vm1 = vcmask 64512   ;;  %vm1203_vm2 = vcmask 15360   ;;  %s2513_s0 = inlined_call_operand.vmem [shape: bf16[8,2], index: 0, kind: input, shape index: {}]   ;;  %s2514_s1 = inlined_call_operand.vmem [shape: bf16[1024,8], index: 1, kind: input, shape index: {}]   ;;  %s2515_s2 = inlined_call_operand.vmem [shape: f32[1024,2], index: 2, kind: output, shape index: {}]  }
   0x1   :  { %v140_v0 = vld [vmem:[%s2513_s0] sm:$0xf]  ;;  %v1665_v4 = vld [vmem:[%s2514_s1 + $0x8] sm:$0xff]   ;;  %v1667_v6 = vld [vmem:[%s2514_s1 + $0x10] sm:$0xff]  }
   0x2   :  { %1661 = vmatprep.subr.msk.bf16.mxu0 %vm654_vm0, %v140_v0  ;;  %1662 = vmatprep.subr.msk.bf16.mxu1 %vm654_vm0, %v140_v0  ;;  %v656_v1 = vsel %vm654_vm0, %v140_v0, 0  ;;  %v1663_v2 = vld [vmem:[%s2514_s1] sm:$0xff]   ;;  %v1666_v5 = vld [vmem:[%s2514_s1 + $0x108] sm:$0xff]   ;;  %v1668_v7 = vld [vmem:[%s2514_s1 + $0x110] sm:$0xff]  }
   0x3   :  { %1530 = vmatpush3.bf16.msra.mxu0 %v656_v1  ;;  %1660 = vmatpush3.bf16.msra.mxu1 %v656_v1  ;;  %v1664_v3 = vld [vmem:[%s2514_s1 + $0x100] sm:$0xff]   ;;  %v1669_v8 = vld [vmem:[%s2514_s1 + $0x18] sm:$0xff]   ;;  %v1673_v12 = vld [vmem:[%s2514_s1 + $0x28] sm:$0xff]  }
   0x4   :  { %1531 = vmatprep.mubr.msk.bf16.mxu0 %vm461_vm1, %v1663_v2  ;;  %1595 = vmatprep.mubr.msk.bf16.mxu1 %vm461_vm1, %v1664_v3  ;;  %v1670_v9 = vld [vmem:[%s2514_s1 + $0x118] sm:$0xff]   ;;  %v1671_v10 = vld [vmem:[%s2514_s1 + $0x20] sm:$0xff]   ;;  %v1674_v13 = vld [vmem:[%s2514_s1 + $0x128] sm:$0xff]  }
   0x5   :  { %v1672_v11 = vld [vmem:[%s2514_s1 + $0x120] sm:$0xff]   ;;  %v1675_v14 = vld [vmem:[%s2514_s1 + $0x30] sm:$0xff]   ;;  %v1677_v16 = vld [vmem:[%s2514_s1 + $0x38] sm:$0xff]  }
   0x6   :  { %1532 = vmatmul.mubr.msk.bf16.vlgmr.msra.gmra.mrb[0].mxu0 %vm461_vm1, %v1665_v4  ;;  %1596 = vmatmul.mubr.msk.bf16.vlgmr.msra.gmra.mrb[0].mxu1 %vm461_vm1, %v1666_v5  ;;  %v1676_v15 = vld [vmem:[%s2514_s1 + $0x130] sm:$0xff]   ;;  %v1678_v17 = vld [vmem:[%s2514_s1 + $0x138] sm:$0xff]   ;;  %v1679_v18 = vld [vmem:[%s2514_s1 + $0x40] sm:$0xff]  }
   0x7   :  { %1535 = vmatprep.mubr.msk.bf16.mxu0 %vm461_vm1, %v1667_v6  ;;  %1599 = vmatprep.mubr.msk.bf16.mxu1 %vm461_vm1, %v1668_v7  ;;  %v1680_v19 = vld [vmem:[%s2514_s1 + $0x140] sm:$0xff]   ;;  %v1681_v20 = vld [vmem:[%s2514_s1 + $0x48] sm:$0xff]   ;;  %v1683_v22 = vld [vmem:[%s2514_s1 + $0x50] sm:$0xff]  }
   0x8   :  { %v1682_v21 = vld [vmem:[%s2514_s1 + $0x148] sm:$0xff]   ;;  %v1684_v23 = vld [vmem:[%s2514_s1 + $0x150] sm:$0xff]   ;;  %v1685_v24 = vld [vmem:[%s2514_s1 + $0x58] sm:$0xff]  }
   0x9   :  { %v1686_v25 = vld [vmem:[%s2514_s1 + $0x158] sm:$0xff]   ;;  %v1687_v26 = vld [vmem:[%s2514_s1 + $0x60] sm:$0xff]   ;;  %v1689_v28 = vld [vmem:[%s2514_s1 + $0x68] sm:$0xff]  }
   0xa   :  { %v1688_v27 = vld [vmem:[%s2514_s1 + $0x160] sm:$0xff]   ;;  %v1690_v29 = vld [vmem:[%s2514_s1 + $0x168] sm:$0xff]   ;;  %v1691_v30 = vld [vmem:[%s2514_s1 + $0x70] sm:$0xff]  }
   0xb   :  { %v1692_v31 = vld [vmem:[%s2514_s1 + $0x170] sm:$0xff]   ;;  %v1693_v32 = vld [vmem:[%s2514_s1 + $0x78] sm:$0xff]   ;;  %v1695_v34 = vld [vmem:[%s2514_s1 + $0x80] sm:$0xff]  }
   0xc   :  { %v1694_v33 = vld [vmem:[%s2514_s1 + $0x178] sm:$0xff]   ;;  %v1696_v35 = vld [vmem:[%s2514_s1 + $0x180] sm:$0xff]   ;;  %v1697_v36 = vld [vmem:[%s2514_s1 + $0x88] sm:$0xff]  }
   0xd   :  { %v1698_v37 = vld [vmem:[%s2514_s1 + $0x188] sm:$0xff]   ;;  %v1699_v38 = vld [vmem:[%s2514_s1 + $0x90] sm:$0xff]   ;;  %v1701_v40 = vld [vmem:[%s2514_s1 + $0x98] sm:$0xff]  }
   0xe   :  { %1536 = vmatmul.mubr.msk.bf16.gmra.mrb[4].mxu0 %vm461_vm1, %v1669_v8  ;;  %1600 = vmatmul.mubr.msk.bf16.gmra.mrb[4].mxu1 %vm461_vm1, %v1670_v9  ;;  %v1700_v39 = vld [vmem:[%s2514_s1 + $0x190] sm:$0xff]   ;;  %v1702_v41 = vld [vmem:[%s2514_s1 + $0x198] sm:$0xff]   ;;  %v1703_v42 = vld [vmem:[%s2514_s1 + $0xa0] sm:$0xff]  }
   0xf   :  { %1539 = vmatprep.mubr.msk.bf16.mxu0 %vm461_vm1, %v1671_v10  ;;  %1603 = vmatprep.mubr.msk.bf16.mxu1 %vm461_vm1, %v1672_v11  ;;  %v1704_v43 = vld [vmem:[%s2514_s1 + $0x1a0] sm:$0xff]   ;;  %v1705_v44 = vld [vmem:[%s2514_s1 + $0xa8] sm:$0xff]   ;;  %v1707_v46 = vld [vmem:[%s2514_s1 + $0xb0] sm:$0xff]  }
  0x10   :  { %v1706_v45 = vld [vmem:[%s2514_s1 + $0x1a8] sm:$0xff]   ;;  %v1708_v47 = vld [vmem:[%s2514_s1 + $0x1b0] sm:$0xff]   ;;  %v1709_v48 = vld [vmem:[%s2514_s1 + $0xb8] sm:$0xff]  }
  0x11   :  { %v1710_v49 = vld [vmem:[%s2514_s1 + $0x1b8] sm:$0xff]   ;;  %v1711_v50 = vld [vmem:[%s2514_s1 + $0xc0] sm:$0xff]   ;;  %v1713_v52 = vld [vmem:[%s2514_s1 + $0xc8] sm:$0xff]  }
  0x12   :  { %v1712_v51 = vld [vmem:[%s2514_s1 + $0x1c0] sm:$0xff]   ;;  %v1714_v53 = vld [vmem:[%s2514_s1 + $0x1c8] sm:$0xff]   ;;  %v1715_v54 = vld [vmem:[%s2514_s1 + $0xd0] sm:$0xff]  }
  0x13   :  { %v1716_v55 = vld [vmem:[%s2514_s1 + $0x1d0] sm:$0xff]   ;;  %v1717_v56 = vld [vmem:[%s2514_s1 + $0xd8] sm:$0xff]   ;;  %v1719_v58 = vld [vmem:[%s2514_s1 + $0xe0] sm:$0xff]  }
  0x14   :  { %v1718_v57 = vld [vmem:[%s2514_s1 + $0x1d8] sm:$0xff]   ;;  %v1720_v59 = vld [vmem:[%s2514_s1 + $0x1e0] sm:$0xff]   ;;  %v1721_v60 = vld [vmem:[%s2514_s1 + $0xe8] sm:$0xff]  }
  0x15   :  { %v1722_v61 = vld [vmem:[%s2514_s1 + $0x1e8] sm:$0xff]   ;;  %v1723_v62 = vld [vmem:[%s2514_s1 + $0xf0] sm:$0xff]   ;;  %v1725_v0 = vld [vmem:[%s2514_s1 + $0xf8] sm:$0xff]  }
  0x16   :  { %1540 = vmatmul.mubr.msk.bf16.gmra.mrb[8].mxu0 %vm461_vm1, %v1673_v12  ;;  %1604 = vmatmul.mubr.msk.bf16.gmra.mrb[8].mxu1 %vm461_vm1, %v1674_v13  ;;  %v1724_v63 = vld [vmem:[%s2514_s1 + $0x1f0] sm:$0xff]   ;;  %v1726_v1 = vld [vmem:[%s2514_s1 + $0x1f8] sm:$0xff]  }
  0x17   :  { %1543 = vmatprep.mubr.msk.bf16.mxu0 %vm461_vm1, %v1675_v14  ;;  %1607 = vmatprep.mubr.msk.bf16.mxu1 %vm461_vm1, %v1676_v15 }
  0x1e   :  { %1544 = vmatmul.mubr.msk.bf16.gmra.mrb[12].mxu0 %vm461_vm1, %v1677_v16  ;;  %1608 = vmatmul.mubr.msk.bf16.gmra.mrb[12].mxu1 %vm461_vm1, %v1678_v17 }
  0x1f   :  { %1547 = vmatprep.mubr.msk.bf16.mxu0 %vm461_vm1, %v1679_v18  ;;  %1611 = vmatprep.mubr.msk.bf16.mxu1 %vm461_vm1, %v1680_v19 }
  0x26   :  { %1548 = vmatmul.mubr.msk.bf16.gmra.mrb[16].mxu0 %vm461_vm1, %v1681_v20  ;;  %1612 = vmatmul.mubr.msk.bf16.gmra.mrb[16].mxu1 %vm461_vm1, %v1682_v21 }
  0x27   :  { %1551 = vmatprep.mubr.msk.bf16.mxu0 %vm461_vm1, %v1683_v22  ;;  %1615 = vmatprep.mubr.msk.bf16.mxu1 %vm461_vm1, %v1684_v23 }
  0x2e   :  { %1552 = vmatmul.mubr.msk.bf16.gmra.mrb[20].mxu0 %vm461_vm1, %v1685_v24  ;;  %1616 = vmatmul.mubr.msk.bf16.gmra.mrb[20].mxu1 %vm461_vm1, %v1686_v25 }
  0x2f   :  { %1555 = vmatprep.mubr.msk.bf16.mxu0 %vm461_vm1, %v1687_v26  ;;  %1619 = vmatprep.mubr.msk.bf16.mxu1 %vm461_vm1, %v1688_v27 }
  0x36   :  { %1556 = vmatmul.mubr.msk.bf16.gmra.mrb[24].mxu0 %vm461_vm1, %v1689_v28  ;;  %1620 = vmatmul.mubr.msk.bf16.gmra.mrb[24].mxu1 %vm461_vm1, %v1690_v29 }
  0x37   :  { %1559 = vmatprep.mubr.msk.bf16.mxu0 %vm461_vm1, %v1691_v30  ;;  %1623 = vmatprep.mubr.msk.bf16.mxu1 %vm461_vm1, %v1692_v31 }
  0x3e   :  { %1560 = vmatmul.mubr.msk.bf16.gmra.mrb[28].mxu0 %vm461_vm1, %v1693_v32  ;;  %1624 = vmatmul.mubr.msk.bf16.gmra.mrb[28].mxu1 %vm461_vm1, %v1694_v33 }
  0x3f   :  { %1563 = vmatprep.mubr.msk.bf16.mxu0 %vm461_vm1, %v1695_v34  ;;  %1627 = vmatprep.mubr.msk.bf16.mxu1 %vm461_vm1, %v1696_v35 }
  0x46   :  { %1564 = vmatmul.mubr.msk.bf16.gmra.mrb[32].mxu0 %vm461_vm1, %v1697_v36  ;;  %1628 = vmatmul.mubr.msk.bf16.gmra.mrb[32].mxu1 %vm461_vm1, %v1698_v37 }
  0x47   :  { %1567 = vmatprep.mubr.msk.bf16.mxu0 %vm461_vm1, %v1699_v38  ;;  %1631 = vmatprep.mubr.msk.bf16.mxu1 %vm461_vm1, %v1700_v39 }
  0x4e   :  { %1568 = vmatmul.mubr.msk.bf16.gmra.mrb[36].mxu0 %vm461_vm1, %v1701_v40  ;;  %1632 = vmatmul.mubr.msk.bf16.gmra.mrb[36].mxu1 %vm461_vm1, %v1702_v41 }
  0x4f   :  { %1571 = vmatprep.mubr.msk.bf16.mxu0 %vm461_vm1, %v1703_v42  ;;  %1635 = vmatprep.mubr.msk.bf16.mxu1 %vm461_vm1, %v1704_v43 }
  0x56   :  { %1572 = vmatmul.mubr.msk.bf16.gmra.mrb[40].mxu0 %vm461_vm1, %v1705_v44  ;;  %1636 = vmatmul.mubr.msk.bf16.gmra.mrb[40].mxu1 %vm461_vm1, %v1706_v45 }
  0x57   :  { %1575 = vmatprep.mubr.msk.bf16.mxu0 %vm461_vm1, %v1707_v46  ;;  %1639 = vmatprep.mubr.msk.bf16.mxu1 %vm461_vm1, %v1708_v47 }
  0x5e   :  { %1576 = vmatmul.mubr.msk.bf16.gmra.mrb[44].mxu0 %vm461_vm1, %v1709_v48  ;;  %1640 = vmatmul.mubr.msk.bf16.gmra.mrb[44].mxu1 %vm461_vm1, %v1710_v49 }
  0x5f   :  { %1579 = vmatprep.mubr.msk.bf16.mxu0 %vm461_vm1, %v1711_v50  ;;  %1643 = vmatprep.mubr.msk.bf16.mxu1 %vm461_vm1, %v1712_v51 }
  0x66   :  { %1580 = vmatmul.mubr.msk.bf16.gmra.mrb[48].mxu0 %vm461_vm1, %v1713_v52  ;;  %1644 = vmatmul.mubr.msk.bf16.gmra.mrb[48].mxu1 %vm461_vm1, %v1714_v53 }
  0x67   :  { %1583 = vmatprep.mubr.msk.bf16.mxu0 %vm461_vm1, %v1715_v54  ;;  %1647 = vmatprep.mubr.msk.bf16.mxu1 %vm461_vm1, %v1716_v55 }
  0x6e   :  { %1584 = vmatmul.mubr.msk.bf16.gmra.mrb[52].mxu0 %vm461_vm1, %v1717_v56  ;;  %1648 = vmatmul.mubr.msk.bf16.gmra.mrb[52].mxu1 %vm461_vm1, %v1718_v57 }
  0x6f   :  { %1587 = vmatprep.mubr.msk.bf16.mxu0 %vm461_vm1, %v1719_v58  ;;  %1651 = vmatprep.mubr.msk.bf16.mxu1 %vm461_vm1, %v1720_v59 }
  0x76   :  { %1588 = vmatmul.mubr.msk.bf16.gmra.mrb[56].mxu0 %vm461_vm1, %v1721_v60  ;;  %1652 = vmatmul.mubr.msk.bf16.gmra.mrb[56].mxu1 %vm461_vm1, %v1722_v61 }
  0x77   :  { %1591 = vmatprep.mubr.msk.bf16.mxu0 %vm461_vm1, %v1723_v62  ;;  %1655 = vmatprep.mubr.msk.bf16.mxu1 %vm461_vm1, %v1724_v63 }
  0x7e   :  { %1592 = vmatmul.mubr.msk.bf16.gmra.mrb[60].mxu0 %vm461_vm1, %v1725_v0  ;;  %1656 = vmatmul.mubr.msk.bf16.gmra.mrb[60].mxu1 %vm461_vm1, %v1726_v1 }
  0xd9   :  { %v1533_v2 = vpop.f32.mrb[0].mxu0  ;;  %v1597_v3 = vpop.f32.mrb[0].mxu1 }
  0xda   :  { %1206 = vst.msk [vmem:[%s2515_s2 + $0x10] sm:$0xff] %vm1203_vm2, %v1533_v2  ;;  %v692_v4 = vpop.f32.mrb[1].mxu0  ;;  %1270 = vst.msk [vmem:[%s2515_s2 + $0x210] sm:$0xff] %vm1203_vm2, %v1597_v3  ;;  %v948_v5 = vpop.f32.mrb[1].mxu1 }
  0xdb   :  { %1204 = vst.msk [vmem:[%s2515_s2] sm:$0xff] %vm1203_vm2, %v692_v4  ;;  %v1534_v6 = vpop.f32.mrb[2].mxu0  ;;  %1268 = vst.msk [vmem:[%s2515_s2 + $0x200] sm:$0xff] %vm1203_vm2, %v948_v5  ;;  %v1598_v7 = vpop.f32.mrb[2].mxu1 }
  0xdc   :  { %1207 = vst.msk [vmem:[%s2515_s2 + $0x18] sm:$0xff] %vm1203_vm2, %v1534_v6  ;;  %v695_v8 = vpop.f32.mrb[3].mxu0  ;;  %1271 = vst.msk [vmem:[%s2515_s2 + $0x218] sm:$0xff] %vm1203_vm2, %v1598_v7  ;;  %v951_v9 = vpop.f32.mrb[3].mxu1 }
  0xdd   :  { %1205 = vst.msk [vmem:[%s2515_s2 + $0x8] sm:$0xff] %vm1203_vm2, %v695_v8  ;;  %1269 = vst.msk [vmem:[%s2515_s2 + $0x208] sm:$0xff] %vm1203_vm2, %v951_v9 }
  0xe1   :  { %v1537_v10 = vpop.f32.mrb[4].mxu0  ;;  %v1601_v11 = vpop.f32.mrb[4].mxu1 }
  0xe2   :  { %1210 = vst.msk [vmem:[%s2515_s2 + $0x30] sm:$0xff] %vm1203_vm2, %v1537_v10  ;;  %v708_v12 = vpop.f32.mrb[5].mxu0  ;;  %1274 = vst.msk [vmem:[%s2515_s2 + $0x230] sm:$0xff] %vm1203_vm2, %v1601_v11  ;;  %v964_v13 = vpop.f32.mrb[5].mxu1 }
  0xe3   :  { %1208 = vst.msk [vmem:[%s2515_s2 + $0x20] sm:$0xff] %vm1203_vm2, %v708_v12  ;;  %v1538_v14 = vpop.f32.mrb[6].mxu0  ;;  %1272 = vst.msk [vmem:[%s2515_s2 + $0x220] sm:$0xff] %vm1203_vm2, %v964_v13  ;;  %v1602_v15 = vpop.f32.mrb[6].mxu1 }
  0xe4   :  { %1211 = vst.msk [vmem:[%s2515_s2 + $0x38] sm:$0xff] %vm1203_vm2, %v1538_v14  ;;  %v711_v16 = vpop.f32.mrb[7].mxu0  ;;  %1275 = vst.msk [vmem:[%s2515_s2 + $0x238] sm:$0xff] %vm1203_vm2, %v1602_v15  ;;  %v967_v17 = vpop.f32.mrb[7].mxu1 }
  0xe5   :  { %1209 = vst.msk [vmem:[%s2515_s2 + $0x28] sm:$0xff] %vm1203_vm2, %v711_v16  ;;  %1273 = vst.msk [vmem:[%s2515_s2 + $0x228] sm:$0xff] %vm1203_vm2, %v967_v17 }
  0xe9   :  { %v1541_v18 = vpop.f32.mrb[8].mxu0  ;;  %v1605_v19 = vpop.f32.mrb[8].mxu1 }
  0xea   :  { %1214 = vst.msk [vmem:[%s2515_s2 + $0x50] sm:$0xff] %vm1203_vm2, %v1541_v18  ;;  %v724_v20 = vpop.f32.mrb[9].mxu0  ;;  %1278 = vst.msk [vmem:[%s2515_s2 + $0x250] sm:$0xff] %vm1203_vm2, %v1605_v19  ;;  %v980_v21 = vpop.f32.mrb[9].mxu1 }
  0xeb   :  { %1212 = vst.msk [vmem:[%s2515_s2 + $0x40] sm:$0xff] %vm1203_vm2, %v724_v20  ;;  %v1542_v22 = vpop.f32.mrb[10].mxu0  ;;  %1276 = vst.msk [vmem:[%s2515_s2 + $0x240] sm:$0xff] %vm1203_vm2, %v980_v21  ;;  %v1606_v23 = vpop.f32.mrb[10].mxu1 }
  0xec   :  { %1215 = vst.msk [vmem:[%s2515_s2 + $0x58] sm:$0xff] %vm1203_vm2, %v1542_v22  ;;  %v727_v24 = vpop.f32.mrb[11].mxu0  ;;  %1279 = vst.msk [vmem:[%s2515_s2 + $0x258] sm:$0xff] %vm1203_vm2, %v1606_v23  ;;  %v983_v25 = vpop.f32.mrb[11].mxu1 }
  0xed   :  { %1213 = vst.msk [vmem:[%s2515_s2 + $0x48] sm:$0xff] %vm1203_vm2, %v727_v24  ;;  %1277 = vst.msk [vmem:[%s2515_s2 + $0x248] sm:$0xff] %vm1203_vm2, %v983_v25 }
  0xf1   :  { %v1545_v26 = vpop.f32.mrb[12].mxu0  ;;  %v1609_v27 = vpop.f32.mrb[12].mxu1 }
  0xf2   :  { %1218 = vst.msk [vmem:[%s2515_s2 + $0x70] sm:$0xff] %vm1203_vm2, %v1545_v26  ;;  %v740_v28 = vpop.f32.mrb[13].mxu0  ;;  %1282 = vst.msk [vmem:[%s2515_s2 + $0x270] sm:$0xff] %vm1203_vm2, %v1609_v27  ;;  %v996_v29 = vpop.f32.mrb[13].mxu1 }
  0xf3   :  { %1216 = vst.msk [vmem:[%s2515_s2 + $0x60] sm:$0xff] %vm1203_vm2, %v740_v28  ;;  %v1546_v30 = vpop.f32.mrb[14].mxu0  ;;  %1280 = vst.msk [vmem:[%s2515_s2 + $0x260] sm:$0xff] %vm1203_vm2, %v996_v29  ;;  %v1610_v31 = vpop.f32.mrb[14].mxu1 }
  0xf4   :  { %1219 = vst.msk [vmem:[%s2515_s2 + $0x78] sm:$0xff] %vm1203_vm2, %v1546_v30  ;;  %v743_v32 = vpop.f32.mrb[15].mxu0  ;;  %1283 = vst.msk [vmem:[%s2515_s2 + $0x278] sm:$0xff] %vm1203_vm2, %v1610_v31  ;;  %v999_v33 = vpop.f32.mrb[15].mxu1 }
  0xf5   :  { %1217 = vst.msk [vmem:[%s2515_s2 + $0x68] sm:$0xff] %vm1203_vm2, %v743_v32  ;;  %1281 = vst.msk [vmem:[%s2515_s2 + $0x268] sm:$0xff] %vm1203_vm2, %v999_v33 }
  0xf9   :  { %v1549_v34 = vpop.f32.mrb[16].mxu0  ;;  %v1613_v35 = vpop.f32.mrb[16].mxu1 }
  0xfa   :  { %1222 = vst.msk [vmem:[%s2515_s2 + $0x90] sm:$0xff] %vm1203_vm2, %v1549_v34  ;;  %v756_v36 = vpop.f32.mrb[17].mxu0  ;;  %1286 = vst.msk [vmem:[%s2515_s2 + $0x290] sm:$0xff] %vm1203_vm2, %v1613_v35  ;;  %v1012_v37 = vpop.f32.mrb[17].mxu1 }
  0xfb   :  { %1220 = vst.msk [vmem:[%s2515_s2 + $0x80] sm:$0xff] %vm1203_vm2, %v756_v36  ;;  %v1550_v38 = vpop.f32.mrb[18].mxu0  ;;  %1284 = vst.msk [vmem:[%s2515_s2 + $0x280] sm:$0xff] %vm1203_vm2, %v1012_v37  ;;  %v1614_v39 = vpop.f32.mrb[18].mxu1 }
  0xfc   :  { %1223 = vst.msk [vmem:[%s2515_s2 + $0x98] sm:$0xff] %vm1203_vm2, %v1550_v38  ;;  %v759_v40 = vpop.f32.mrb[19].mxu0  ;;  %1287 = vst.msk [vmem:[%s2515_s2 + $0x298] sm:$0xff] %vm1203_vm2, %v1614_v39  ;;  %v1015_v41 = vpop.f32.mrb[19].mxu1 }
  0xfd   :  { %1221 = vst.msk [vmem:[%s2515_s2 + $0x88] sm:$0xff] %vm1203_vm2, %v759_v40  ;;  %1285 = vst.msk [vmem:[%s2515_s2 + $0x288] sm:$0xff] %vm1203_vm2, %v1015_v41 }
 0x101   :  { %v1553_v42 = vpop.f32.mrb[20].mxu0  ;;  %v1617_v43 = vpop.f32.mrb[20].mxu1 }
 0x102   :  { %1226 = vst.msk [vmem:[%s2515_s2 + $0xb0] sm:$0xff] %vm1203_vm2, %v1553_v42  ;;  %v772_v44 = vpop.f32.mrb[21].mxu0  ;;  %1290 = vst.msk [vmem:[%s2515_s2 + $0x2b0] sm:$0xff] %vm1203_vm2, %v1617_v43  ;;  %v1028_v45 = vpop.f32.mrb[21].mxu1 }
 0x103   :  { %1224 = vst.msk [vmem:[%s2515_s2 + $0xa0] sm:$0xff] %vm1203_vm2, %v772_v44  ;;  %v1554_v46 = vpop.f32.mrb[22].mxu0  ;;  %1288 = vst.msk [vmem:[%s2515_s2 + $0x2a0] sm:$0xff] %vm1203_vm2, %v1028_v45  ;;  %v1618_v47 = vpop.f32.mrb[22].mxu1 }
 0x104   :  { %1227 = vst.msk [vmem:[%s2515_s2 + $0xb8] sm:$0xff] %vm1203_vm2, %v1554_v46  ;;  %v775_v48 = vpop.f32.mrb[23].mxu0  ;;  %1291 = vst.msk [vmem:[%s2515_s2 + $0x2b8] sm:$0xff] %vm1203_vm2, %v1618_v47  ;;  %v1031_v49 = vpop.f32.mrb[23].mxu1 }
 0x105   :  { %1225 = vst.msk [vmem:[%s2515_s2 + $0xa8] sm:$0xff] %vm1203_vm2, %v775_v48  ;;  %1289 = vst.msk [vmem:[%s2515_s2 + $0x2a8] sm:$0xff] %vm1203_vm2, %v1031_v49 }
 0x109   :  { %v1557_v50 = vpop.f32.mrb[24].mxu0  ;;  %v1621_v51 = vpop.f32.mrb[24].mxu1 }
 0x10a   :  { %1230 = vst.msk [vmem:[%s2515_s2 + $0xd0] sm:$0xff] %vm1203_vm2, %v1557_v50  ;;  %v788_v52 = vpop.f32.mrb[25].mxu0  ;;  %1294 = vst.msk [vmem:[%s2515_s2 + $0x2d0] sm:$0xff] %vm1203_vm2, %v1621_v51  ;;  %v1044_v53 = vpop.f32.mrb[25].mxu1 }
 0x10b   :  { %1228 = vst.msk [vmem:[%s2515_s2 + $0xc0] sm:$0xff] %vm1203_vm2, %v788_v52  ;;  %v1558_v54 = vpop.f32.mrb[26].mxu0  ;;  %1292 = vst.msk [vmem:[%s2515_s2 + $0x2c0] sm:$0xff] %vm1203_vm2, %v1044_v53  ;;  %v1622_v55 = vpop.f32.mrb[26].mxu1 }
 0x10c   :  { %1231 = vst.msk [vmem:[%s2515_s2 + $0xd8] sm:$0xff] %vm1203_vm2, %v1558_v54  ;;  %v791_v56 = vpop.f32.mrb[27].mxu0  ;;  %1295 = vst.msk [vmem:[%s2515_s2 + $0x2d8] sm:$0xff] %vm1203_vm2, %v1622_v55  ;;  %v1047_v57 = vpop.f32.mrb[27].mxu1 }
 0x10d   :  { %1229 = vst.msk [vmem:[%s2515_s2 + $0xc8] sm:$0xff] %vm1203_vm2, %v791_v56  ;;  %1293 = vst.msk [vmem:[%s2515_s2 + $0x2c8] sm:$0xff] %vm1203_vm2, %v1047_v57 }
 0x111   :  { %v1561_v58 = vpop.f32.mrb[28].mxu0  ;;  %v1625_v59 = vpop.f32.mrb[28].mxu1 }
 0x112   :  { %1234 = vst.msk [vmem:[%s2515_s2 + $0xf0] sm:$0xff] %vm1203_vm2, %v1561_v58  ;;  %v804_v60 = vpop.f32.mrb[29].mxu0  ;;  %1298 = vst.msk [vmem:[%s2515_s2 + $0x2f0] sm:$0xff] %vm1203_vm2, %v1625_v59  ;;  %v1060_v61 = vpop.f32.mrb[29].mxu1 }
 0x113   :  { %1232 = vst.msk [vmem:[%s2515_s2 + $0xe0] sm:$0xff] %vm1203_vm2, %v804_v60  ;;  %v1562_v62 = vpop.f32.mrb[30].mxu0  ;;  %1296 = vst.msk [vmem:[%s2515_s2 + $0x2e0] sm:$0xff] %vm1203_vm2, %v1060_v61  ;;  %v1626_v63 = vpop.f32.mrb[30].mxu1 }
 0x114   :  { %1235 = vst.msk [vmem:[%s2515_s2 + $0xf8] sm:$0xff] %vm1203_vm2, %v1562_v62  ;;  %v807_v0 = vpop.f32.mrb[31].mxu0  ;;  %1299 = vst.msk [vmem:[%s2515_s2 + $0x2f8] sm:$0xff] %vm1203_vm2, %v1626_v63  ;;  %v1063_v1 = vpop.f32.mrb[31].mxu1 }
 0x115   :  { %1233 = vst.msk [vmem:[%s2515_s2 + $0xe8] sm:$0xff] %vm1203_vm2, %v807_v0  ;;  %1297 = vst.msk [vmem:[%s2515_s2 + $0x2e8] sm:$0xff] %vm1203_vm2, %v1063_v1 }
 0x119   :  { %v1565_v2 = vpop.f32.mrb[32].mxu0  ;;  %v1629_v3 = vpop.f32.mrb[32].mxu1 }
 0x11a   :  { %1238 = vst.msk [vmem:[%s2515_s2 + $0x110] sm:$0xff] %vm1203_vm2, %v1565_v2  ;;  %v820_v4 = vpop.f32.mrb[33].mxu0  ;;  %1302 = vst.msk [vmem:[%s2515_s2 + $0x310] sm:$0xff] %vm1203_vm2, %v1629_v3  ;;  %v1076_v5 = vpop.f32.mrb[33].mxu1 }
 0x11b   :  { %1236 = vst.msk [vmem:[%s2515_s2 + $0x100] sm:$0xff] %vm1203_vm2, %v820_v4  ;;  %v1566_v6 = vpop.f32.mrb[34].mxu0  ;;  %1300 = vst.msk [vmem:[%s2515_s2 + $0x300] sm:$0xff] %vm1203_vm2, %v1076_v5  ;;  %v1630_v7 = vpop.f32.mrb[34].mxu1 }
 0x11c   :  { %1239 = vst.msk [vmem:[%s2515_s2 + $0x118] sm:$0xff] %vm1203_vm2, %v1566_v6  ;;  %v823_v8 = vpop.f32.mrb[35].mxu0  ;;  %1303 = vst.msk [vmem:[%s2515_s2 + $0x318] sm:$0xff] %vm1203_vm2, %v1630_v7  ;;  %v1079_v9 = vpop.f32.mrb[35].mxu1 }
 0x11d   :  { %1237 = vst.msk [vmem:[%s2515_s2 + $0x108] sm:$0xff] %vm1203_vm2, %v823_v8  ;;  %1301 = vst.msk [vmem:[%s2515_s2 + $0x308] sm:$0xff] %vm1203_vm2, %v1079_v9 }
 0x121   :  { %v1569_v10 = vpop.f32.mrb[36].mxu0  ;;  %v1633_v11 = vpop.f32.mrb[36].mxu1 }
 0x122   :  { %1242 = vst.msk [vmem:[%s2515_s2 + $0x130] sm:$0xff] %vm1203_vm2, %v1569_v10  ;;  %v836_v12 = vpop.f32.mrb[37].mxu0  ;;  %1306 = vst.msk [vmem:[%s2515_s2 + $0x330] sm:$0xff] %vm1203_vm2, %v1633_v11  ;;  %v1092_v13 = vpop.f32.mrb[37].mxu1 }
 0x123   :  { %1240 = vst.msk [vmem:[%s2515_s2 + $0x120] sm:$0xff] %vm1203_vm2, %v836_v12  ;;  %v1570_v14 = vpop.f32.mrb[38].mxu0  ;;  %1304 = vst.msk [vmem:[%s2515_s2 + $0x320] sm:$0xff] %vm1203_vm2, %v1092_v13  ;;  %v1634_v15 = vpop.f32.mrb[38].mxu1 }
 0x124   :  { %1243 = vst.msk [vmem:[%s2515_s2 + $0x138] sm:$0xff] %vm1203_vm2, %v1570_v14  ;;  %v839_v16 = vpop.f32.mrb[39].mxu0  ;;  %1307 = vst.msk [vmem:[%s2515_s2 + $0x338] sm:$0xff] %vm1203_vm2, %v1634_v15  ;;  %v1095_v17 = vpop.f32.mrb[39].mxu1 }
 0x125   :  { %1241 = vst.msk [vmem:[%s2515_s2 + $0x128] sm:$0xff] %vm1203_vm2, %v839_v16  ;;  %1305 = vst.msk [vmem:[%s2515_s2 + $0x328] sm:$0xff] %vm1203_vm2, %v1095_v17 }
 0x129   :  { %v1573_v18 = vpop.f32.mrb[40].mxu0  ;;  %v1637_v19 = vpop.f32.mrb[40].mxu1 }
 0x12a   :  { %1246 = vst.msk [vmem:[%s2515_s2 + $0x150] sm:$0xff] %vm1203_vm2, %v1573_v18  ;;  %v852_v20 = vpop.f32.mrb[41].mxu0  ;;  %1310 = vst.msk [vmem:[%s2515_s2 + $0x350] sm:$0xff] %vm1203_vm2, %v1637_v19  ;;  %v1108_v21 = vpop.f32.mrb[41].mxu1 }
 0x12b   :  { %1244 = vst.msk [vmem:[%s2515_s2 + $0x140] sm:$0xff] %vm1203_vm2, %v852_v20  ;;  %v1574_v22 = vpop.f32.mrb[42].mxu0  ;;  %1308 = vst.msk [vmem:[%s2515_s2 + $0x340] sm:$0xff] %vm1203_vm2, %v1108_v21  ;;  %v1638_v23 = vpop.f32.mrb[42].mxu1 }
 0x12c   :  { %1247 = vst.msk [vmem:[%s2515_s2 + $0x158] sm:$0xff] %vm1203_vm2, %v1574_v22  ;;  %v855_v24 = vpop.f32.mrb[43].mxu0  ;;  %1311 = vst.msk [vmem:[%s2515_s2 + $0x358] sm:$0xff] %vm1203_vm2, %v1638_v23  ;;  %v1111_v25 = vpop.f32.mrb[43].mxu1 }
 0x12d   :  { %1245 = vst.msk [vmem:[%s2515_s2 + $0x148] sm:$0xff] %vm1203_vm2, %v855_v24  ;;  %1309 = vst.msk [vmem:[%s2515_s2 + $0x348] sm:$0xff] %vm1203_vm2, %v1111_v25 }
 0x131   :  { %v1577_v26 = vpop.f32.mrb[44].mxu0  ;;  %v1641_v27 = vpop.f32.mrb[44].mxu1 }
 0x132   :  { %1250 = vst.msk [vmem:[%s2515_s2 + $0x170] sm:$0xff] %vm1203_vm2, %v1577_v26  ;;  %v868_v28 = vpop.f32.mrb[45].mxu0  ;;  %1314 = vst.msk [vmem:[%s2515_s2 + $0x370] sm:$0xff] %vm1203_vm2, %v1641_v27  ;;  %v1124_v29 = vpop.f32.mrb[45].mxu1 }
 0x133   :  { %1248 = vst.msk [vmem:[%s2515_s2 + $0x160] sm:$0xff] %vm1203_vm2, %v868_v28  ;;  %v1578_v30 = vpop.f32.mrb[46].mxu0  ;;  %1312 = vst.msk [vmem:[%s2515_s2 + $0x360] sm:$0xff] %vm1203_vm2, %v1124_v29  ;;  %v1642_v31 = vpop.f32.mrb[46].mxu1 }
 0x134   :  { %1251 = vst.msk [vmem:[%s2515_s2 + $0x178] sm:$0xff] %vm1203_vm2, %v1578_v30  ;;  %v871_v32 = vpop.f32.mrb[47].mxu0  ;;  %1315 = vst.msk [vmem:[%s2515_s2 + $0x378] sm:$0xff] %vm1203_vm2, %v1642_v31  ;;  %v1127_v33 = vpop.f32.mrb[47].mxu1 }
 0x135   :  { %1249 = vst.msk [vmem:[%s2515_s2 + $0x168] sm:$0xff] %vm1203_vm2, %v871_v32  ;;  %1313 = vst.msk [vmem:[%s2515_s2 + $0x368] sm:$0xff] %vm1203_vm2, %v1127_v33 }
 0x139   :  { %v1581_v34 = vpop.f32.mrb[48].mxu0  ;;  %v1645_v35 = vpop.f32.mrb[48].mxu1 }
 0x13a   :  { %1254 = vst.msk [vmem:[%s2515_s2 + $0x190] sm:$0xff] %vm1203_vm2, %v1581_v34  ;;  %v884_v36 = vpop.f32.mrb[49].mxu0  ;;  %1318 = vst.msk [vmem:[%s2515_s2 + $0x390] sm:$0xff] %vm1203_vm2, %v1645_v35  ;;  %v1140_v37 = vpop.f32.mrb[49].mxu1 }
 0x13b   :  { %1252 = vst.msk [vmem:[%s2515_s2 + $0x180] sm:$0xff] %vm1203_vm2, %v884_v36  ;;  %v1582_v38 = vpop.f32.mrb[50].mxu0  ;;  %1316 = vst.msk [vmem:[%s2515_s2 + $0x380] sm:$0xff] %vm1203_vm2, %v1140_v37  ;;  %v1646_v39 = vpop.f32.mrb[50].mxu1 }
 0x13c   :  { %1255 = vst.msk [vmem:[%s2515_s2 + $0x198] sm:$0xff] %vm1203_vm2, %v1582_v38  ;;  %v887_v40 = vpop.f32.mrb[51].mxu0  ;;  %1319 = vst.msk [vmem:[%s2515_s2 + $0x398] sm:$0xff] %vm1203_vm2, %v1646_v39  ;;  %v1143_v41 = vpop.f32.mrb[51].mxu1 }
 0x13d   :  { %1253 = vst.msk [vmem:[%s2515_s2 + $0x188] sm:$0xff] %vm1203_vm2, %v887_v40  ;;  %1317 = vst.msk [vmem:[%s2515_s2 + $0x388] sm:$0xff] %vm1203_vm2, %v1143_v41 }
 0x141   :  { %v1585_v42 = vpop.f32.mrb[52].mxu0  ;;  %v1649_v43 = vpop.f32.mrb[52].mxu1 }
 0x142   :  { %1258 = vst.msk [vmem:[%s2515_s2 + $0x1b0] sm:$0xff] %vm1203_vm2, %v1585_v42  ;;  %v900_v44 = vpop.f32.mrb[53].mxu0  ;;  %1322 = vst.msk [vmem:[%s2515_s2 + $0x3b0] sm:$0xff] %vm1203_vm2, %v1649_v43  ;;  %v1156_v45 = vpop.f32.mrb[53].mxu1 }
 0x143   :  { %1256 = vst.msk [vmem:[%s2515_s2 + $0x1a0] sm:$0xff] %vm1203_vm2, %v900_v44  ;;  %v1586_v46 = vpop.f32.mrb[54].mxu0  ;;  %1320 = vst.msk [vmem:[%s2515_s2 + $0x3a0] sm:$0xff] %vm1203_vm2, %v1156_v45  ;;  %v1650_v47 = vpop.f32.mrb[54].mxu1 }
 0x144   :  { %1259 = vst.msk [vmem:[%s2515_s2 + $0x1b8] sm:$0xff] %vm1203_vm2, %v1586_v46  ;;  %v903_v48 = vpop.f32.mrb[55].mxu0  ;;  %1323 = vst.msk [vmem:[%s2515_s2 + $0x3b8] sm:$0xff] %vm1203_vm2, %v1650_v47  ;;  %v1159_v49 = vpop.f32.mrb[55].mxu1 }
 0x145   :  { %1257 = vst.msk [vmem:[%s2515_s2 + $0x1a8] sm:$0xff] %vm1203_vm2, %v903_v48  ;;  %1321 = vst.msk [vmem:[%s2515_s2 + $0x3a8] sm:$0xff] %vm1203_vm2, %v1159_v49 }
 0x149   :  { %v1589_v50 = vpop.f32.mrb[56].mxu0  ;;  %v1653_v51 = vpop.f32.mrb[56].mxu1 }
 0x14a   :  { %1262 = vst.msk [vmem:[%s2515_s2 + $0x1d0] sm:$0xff] %vm1203_vm2, %v1589_v50  ;;  %v916_v52 = vpop.f32.mrb[57].mxu0  ;;  %1326 = vst.msk [vmem:[%s2515_s2 + $0x3d0] sm:$0xff] %vm1203_vm2, %v1653_v51  ;;  %v1172_v53 = vpop.f32.mrb[57].mxu1 }
 0x14b   :  { %1260 = vst.msk [vmem:[%s2515_s2 + $0x1c0] sm:$0xff] %vm1203_vm2, %v916_v52  ;;  %v1590_v54 = vpop.f32.mrb[58].mxu0  ;;  %1324 = vst.msk [vmem:[%s2515_s2 + $0x3c0] sm:$0xff] %vm1203_vm2, %v1172_v53  ;;  %v1654_v55 = vpop.f32.mrb[58].mxu1 }
 0x14c   :  { %1263 = vst.msk [vmem:[%s2515_s2 + $0x1d8] sm:$0xff] %vm1203_vm2, %v1590_v54  ;;  %v919_v56 = vpop.f32.mrb[59].mxu0  ;;  %1327 = vst.msk [vmem:[%s2515_s2 + $0x3d8] sm:$0xff] %vm1203_vm2, %v1654_v55  ;;  %v1175_v57 = vpop.f32.mrb[59].mxu1 }
 0x14d   :  { %1261 = vst.msk [vmem:[%s2515_s2 + $0x1c8] sm:$0xff] %vm1203_vm2, %v919_v56  ;;  %1325 = vst.msk [vmem:[%s2515_s2 + $0x3c8] sm:$0xff] %vm1203_vm2, %v1175_v57 }
 0x151   :  { %v1593_v58 = vpop.f32.mrb[60].mxu0  ;;  %v1657_v59 = vpop.f32.mrb[60].mxu1 }
 0x152   :  { %1266 = vst.msk [vmem:[%s2515_s2 + $0x1f0] sm:$0xff] %vm1203_vm2, %v1593_v58  ;;  %v932_v60 = vpop.f32.mrb[61].mxu0  ;;  %1330 = vst.msk [vmem:[%s2515_s2 + $0x3f0] sm:$0xff] %vm1203_vm2, %v1657_v59  ;;  %v1188_v61 = vpop.f32.mrb[61].mxu1 }
 0x153   :  { %1264 = vst.msk [vmem:[%s2515_s2 + $0x1e0] sm:$0xff] %vm1203_vm2, %v932_v60  ;;  %v1594_v62 = vpop.f32.mrb[62].mxu0  ;;  %1328 = vst.msk [vmem:[%s2515_s2 + $0x3e0] sm:$0xff] %vm1203_vm2, %v1188_v61  ;;  %v1658_v63 = vpop.f32.mrb[62].mxu1 }
 0x154   :  { %1267 = vst.msk [vmem:[%s2515_s2 + $0x1f8] sm:$0xff] %vm1203_vm2, %v1594_v62  ;;  %v935_v0 = vpop.f32.mrb[63].mxu0  ;;  %1331 = vst.msk [vmem:[%s2515_s2 + $0x3f8] sm:$0xff] %vm1203_vm2, %v1658_v63  ;;  %v1191_v1 = vpop.f32.mrb[63].mxu1 }
 0x155   :  { %1265 = vst.msk [vmem:[%s2515_s2 + $0x1e8] sm:$0xff] %vm1203_vm2, %v935_v0  ;;  %1329 = vst.msk [vmem:[%s2515_s2 + $0x3e8] sm:$0xff] %vm1203_vm2, %v1191_v1 }

// kernel: squeeze.8
= control target key start
LH: loop header
LB: loop body
LE: loop exit
PB: predicated region body
PF: predicated region fallthrough
CT: control target
= control target key end

     0   :  { %s37_s8 = smov 32   ;;  %vm7_vm0 = vcmask 261120   ;;  %s38_s9 = smov 64   ;;  %s55_s0 = inlined_call_operand.vmem [shape: f32[128], index: 0, kind: input, shape index: {}]   ;;  %s56_s1 = inlined_call_operand.vmem [shape: f32[4,32], index: 1, kind: output, shape index: {}]  }
   0x1   :  { %v4_v0 = vld [vmem:[%s55_s0] sm:$0x1]  ;;  %s36_s0 = smov 96  }
   0x2   :  { %5 = vst [vmem:[#allocation1] sm:$0x1] %v4_v0 }
   0x9   :  { %v9_v1 = vld [vmem:[#allocation1] sm:$0x1]  }
   0xa   :  { %v21_v2 = vld [vmem:[#allocation1] sm:$0x1]   ;;  %10 = vrot.lane.b32.xlu0 %v9_v1, %s36_s0 }
   0xb   :  { %22 = vrot.lane.b32.xlu1 %v21_v2, %s37_s8  ;;  %v6_v3 = vld [vmem:[#allocation1] sm:$0x1]  }
   0xc   :  { %v15_v4 = vld [vmem:[#allocation1] sm:$0x1]   ;;  %8 = vst.msk [vmem:[#allocation0] sm:$0x1] %vm7_vm0, %v6_v3  }
   0xe   :  { %16 = vrot.lane.b32.xlu0 %v15_v4, %s38_s9 }
  0x7c   :  { %v11_v5 = vpop.permute.xlu0 %10  }
  0x7d   :  { %v23_v6 = vpop.permute.xlu1 %22   ;;  %14 = vst.msk [vmem:[#allocation0 + $0x1] sm:$0x1] %vm7_vm0, %v11_v5  }
  0x7e   :  { %26 = vst.msk [vmem:[#allocation0 + $0x3] sm:$0x1] %vm7_vm0, %v23_v6  }
  0x80   :  { %v17_v7 = vpop.permute.xlu0 %16  }
  0x81   :  { %20 = vst.msk [vmem:[#allocation0 + $0x2] sm:$0x1] %vm7_vm0, %v17_v7  }
  0x88   :  { %v30_v8 = vld [vmem:[#allocation0] sm:$0xf] }
  0x89   :  { %32 = vst [vmem:[%s56_s1] sm:$0xf] %v30_v8 }

// kernel: squeeze.10
= control target key start
LH: loop header
LB: loop body
LE: loop exit
PB: predicated region body
PF: predicated region fallthrough
CT: control target
= control target key end

     0   :  { %s37_s8 = smov 80   ;;  %vm7_vm0 = vcmask 130048   ;;  %s38_s9 = smov 96   ;;  %s55_s0 = inlined_call_operand.vmem [shape: f32[64], index: 0, kind: input, shape index: {}]   ;;  %s56_s1 = inlined_call_operand.vmem [shape: f32[4,16], index: 1, kind: output, shape index: {}]  }
   0x1   :  { %v4_v0 = vld [vmem:[%s55_s0] sm:$0x1]  ;;  %s36_s0 = smov 112  }
   0x2   :  { %5 = vst [vmem:[#allocation1] sm:$0x1] %v4_v0 }
   0x9   :  { %v9_v1 = vld [vmem:[#allocation1] sm:$0x1]  }
   0xa   :  { %v21_v2 = vld [vmem:[#allocation1] sm:$0x1]   ;;  %10 = vrot.lane.b32.xlu0 %v9_v1, %s36_s0 }
   0xb   :  { %22 = vrot.lane.b32.xlu1 %v21_v2, %s37_s8  ;;  %v6_v3 = vld [vmem:[#allocation1] sm:$0x1]  }
   0xc   :  { %v15_v4 = vld [vmem:[#allocation1] sm:$0x1]   ;;  %8 = vst.msk [vmem:[#allocation0] sm:$0x1] %vm7_vm0, %v6_v3  }
   0xe   :  { %16 = vrot.lane.b32.xlu0 %v15_v4, %s38_s9 }
  0x7c   :  { %v11_v5 = vpop.permute.xlu0 %10  }
  0x7d   :  { %v23_v6 = vpop.permute.xlu1 %22   ;;  %14 = vst.msk [vmem:[#allocation0 + $0x1] sm:$0x1] %vm7_vm0, %v11_v5  }
  0x7e   :  { %26 = vst.msk [vmem:[#allocation0 + $0x3] sm:$0x1] %vm7_vm0, %v23_v6  }
  0x80   :  { %v17_v7 = vpop.permute.xlu0 %16  }
  0x81   :  { %20 = vst.msk [vmem:[#allocation0 + $0x2] sm:$0x1] %vm7_vm0, %v17_v7  }
  0x88   :  { %v30_v8 = vld [vmem:[#allocation0] sm:$0xf] }
  0x89   :  { %32 = vst [vmem:[%s56_s1] sm:$0xf] %v30_v8 }

// kernel: generator_forward.7
= control target key start
LH: loop header
LB: loop body
LE: loop exit
PB: predicated region body
PF: predicated region fallthrough
CT: control target
= control target key end

     0   :  { %10 = vsyncpa [#allocation3], 0  ;;  %s3529_s15 = smov 0   ;;  %s3531_s16 = smov 0   ;;  %s4155_s0 = inlined_call_operand.vmem [shape: bf16[2,64,42], index: 0, kind: input, shape index: {}]   ;;  %s4156_s1 = inlined_call_operand.vmem [shape: bf16[9,128,64], index: 1, kind: input, shape index: {}]   ;;  %s4157_s2 = inlined_call_operand.hbm [shape: bf16[1,24], index: 2, kind: input, shape index: {}]   ;;  %s4158_s3 = inlined_call_operand.vmem [shape: bf16[2,128,24], index: 3, kind: output, shape index: {0}]   ;;  %s4159_s4 = inlined_call_operand.vmem [shape: f32[2,1,128,2], index: 4, kind: output, shape index: {1}]  }
   0x1   :  { %s3533_s17 = smov 0  }
   0x2 LB: > { %s2533_s18 = sadd.s32 4294967295, %s3493_s17   ;;  %s28_s19 = sadd.s32 1, %s3489_s16  ;;  %s3493_s17 = sphi %s3533_s17, %s16_s17   ;;  %s3489_s16 = sphi %s3531_s16, %s4169_s16   ;;  %s3485_s15 = sphi %s3529_s15, %s4168_s15  }
   0x3   : > { %p30_p0 = scmp.ge.s32.totalorder %s28_s19, 2  ;;  %p2535_p1 = scmp.ge.s32.totalorder %s3493_s17, 1 }
   0x4   : > { %p162_p2 = scmp.lt.s32.totalorder %s3493_s17, 3  ;;  %p3554_p4 = scmp.eq.s32.totalorder %s2533_s18, 0 }
   0x5   : > { %s4171_s19 = smov (%p30_p0, %s28_s19), 0  ;;  %s3495_s22 = smov [#allocation2]  }
   0x6   : > { %p3550_p3 = pnand %p2535_p1, %p162_p2  ;;  %s184_s23 = sshll.u32 %s3495_s22, 4  ;;  %s185_s23 = int_to_ptr.vmem [resolvable:$true] %s184_s23 }
   0x7   : > { %s4164_s21 = scalar_select %p3554_p4, 1, 0 }
   0x8   : > { %s4163_s20 = scalar_select %p3550_p3, 1, 0 }
   0x9   : > { %p3324_p5 = pneg %p3550_p3  ;;  %s3439_s27 = scalar_lea.hbm %s4157_s2, 16 }
   0xa   : > { %p3440_p7 = scmp.ne.s32.totalorder %s4157_s2, %s3439_s27  ;;  %p3446_p11 = scmp.lt.u32.totalorder %s3439_s27, %s4157_s2 }
   0xb   : > { %p3562_p6 = pnand %p3554_p4, %p3324_p5 }
   0xd   : > { %p3441_p8 = pneg %p3562_p6 }
   0xf   : > { %p3442_p9 = pnand %p3441_p8, %p3440_p7 }
  0x11   : > { %p3443_p10 = pneg %p3442_p9 }
  0x13   : > { %p3448_p12 = pnand %p3446_p11, %p3443_p10 }
  0x15   : > { %3451 = shalt.err (!%p3448_p12)
}
  0x16   : > { %s3452_s6 = scalar_lea.vmem %s185_s23, 16  ;;  %s3459_s7 = scalar_lea.vmem %s185_s23, 32 }
  0x17   : > { %p3453_p13 = scmp.ne.s32.totalorder %s185_s23, %s3452_s6  ;;  %p3460_p2 = scmp.lt.s32.totalorder %s185_s23, %s185_s23 }
  0x18   : > { %p3461_p5 = scmp.lt.s32.totalorder %s3459_s7, %s3452_s6 }
  0x19   : > { %p3455_p0 = pnand %p3453_p13, %p3441_p8 }
  0x1a   : > { %p3462_p4 = por %p3461_p5, %p3460_p2 }
  0x1b   : > { %p3456_p1 = pneg %p3455_p0 }
  0x1d   : > { %p3463_p3 = pnand %p3462_p4, %p3456_p1 }
  0x1f   : > { %3466 = shalt.err (!%p3463_p3)
}
  0x20   : > { %3327 = dma.hbm_to_vmem [thread:$0]  (!%p3562_p6), %s4157_s2, 16, %s185_s23, [#allocation3]  }
  0x21   : > { %p4166_p7 = scmp.ne.s32.totalorder %s4163_s20, 0 }
  0x22   : > { %p4167_p9 = scmp.ne.s32.totalorder (!%p4166_p7), %s4164_s21, 0 }
  0x23   : > { %205 = sbr.rel (%p4166_p7) target bundleno = 721 (0x2d1), region = 32 }
  0x2a   : > { %3480 = dma.done.wait (%p4167_p9), [#allocation3], 16  }
  0x2b   : > { %3482 = vsyncadd (%p4167_p9), [#allocation3], 4294967280  ;;  %p249_p8 = scmp.lt.s32.totalorder %s3485_s15, 1  ;;  %s3496_s14 = smov 127   ;;  %vm393_vm0 = vcmask 523264   ;;  %v3367_v2 = vld [vmem:[%s4156_s1 + $0x40] sm:$0xff]  }
  0x2c   : > { %s3497_s21 = smov 121   ;;  %2976 = vmatprep.mubr.msk.bf16.mxu1 %vm393_vm0, %v3367_v2  ;;  %v3369_v4 = vld [vmem:[%s4156_s1 + $0x100] sm:$0xff]   ;;  %s3498_s24 = smov 120   ;;  %v3368_v14 = vld [vmem:[%s4156_s1 + $0x48] sm:$0xff]   ;;  %v3371_v15 = vld [vmem:[%s4156_s1 + $0x50] sm:$0xff]   ;;  %vm2186_vm1 = vcmask 191488  }
  0x2d   : > { %s4173_s15 = smov (!%p249_p8, %s3485_s15), 1  ;;  %3072 = vmatprep.mubr.msk.bf16.mxu0 %vm393_vm0, %v3369_v4  ;;  %s3499_s25 = smov 116   ;;  %v3370_v17 = vld [vmem:[%s4156_s1 + $0x108] sm:$0xff]   ;;  %v3373_v18 = vld [vmem:[%s4156_s1 + $0x110] sm:$0xff]   ;;  %v3372_v21 = vld [vmem:[%s4156_s1 + $0x58] sm:$0xff]   ;;  %vm2225_vm2 = vcmask 195584  }
  0x2e   : > { %s2841_s10 = sshll.u32 %s4173_s15, 5  ;;  %s3500_s26 = smov 126   ;;  %v3375_v22 = vld [vmem:[%s4156_s1 + $0x60] sm:$0xff]   ;;  %v3374_v24 = vld [vmem:[%s4156_s1 + $0x118] sm:$0xff]   ;;  %v3376_v28 = vld [vmem:[%s4156_s1 + $0x68] sm:$0xff]   ;;  %vm2338_vm3 = vcmask 7168  }
  0x2f   : > { %s253_s13 = scalar_lea.vmem %s4155_s0, %s2841_s10  ;;  %s3501_s27 = smov 115   ;;  %v3377_v25 = vld [vmem:[%s4156_s1 + $0x140] sm:$0xff]   ;;  %v3379_v29 = vld [vmem:[%s4156_s1 + $0x70] sm:$0xff]   ;;  %v3378_v31 = vld [vmem:[%s4156_s1 + $0x148] sm:$0xff]   ;;  %vm2355_vm4 = vcmask 15360  }
  0x30   : > { %v3596_v0 = vld [vmem:[%s253_s13] sm:$0xff]   ;;  %v3598_v1 = vld [vmem:[%s253_s13 + $0x8] sm:$0xff]   ;;  %v3605_v3 = vld [vmem:[%s253_s13 + $0x10] sm:$0xff]   ;;  %s3502_s28 = smov 122   ;;  %s3503_s29 = smov 114  }
  0x31   : > { %381 = vrot.lane.b32.xlu0 %v3596_v0, %s3496_s14  ;;  %383 = vrot.lane.b32.xlu1 %v3598_v1, %s3496_s14  ;;  %v3615_v5 = vld [vmem:[%s253_s13 + $0x18] sm:$0xff]   ;;  %v3381_v32 = vld [vmem:[%s4156_s1 + $0x150] sm:$0xff]   ;;  %s2842_s12 = sshll.u32 %s4173_s15, 6  ;;  %s2843_s20 = sshll.u32 %s4173_s15, 7 }
  0x32   : > { %v3380_v34 = vld [vmem:[%s4156_s1 + $0x78] sm:$0xff]   ;;  %v3383_v35 = vld [vmem:[%s4156_s1] sm:$0xff]   ;;  %v3384_v40 = vld [vmem:[%s4156_s1 + $0x8] sm:$0xff]   ;;  %s3962_s18 = scalar_lea.vmem %s4158_s3, %s2842_s12  ;;  %s4096_s23 = scalar_lea.vmem %s4159_s4, %s2843_s20 }
  0x33   : > { %v3382_v36 = vld [vmem:[%s4156_s1 + $0x158] sm:$0xff]   ;;  %v3385_v37 = vld [vmem:[%s4156_s1 + $0x160] sm:$0xff]   ;;  %v3387_v41 = vld [vmem:[%s4156_s1 + $0x10] sm:$0xff]  }
  0x34   : > { %v3386_v44 = vld [vmem:[%s4156_s1 + $0x168] sm:$0xff]   ;;  %v3389_v45 = vld [vmem:[%s4156_s1 + $0x170] sm:$0xff]   ;;  %v3388_v46 = vld [vmem:[%s4156_s1 + $0x18] sm:$0xff]  }
  0x35   : > { %1149 = vrot.lane.b32.xlu0 %v3596_v0, %s3497_s21  ;;  %1151 = vrot.lane.b32.xlu1 %v3598_v1, %s3497_s21  ;;  %v3391_v47 = vld [vmem:[%s4156_s1 + $0x20] sm:$0xff]   ;;  %v3390_v49 = vld [vmem:[%s4156_s1 + $0x178] sm:$0xff]  }
  0x36   : > { %v3393_v50 = vld [vmem:[%s4156_s1 + $0x180] sm:$0xff]   ;;  %v3392_v53 = vld [vmem:[%s4156_s1 + $0x28] sm:$0xff]   ;;  %v3395_v54 = vld [vmem:[%s4156_s1 + $0x30] sm:$0xff]  }
  0x37   : > { %v3394_v55 = vld [vmem:[%s4156_s1 + $0x188] sm:$0xff]   ;;  %v3397_v56 = vld [vmem:[%s4156_s1 + $0x190] sm:$0xff]   ;;  %v3396_v58 = vld [vmem:[%s4156_s1 + $0x38] sm:$0xff]  }
  0x38   : > { %v3399_v59 = vld [vmem:[%s4156_s1 + $0x80] sm:$0xff]   ;;  %v3398_v60 = vld [vmem:[%s4156_s1 + $0x198] sm:$0xff]   ;;  %v3400_v63 = vld [vmem:[%s4156_s1 + $0x88] sm:$0xff]  }
  0x39   : > { %385 = vrot.lane.b32.xlu0 %v3605_v3, %s3496_s14  ;;  %1153 = vrot.lane.b32.xlu1 %v3605_v3, %s3497_s21  ;;  %v3401_v62 = vld [vmem:[%s4156_s1 + $0x1a0] sm:$0xff]  }
  0x3d   : > { %387 = vrot.lane.b32.xlu0 %v3615_v5, %s3496_s14  ;;  %1155 = vrot.lane.b32.xlu1 %v3615_v5, %s3497_s21 }
  0x41   : > { %1355 = vrot.lane.b32.xlu0 %v3596_v0, %s3498_s24  ;;  %1357 = vrot.lane.b32.xlu1 %v3598_v1, %s3498_s24 }
  0x45   : > { %1359 = vrot.lane.b32.xlu0 %v3605_v3, %s3498_s24  ;;  %1361 = vrot.lane.b32.xlu1 %v3615_v5, %s3498_s24 }
  0x49   : > { %1561 = vrot.lane.b32.xlu0 %v3596_v0, %s3499_s25  ;;  %1563 = vrot.lane.b32.xlu1 %v3598_v1, %s3499_s25 }
  0x4d   : > { %1565 = vrot.lane.b32.xlu0 %v3605_v3, %s3499_s25  ;;  %1567 = vrot.lane.b32.xlu1 %v3615_v5, %s3499_s25 }
  0x51   : > { %737 = vrot.lane.b32.xlu0 %v3596_v0, %s3500_s26  ;;  %739 = vrot.lane.b32.xlu1 %v3598_v1, %s3500_s26 }
  0x55   : > { %741 = vrot.lane.b32.xlu0 %v3605_v3, %s3500_s26  ;;  %743 = vrot.lane.b32.xlu1 %v3615_v5, %s3500_s26 }
  0x59   : > { %1767 = vrot.lane.b32.xlu0 %v3596_v0, %s3501_s27  ;;  %1769 = vrot.lane.b32.xlu1 %v3598_v1, %s3501_s27 }
  0x5d   : > { %1771 = vrot.lane.b32.xlu0 %v3605_v3, %s3501_s27  ;;  %1773 = vrot.lane.b32.xlu1 %v3615_v5, %s3501_s27 }
  0x61   : > { %943 = vrot.lane.b32.xlu0 %v3596_v0, %s3502_s28  ;;  %945 = vrot.lane.b32.xlu1 %v3598_v1, %s3502_s28 }
  0x65   : > { %947 = vrot.lane.b32.xlu0 %v3605_v3, %s3502_s28  ;;  %949 = vrot.lane.b32.xlu1 %v3615_v5, %s3502_s28 }
  0x69   : > { %1973 = vrot.lane.b32.xlu0 %v3596_v0, %s3503_s29  ;;  %1975 = vrot.lane.b32.xlu1 %v3598_v1, %s3503_s29 }
  0x6d   : > { %1977 = vrot.lane.b32.xlu0 %v3605_v3, %s3503_s29  ;;  %1979 = vrot.lane.b32.xlu1 %v3615_v5, %s3503_s29 }
  0xa3   : > { %v382_v6 = vpop.permute.xlu0 %381  ;;  %v384_v7 = vpop.permute.xlu1 %383 }
  0xa4   : > { %2968 = vmatprep.subr.bf16.mxu1 %v382_v6 }
  0xa5   : > { %2969 = vmatpush3.bf16.msra.mxu1 %v382_v6  ;;  %v3404_v6 = vld [vmem:[%s4156_s1 + $0x98] sm:$0xff]  }
  0xa6   : > { %2970 = vmatprep.subr.bf16.mxu1 %v384_v7 }
  0xa7   : > { %v3644_v8 = vpop.permute.xlu0 %1149  ;;  %v3647_v9 = vpop.permute.xlu1 %1151 }
  0xa8   : > { %3064 = vmatprep.subr.bf16.mxu0 %v3644_v8 }
  0xa9   : > { %2971 = vmatpush3.bf16.msra.mxu1 %v384_v7  ;;  %3065 = vmatpush3.bf16.msra.mxu0 %v3644_v8  ;;  %v3407_v7 = vld [vmem:[%s4156_s1 + $0xa0] sm:$0xff]  }
  0xaa   : > { %3066 = vmatprep.subr.bf16.mxu0 %v3647_v9 }
  0xab   : > { %v386_v10 = vpop.permute.xlu0 %385  ;;  %v3651_v11 = vpop.permute.xlu1 %1153 }
  0xac   : > { %2972 = vmatprep.subr.bf16.mxu1 %v386_v10 }
  0xad   : > { %2973 = vmatpush3.bf16.msra.mxu1 %v386_v10  ;;  %3067 = vmatpush3.bf16.msra.mxu0 %v3647_v9 }
  0xae   : > { %3068 = vmatprep.subr.bf16.mxu0 %v3651_v11 }
  0xaf   : > { %v388_v12 = vpop.permute.xlu0 %387  ;;  %v3655_v13 = vpop.permute.xlu1 %1155 }
  0xb0   : > { %2974 = vmatprep.subr.bf16.mxu1 %v388_v12 }
  0xb1   : > { %2975 = vmatpush3.bf16.msra.mxu1 %v388_v12  ;;  %3069 = vmatpush3.bf16.msra.mxu0 %v3651_v11  ;;  %v3406_v12 = vld [vmem:[%s4156_s1 + $0x1b8] sm:$0xff]  }
  0xb2   : > { %3070 = vmatprep.subr.bf16.mxu0 %v3655_v13  ;;  %2992 = vmatprep.subr.bf16.mxu1 %v3596_v0 }
  0xb3   : > { %v1356_v16 = vpop.permute.xlu0 %1355  ;;  %v1358_v19 = vpop.permute.xlu1 %1357 }
  0xb4   : > { %2977 = vmatmul.mubr.msk.bf16.vlgmr.msra.gmra.mrb[0].mxu1 %vm393_vm0, %v3368_v14  ;;  %v3409_v14 = vld [vmem:[%s4156_s1 + $0x1c0] sm:$0xff]  }
  0xb5   : > { %3071 = vmatpush3.bf16.msra.mxu0 %v3655_v13  ;;  %2980 = vmatprep.mubr.msk.bf16.mxu1 %vm393_vm0, %v3371_v15  ;;  %v3408_v15 = vld [vmem:[%s4156_s1 + $0xa8] sm:$0xff]  }
  0xb6   : > { %3088 = vmatprep.subr.bf16.mxu0 %v1356_v16  ;;  %2993 = vmatpush3.bf16.msra.mxu1 %v3596_v0 }
  0xb7   : > { %v1360_v20 = vpop.permute.xlu0 %1359  ;;  %2994 = vmatprep.subr.bf16.mxu1 %v3598_v1  ;;  %v1362_v26 = vpop.permute.xlu1 %1361 }
  0xb8   : > { %3073 = vmatmul.mubr.msk.bf16.vlgmr.msra.gmra.mrb[0].mxu0 %vm393_vm0, %v3370_v17  ;;  %v3410_v17 = vld [vmem:[%s4156_s1 + $0x1c8] sm:$0xff]  }
  0xb9   : > { %3089 = vmatpush3.bf16.msra.mxu0 %v1356_v16  ;;  %3076 = vmatprep.mubr.msk.bf16.mxu0 %vm393_vm0, %v3373_v18  ;;  %v3411_v16 = vld [vmem:[%s4156_s1 + $0xb0] sm:$0xff]  }
  0xba   : > { %3090 = vmatprep.subr.bf16.mxu0 %v1358_v19  ;;  %2995 = vmatpush3.bf16.msra.mxu1 %v3598_v1  ;;  %v3403_v1 = vld [vmem:[%s4156_s1 + $0x90] sm:$0xff]  }
  0xbb   : > { %v1562_v23 = vpop.permute.xlu0 %1561  ;;  %2996 = vmatprep.subr.bf16.mxu1 %v3605_v3  ;;  %v1564_v33 = vpop.permute.xlu1 %1563  ;;  %v3413_v18 = vld [vmem:[%s4156_s1 + $0x1d0] sm:$0xff]  }
  0xbc   : > { %2981 = vmatmul.mubr.msk.bf16.gmra.mrb[4].mxu1 %vm393_vm0, %v3372_v21  ;;  %v3415_v21 = vld [vmem:[%s4156_s1 + $0xc0] sm:$0xff]  }
  0xbd   : > { %3091 = vmatpush3.bf16.msra.mxu0 %v1358_v19  ;;  %2984 = vmatprep.mubr.msk.bf16.mxu1 %vm393_vm0, %v3375_v22 }
  0xbe   : > { %3092 = vmatprep.subr.bf16.mxu0 %v1360_v20  ;;  %2997 = vmatpush3.bf16.msra.mxu1 %v3605_v3  ;;  %v3402_v3 = vld [vmem:[%s4156_s1 + $0x1a8] sm:$0xff]  }
  0xbf   : > { %2998 = vmatprep.subr.bf16.mxu1 %v3615_v5  ;;  %v1566_v27 = vpop.permute.xlu0 %1565  ;;  %v1568_v38 = vpop.permute.xlu1 %1567 }
  0xc0   : > { %3077 = vmatmul.mubr.msk.bf16.gmra.mrb[4].mxu0 %vm393_vm0, %v3374_v24  ;;  %v3417_v24 = vld [vmem:[%s4156_s1 + $0x1e0] sm:$0xff]  }
  0xc1   : > { %3093 = vmatpush3.bf16.msra.mxu0 %v1360_v20  ;;  %3096 = vmatprep.mubr.msk.bf16.mxu0 %vm393_vm0, %v3377_v25  ;;  %v3412_v20 = vld [vmem:[%s4156_s1 + $0xb8] sm:$0xff]  }
  0xc2   : > { %3094 = vmatprep.subr.bf16.mxu0 %v1362_v26  ;;  %2999 = vmatpush3.bf16.msra.mxu1 %v3615_v5  ;;  %v3405_v5 = vld [vmem:[%s4156_s1 + $0x1b0] sm:$0xff]  }
  0xc3   : > { %v738_v30 = vpop.permute.xlu0 %737  ;;  %v740_v42 = vpop.permute.xlu1 %739 }
  0xc4   : > { %2985 = vmatmul.mubr.msk.bf16.gmra.mrb[8].mxu1 %vm393_vm0, %v3376_v28  ;;  %3016 = vmatprep.subr.bf16.mxu1 %v738_v30  ;;  %v3418_v28 = vld [vmem:[%s4156_s1 + $0x1e8] sm:$0xff]  }
  0xc5   : > { %3095 = vmatpush3.bf16.msra.mxu0 %v1362_v26  ;;  %2988 = vmatprep.mubr.msk.bf16.mxu1 %vm393_vm0, %v3379_v29  ;;  %v3416_v26 = vld [vmem:[%s4156_s1 + $0xc8] sm:$0xff]   ;;  %v3421_v29 = vld [vmem:[%s4156_s1 + $0x1f0] sm:$0xff]  }
  0xc6   : > { %3112 = vmatprep.subr.bf16.mxu0 %v1562_v23 }
  0xc7   : > { %v742_v39 = vpop.permute.xlu0 %741  ;;  %v744_v51 = vpop.permute.xlu1 %743 }
  0xc8   : > { %3097 = vmatmul.mubr.msk.bf16.vlgmr.msra.gmra.mrb[0].mxu0 %vm393_vm0, %v3378_v31  ;;  %v3422_v31 = vld [vmem:[%s4156_s1 + $0x1f8] sm:$0xff]  }
  0xc9   : > { %3113 = vmatpush3.bf16.msra.mxu0 %v1562_v23  ;;  %3100 = vmatprep.mubr.msk.bf16.mxu0 %vm393_vm0, %v3381_v32  ;;  %v3414_v23 = vld [vmem:[%s4156_s1 + $0x1d8] sm:$0xff]   ;;  %v3424_v32 = vld [vmem:[%s4156_s1 + $0xe8] sm:$0xff]  }
  0xca   : > { %3114 = vmatprep.subr.bf16.mxu0 %v1564_v33 }
  0xcb   : > { %v1768_v43 = vpop.permute.xlu0 %1767  ;;  %v1770_v57 = vpop.permute.xlu1 %1769 }
  0xcc   : > { %2989 = vmatmul.mubr.msk.bf16.gmra.mrb[12].mxu1 %vm393_vm0, %v3380_v34  ;;  %v3429_v34 = vld [vmem:[%s4156_s1 + $0x210] sm:$0xff]  }
  0xcd   : > { %3115 = vmatpush3.bf16.msra.mxu0 %v1564_v33  ;;  %3000 = vmatprep.mubr.msk.bf16.mxu1 %vm393_vm0, %v3383_v35  ;;  %v3426_v33 = vld [vmem:[%s4156_s1 + $0x208] sm:$0xff]   ;;  %v3431_v35 = vld [vmem:[%s4156_s1 + $0x120] sm:$0xff]  }
  0xce   : > { %3116 = vmatprep.subr.bf16.mxu0 %v1566_v27 }
  0xcf   : > { %v1772_v48 = vpop.permute.xlu0 %1771  ;;  %v1774_v61 = vpop.permute.xlu1 %1773 }
  0xd0   : > { %3101 = vmatmul.mubr.msk.bf16.gmra.mrb[4].mxu0 %vm393_vm0, %v3382_v36  ;;  %v3430_v36 = vld [vmem:[%s4156_s1 + $0x218] sm:$0xff]  }
  0xd1   : > { %3104 = vmatprep.mubr.msk.bf16.mxu0 %vm393_vm0, %v3385_v37  ;;  %3117 = vmatpush3.bf16.msra.mxu0 %v1566_v27  ;;  %v3419_v27 = vld [vmem:[%s4156_s1 + $0xd0] sm:$0xff]   ;;  %v3433_v37 = vld [vmem:[%s4156_s1 + $0x220] sm:$0xff]  }
  0xd2   : > { %3118 = vmatprep.subr.bf16.mxu0 %v1568_v38 }
  0xd3   : > { %v944_v52 = vpop.permute.xlu0 %943  ;;  %v946_v2 = vpop.permute.xlu1 %945 }
  0xd4   : > { %3001 = vmatmul.mubr.msk.bf16.vlgmr.msra.gmra.mrb[0].mxu1 %vm393_vm0, %v3384_v40  ;;  %v3434_v40 = vld [vmem:[%s4156_s1 + $0x228] sm:$0xff]  }
  0xd5   : > { %3004 = vmatprep.mubr.msk.bf16.mxu1 %vm393_vm0, %v3387_v41  ;;  %3017 = vmatpush3.bf16.msra.mxu1 %v738_v30  ;;  %v3420_v30 = vld [vmem:[%s4156_s1 + $0xd8] sm:$0xff]   ;;  %v3437_v41 = vld [vmem:[%s4156_s1 + $0x230] sm:$0xff]  }
  0xd6   : > { %3018 = vmatprep.subr.bf16.mxu1 %v740_v42  ;;  %3119 = vmatpush3.bf16.msra.mxu0 %v1568_v38  ;;  %v3432_v38 = vld [vmem:[%s4156_s1 + $0x128] sm:$0xff]  }
  0xd7   : > { %3136 = vmatprep.subr.bf16.mxu0 %v1768_v43  ;;  %v948_v0 = vpop.permute.xlu0 %947  ;;  %v950_v10 = vpop.permute.xlu1 %949 }
  0xd8   : > { %3105 = vmatmul.mubr.msk.bf16.gmra.mrb[8].mxu0 %vm393_vm0, %v3386_v44 }
  0xd9   : > { %3108 = vmatprep.mubr.msk.bf16.mxu0 %vm393_vm0, %v3389_v45  ;;  %3019 = vmatpush3.bf16.msra.mxu1 %v740_v42  ;;  %v3436_v42 = vld [vmem:[%s4156_s1 + $0x138] sm:$0xff]  }
  0xda   : > { %3020 = vmatprep.subr.bf16.mxu1 %v742_v39 }
  0xdb   : > { %v1974_v4 = vpop.permute.xlu0 %1973  ;;  %v1976_v19 = vpop.permute.xlu1 %1975 }
  0xdc   : > { %3005 = vmatmul.mubr.msk.bf16.gmra.mrb[4].mxu1 %vm393_vm0, %v3388_v46 }
  0xdd   : > { %3008 = vmatprep.mubr.msk.bf16.mxu1 %vm393_vm0, %v3391_v47  ;;  %3021 = vmatpush3.bf16.msra.mxu1 %v742_v39  ;;  %v3435_v39 = vld [vmem:[%s4156_s1 + $0x130] sm:$0xff]  }
  0xde   : > { %3022 = vmatprep.subr.bf16.mxu1 %v744_v51 }
  0xdf   : > { %v1978_v22 = vpop.permute.xlu0 %1977  ;;  %v1980_v25 = vpop.permute.xlu1 %1979 }
  0xe0   : > { %3109 = vmatmul.mubr.msk.bf16.gmra.mrb[12].mxu0 %vm393_vm0, %v3390_v49 }
  0xe1   : > { %3120 = vmatprep.mubr.msk.bf16.mxu0 %vm393_vm0, %v3393_v50  ;;  %3023 = vmatpush3.bf16.msra.mxu1 %v744_v51 }
  0xe2   : > { %3040 = vmatprep.subr.bf16.mxu1 %v944_v52 }
  0xe4   : > { %3009 = vmatmul.mubr.msk.bf16.gmra.mrb[8].mxu1 %vm393_vm0, %v3392_v53 }
  0xe5   : > { %3012 = vmatprep.mubr.msk.bf16.mxu1 %vm393_vm0, %v3395_v54  ;;  %v2203_v54 = vld [vmem:[#allocation2] sm:$0x1] }
  0xe8   : > { %3121 = vmatmul.mubr.msk.bf16.vlgmr.msra.gmra.mrb[0].mxu0 %vm393_vm0, %v3394_v55  ;;  %v2204_v55 = vunpack.c.l.bf16 %v2203_v54 }
  0xe9   : > { %3137 = vmatpush3.bf16.msra.mxu0 %v1768_v43  ;;  %3124 = vmatprep.mubr.msk.bf16.mxu0 %vm393_vm0, %v3397_v56  ;;  %v3438_v43 = vld [vmem:[%s4156_s1 + $0x238] sm:$0xff]  }
  0xea   : > { %3138 = vmatprep.subr.bf16.mxu0 %v1770_v57 }
  0xec   : > { %3013 = vmatmul.mubr.msk.bf16.gmra.mrb[12].mxu1 %vm393_vm0, %v3396_v58 }
  0xed   : > { %3139 = vmatpush3.bf16.msra.mxu0 %v1770_v57  ;;  %3024 = vmatprep.mubr.msk.bf16.mxu1 %vm393_vm0, %v3399_v59 }
  0xee   : > { %3140 = vmatprep.subr.bf16.mxu0 %v1772_v48 }
  0xf0   : > { %3125 = vmatmul.mubr.msk.bf16.gmra.mrb[4].mxu0 %vm393_vm0, %v3398_v60 }
  0xf1   : > { %3128 = vmatprep.mubr.msk.bf16.mxu0 %vm393_vm0, %v3401_v62  ;;  %3141 = vmatpush3.bf16.msra.mxu0 %v1772_v48  ;;  %v2205_v48 = vlaneseq }
  0xf2   : > { %3142 = vmatprep.subr.bf16.mxu0 %v1774_v61 }
  0xf3   : > { %v2206_v53 = vshrl.u32 %v2205_v48, 7 }
  0xf4   : > { %3025 = vmatmul.mubr.msk.bf16.vlgmr.msra.gmra.mrb[0].mxu1 %vm393_vm0, %v3400_v63 }
  0xf5   : > { %3041 = vmatpush3.bf16.msra.mxu1 %v944_v52  ;;  %3028 = vmatprep.mubr.msk.bf16.mxu1 %vm393_vm0, %v3403_v1  ;;  %v2207_v56 = vsub.s32 0, %v2206_v53 }
  0xf6   : > { %3042 = vmatprep.subr.bf16.mxu1 %v946_v2  ;;  %3143 = vmatpush3.bf16.msra.mxu0 %v1774_v61 }
  0xf7   : > { %3160 = vmatprep.subr.bf16.mxu0 %v1974_v4  ;;  %v3957_v57 = vrot.slane %v2204_v55, %v2207_v56 }
  0xf8   : > { %3129 = vmatmul.mubr.msk.bf16.gmra.mrb[8].mxu0 %vm393_vm0, %v3402_v3 }
  0xf9   : > { %3043 = vmatpush3.bf16.msra.mxu1 %v946_v2  ;;  %3132 = vmatprep.mubr.msk.bf16.mxu0 %vm393_vm0, %v3405_v5 }
  0xfa   : > { %3044 = vmatprep.subr.bf16.mxu1 %v948_v0 }
  0xfc   : > { %3029 = vmatmul.mubr.msk.bf16.gmra.mrb[4].mxu1 %vm393_vm0, %v3404_v6 }
  0xfd   : > { %3045 = vmatpush3.bf16.msra.mxu1 %v948_v0  ;;  %3032 = vmatprep.mubr.msk.bf16.mxu1 %vm393_vm0, %v3407_v7 }
  0xfe   : > { %3046 = vmatprep.subr.bf16.mxu1 %v950_v10 }
 0x100   : > { %3133 = vmatmul.mubr.msk.bf16.gmra.mrb[12].mxu0 %vm393_vm0, %v3406_v12 }
 0x101   : > { %3047 = vmatpush3.bf16.msra.mxu1 %v950_v10  ;;  %3144 = vmatprep.mubr.msk.bf16.mxu0 %vm393_vm0, %v3409_v14 }
 0x102   : > { %3184 = vmatprep.subr.bf16.mxu1 %v3644_v8 }
 0x104   : > { %3033 = vmatmul.mubr.msk.bf16.gmra.mrb[8].mxu1 %vm393_vm0, %v3408_v15 }
 0x105   : > { %3036 = vmatprep.mubr.msk.bf16.mxu1 %vm393_vm0, %v3411_v16 }
 0x108   : > { %3145 = vmatmul.mubr.msk.bf16.vlgmr.msra.gmra.mrb[0].mxu0 %vm393_vm0, %v3410_v17 }
 0x109   : > { %3161 = vmatpush3.bf16.msra.mxu0 %v1974_v4  ;;  %3148 = vmatprep.mubr.msk.bf16.mxu0 %vm393_vm0, %v3413_v18 }
 0x10a   : > { %3162 = vmatprep.subr.bf16.mxu0 %v1976_v19 }
 0x10c   : > { %3037 = vmatmul.mubr.msk.bf16.gmra.mrb[12].mxu1 %vm393_vm0, %v3412_v20 }
 0x10d   : > { %3163 = vmatpush3.bf16.msra.mxu0 %v1976_v19  ;;  %3048 = vmatprep.mubr.msk.bf16.mxu1 %vm393_vm0, %v3415_v21 }
 0x10e   : > { %3164 = vmatprep.subr.bf16.mxu0 %v1978_v22 }
 0x110   : > { %3149 = vmatmul.mubr.msk.bf16.gmra.mrb[4].mxu0 %vm393_vm0, %v3414_v23 }
 0x111   : > { %3152 = vmatprep.mubr.msk.bf16.mxu0 %vm393_vm0, %v3417_v24  ;;  %3165 = vmatpush3.bf16.msra.mxu0 %v1978_v22 }
 0x112   : > { %3166 = vmatprep.subr.bf16.mxu0 %v1980_v25 }
 0x114   : > { %3049 = vmatmul.mubr.msk.bf16.vlgmr.msra.gmra.mrb[0].mxu1 %vm393_vm0, %v3416_v26 }
 0x115   : > { %3188 = vmatpush3.bf16.msra.mxu1 %v3644_v8  ;;  %3052 = vmatprep.mubr.msk.bf16.mxu1 %vm393_vm0, %v3419_v27  ;;  %v3423_v8 = vld [vmem:[%s4156_s1 + $0xe0] sm:$0xff]  }
 0x116   : > { %3185 = vmatprep.subr.bf16.mxu1 %v3647_v9  ;;  %3167 = vmatpush3.bf16.msra.mxu0 %v1980_v25 }
 0x118   : > { %3153 = vmatmul.mubr.msk.bf16.gmra.mrb[8].mxu0 %vm393_vm0, %v3418_v28 }
 0x119   : > { %3189 = vmatpush3.bf16.msra.mxu1 %v3647_v9  ;;  %3156 = vmatprep.mubr.msk.bf16.mxu0 %vm393_vm0, %v3421_v29  ;;  %v3425_v9 = vld [vmem:[%s4156_s1 + $0x200] sm:$0xff]  }
 0x11a   : > { %3186 = vmatprep.subr.bf16.mxu1 %v3651_v11 }
 0x11c   : > { %3053 = vmatmul.mubr.msk.bf16.gmra.mrb[4].mxu1 %vm393_vm0, %v3420_v30 }
 0x11d   : > { %3190 = vmatpush3.bf16.msra.mxu1 %v3651_v11  ;;  %3056 = vmatprep.mubr.msk.bf16.mxu1 %vm393_vm0, %v3423_v8  ;;  %v3427_v11 = vld [vmem:[%s4156_s1 + $0xf0] sm:$0xff]  }
 0x11e   : > { %3187 = vmatprep.subr.bf16.mxu1 %v3655_v13 }
 0x120   : > { %3157 = vmatmul.mubr.msk.bf16.gmra.mrb[12].mxu0 %vm393_vm0, %v3422_v31 }
 0x121   : > { %3191 = vmatpush3.bf16.msra.mxu1 %v3655_v13  ;;  %3168 = vmatprep.mubr.msk.bf16.mxu0 %vm393_vm0, %v3425_v9  ;;  %v3428_v13 = vld [vmem:[%s4156_s1 + $0xf8] sm:$0xff]  }
 0x124   : > { %3057 = vmatmul.mubr.msk.bf16.gmra.mrb[8].mxu1 %vm393_vm0, %v3424_v32 }
 0x125   : > { %3060 = vmatprep.mubr.msk.bf16.mxu1 %vm393_vm0, %v3427_v11 }
 0x128   : > { %3169 = vmatmul.mubr.msk.bf16.vlgmr.msra.gmra.mrb[0].mxu0 %vm393_vm0, %v3426_v33 }
 0x129   : > { %3172 = vmatprep.mubr.msk.bf16.mxu0 %vm393_vm0, %v3429_v34 }
 0x12c   : > { %3061 = vmatmul.mubr.msk.bf16.gmra.mrb[12].mxu1 %vm393_vm0, %v3428_v13 }
 0x12d   : > { %3080 = vmatprep.mubr.msk.bf16.mxu1 %vm393_vm0, %v3431_v35 }
 0x130   : > { %3173 = vmatmul.mubr.msk.bf16.gmra.mrb[4].mxu0 %vm393_vm0, %v3430_v36 }
 0x131   : > { %3176 = vmatprep.mubr.msk.bf16.mxu0 %vm393_vm0, %v3433_v37 }
 0x134   : > { %3081 = vmatmul.mubr.msk.bf16.vlgmr.msra.gmra.mrb[8].mxu1 %vm393_vm0, %v3432_v38 }
 0x135   : > { %3084 = vmatprep.mubr.msk.bf16.mxu1 %vm393_vm0, %v3435_v39 }
 0x138   : > { %3177 = vmatmul.mubr.msk.bf16.gmra.mrb[8].mxu0 %vm393_vm0, %v3434_v40 }
 0x139   : > { %3180 = vmatprep.mubr.msk.bf16.mxu0 %vm393_vm0, %v3437_v41 }
 0x13c   : > { %3085 = vmatmul.mubr.msk.bf16.gmra.mrb[12].mxu1 %vm393_vm0, %v3436_v42 }
 0x140   : > { %3181 = vmatmul.mubr.msk.bf16.gmra.mrb[12].mxu0 %vm393_vm0, %v3438_v43 }
 0x1e7   : > { %v3050_v44 = vpop.f32.mrb[0].mxu1 }
 0x1e8   : > { %v1013_v45 = vpop.f32.mrb[1].mxu1 }
 0x1e9   : > { %v3051_v46 = vpop.f32.mrb[2].mxu1 }
 0x1ea   : > { %v1016_v47 = vpop.f32.mrb[3].mxu1 }
 0x1ef   : > { %v3054_v49 = vpop.f32.mrb[4].mxu1 }
 0x1f0   : > { %v1029_v50 = vpop.f32.mrb[5].mxu1 }
 0x1f1   : > { %v3055_v51 = vpop.f32.mrb[6].mxu1 }
 0x1f2   : > { %v1032_v52 = vpop.f32.mrb[7].mxu1 }
 0x1fb   : > { %v3170_v58 = vpop.f32.mrb[0].mxu0 }
 0x1fc   : > { %v3192_v59 = vadd.f32 %v3170_v58, %v3050_v44  ;;  %v2043_v60 = vpop.f32.mrb[1].mxu0 }
 0x1fd   : > { %v3193_v61 = vadd.f32 %v2043_v60, %v1013_v45  ;;  %v3171_v62 = vpop.f32.mrb[2].mxu0 }
 0x1fe   : > { %v2846_v63 = vpack.c.bf16 %v3192_v59, %v3192_v59  ;;  %v3194_v0 = vadd.f32 %v3171_v62, %v3051_v46  ;;  %v2046_v1 = vpop.f32.mrb[3].mxu0  ;;  %v2211_v2 = vmul.f32 %v3192_v59, %v3957_v57 }
 0x1ff   : > { %v2844_v3 = vpack.c.bf16 %v3193_v61, %v3193_v61  ;;  %v3195_v4 = vadd.f32 %v2046_v1, %v1016_v47  ;;  %v2209_v10 = vmul.f32 %v3193_v61, %v3957_v57 }
 0x200   : > { %2189 = vst.msk [vmem:[%s3962_s18 + $0x8] sm:$0xf] %vm2186_vm1, %v2846_v63  ;;  %v2847_v5 = vpack.c.bf16 %v3194_v0, %v3194_v0  ;;  %v2232_v6 = vsel %vm2225_vm2, %v2211_v2, 0.0  ;;  %v2276_v7 = vmul.f32 %v3192_v59, %v2211_v2  ;;  %v2212_v20 = vmul.f32 %v3194_v0, %v3957_v57 }
 0x201   : > { %2187 = vst.msk [vmem:[%s3962_s18] sm:$0xf] %vm2186_vm1, %v2844_v3  ;;  %v2845_v12 = vpack.c.bf16 %v3195_v4, %v3195_v4  ;;  %2233 = vadd.xlane.f32.xlu0 %v2232_v6  ;;  %v2210_v15 = vmul.f32 %v3195_v4, %v3957_v57  ;;  %v2226_v19 = vsel %vm2225_vm2, %v2209_v10, 0.0  ;;  %v2274_v27 = vmul.f32 %v3193_v61, %v2209_v10 }
 0x202   : > { %2190 = vst.msk [vmem:[%s3962_s18 + $0xc] sm:$0xf] %vm2186_vm1, %v2847_v5  ;;  %v2296_v14 = vsel %vm2225_vm2, %v2276_v7, 0.0  ;;  %v2235_v9 = vsel %vm2225_vm2, %v2212_v20, 0.0  ;;  %v2277_v32 = vmul.f32 %v3194_v0, %v2212_v20 }
 0x203   : > { %2188 = vst.msk [vmem:[%s3962_s18 + $0x4] sm:$0xf] %vm2186_vm1, %v2845_v12  ;;  %2297 = vadd.xlane.f32.xlu1 %v2296_v14  ;;  %v3174_v16 = vpop.f32.mrb[4].mxu0  ;;  %v2229_v26 = vsel %vm2225_vm2, %v2210_v15, 0.0  ;;  %v2290_v13 = vsel %vm2225_vm2, %v2274_v27, 0.0  ;;  %v2275_v40 = vmul.f32 %v3195_v4, %v2210_v15 }
 0x204   : > { %v3196_v17 = vadd.f32 %v3174_v16, %v3054_v49  ;;  %v2059_v18 = vpop.f32.mrb[5].mxu0  ;;  %v2299_v39 = vsel %vm2225_vm2, %v2277_v32, 0.0 }
 0x205   : > { %v3979_v21 = vadd.f32 %v2059_v18, %v1029_v50  ;;  %2227 = vadd.xlane.f32.xlu0 %v2226_v19  ;;  %v3175_v22 = vpop.f32.mrb[6].mxu0  ;;  %v2293_v53 = vsel %vm2225_vm2, %v2275_v40, 0.0 }
 0x206   : > { %v2850_v23 = vpack.c.bf16 %v3196_v17, %v3196_v17  ;;  %v3981_v24 = vadd.f32 %v3175_v22, %v3055_v51  ;;  %v2062_v25 = vpop.f32.mrb[7].mxu0  ;;  %v2215_v35 = vmul.f32 %v3196_v17, %v3957_v57 }
 0x207   : > { %v2848_v28 = vpack.c.bf16 %v3979_v21, %v3979_v21  ;;  %v3986_v29 = vadd.f32 %v2062_v25, %v1032_v52  ;;  %v3082_v30 = vpop.f32.mrb[8].mxu1  ;;  %2230 = vadd.xlane.f32.xlu1 %v2229_v26  ;;  %v2213_v47 = vmul.f32 %v3979_v21, %v3957_v57 }
 0x208   : > { %2193 = vst.msk [vmem:[%s3962_s18 + $0x18] sm:$0xf] %vm2186_vm1, %v2850_v23  ;;  %v2851_v8 = vpack.c.bf16 %v3981_v24, %v3981_v24  ;;  %v1251_v31 = vpop.f32.mrb[9].mxu1  ;;  %v2244_v46 = vsel %vm2225_vm2, %v2215_v35, 0.0  ;;  %v2216_v54 = vmul.f32 %v3981_v24, %v3957_v57  ;;  %v2280_v60 = vmul.f32 %v3196_v17, %v2215_v35 }
 0x209   : > { %2191 = vst.msk [vmem:[%s3962_s18 + $0x10] sm:$0xf] %vm2186_vm1, %v2848_v28  ;;  %v2849_v11 = vpack.c.bf16 %v3986_v29, %v3986_v29  ;;  %v3083_v33 = vpop.f32.mrb[10].mxu1  ;;  %2236 = vadd.xlane.f32.xlu0 %v2235_v9  ;;  %v2238_v59 = vsel %vm2225_vm2, %v2213_v47, 0.0  ;;  %v2214_v1 = vmul.f32 %v3986_v29, %v3957_v57  ;;  %v2278_v10 = vmul.f32 %v3979_v21, %v2213_v47 }
 0x20a   : > { %2194 = vst.msk [vmem:[%s3962_s18 + $0x1c] sm:$0xf] %vm2186_vm1, %v2851_v8  ;;  %v1254_v34 = vpop.f32.mrb[11].mxu1  ;;  %v2247_v0 = vsel %vm2225_vm2, %v2216_v54, 0.0  ;;  %v2308_v7 = vsel %vm2225_vm2, %v2280_v60, 0.0  ;;  %v2281_v17 = vmul.f32 %v3981_v24, %v2216_v54 }
 0x20b   : > { %2192 = vst.msk [vmem:[%s3962_s18 + $0x14] sm:$0xf] %vm2186_vm1, %v2849_v11  ;;  %2291 = vadd.xlane.f32.xlu1 %v2290_v13  ;;  %v3178_v36 = vpop.f32.mrb[8].mxu0  ;;  %v2241_v16 = vsel %vm2225_vm2, %v2214_v1, 0.0  ;;  %v2302_v20 = vsel %vm2225_vm2, %v2278_v10, 0.0  ;;  %v2279_v24 = vmul.f32 %v3986_v29, %v2214_v1 }
 0x20c   : > { %v4003_v37 = vadd.f32 %v3178_v36, %v3082_v30  ;;  %v2075_v38 = vpop.f32.mrb[9].mxu0  ;;  %v2311_v23 = vsel %vm2225_vm2, %v2281_v17, 0.0 }
 0x20d   : > { %v4006_v41 = vadd.f32 %v2075_v38, %v1251_v31  ;;  %2300 = vadd.xlane.f32.xlu0 %v2299_v39  ;;  %v3179_v42 = vpop.f32.mrb[10].mxu0  ;;  %v2305_v28 = vsel %vm2225_vm2, %v2279_v24, 0.0 }
 0x20e   : > { %v2854_v43 = vpack.c.bf16 %v4003_v37, %v4003_v37  ;;  %v4010_v44 = vadd.f32 %v3179_v42, %v3083_v33  ;;  %v2078_v45 = vpop.f32.mrb[11].mxu0  ;;  %v2219_v21 = vmul.f32 %v4003_v37, %v3957_v57 }
 0x20f   : > { %v2852_v48 = vpack.c.bf16 %v4006_v41, %v4006_v41  ;;  %v4017_v49 = vadd.f32 %v2078_v45, %v1254_v34  ;;  %v3086_v50 = vpop.f32.mrb[12].mxu1  ;;  %2245 = vadd.xlane.f32.xlu1 %v2244_v46  ;;  %v2217_v27 = vmul.f32 %v4006_v41, %v3957_v57 }
 0x210   : > { %2197 = vst.msk [vmem:[%s3962_s18 + $0x28] sm:$0xf] %vm2186_vm1, %v2854_v43  ;;  %v2855_v51 = vpack.c.bf16 %v4010_v44, %v4010_v44  ;;  %v1267_v52 = vpop.f32.mrb[13].mxu1  ;;  %v2256_v26 = vsel %vm2225_vm2, %v2219_v21, 0.0  ;;  %v2220_v30 = vmul.f32 %v4010_v44, %v3957_v57  ;;  %v2284_v31 = vmul.f32 %v4003_v37, %v2219_v21 }
 0x211   : > { %2195 = vst.msk [vmem:[%s3962_s18 + $0x20] sm:$0xf] %vm2186_vm1, %v2852_v48  ;;  %v2853_v55 = vpack.c.bf16 %v4017_v49, %v4017_v49  ;;  %v3087_v56 = vpop.f32.mrb[14].mxu1  ;;  %2294 = vadd.xlane.f32.xlu0 %v2293_v53  ;;  %v2250_v8 = vsel %vm2225_vm2, %v2217_v27, 0.0  ;;  %v2218_v9 = vmul.f32 %v4017_v49, %v3957_v57  ;;  %v2282_v11 = vmul.f32 %v4006_v41, %v2217_v27 }
 0x212   : > { %2198 = vst.msk [vmem:[%s3962_s18 + $0x2c] sm:$0xf] %vm2186_vm1, %v2855_v51  ;;  %v1270_v58 = vpop.f32.mrb[15].mxu1  ;;  %v2259_v29 = vsel %vm2225_vm2, %v2220_v30, 0.0  ;;  %v2320_v32 = vsel %vm2225_vm2, %v2284_v31, 0.0  ;;  %v2285_v34 = vmul.f32 %v4010_v44, %v2220_v30 }
 0x213   : > { %2196 = vst.msk [vmem:[%s3962_s18 + $0x24] sm:$0xf] %vm2186_vm1, %v2853_v55  ;;  %2239 = vadd.xlane.f32.xlu1 %v2238_v59  ;;  %v3182_v61 = vpop.f32.mrb[12].mxu0  ;;  %v2253_v33 = vsel %vm2225_vm2, %v2218_v9, 0.0  ;;  %v2314_v13 = vsel %vm2225_vm2, %v2282_v11, 0.0  ;;  %v2283_v37 = vmul.f32 %v4017_v49, %v2218_v9 }
 0x214   : > { %v4035_v62 = vadd.f32 %v3182_v61, %v3086_v50  ;;  %v2091_v63 = vpop.f32.mrb[13].mxu0  ;;  %v2323_v36 = vsel %vm2225_vm2, %v2285_v34, 0.0 }
 0x215   : > { %v3205_v2 = vadd.f32 %v2091_v63, %v1267_v52  ;;  %2248 = vadd.xlane.f32.xlu0 %v2247_v0  ;;  %v3183_v3 = vpop.f32.mrb[14].mxu0  ;;  %v2317_v40 = vsel %vm2225_vm2, %v2283_v37, 0.0 }
 0x216   : > { %v2858_v4 = vpack.c.bf16 %v4035_v62, %v4035_v62  ;;  %v3206_v5 = vadd.f32 %v3183_v3, %v3087_v56  ;;  %v2094_v6 = vpop.f32.mrb[15].mxu0  ;;  %v2223_v35 = vmul.f32 %v4035_v62, %v3957_v57 }
 0x217   : > { %v2856_v12 = vpack.c.bf16 %v3205_v2, %v3205_v2  ;;  %v3207_v14 = vadd.f32 %v2094_v6, %v1270_v58  ;;  %2309 = vadd.xlane.f32.xlu1 %v2308_v7  ;;  %v2221_v39 = vmul.f32 %v3205_v2, %v3957_v57 }
 0x218   : > { %2201 = vst.msk [vmem:[%s3962_s18 + $0x38] sm:$0xf] %vm2186_vm1, %v2858_v4  ;;  %v2859_v15 = vpack.c.bf16 %v3206_v5, %v3206_v5  ;;  %v2224_v18 = vmul.f32 %v3206_v5, %v3957_v57  ;;  %v2268_v38 = vsel %vm2225_vm2, %v2223_v35, 0.0  ;;  %v2288_v46 = vmul.f32 %v4035_v62, %v2223_v35 }
 0x219   : > { %2199 = vst.msk [vmem:[%s3962_s18 + $0x30] sm:$0xf] %vm2186_vm1, %v2856_v12  ;;  %v2857_v19 = vpack.c.bf16 %v3207_v14, %v3207_v14  ;;  %2242 = vadd.xlane.f32.xlu0 %v2241_v16  ;;  %v2262_v41 = vsel %vm2225_vm2, %v2221_v39, 0.0  ;;  %v2286_v42 = vmul.f32 %v3205_v2, %v2221_v39  ;;  %v2222_v44 = vmul.f32 %v3207_v14, %v3957_v57 }
 0x21a   : > { %2202 = vst.msk [vmem:[%s3962_s18 + $0x3c] sm:$0xf] %vm2186_vm1, %v2859_v15  ;;  %v2289_v22 = vmul.f32 %v3206_v5, %v2224_v18  ;;  %v2271_v43 = vsel %vm2225_vm2, %v2224_v18, 0.0  ;;  %v2332_v49 = vsel %vm2225_vm2, %v2288_v46, 0.0 }
 0x21b   : > { %2200 = vst.msk [vmem:[%s3962_s18 + $0x34] sm:$0xf] %vm2186_vm1, %v2857_v19  ;;  %2303 = vadd.xlane.f32.xlu1 %v2302_v20  ;;  %v2326_v45 = vsel %vm2225_vm2, %v2286_v42, 0.0  ;;  %v2265_v47 = vsel %vm2225_vm2, %v2222_v44, 0.0  ;;  %v2287_v48 = vmul.f32 %v3207_v14, %v2222_v44 }
 0x21c   : > { %v2335_v25 = vsel %vm2225_vm2, %v2289_v22, 0.0 }
 0x21d   : > { %2312 = vadd.xlane.f32.xlu0 %v2311_v23  ;;  %v2329_v50 = vsel %vm2225_vm2, %v2287_v48, 0.0 }
 0x21f   : > { %2257 = vadd.xlane.f32.xlu1 %v2256_v26 }
 0x221   : > { %2306 = vadd.xlane.f32.xlu0 %v2305_v28 }
 0x223   : > { %2251 = vadd.xlane.f32.xlu1 %v2250_v8 }
 0x225   : > { %2260 = vadd.xlane.f32.xlu0 %v2259_v29 }
 0x227   : > { %2321 = vadd.xlane.f32.xlu1 %v2320_v32 }
 0x229   : > { %2254 = vadd.xlane.f32.xlu0 %v2253_v33 }
 0x22b   : > { %2315 = vadd.xlane.f32.xlu1 %v2314_v13 }
 0x22d   : > { %2324 = vadd.xlane.f32.xlu0 %v2323_v36 }
 0x22f   : > { %2269 = vadd.xlane.f32.xlu1 %v2268_v38 }
 0x231   : > { %2318 = vadd.xlane.f32.xlu0 %v2317_v40 }
 0x233   : > { %2263 = vadd.xlane.f32.xlu1 %v2262_v41 }
 0x235   : > { %2272 = vadd.xlane.f32.xlu0 %v2271_v43 }
 0x237   : > { %2327 = vadd.xlane.f32.xlu1 %v2326_v45 }
 0x239   : > { %2266 = vadd.xlane.f32.xlu0 %v2265_v47 }
 0x23b   : > { %2333 = vadd.xlane.f32.xlu1 %v2332_v49 }
 0x23d   : > { %2330 = vadd.xlane.f32.xlu0 %v2329_v50 }
 0x241   : > { %2336 = vadd.xlane.f32.xlu0 %v2335_v25 }
 0x28e   : > { %v2234_v51 = vpop.xlane.xlu0 %2233 }
 0x290   : > { %v2298_v57 = vpop.xlane.xlu1 %2297 }
 0x291   : > { %v2341_v52 = vsel %vm2338_vm3, %v2234_v51, %v2298_v57 }
 0x292   : > { %2358 = vst.msk [vmem:[%s4096_s23 + $0x10] sm:$0xff] %vm2355_vm4, %v2341_v52  ;;  %v2228_v53 = vpop.xlane.xlu0 %2227 }
 0x294   : > { %v2231_v54 = vpop.xlane.xlu1 %2230 }
 0x296   : > { %v2237_v55 = vpop.xlane.xlu0 %2236 }
 0x298   : > { %v2292_v56 = vpop.xlane.xlu1 %2291 }
 0x299   : > { %v2339_v58 = vsel %vm2338_vm3, %v2228_v53, %v2292_v56 }
 0x29a   : > { %2356 = vst.msk [vmem:[%s4096_s23] sm:$0xff] %vm2355_vm4, %v2339_v58  ;;  %v2301_v59 = vpop.xlane.xlu0 %2300 }
 0x29b   : > { %v2342_v60 = vsel %vm2338_vm3, %v2237_v55, %v2301_v59 }
 0x29c   : > { %2359 = vst.msk [vmem:[%s4096_s23 + $0x18] sm:$0xff] %vm2355_vm4, %v2342_v60  ;;  %v2246_v61 = vpop.xlane.xlu1 %2245 }
 0x29e   : > { %v2295_v62 = vpop.xlane.xlu0 %2294 }
 0x29f   : > { %v2340_v63 = vsel %vm2338_vm3, %v2231_v54, %v2295_v62 }
 0x2a0   : > { %2357 = vst.msk [vmem:[%s4096_s23 + $0x8] sm:$0xff] %vm2355_vm4, %v2340_v63  ;;  %v2240_v0 = vpop.xlane.xlu1 %2239 }
 0x2a2   : > { %v2249_v1 = vpop.xlane.xlu0 %2248 }
 0x2a4   : > { %v2310_v2 = vpop.xlane.xlu1 %2309 }
 0x2a5   : > { %v2345_v3 = vsel %vm2338_vm3, %v2246_v61, %v2310_v2 }
 0x2a6   : > { %2362 = vst.msk [vmem:[%s4096_s23 + $0x30] sm:$0xff] %vm2355_vm4, %v2345_v3  ;;  %v2243_v4 = vpop.xlane.xlu0 %2242 }
 0x2a8   : > { %v2304_v5 = vpop.xlane.xlu1 %2303 }
 0x2a9   : > { %v2343_v6 = vsel %vm2338_vm3, %v2240_v0, %v2304_v5 }
 0x2aa   : > { %2360 = vst.msk [vmem:[%s4096_s23 + $0x20] sm:$0xff] %vm2355_vm4, %v2343_v6  ;;  %v2313_v7 = vpop.xlane.xlu0 %2312 }
 0x2ab   : > { %v2346_v10 = vsel %vm2338_vm3, %v2249_v1, %v2313_v7 }
 0x2ac   : > { %2363 = vst.msk [vmem:[%s4096_s23 + $0x38] sm:$0xff] %vm2355_vm4, %v2346_v10  ;;  %v2258_v12 = vpop.xlane.xlu1 %2257 }
 0x2ae   : > { %v2307_v14 = vpop.xlane.xlu0 %2306 }
 0x2af   : > { %v2344_v15 = vsel %vm2338_vm3, %v2243_v4, %v2307_v14 }
 0x2b0   : > { %2361 = vst.msk [vmem:[%s4096_s23 + $0x28] sm:$0xff] %vm2355_vm4, %v2344_v15  ;;  %v2252_v16 = vpop.xlane.xlu1 %2251 }
 0x2b2   : > { %v2261_v17 = vpop.xlane.xlu0 %2260 }
 0x2b4   : > { %v2322_v18 = vpop.xlane.xlu1 %2321 }
 0x2b5   : > { %v2349_v19 = vsel %vm2338_vm3, %v2258_v12, %v2322_v18 }
 0x2b6   : > { %2366 = vst.msk [vmem:[%s4096_s23 + $0x50] sm:$0xff] %vm2355_vm4, %v2349_v19  ;;  %v2255_v20 = vpop.xlane.xlu0 %2254 }
 0x2b8   : > { %v2316_v21 = vpop.xlane.xlu1 %2315 }
 0x2b9   : > { %v2347_v22 = vsel %vm2338_vm3, %v2252_v16, %v2316_v21 }
 0x2ba   : > { %2364 = vst.msk [vmem:[%s4096_s23 + $0x40] sm:$0xff] %vm2355_vm4, %v2347_v22  ;;  %v2325_v23 = vpop.xlane.xlu0 %2324 }
 0x2bb   : > { %v2350_v24 = vsel %vm2338_vm3, %v2261_v17, %v2325_v23 }
 0x2bc   : > { %2367 = vst.msk [vmem:[%s4096_s23 + $0x58] sm:$0xff] %vm2355_vm4, %v2350_v24  ;;  %v2270_v25 = vpop.xlane.xlu1 %2269 }
 0x2be   : > { %v2319_v26 = vpop.xlane.xlu0 %2318 }
 0x2bf   : > { %v2348_v27 = vsel %vm2338_vm3, %v2255_v20, %v2319_v26 }
 0x2c0   : > { %2365 = vst.msk [vmem:[%s4096_s23 + $0x48] sm:$0xff] %vm2355_vm4, %v2348_v27  ;;  %v2264_v28 = vpop.xlane.xlu1 %2263 }
 0x2c2   : > { %v2273_v30 = vpop.xlane.xlu0 %2272 }
 0x2c4   : > { %v2328_v8 = vpop.xlane.xlu1 %2327 }
 0x2c5   : > { %v2351_v31 = vsel %vm2338_vm3, %v2264_v28, %v2328_v8 }
 0x2c6   : > { %2368 = vst.msk [vmem:[%s4096_s23 + $0x60] sm:$0xff] %vm2355_vm4, %v2351_v31  ;;  %v2267_v29 = vpop.xlane.xlu0 %2266 }
 0x2c8   : > { %v2334_v9 = vpop.xlane.xlu1 %2333 }
 0x2c9   : > { %v2353_v32 = vsel %vm2338_vm3, %v2270_v25, %v2334_v9 }
 0x2ca   : > { %2370 = vst.msk [vmem:[%s4096_s23 + $0x70] sm:$0xff] %vm2355_vm4, %v2353_v32  ;;  %v2331_v11 = vpop.xlane.xlu0 %2330 }
 0x2cb   : > { %v2352_v33 = vsel %vm2338_vm3, %v2267_v29, %v2331_v11 }
 0x2cc   : > { %2369 = vst.msk [vmem:[%s4096_s23 + $0x68] sm:$0xff] %vm2355_vm4, %v2352_v33 }
 0x2ce   : > { %v2337_v34 = vpop.xlane.xlu0 %2336 }
 0x2cf   : > { %v2354_v13 = vsel %vm2338_vm3, %v2273_v30, %v2337_v34 }
 0x2d0   : > { %2371 = vst.msk [vmem:[%s4096_s23 + $0x78] sm:$0xff] %vm2355_vm4, %v2354_v13 }
 0x2d1 PF: > { %s16_s17 = sadd.s32 1, %s3493_s17   ;;  %s4168_s15 = smov %s3489_s16 }
 0x2d2   : > { %p13_p3 = scmp.ge.s32.totalorder %s16_s17, 4   ;;  %s4169_s16 = smov %s4171_s19 }
 0x2d4   :  { %15 = sbr.rel (!%p13_p3) target bundleno = 2 (0x2), region = 90 }
 0x2db   :  { %2426 = vsyncpa [#allocation3], 1 }
 0x2dc   :  { %2428 = vsyncpa [#allocation3 + $0x1], 1 }

// kernel: generator_forward.8
= control target key start
LH: loop header
LB: loop body
LE: loop exit
PB: predicated region body
PF: predicated region fallthrough
CT: control target
= control target key end

     0   :  { %10 = vsyncpa [#allocation3], 0  ;;  %s2219_s15 = smov 0   ;;  %s2221_s16 = smov 0   ;;  %s2529_s0 = inlined_call_operand.vmem [shape: bf16[2,32,110], index: 0, kind: input, shape index: {}]   ;;  %s2530_s1 = inlined_call_operand.vmem [shape: bf16[9,64,32], index: 1, kind: input, shape index: {}]   ;;  %s2531_s2 = inlined_call_operand.hbm [shape: bf16[1,80], index: 2, kind: input, shape index: {}]   ;;  %s2532_s3 = inlined_call_operand.vmem [shape: bf16[2,64,80], index: 3, kind: output, shape index: {0}]   ;;  %s2533_s4 = inlined_call_operand.vmem [shape: f32[2,1,64,2], index: 4, kind: output, shape index: {1}]  }
   0x1   :  { %s2223_s17 = smov 0  }
   0x2 LB: > { %s1645_s18 = sadd.s32 4294967295, %s2183_s17   ;;  %s28_s19 = sadd.s32 1, %s2179_s16  ;;  %s2183_s17 = sphi %s2223_s17, %s16_s17   ;;  %s2179_s16 = sphi %s2221_s16, %s2543_s16   ;;  %s2175_s15 = sphi %s2219_s15, %s2542_s15  }
   0x3   : > { %p30_p0 = scmp.ge.s32.totalorder %s28_s19, 2  ;;  %p1647_p1 = scmp.ge.s32.totalorder %s2183_s17, 1 }
   0x4   : > { %p162_p2 = scmp.lt.s32.totalorder %s2183_s17, 3  ;;  %p2244_p4 = scmp.eq.s32.totalorder %s1645_s18, 0 }
   0x5   : > { %s2545_s19 = smov (%p30_p0, %s28_s19), 0  ;;  %s2185_s22 = smov [#allocation2]  }
   0x6   : > { %p2240_p3 = pnand %p1647_p1, %p162_p2  ;;  %s184_s23 = sshll.u32 %s2185_s22, 4  ;;  %s185_s23 = int_to_ptr.vmem [resolvable:$true] %s184_s23 }
   0x7   : > { %s2538_s21 = scalar_select %p2244_p4, 1, 0 }
   0x8   : > { %s2537_s20 = scalar_select %p2240_p3, 1, 0 }
   0x9   : > { %p2052_p5 = pneg %p2240_p3  ;;  %s2129_s27 = scalar_lea.hbm %s2531_s2, 16 }
   0xa   : > { %p2130_p7 = scmp.ne.s32.totalorder %s2531_s2, %s2129_s27  ;;  %p2136_p11 = scmp.lt.u32.totalorder %s2129_s27, %s2531_s2 }
   0xb   : > { %p2252_p6 = pnand %p2244_p4, %p2052_p5 }
   0xd   : > { %p2131_p8 = pneg %p2252_p6 }
   0xf   : > { %p2132_p9 = pnand %p2131_p8, %p2130_p7 }
  0x11   : > { %p2133_p10 = pneg %p2132_p9 }
  0x13   : > { %p2138_p12 = pnand %p2136_p11, %p2133_p10 }
  0x15   : > { %2141 = shalt.err (!%p2138_p12)
}
  0x16   : > { %s2142_s6 = scalar_lea.vmem %s185_s23, 16  ;;  %s2149_s7 = scalar_lea.vmem %s185_s23, 32 }
  0x17   : > { %p2143_p13 = scmp.ne.s32.totalorder %s185_s23, %s2142_s6  ;;  %p2150_p2 = scmp.lt.s32.totalorder %s185_s23, %s185_s23 }
  0x18   : > { %p2151_p5 = scmp.lt.s32.totalorder %s2149_s7, %s2142_s6 }
  0x19   : > { %p2145_p0 = pnand %p2143_p13, %p2131_p8 }
  0x1a   : > { %p2152_p4 = por %p2151_p5, %p2150_p2 }
  0x1b   : > { %p2146_p1 = pneg %p2145_p0 }
  0x1d   : > { %p2153_p3 = pnand %p2152_p4, %p2146_p1 }
  0x1f   : > { %2156 = shalt.err (!%p2153_p3)
}
  0x20   : > { %2055 = dma.hbm_to_vmem [thread:$0]  (!%p2252_p6), %s2531_s2, 16, %s185_s23, [#allocation3]  }
  0x21   : > { %p2540_p7 = scmp.ne.s32.totalorder %s2537_s20, 0 }
  0x22   : > { %p2541_p9 = scmp.ne.s32.totalorder (!%p2540_p7), %s2538_s21, 0 }
  0x23   : > { %205 = sbr.rel (%p2540_p7) target bundleno = 629 (0x275), region = 32 }
  0x2a   : > { %2170 = dma.done.wait (%p2541_p9), [#allocation3], 16  }
  0x2b   : > { %2172 = vsyncadd (%p2541_p9), [#allocation3], 4294967280  ;;  %p249_p8 = scmp.lt.s32.totalorder %s2175_s15, 1  ;;  %vm337_vm0 = vcmask 261120   ;;  %s2186_s14 = smov 127   ;;  %v2093_v2 = vld [vmem:[%s2530_s1 + $0x20] sm:$0xff]   ;;  %v1397_v58 = vlaneseq }
  0x2c   : > { %1876 = vmatprep.mubr.msk.bf16.mxu1 %vm337_vm0, %v2093_v2  ;;  %v2095_v3 = vld [vmem:[%s2530_s1 + $0x80] sm:$0xff]   ;;  %s2187_s23 = smov 117   ;;  %s2188_s24 = smov 116   ;;  %v2094_v8 = vld [vmem:[%s2530_s1 + $0x28] sm:$0xff]   ;;  %v2097_v9 = vld [vmem:[%s2530_s1 + $0x30] sm:$0xff]   ;;  %vm1386_vm1 = vcmask 650240  }
  0x2d   : > { %s2547_s15 = smov (!%p249_p8, %s2175_s15), 1  ;;  %1924 = vmatprep.mubr.msk.bf16.mxu0 %vm337_vm0, %v2095_v3  ;;  %s2189_s25 = smov 108   ;;  %v2096_v11 = vld [vmem:[%s2530_s1 + $0x88] sm:$0xff]   ;;  %v2100_v13 = vld [vmem:[%s2530_s1 + $0xa0] sm:$0xff]   ;;  %v2098_v14 = vld [vmem:[%s2530_s1 + $0x38] sm:$0xff]   ;;  %v1398_v59 = vshrl.u32 %v1397_v58, 7 }
  0x2e   : > { %s1807_s10 = sshll.u32 %s2547_s15, 4  ;;  %s2190_s26 = smov 126   ;;  %v2099_v16 = vld [vmem:[%s2530_s1] sm:$0xff]   ;;  %v2101_v18 = vld [vmem:[%s2530_s1 + $0x8] sm:$0xff]   ;;  %v2103_v20 = vld [vmem:[%s2530_s1 + $0x10] sm:$0xff]   ;;  %vm1409_vm2 = vcmask 654336  }
  0x2f   : > { %s253_s13 = scalar_lea.vmem %s2529_s0, %s1807_s10  ;;  %s2191_s27 = smov 107   ;;  %v2102_v19 = vld [vmem:[%s2530_s1 + $0xa8] sm:$0xff]   ;;  %v2104_v21 = vld [vmem:[%s2530_s1 + $0xb0] sm:$0xff]   ;;  %v2105_v25 = vld [vmem:[%s2530_s1 + $0x18] sm:$0xff]   ;;  %v1399_v62 = vsub.s32 0, %v1398_v59  ;;  %vm1466_vm3 = vcmask 7168  }
  0x30   : > { %v2091_v0 = vld [vmem:[%s253_s13] sm:$0xff]   ;;  %v2092_v1 = vld [vmem:[%s253_s13 + $0x8] sm:$0xff]   ;;  %s2192_s28 = smov 118   ;;  %s2193_s29 = smov 106   ;;  %v2106_v26 = vld [vmem:[%s2530_s1 + $0xb8] sm:$0xff]   ;;  %vm1475_vm4 = vcmask 15360  }
  0x31   : > { %331 = vrot.lane.b32.xlu0 %v2091_v0, %s2186_s14  ;;  %333 = vrot.lane.b32.xlu1 %v2092_v1, %s2186_s14  ;;  %v2107_v27 = vld [vmem:[%s2530_s1 + $0x40] sm:$0xff]   ;;  %v2109_v30 = vld [vmem:[%s2530_s1 + $0x48] sm:$0xff]   ;;  %v1395_v60 = vld [vmem:[#allocation2] sm:$0x1]  ;;  %s1808_s6 = sshll.u32 %s2547_s15, 5  ;;  %s1809_s10 = sshll.u32 %s2547_s15, 6 }
  0x32   : > { %v2108_v29 = vld [vmem:[%s2530_s1 + $0xc0] sm:$0xff]   ;;  %v2110_v31 = vld [vmem:[%s2530_s1 + $0xc8] sm:$0xff]   ;;  %v2111_v32 = vld [vmem:[%s2530_s1 + $0x50] sm:$0xff]   ;;  %v1396_v61 = vunpack.c.l.bf16 %v1395_v60  ;;  %s2448_s9 = scalar_lea.vmem %s2532_s3, %s1808_s6  ;;  %s2494_s13 = scalar_lea.vmem %s2533_s4, %s1809_s10 }
  0x33   : > { %v2112_v35 = vld [vmem:[%s2530_s1 + $0xd0] sm:$0xff]   ;;  %v2113_v37 = vld [vmem:[%s2530_s1 + $0x58] sm:$0xff]   ;;  %v2115_v39 = vld [vmem:[%s2530_s1 + $0x60] sm:$0xff]  }
  0x34   : > { %v2114_v38 = vld [vmem:[%s2530_s1 + $0xd8] sm:$0xff]   ;;  %v2116_v40 = vld [vmem:[%s2530_s1 + $0xe0] sm:$0xff]   ;;  %v2117_v41 = vld [vmem:[%s2530_s1 + $0x68] sm:$0xff]   ;;  %v2443_v63 = vrot.slane %v1396_v61, %v1399_v62 }
  0x35   : > { %783 = vrot.lane.b32.xlu0 %v2091_v0, %s2187_s23  ;;  %785 = vrot.lane.b32.xlu1 %v2092_v1, %s2187_s23  ;;  %v2118_v42 = vld [vmem:[%s2530_s1 + $0xe8] sm:$0xff]   ;;  %v2119_v43 = vld [vmem:[%s2530_s1 + $0x70] sm:$0xff]  }
  0x36   : > { %v2120_v44 = vld [vmem:[%s2530_s1 + $0xf0] sm:$0xff]   ;;  %v2121_v46 = vld [vmem:[%s2530_s1 + $0x78] sm:$0xff]   ;;  %v2123_v48 = vld [vmem:[%s2530_s1 + $0x100] sm:$0xff]  }
  0x37   : > { %v2122_v47 = vld [vmem:[%s2530_s1 + $0xf8] sm:$0xff]   ;;  %v2125_v49 = vld [vmem:[%s2530_s1 + $0x90] sm:$0xff]   ;;  %v2124_v50 = vld [vmem:[%s2530_s1 + $0x108] sm:$0xff]  }
  0x38   : > { %v2127_v51 = vld [vmem:[%s2530_s1 + $0x110] sm:$0xff]   ;;  %v2126_v52 = vld [vmem:[%s2530_s1 + $0x98] sm:$0xff]  }
  0x39   : > { %903 = vrot.lane.b32.xlu0 %v2091_v0, %s2188_s24  ;;  %905 = vrot.lane.b32.xlu1 %v2092_v1, %s2188_s24  ;;  %v2128_v53 = vld [vmem:[%s2530_s1 + $0x118] sm:$0xff]  }
  0x3d   : > { %1023 = vrot.lane.b32.xlu0 %v2091_v0, %s2189_s25  ;;  %543 = vrot.lane.b32.xlu1 %v2091_v0, %s2190_s26 }
  0x41   : > { %1025 = vrot.lane.b32.xlu0 %v2092_v1, %s2189_s25  ;;  %545 = vrot.lane.b32.xlu1 %v2092_v1, %s2190_s26 }
  0x45   : > { %1143 = vrot.lane.b32.xlu0 %v2091_v0, %s2191_s27  ;;  %663 = vrot.lane.b32.xlu1 %v2091_v0, %s2192_s28 }
  0x49   : > { %1145 = vrot.lane.b32.xlu0 %v2092_v1, %s2191_s27  ;;  %665 = vrot.lane.b32.xlu1 %v2092_v1, %s2192_s28 }
  0x4d   : > { %1263 = vrot.lane.b32.xlu0 %v2091_v0, %s2193_s29  ;;  %1265 = vrot.lane.b32.xlu1 %v2092_v1, %s2193_s29 }
  0xa3   : > { %v332_v4 = vpop.permute.xlu0 %331  ;;  %v334_v5 = vpop.permute.xlu1 %333 }
  0xa4   : > { %1872 = vmatprep.subr.bf16.mxu1 %v332_v4 }
  0xa5   : > { %1873 = vmatpush3.bf16.msra.mxu1 %v332_v4 }
  0xa6   : > { %1874 = vmatprep.subr.bf16.mxu1 %v334_v5 }
  0xa7   : > { %v2294_v6 = vpop.permute.xlu0 %783  ;;  %v2297_v7 = vpop.permute.xlu1 %785 }
  0xa8   : > { %1920 = vmatprep.subr.bf16.mxu0 %v2294_v6 }
  0xa9   : > { %1875 = vmatpush3.bf16.msra.mxu1 %v334_v5  ;;  %1921 = vmatpush3.bf16.msra.mxu0 %v2294_v6 }
  0xaa   : > { %1922 = vmatprep.subr.bf16.mxu0 %v2297_v7  ;;  %1884 = vmatprep.subr.bf16.mxu1 %v2091_v0 }
  0xab   : > { %v904_v10 = vpop.permute.xlu0 %903  ;;  %v906_v12 = vpop.permute.xlu1 %905 }
  0xac   : > { %1877 = vmatmul.mubr.msk.bf16.vlgmr.msra.gmra.mrb[0].mxu1 %vm337_vm0, %v2094_v8 }
  0xad   : > { %1923 = vmatpush3.bf16.msra.mxu0 %v2297_v7  ;;  %1880 = vmatprep.mubr.msk.bf16.mxu1 %vm337_vm0, %v2097_v9 }
  0xae   : > { %1932 = vmatprep.subr.bf16.mxu0 %v904_v10  ;;  %1885 = vmatpush3.bf16.msra.mxu1 %v2091_v0 }
  0xaf   : > { %1886 = vmatprep.subr.bf16.mxu1 %v2092_v1  ;;  %v544_v15 = vpop.permute.xlu1 %543  ;;  %v1024_v17 = vpop.permute.xlu0 %1023 }
  0xb0   : > { %1925 = vmatmul.mubr.msk.bf16.vlgmr.msra.gmra.mrb[0].mxu0 %vm337_vm0, %v2096_v11 }
  0xb1   : > { %1933 = vmatpush3.bf16.msra.mxu0 %v904_v10  ;;  %1936 = vmatprep.mubr.msk.bf16.mxu0 %vm337_vm0, %v2100_v13 }
  0xb2   : > { %1934 = vmatprep.subr.bf16.mxu0 %v906_v12  ;;  %1887 = vmatpush3.bf16.msra.mxu1 %v2092_v1 }
  0xb3   : > { %1896 = vmatprep.subr.bf16.mxu1 %v544_v15  ;;  %v1026_v22 = vpop.permute.xlu0 %1025  ;;  %v546_v23 = vpop.permute.xlu1 %545 }
  0xb4   : > { %1881 = vmatmul.mubr.msk.bf16.gmra.mrb[4].mxu1 %vm337_vm0, %v2098_v14 }
  0xb5   : > { %1935 = vmatpush3.bf16.msra.mxu0 %v906_v12  ;;  %1888 = vmatprep.mubr.msk.bf16.mxu1 %vm337_vm0, %v2099_v16 }
  0xb6   : > { %1944 = vmatprep.subr.bf16.mxu0 %v1024_v17 }
  0xb7   : > { %v1144_v24 = vpop.permute.xlu0 %1143  ;;  %v664_v28 = vpop.permute.xlu1 %663 }
  0xbb   : > { %v666_v33 = vpop.permute.xlu1 %665  ;;  %v1146_v34 = vpop.permute.xlu0 %1145 }
  0xbc   : > { %1889 = vmatmul.mubr.msk.bf16.vlgmr.msra.gmra.mrb[0].mxu1 %vm337_vm0, %v2101_v18  ;;  %1937 = vmatmul.mubr.msk.bf16.vlgmr.msra.gmra.mrb[0].mxu0 %vm337_vm0, %v2102_v19 }
  0xbd   : > { %1945 = vmatpush3.bf16.msra.mxu0 %v1024_v17  ;;  %1892 = vmatprep.mubr.msk.bf16.mxu1 %vm337_vm0, %v2103_v20 }
  0xbe   : > { %1940 = vmatprep.mubr.msk.bf16.mxu0 %vm337_vm0, %v2104_v21  ;;  %1946 = vmatprep.subr.bf16.mxu0 %v1026_v22 }
  0xbf   : > { %1897 = vmatpush3.bf16.msra.mxu1 %v544_v15  ;;  %v1264_v36 = vpop.permute.xlu0 %1263  ;;  %v1266_v45 = vpop.permute.xlu1 %1265 }
  0xc0   : > { %1898 = vmatprep.subr.bf16.mxu1 %v546_v23 }
  0xc1   : > { %1947 = vmatpush3.bf16.msra.mxu0 %v1026_v22 }
  0xc2   : > { %1956 = vmatprep.subr.bf16.mxu0 %v1144_v24 }
  0xc3   : > { %1899 = vmatpush3.bf16.msra.mxu1 %v546_v23 }
  0xc4   : > { %1893 = vmatmul.mubr.msk.bf16.gmra.mrb[4].mxu1 %vm337_vm0, %v2105_v25  ;;  %1941 = vmatmul.mubr.msk.bf16.gmra.mrb[4].mxu0 %vm337_vm0, %v2106_v26 }
  0xc5   : > { %1900 = vmatprep.mubr.msk.bf16.mxu1 %vm337_vm0, %v2107_v27  ;;  %1908 = vmatprep.subr.bf16.mxu1 %v664_v28 }
  0xc6   : > { %1948 = vmatprep.mubr.msk.bf16.mxu0 %vm337_vm0, %v2108_v29 }
  0xcc   : > { %1901 = vmatmul.mubr.msk.bf16.vlgmr.msra.gmra.mrb[0].mxu1 %vm337_vm0, %v2109_v30  ;;  %1949 = vmatmul.mubr.msk.bf16.vlgmr.msra.gmra.mrb[0].mxu0 %vm337_vm0, %v2110_v31 }
  0xcd   : > { %1909 = vmatpush3.bf16.msra.mxu1 %v664_v28  ;;  %1957 = vmatpush3.bf16.msra.mxu0 %v1144_v24 }
  0xce   : > { %1910 = vmatprep.subr.bf16.mxu1 %v666_v33  ;;  %1904 = vmatprep.mubr.msk.bf16.mxu1 %vm337_vm0, %v2111_v32 }
  0xcf   : > { %1952 = vmatprep.mubr.msk.bf16.mxu0 %vm337_vm0, %v2112_v35  ;;  %1958 = vmatprep.subr.bf16.mxu0 %v1146_v34 }
  0xd1   : > { %1911 = vmatpush3.bf16.msra.mxu1 %v666_v33  ;;  %1959 = vmatpush3.bf16.msra.mxu0 %v1146_v34 }
  0xd2   : > { %1980 = vmatprep.subr.bf16.mxu1 %v2294_v6  ;;  %1968 = vmatprep.subr.bf16.mxu0 %v1264_v36 }
  0xd4   : > { %1905 = vmatmul.mubr.msk.bf16.gmra.mrb[4].mxu1 %vm337_vm0, %v2113_v37  ;;  %1953 = vmatmul.mubr.msk.bf16.gmra.mrb[4].mxu0 %vm337_vm0, %v2114_v38 }
  0xd5   : > { %1912 = vmatprep.mubr.msk.bf16.mxu1 %vm337_vm0, %v2115_v39  ;;  %1960 = vmatprep.mubr.msk.bf16.mxu0 %vm337_vm0, %v2116_v40 }
  0xdc   : > { %1913 = vmatmul.mubr.msk.bf16.vlgmr.msra.gmra.mrb[0].mxu1 %vm337_vm0, %v2117_v41  ;;  %1961 = vmatmul.mubr.msk.bf16.vlgmr.msra.gmra.mrb[0].mxu0 %vm337_vm0, %v2118_v42 }
  0xdd   : > { %1982 = vmatpush3.bf16.msra.mxu1 %v2294_v6  ;;  %1969 = vmatpush3.bf16.msra.mxu0 %v1264_v36 }
  0xde   : > { %1981 = vmatprep.subr.bf16.mxu1 %v2297_v7  ;;  %1916 = vmatprep.mubr.msk.bf16.mxu1 %vm337_vm0, %v2119_v43 }
  0xdf   : > { %1964 = vmatprep.mubr.msk.bf16.mxu0 %vm337_vm0, %v2120_v44  ;;  %1970 = vmatprep.subr.bf16.mxu0 %v1266_v45 }
  0xe1   : > { %1983 = vmatpush3.bf16.msra.mxu1 %v2297_v7  ;;  %1971 = vmatpush3.bf16.msra.mxu0 %v1266_v45 }
  0xe4   : > { %1917 = vmatmul.mubr.msk.bf16.gmra.mrb[4].mxu1 %vm337_vm0, %v2121_v46  ;;  %1965 = vmatmul.mubr.msk.bf16.gmra.mrb[4].mxu0 %vm337_vm0, %v2122_v47 }
  0xe5   : > { %1972 = vmatprep.mubr.msk.bf16.mxu0 %vm337_vm0, %v2123_v48  ;;  %1928 = vmatprep.mubr.msk.bf16.mxu1 %vm337_vm0, %v2125_v49 }
  0xec   : > { %1973 = vmatmul.mubr.msk.bf16.vlgmr.msra.gmra.mrb[0].mxu0 %vm337_vm0, %v2124_v50 }
  0xed   : > { %1976 = vmatprep.mubr.msk.bf16.mxu0 %vm337_vm0, %v2127_v51 }
  0xf0   : > { %1929 = vmatmul.mubr.msk.bf16.vlgmr.msra.gmra.mrb[4].mxu1 %vm337_vm0, %v2126_v52 }
  0xf4   : > { %1977 = vmatmul.mubr.msk.bf16.gmra.mrb[4].mxu0 %vm337_vm0, %v2128_v53 }
 0x1af   : > { %v1914_v54 = vpop.f32.mrb[0].mxu1 }
 0x1b0   : > { %v715_v55 = vpop.f32.mrb[1].mxu1 }
 0x1b1   : > { %v1915_v56 = vpop.f32.mrb[2].mxu1 }
 0x1b2   : > { %v718_v57 = vpop.f32.mrb[3].mxu1 }
 0x1bf   : > { %v1974_v0 = vpop.f32.mrb[0].mxu0 }
 0x1c0   : > { %v1984_v1 = vadd.f32 %v1974_v0, %v1914_v54  ;;  %v1315_v2 = vpop.f32.mrb[1].mxu0 }
 0x1c1   : > { %v1985_v3 = vadd.f32 %v1315_v2, %v715_v55  ;;  %v1975_v4 = vpop.f32.mrb[2].mxu0 }
 0x1c2   : > { %v1812_v5 = vpack.c.bf16 %v1984_v1, %v1984_v1  ;;  %v1986_v6 = vadd.f32 %v1975_v4, %v1915_v56  ;;  %v1318_v7 = vpop.f32.mrb[3].mxu0  ;;  %v1403_v8 = vmul.f32 %v1984_v1, %v2443_v63 }
 0x1c3   : > { %v1810_v9 = vpack.c.bf16 %v1985_v3, %v1985_v3  ;;  %v1987_v10 = vadd.f32 %v1318_v7, %v718_v57  ;;  %v1930_v11 = vpop.f32.mrb[4].mxu1  ;;  %v1401_v16 = vmul.f32 %v1985_v3, %v2443_v63 }
 0x1c4   : > { %1389 = vst.msk [vmem:[%s2448_s9 + $0x8] sm:$0xf] %vm1386_vm1, %v1812_v5  ;;  %v1813_v12 = vpack.c.bf16 %v1986_v6, %v1986_v6  ;;  %v851_v13 = vpop.f32.mrb[5].mxu1  ;;  %v1416_v14 = vsel %vm1409_vm2, %v1403_v8, 0.0  ;;  %v1436_v15 = vmul.f32 %v1984_v1, %v1403_v8  ;;  %v1404_v26 = vmul.f32 %v1986_v6, %v2443_v63 }
 0x1c5   : > { %1387 = vst.msk [vmem:[%s2448_s9] sm:$0xf] %vm1386_vm1, %v1810_v9  ;;  %v1811_v17 = vpack.c.bf16 %v1987_v10, %v1987_v10  ;;  %v1931_v18 = vpop.f32.mrb[6].mxu1  ;;  %1417 = vadd.xlane.f32.xlu0 %v1416_v14  ;;  %v1402_v21 = vmul.f32 %v1987_v10, %v2443_v63  ;;  %v1410_v25 = vsel %vm1409_vm2, %v1401_v16, 0.0  ;;  %v1434_v33 = vmul.f32 %v1985_v3, %v1401_v16 }
 0x1c6   : > { %1390 = vst.msk [vmem:[%s2448_s9 + $0xc] sm:$0xf] %vm1386_vm1, %v1813_v12  ;;  %v854_v19 = vpop.f32.mrb[7].mxu1  ;;  %v1448_v20 = vsel %vm1409_vm2, %v1436_v15, 0.0  ;;  %v1419_v37 = vsel %vm1409_vm2, %v1404_v26, 0.0  ;;  %v1437_v38 = vmul.f32 %v1986_v6, %v1404_v26 }
 0x1c7   : > { %1388 = vst.msk [vmem:[%s2448_s9 + $0x4] sm:$0xf] %vm1386_vm1, %v1811_v17  ;;  %1449 = vadd.xlane.f32.xlu1 %v1448_v20  ;;  %v1978_v22 = vpop.f32.mrb[4].mxu0  ;;  %v1413_v32 = vsel %vm1409_vm2, %v1402_v21, 0.0  ;;  %v1442_v40 = vsel %vm1409_vm2, %v1434_v33, 0.0  ;;  %v1435_v43 = vmul.f32 %v1987_v10, %v1402_v21 }
 0x1c8   : > { %v1988_v23 = vadd.f32 %v1978_v22, %v1930_v11  ;;  %v1331_v24 = vpop.f32.mrb[5].mxu0  ;;  %v1451_v42 = vsel %vm1409_vm2, %v1437_v38, 0.0 }
 0x1c9   : > { %v1989_v27 = vadd.f32 %v1331_v24, %v851_v13  ;;  %1411 = vadd.xlane.f32.xlu0 %v1410_v25  ;;  %v1979_v28 = vpop.f32.mrb[6].mxu0  ;;  %v1445_v46 = vsel %vm1409_vm2, %v1435_v43, 0.0 }
 0x1ca   : > { %v1816_v29 = vpack.c.bf16 %v1988_v23, %v1988_v23  ;;  %v1990_v30 = vadd.f32 %v1979_v28, %v1931_v18  ;;  %v1334_v31 = vpop.f32.mrb[7].mxu0  ;;  %v1407_v41 = vmul.f32 %v1988_v23, %v2443_v63 }
 0x1cb   : > { %v1814_v34 = vpack.c.bf16 %v1989_v27, %v1989_v27  ;;  %v1991_v35 = vadd.f32 %v1334_v31, %v854_v19  ;;  %1414 = vadd.xlane.f32.xlu1 %v1413_v32  ;;  %v1405_v45 = vmul.f32 %v1989_v27, %v2443_v63 }
 0x1cc   : > { %1393 = vst.msk [vmem:[%s2448_s9 + $0x18] sm:$0xf] %vm1386_vm1, %v1816_v29  ;;  %v1817_v36 = vpack.c.bf16 %v1990_v30, %v1990_v30  ;;  %v1428_v44 = vsel %vm1409_vm2, %v1407_v41, 0.0  ;;  %v1408_v47 = vmul.f32 %v1990_v30, %v2443_v63  ;;  %v1440_v53 = vmul.f32 %v1988_v23, %v1407_v41 }
 0x1cd   : > { %1391 = vst.msk [vmem:[%s2448_s9 + $0x10] sm:$0xf] %vm1386_vm1, %v1814_v34  ;;  %v1815_v39 = vpack.c.bf16 %v1991_v35, %v1991_v35  ;;  %1420 = vadd.xlane.f32.xlu0 %v1419_v37  ;;  %v1422_v48 = vsel %vm1409_vm2, %v1405_v45, 0.0  ;;  %v1438_v49 = vmul.f32 %v1989_v27, %v1405_v45  ;;  %v1406_v51 = vmul.f32 %v1991_v35, %v2443_v63 }
 0x1ce   : > { %1394 = vst.msk [vmem:[%s2448_s9 + $0x1c] sm:$0xf] %vm1386_vm1, %v1817_v36  ;;  %v1431_v50 = vsel %vm1409_vm2, %v1408_v47, 0.0  ;;  %v1460_v56 = vsel %vm1409_vm2, %v1440_v53, 0.0  ;;  %v1441_v58 = vmul.f32 %v1990_v30, %v1408_v47 }
 0x1cf   : > { %1392 = vst.msk [vmem:[%s2448_s9 + $0x14] sm:$0xf] %vm1386_vm1, %v1815_v39  ;;  %1443 = vadd.xlane.f32.xlu1 %v1442_v40  ;;  %v1454_v52 = vsel %vm1409_vm2, %v1438_v49, 0.0  ;;  %v1425_v54 = vsel %vm1409_vm2, %v1406_v51, 0.0  ;;  %v1439_v55 = vmul.f32 %v1991_v35, %v1406_v51 }
 0x1d0   : > { %v1463_v59 = vsel %vm1409_vm2, %v1441_v58, 0.0 }
 0x1d1   : > { %1452 = vadd.xlane.f32.xlu0 %v1451_v42  ;;  %v1457_v57 = vsel %vm1409_vm2, %v1439_v55, 0.0 }
 0x1d3   : > { %1429 = vadd.xlane.f32.xlu1 %v1428_v44 }
 0x1d5   : > { %1446 = vadd.xlane.f32.xlu0 %v1445_v46 }
 0x1d7   : > { %1423 = vadd.xlane.f32.xlu1 %v1422_v48 }
 0x1d9   : > { %1432 = vadd.xlane.f32.xlu0 %v1431_v50 }
 0x1db   : > { %1455 = vadd.xlane.f32.xlu1 %v1454_v52 }
 0x1dd   : > { %1426 = vadd.xlane.f32.xlu0 %v1425_v54 }
 0x1df   : > { %1461 = vadd.xlane.f32.xlu1 %v1460_v56 }
 0x1e1   : > { %1458 = vadd.xlane.f32.xlu0 %v1457_v57 }
 0x1e5   : > { %1464 = vadd.xlane.f32.xlu0 %v1463_v59 }
 0x252   : > { %v1418_v60 = vpop.xlane.xlu0 %1417 }
 0x254   : > { %v1450_v61 = vpop.xlane.xlu1 %1449 }
 0x255   : > { %v1469_v62 = vsel %vm1466_vm3, %v1418_v60, %v1450_v61 }
 0x256   : > { %1478 = vst.msk [vmem:[%s2494_s13 + $0x10] sm:$0xff] %vm1475_vm4, %v1469_v62  ;;  %v1412_v63 = vpop.xlane.xlu0 %1411 }
 0x258   : > { %v1415_v0 = vpop.xlane.xlu1 %1414 }
 0x25a   : > { %v1421_v1 = vpop.xlane.xlu0 %1420 }
 0x25c   : > { %v1444_v2 = vpop.xlane.xlu1 %1443 }
 0x25d   : > { %v1467_v3 = vsel %vm1466_vm3, %v1412_v63, %v1444_v2 }
 0x25e   : > { %1476 = vst.msk [vmem:[%s2494_s13] sm:$0xff] %vm1475_vm4, %v1467_v3  ;;  %v1453_v4 = vpop.xlane.xlu0 %1452 }
 0x25f   : > { %v1470_v5 = vsel %vm1466_vm3, %v1421_v1, %v1453_v4 }
 0x260   : > { %1479 = vst.msk [vmem:[%s2494_s13 + $0x18] sm:$0xff] %vm1475_vm4, %v1470_v5  ;;  %v1430_v6 = vpop.xlane.xlu1 %1429 }
 0x262   : > { %v1447_v7 = vpop.xlane.xlu0 %1446 }
 0x263   : > { %v1468_v8 = vsel %vm1466_vm3, %v1415_v0, %v1447_v7 }
 0x264   : > { %1477 = vst.msk [vmem:[%s2494_s13 + $0x8] sm:$0xff] %vm1475_vm4, %v1468_v8  ;;  %v1424_v9 = vpop.xlane.xlu1 %1423 }
 0x266   : > { %v1433_v10 = vpop.xlane.xlu0 %1432 }
 0x268   : > { %v1456_v11 = vpop.xlane.xlu1 %1455 }
 0x269   : > { %v1471_v12 = vsel %vm1466_vm3, %v1424_v9, %v1456_v11 }
 0x26a   : > { %1480 = vst.msk [vmem:[%s2494_s13 + $0x20] sm:$0xff] %vm1475_vm4, %v1471_v12  ;;  %v1427_v13 = vpop.xlane.xlu0 %1426 }
 0x26c   : > { %v1462_v14 = vpop.xlane.xlu1 %1461 }
 0x26d   : > { %v1473_v15 = vsel %vm1466_vm3, %v1430_v6, %v1462_v14 }
 0x26e   : > { %1482 = vst.msk [vmem:[%s2494_s13 + $0x30] sm:$0xff] %vm1475_vm4, %v1473_v15  ;;  %v1459_v16 = vpop.xlane.xlu0 %1458 }
 0x26f   : > { %v1472_v17 = vsel %vm1466_vm3, %v1427_v13, %v1459_v16 }
 0x270   : > { %1481 = vst.msk [vmem:[%s2494_s13 + $0x28] sm:$0xff] %vm1475_vm4, %v1472_v17 }
 0x272   : > { %v1465_v18 = vpop.xlane.xlu0 %1464 }
 0x273   : > { %v1474_v19 = vsel %vm1466_vm3, %v1433_v10, %v1465_v18 }
 0x274   : > { %1483 = vst.msk [vmem:[%s2494_s13 + $0x38] sm:$0xff] %vm1475_vm4, %v1474_v19 }
 0x275 PF: > { %s16_s17 = sadd.s32 1, %s2183_s17   ;;  %s2542_s15 = smov %s2179_s16 }
 0x276   : > { %p13_p3 = scmp.ge.s32.totalorder %s16_s17, 4   ;;  %s2543_s16 = smov %s2545_s19 }
 0x278   :  { %15 = sbr.rel (!%p13_p3) target bundleno = 2 (0x2), region = 90 }
 0x27f   :  { %1538 = vsyncpa [#allocation3], 1 }
 0x280   :  { %1540 = vsyncpa [#allocation3 + $0x1], 1 }

// kernel: squeeze.12
= control target key start
LH: loop header
LB: loop body
LE: loop exit
PB: predicated region body
PF: predicated region fallthrough
CT: control target
= control target key end

     0   :  { %s37_s8 = smov 104   ;;  %vm7_vm0 = vcmask 64512   ;;  %s38_s9 = smov 112   ;;  %s55_s0 = inlined_call_operand.vmem [shape: f32[32], index: 0, kind: input, shape index: {}]   ;;  %s56_s1 = inlined_call_operand.vmem [shape: f32[4,8], index: 1, kind: output, shape index: {}]  }
   0x1   :  { %v4_v0 = vld [vmem:[%s55_s0] sm:$0x1]  ;;  %s36_s0 = smov 120  }
   0x2   :  { %5 = vst [vmem:[#allocation1] sm:$0x1] %v4_v0 }
   0x9   :  { %v9_v1 = vld [vmem:[#allocation1] sm:$0x1]  }
   0xa   :  { %v21_v2 = vld [vmem:[#allocation1] sm:$0x1]   ;;  %10 = vrot.lane.b32.xlu0 %v9_v1, %s36_s0 }
   0xb   :  { %22 = vrot.lane.b32.xlu1 %v21_v2, %s37_s8  ;;  %v6_v3 = vld [vmem:[#allocation1] sm:$0x1]  }
   0xc   :  { %v15_v4 = vld [vmem:[#allocation1] sm:$0x1]   ;;  %8 = vst.msk [vmem:[#allocation0] sm:$0x1] %vm7_vm0, %v6_v3  }
   0xe   :  { %16 = vrot.lane.b32.xlu0 %v15_v4, %s38_s9 }
  0x7c   :  { %v11_v5 = vpop.permute.xlu0 %10  }
  0x7d   :  { %v23_v6 = vpop.permute.xlu1 %22   ;;  %14 = vst.msk [vmem:[#allocation0 + $0x1] sm:$0x1] %vm7_vm0, %v11_v5  }
  0x7e   :  { %26 = vst.msk [vmem:[#allocation0 + $0x3] sm:$0x1] %vm7_vm0, %v23_v6  }
  0x80   :  { %v17_v7 = vpop.permute.xlu0 %16  }
  0x81   :  { %20 = vst.msk [vmem:[#allocation0 + $0x2] sm:$0x1] %vm7_vm0, %v17_v7  }
  0x88   :  { %v30_v8 = vld [vmem:[#allocation0] sm:$0xf] }
  0x89   :  { %32 = vst [vmem:[%s56_s1] sm:$0xf] %v30_v8 }

// kernel: generator_forward.9
= control target key start
LH: loop header
LB: loop body
LE: loop exit
PB: predicated region body
PF: predicated region fallthrough
CT: control target
= control target key end

     0   :  { %10 = vsyncpa [#allocation3], 0  ;;  %s2366_s15 = smov 0   ;;  %s2368_s16 = smov 0   ;;  %s2643_s0 = inlined_call_operand.vmem [shape: bf16[2,16,342], index: 0, kind: input, shape index: {}]   ;;  %s2644_s1 = inlined_call_operand.vmem [shape: bf16[9,32,16], index: 1, kind: input, shape index: {}]   ;;  %s2645_s2 = inlined_call_operand.hbm [shape: bf16[1,288], index: 2, kind: input, shape index: {}]   ;;  %s2646_s3 = inlined_call_operand.vmem [shape: bf16[2,32,288], index: 3, kind: output, shape index: {0}]   ;;  %s2647_s4 = inlined_call_operand.vmem [shape: f32[2,1,32,2], index: 4, kind: output, shape index: {1}]  }
   0x1   :  { %s2370_s17 = smov 0  }
   0x2 LB: > { %s1910_s18 = sadd.s32 4294967295, %s2329_s17   ;;  %s28_s19 = sadd.s32 1, %s2325_s16  ;;  %s2329_s17 = sphi %s2370_s17, %s16_s17   ;;  %s2325_s16 = sphi %s2368_s16, %s2657_s16   ;;  %s2321_s15 = sphi %s2366_s15, %s2656_s15  }
   0x3   : > { %p30_p0 = scmp.ge.s32.totalorder %s28_s19, 2  ;;  %p1912_p1 = scmp.ge.s32.totalorder %s2329_s17, 1 }
   0x4   : > { %p162_p2 = scmp.lt.s32.totalorder %s2329_s17, 3  ;;  %p2391_p4 = scmp.eq.s32.totalorder %s1910_s18, 0 }
   0x5   : > { %s2659_s19 = smov (%p30_p0, %s28_s19), 0  ;;  %s2331_s22 = smov [#allocation2]  }
   0x6   : > { %p2387_p3 = pnand %p1912_p1, %p162_p2  ;;  %s184_s23 = sshll.u32 %s2331_s22, 4  ;;  %s185_s23 = int_to_ptr.vmem [resolvable:$true] %s184_s23 }
   0x7   : > { %s2652_s21 = scalar_select %p2391_p4, 1, 0 }
   0x8   : > { %s2651_s20 = scalar_select %p2387_p3, 1, 0 }
   0x9   : > { %p2213_p5 = pneg %p2387_p3  ;;  %s2275_s27 = scalar_lea.hbm %s2645_s2, 48 }
   0xa   : > { %p2276_p7 = scmp.ne.s32.totalorder %s2645_s2, %s2275_s27  ;;  %p2282_p11 = scmp.lt.u32.totalorder %s2275_s27, %s2645_s2 }
   0xb   : > { %p2399_p6 = pnand %p2391_p4, %p2213_p5 }
   0xd   : > { %p2277_p8 = pneg %p2399_p6 }
   0xf   : > { %p2278_p9 = pnand %p2277_p8, %p2276_p7 }
  0x11   : > { %p2279_p10 = pneg %p2278_p9 }
  0x13   : > { %p2284_p12 = pnand %p2282_p11, %p2279_p10 }
  0x15   : > { %2287 = shalt.err (!%p2284_p12)
}
  0x16   : > { %s2288_s6 = scalar_lea.vmem %s185_s23, 48  ;;  %s2295_s7 = scalar_lea.vmem %s185_s23, 64 }
  0x17   : > { %p2289_p13 = scmp.ne.s32.totalorder %s185_s23, %s2288_s6  ;;  %p2296_p2 = scmp.lt.s32.totalorder %s185_s23, %s185_s23 }
  0x18   : > { %p2297_p5 = scmp.lt.s32.totalorder %s2295_s7, %s2288_s6 }
  0x19   : > { %p2291_p0 = pnand %p2289_p13, %p2277_p8 }
  0x1a   : > { %p2298_p4 = por %p2297_p5, %p2296_p2 }
  0x1b   : > { %p2292_p1 = pneg %p2291_p0 }
  0x1d   : > { %p2299_p3 = pnand %p2298_p4, %p2292_p1 }
  0x1f   : > { %2302 = shalt.err (!%p2299_p3)
}
  0x20   : > { %2216 = dma.hbm_to_vmem [thread:$0]  (!%p2399_p6), %s2645_s2, 48, %s185_s23, [#allocation3]  }
  0x21   : > { %p2654_p7 = scmp.ne.s32.totalorder %s2651_s20, 0 }
  0x22   : > { %p2655_p9 = scmp.ne.s32.totalorder (!%p2654_p7), %s2652_s21, 0 }
  0x23   : > { %205 = sbr.rel (%p2654_p7) target bundleno = 675 (0x2a3), region = 32 }
  0x2a   : > { %2316 = dma.done.wait (%p2655_p9), [#allocation3], 48  }
  0x2b   : > { %2318 = vsyncadd (%p2655_p9), [#allocation3], 4294967248  ;;  %p250_p8 = scmp.lt.s32.totalorder %s2321_s15, 1  ;;  %v2332_v0 = vmov 0   ;;  %s2333_s14 = smov 127   ;;  %vm324_vm0 = vcmask 1039360  }
  0x2c   : > { %369 = vmatprep.mubr.bf16.mxu1 %v2332_v0  ;;  %625 = vmatprep.mubr.bf16.mxu0 %v2332_v0  ;;  %s2334_s18 = smov 126   ;;  %s2335_s20 = smov 110   ;;  %v2257_v10 = vld [vmem:[%s2644_s1 + $0x10] sm:$0xff]   ;;  %vm581_vm1 = vcmask 1031168   ;;  %vm330_vm2 = vcmask 130048   ;;  %v2465_v15 = vld [vmem:[%s2644_s1 + $0x20] sm:$0xff]  }
  0x2d   : > { %s2661_s15 = smov (!%p250_p8, %s2321_s15), 1  ;;  %s2336_s21 = smov 109   ;;  %vm728_vm3 = vcmask 900096   ;;  %v2259_v19 = vld [vmem:[%s2644_s1 + $0x18] sm:$0xff]   ;;  %v2260_v23 = vld [vmem:[%s2644_s1 + $0x28] sm:$0xff]   ;;  %vm875_vm4 = vcmask 891904  }
  0x2e   : > { %s2207_s10 = smul.u32 24, %s2661_s15  ;;  %s2337_s22 = smov 108   ;;  %v2261_v27 = vld [vmem:[%s2644_s1 + $0x30] sm:$0xff]   ;;  %vm1022_vm5 = vcmask 883712   ;;  %v2262_v32 = vld [vmem:[%s2644_s1] sm:$0xff]   ;;  %v2263_v33 = vld [vmem:[%s2644_s1 + $0x38] sm:$0xff]  }
  0x2f   : > { %s2338_s23 = smov 92   ;;  %s2339_s24 = smov 91   ;;  %v2264_v34 = vld [vmem:[%s2644_s1 + $0x8] sm:$0xff]   ;;  %v2265_v36 = vld [vmem:[%s2644_s1 + $0x40] sm:$0xff]   ;;  %vm1169_vm6 = vcmask 752640   ;;  %v2267_v43 = vld [vmem:[%s2644_s1 + $0x50] sm:$0xff]  }
  0x30   : > { %s254_s13 = scalar_lea.vmem %s2643_s0, %s2207_s10  ;;  %s2340_s25 = smov 90   ;;  %v2266_v41 = vld [vmem:[%s2644_s1 + $0x48] sm:$0xff]   ;;  %vm1316_vm7 = vcmask 744448   ;;  %v2268_v48 = vld [vmem:[%s2644_s1 + $0x58] sm:$0xff]   ;;  %v2269_v50 = vld [vmem:[%s2644_s1 + $0x60] sm:$0xff]   ;;  %vm1463_vm8 = vcmask 736256  }
  0x31   : > { %v2253_v1 = vld [vmem:[%s254_s13 + $0x4] ss:$12 sps:$4 sm:$0xff]   ;;  %v2435_v2 = vld [vmem:[%s254_s13] ss:$12 sps:$4 sm:$0xff]   ;;  %v2438_v3 = vld [vmem:[%s254_s13 + $0x8] ss:$12 sps:$4 sm:$0xff]  }
  0x32   : > { %320 = vrot.lane.b32.xlu0 %v2253_v1, %s2333_s14  ;;  %318 = vrot.lane.b32.xlu1 %v2435_v2, %s2333_s14  ;;  %v2270_v55 = vld [vmem:[%s2644_s1 + $0x68] sm:$0xff]   ;;  %v2271_v57 = vld [vmem:[%s2644_s1 + $0x70] sm:$0xff]   ;;  %vm1630_vm9 = vcmask 257024   ;;  %vm1681_vm10 = vcmask 261120   ;;  %vm1733_vm11 = vcmask 7168   ;;  %vm1738_vm12 = vcmask 15360  }
  0x33   : > { %v2272_v59 = vld [vmem:[%s2644_s1 + $0x78] sm:$0xff]   ;;  %v2273_v60 = vld [vmem:[%s2644_s1 + $0x80] sm:$0xff]   ;;  %v2274_v61 = vld [vmem:[%s2644_s1 + $0x88] sm:$0xff]  }
  0x36   : > { %322 = vrot.lane.b32.xlu0 %v2438_v3, %s2333_s14  ;;  %577 = vrot.lane.b32.xlu1 %v2253_v1, %s2334_s18  ;;  %s2208_s14 = smul.u32 48, %s2661_s15 }
  0x3a   : > { %579 = vrot.lane.b32.xlu0 %v2438_v3, %s2334_s18  ;;  %575 = vrot.lane.b32.xlu1 %v2435_v2, %s2334_s18 }
  0x3e   : > { %724 = vrot.lane.b32.xlu0 %v2253_v1, %s2335_s20  ;;  %726 = vrot.lane.b32.xlu1 %v2438_v3, %s2335_s20 }
  0x42   : > { %722 = vrot.lane.b32.xlu0 %v2435_v2, %s2335_s20  ;;  %871 = vrot.lane.b32.xlu1 %v2253_v1, %s2336_s21 }
  0x46   : > { %873 = vrot.lane.b32.xlu0 %v2438_v3, %s2336_s21  ;;  %869 = vrot.lane.b32.xlu1 %v2435_v2, %s2336_s21  ;;  %s2605_s21 = scalar_lea.vmem %s2646_s3, %s2208_s14 }
  0x4a   : > { %1018 = vrot.lane.b32.xlu0 %v2253_v1, %s2337_s22  ;;  %1020 = vrot.lane.b32.xlu1 %v2438_v3, %s2337_s22 }
  0x4e   : > { %1016 = vrot.lane.b32.xlu0 %v2435_v2, %s2337_s22  ;;  %1165 = vrot.lane.b32.xlu1 %v2253_v1, %s2338_s23  ;;  %s2021_s22 = sshll.u32 %s2661_s15, 5 }
  0x52   : > { %1167 = vrot.lane.b32.xlu0 %v2438_v3, %s2338_s23  ;;  %1163 = vrot.lane.b32.xlu1 %v2435_v2, %s2338_s23 }
  0x56   : > { %1312 = vrot.lane.b32.xlu0 %v2253_v1, %s2339_s24  ;;  %1314 = vrot.lane.b32.xlu1 %v2438_v3, %s2339_s24 }
  0x5a   : > { %1310 = vrot.lane.b32.xlu0 %v2435_v2, %s2339_s24  ;;  %1459 = vrot.lane.b32.xlu1 %v2253_v1, %s2340_s25 }
  0x5e   : > { %1461 = vrot.lane.b32.xlu0 %v2438_v3, %s2340_s25  ;;  %1457 = vrot.lane.b32.xlu1 %v2435_v2, %s2340_s25  ;;  %s280_s25 = scalar_lea.vmem %s2647_s4, %s2021_s22 }
  0xa4   : > { %v321_v4 = vpop.permute.xlu0 %320  ;;  %v319_v5 = vpop.permute.xlu1 %318 }
  0xa5   : > { %v325_v9 = vsel %vm324_vm0, %v319_v5, %v321_v4 }
  0xa8   : > { %v323_v6 = vpop.permute.xlu0 %322  ;;  %v578_v7 = vpop.permute.xlu1 %577 }
  0xa9   : > { %v326_v8 = vsel %vm324_vm0, %v321_v4, %v323_v6 }
  0xaa   : > { %337 = vmatprep.subr.bf16.mxu1 %v326_v8  ;;  %v1638_v8 = vld [vmem:[#allocation2] sm:$0x7] }
  0xab   : > { %338 = vmatpush1.bf16.msra.mxu1 %v325_v9  ;;  %v1639_v9 = vunpack.c.l.bf16 %v1638_v8 }
  0xac   : > { %v2458_v11 = vpop.permute.xlu0 %579  ;;  %2057 = vmatprep.subr.bf16.mxu1 %v323_v6  ;;  %v576_v12 = vpop.permute.xlu1 %575 }
  0xad   : > { %v583_v13 = vsel %vm581_vm1, %v578_v7, %v2458_v11  ;;  %v582_v14 = vsel %vm581_vm1, %v576_v12, %v578_v7 }
  0xae   : > { %1931 = vmatmul.mubr.msk.bf16.vlgmr.msra.gmra.mrb[0].mxu1 %vm330_vm2, %v2257_v10  ;;  %593 = vmatprep.subr.bf16.mxu0 %v583_v13 }
  0xaf   : > { %2058 = vmatpush3.bf16.msra.mxu1 %v323_v6  ;;  %594 = vmatpush1.bf16.msra.mxu0 %v582_v14  ;;  %v1641_v6 = vlaneseq }
  0xb0   : > { %v725_v16 = vpop.permute.xlu0 %724  ;;  %379 = vmatprep.mubr.bf16.mxu1 %v2332_v0  ;;  %v2468_v17 = vpop.permute.xlu1 %726  ;;  %458 = vmatprep.subr.bf16.mxu1 %v2253_v1 }
  0xb1   : > { %v730_v18 = vsel %vm728_vm3, %v725_v16, %v2468_v17  ;;  %v1642_v7 = vshrl.u32 %v1641_v6, 7 }
  0xb2   : > { %1947 = vmatmul.mubr.msk.bf16.vlgmr.msra.gmra.mrb[0].mxu0 %vm330_vm2, %v2465_v15  ;;  %740 = vmatprep.subr.bf16.mxu0 %v730_v18 }
  0xb3   : > { %635 = vmatprep.mubr.bf16.mxu0 %v2332_v0 }
  0xb4   : > { %v723_v20 = vpop.permute.xlu0 %722  ;;  %v872_v21 = vpop.permute.xlu1 %871 }
  0xb5   : > { %v729_v22 = vsel %vm728_vm3, %v723_v20, %v725_v16 }
  0xb6   : > { %1932 = vmatmul.mubr.msk.bf16.gmra.mrb[4].mxu1 %vm330_vm2, %v2259_v19  ;;  %741 = vmatpush1.bf16.msra.mxu0 %v729_v22 }
  0xb7   : > { %2059 = vmatprep.mubr.msk.bf16.mxu1 %vm330_vm2, %v2257_v10  ;;  %v1643_v10 = vsub.s32 0, %v1642_v7 }
  0xb8   : > { %v2482_v24 = vpop.permute.xlu0 %873  ;;  %v870_v26 = vpop.permute.xlu1 %869 }
  0xb9   : > { %v877_v25 = vsel %vm875_vm4, %v872_v21, %v2482_v24  ;;  %v876_v29 = vsel %vm875_vm4, %v870_v26, %v872_v21  ;;  %v1644_v12 = vrot.slane %v1639_v9, %v1643_v10 }
  0xba   : > { %1948 = vmatmul.mubr.msk.bf16.gmra.mrb[4].mxu0 %vm330_vm2, %v2260_v23  ;;  %887 = vmatprep.subr.bf16.mxu0 %v877_v25 }
  0xbb   : > { %772 = vmatprep.mubr.bf16.mxu0 %v2332_v0  ;;  %v1659_v14 = vrot.slane %v1644_v12, %v1643_v10 }
  0xbc   : > { %v2491_v28 = vpop.permute.xlu1 %1020  ;;  %v1019_v30 = vpop.permute.xlu0 %1018 }
  0xbd   : > { %v1024_v31 = vsel %vm1022_vm5, %v1019_v30, %v2491_v28 }
  0xbe   : > { %2060 = vmatmul.mubr.msk.bf16.vlgmr.msra.gmra.mrb[8].mxu1 %vm330_vm2, %v2259_v19 }
  0xbf   : > { %459 = vmatpush1.bf16.msra.mxu1 %v2435_v2  ;;  %490 = vmatprep.mubr.bf16.mxu1 %v2332_v0 }
  0xc0   : > { %2063 = vmatprep.subr.bf16.mxu1 %v2438_v3  ;;  %v1017_v35 = vpop.permute.xlu0 %1016  ;;  %v1166_v39 = vpop.permute.xlu1 %1165 }
  0xc1   : > { %v1023_v38 = vsel %vm1022_vm5, %v1017_v35, %v1019_v30 }
  0xc2   : > { %1957 = vmatmul.mubr.msk.bf16.vlgmr.msra.gmra.mrb[0].mxu0 %vm330_vm2, %v2261_v27 }
  0xc3   : > { %782 = vmatprep.mubr.bf16.mxu0 %v2332_v0  ;;  %888 = vmatpush1.bf16.msra.mxu0 %v876_v29 }
  0xc4   : > { %1034 = vmatprep.subr.bf16.mxu0 %v1024_v31  ;;  %v2519_v37 = vpop.permute.xlu0 %1167  ;;  %v1164_v42 = vpop.permute.xlu1 %1163 }
  0xc5   : > { %v1171_v40 = vsel %vm1169_vm6, %v1166_v39, %v2519_v37  ;;  %v1170_v45 = vsel %vm1169_vm6, %v1164_v42, %v1166_v39 }
  0xc6   : > { %1937 = vmatmul.mubr.msk.bf16.vlgmr.msra.gmra.mrb[0].mxu1 %vm330_vm2, %v2262_v32 }
  0xc7   : > { %2064 = vmatpush3.bf16.msra.mxu1 %v2438_v3  ;;  %500 = vmatprep.mubr.bf16.mxu1 %v2332_v0 }
  0xc8   : > { %2069 = vmatprep.subr.bf16.mxu1 %v2458_v11  ;;  %v1315_v44 = vpop.permute.xlu1 %1314  ;;  %v1313_v46 = vpop.permute.xlu0 %1312 }
  0xc9   : > { %v1318_v47 = vsel %vm1316_vm7, %v1313_v46, %v1315_v44 }
  0xca   : > { %1958 = vmatmul.mubr.msk.bf16.gmra.mrb[4].mxu0 %vm330_vm2, %v2263_v33 }
  0xcb   : > { %919 = vmatprep.mubr.bf16.mxu0 %v2332_v0 }
  0xcc   : > { %v1311_v49 = vpop.permute.xlu0 %1310  ;;  %v1460_v53 = vpop.permute.xlu1 %1459 }
  0xcd   : > { %v1317_v52 = vsel %vm1316_vm7, %v1311_v49, %v1313_v46 }
  0xce   : > { %1938 = vmatmul.mubr.msk.bf16.gmra.mrb[4].mxu1 %vm330_vm2, %v2264_v34 }
  0xcf   : > { %2065 = vmatprep.mubr.msk.bf16.mxu1 %vm330_vm2, %v2262_v32 }
  0xd0   : > { %v1462_v51 = vpop.permute.xlu0 %1461  ;;  %v1458_v56 = vpop.permute.xlu1 %1457 }
  0xd1   : > { %v1465_v54 = vsel %vm1463_vm8, %v1460_v53, %v1462_v51  ;;  %v1464_v58 = vsel %vm1463_vm8, %v1458_v56, %v1460_v53 }
  0xd2   : > { %1967 = vmatmul.mubr.msk.bf16.vlgmr.msra.gmra.mrb[0].mxu0 %vm330_vm2, %v2265_v36 }
  0xd3   : > { %929 = vmatprep.mubr.bf16.mxu0 %v2332_v0  ;;  %1035 = vmatpush1.bf16.msra.mxu0 %v1023_v38 }
  0xd4   : > { %1181 = vmatprep.subr.bf16.mxu0 %v1171_v40 }
  0xd6   : > { %2066 = vmatmul.mubr.msk.bf16.vlgmr.msra.gmra.mrb[8].mxu1 %vm330_vm2, %v2264_v34 }
  0xd7   : > { %2070 = vmatpush3.bf16.msra.mxu1 %v2458_v11  ;;  %2071 = vmatprep.mubr.msk.bf16.mxu1 %vm330_vm2, %v2465_v15  ;;  %v1647_v11 = vsub.s32 2, %v1642_v7 }
  0xd8   : > { %2075 = vmatprep.subr.bf16.mxu1 %v2468_v17 }
  0xd9   : > { %v1648_v13 = vrot.slane %v1639_v9, %v1647_v11 }
  0xda   : > { %1968 = vmatmul.mubr.msk.bf16.gmra.mrb[4].mxu0 %vm330_vm2, %v2266_v41 }
  0xdb   : > { %1066 = vmatprep.mubr.bf16.mxu0 %v2332_v0  ;;  %v1663_v16 = vrot.slane %v1648_v13, %v1643_v10 }
  0xe2   : > { %2072 = vmatmul.mubr.msk.bf16.vlgmr.msra.gmra.mrb[8].mxu1 %vm330_vm2, %v2260_v23  ;;  %1977 = vmatmul.mubr.msk.bf16.vlgmr.msra.gmra.mrb[0].mxu0 %vm330_vm2, %v2267_v43 }
  0xe3   : > { %2076 = vmatpush3.bf16.msra.mxu1 %v2468_v17  ;;  %1076 = vmatprep.mubr.bf16.mxu0 %v2332_v0 }
  0xe4   : > { %2081 = vmatprep.subr.bf16.mxu1 %v2482_v24  ;;  %1182 = vmatpush1.bf16.msra.mxu0 %v1170_v45 }
  0xe5   : > { %2077 = vmatprep.mubr.msk.bf16.mxu1 %vm330_vm2, %v2261_v27  ;;  %1328 = vmatprep.subr.bf16.mxu0 %v1318_v47 }
  0xea   : > { %1978 = vmatmul.mubr.msk.bf16.gmra.mrb[4].mxu0 %vm330_vm2, %v2268_v48 }
  0xeb   : > { %1213 = vmatprep.mubr.bf16.mxu0 %v2332_v0 }
  0xee   : > { %2078 = vmatmul.mubr.msk.bf16.vlgmr.msra.gmra.mrb[8].mxu1 %vm330_vm2, %v2263_v33 }
  0xef   : > { %2082 = vmatpush3.bf16.msra.mxu1 %v2482_v24  ;;  %2083 = vmatprep.mubr.msk.bf16.mxu1 %vm330_vm2, %v2265_v36 }
  0xf0   : > { %2087 = vmatprep.subr.bf16.mxu1 %v2491_v28 }
  0xf2   : > { %1987 = vmatmul.mubr.msk.bf16.vlgmr.msra.gmra.mrb[0].mxu0 %vm330_vm2, %v2269_v50 }
  0xf3   : > { %1223 = vmatprep.mubr.bf16.mxu0 %v2332_v0  ;;  %1329 = vmatpush1.bf16.msra.mxu0 %v1317_v52 }
  0xf4   : > { %1475 = vmatprep.subr.bf16.mxu0 %v1465_v54 }
  0xfa   : > { %2084 = vmatmul.mubr.msk.bf16.vlgmr.msra.gmra.mrb[8].mxu1 %vm330_vm2, %v2266_v41  ;;  %1988 = vmatmul.mubr.msk.bf16.gmra.mrb[4].mxu0 %vm330_vm2, %v2270_v55 }
  0xfb   : > { %2088 = vmatpush3.bf16.msra.mxu1 %v2491_v28  ;;  %1360 = vmatprep.mubr.bf16.mxu0 %v2332_v0 }
  0xfc   : > { %2093 = vmatprep.subr.bf16.mxu1 %v2519_v37  ;;  %2089 = vmatprep.mubr.msk.bf16.mxu1 %vm330_vm2, %v2267_v43 }
 0x102   : > { %1997 = vmatmul.mubr.msk.bf16.vlgmr.msra.gmra.mrb[0].mxu0 %vm330_vm2, %v2271_v57 }
 0x103   : > { %1370 = vmatprep.mubr.bf16.mxu0 %v2332_v0  ;;  %1476 = vmatpush1.bf16.msra.mxu0 %v1464_v58 }
 0x106   : > { %2090 = vmatmul.mubr.msk.bf16.vlgmr.msra.gmra.mrb[8].mxu1 %vm330_vm2, %v2268_v48 }
 0x107   : > { %2094 = vmatpush3.bf16.msra.mxu1 %v2519_v37  ;;  %2095 = vmatprep.mubr.msk.bf16.mxu1 %vm330_vm2, %v2269_v50 }
 0x108   : > { %2099 = vmatprep.subr.bf16.mxu1 %v1315_v44 }
 0x10a   : > { %1998 = vmatmul.mubr.msk.bf16.gmra.mrb[4].mxu0 %vm330_vm2, %v2272_v59 }
 0x10b   : > { %1507 = vmatprep.mubr.bf16.mxu0 %v2332_v0 }
 0x112   : > { %2096 = vmatmul.mubr.msk.bf16.vlgmr.msra.gmra.mrb[8].mxu1 %vm330_vm2, %v2270_v55  ;;  %2007 = vmatmul.mubr.msk.bf16.vlgmr.msra.gmra.mrb[0].mxu0 %vm330_vm2, %v2273_v60 }
 0x113   : > { %2100 = vmatpush3.bf16.msra.mxu1 %v1315_v44  ;;  %1517 = vmatprep.mubr.bf16.mxu0 %v2332_v0 }
 0x114   : > { %2105 = vmatprep.subr.bf16.mxu1 %v1462_v51  ;;  %2101 = vmatprep.mubr.msk.bf16.mxu1 %vm330_vm2, %v2271_v57 }
 0x11a   : > { %2008 = vmatmul.mubr.msk.bf16.gmra.mrb[4].mxu0 %vm330_vm2, %v2274_v61 }
 0x11e   : > { %2102 = vmatmul.mubr.msk.bf16.vlgmr.msra.gmra.mrb[8].mxu1 %vm330_vm2, %v2272_v59 }
 0x11f   : > { %2106 = vmatpush3.bf16.msra.mxu1 %v1462_v51  ;;  %2107 = vmatprep.mubr.msk.bf16.mxu1 %vm330_vm2, %v2273_v60  ;;  %v1651_v51 = vsub.s32 4, %v1642_v7 }
 0x121   : > { %v1652_v60 = vrot.slane %v1639_v9, %v1651_v51 }
 0x12a   : > { %2108 = vmatmul.mubr.msk.bf16.vlgmr.msra.gmra.mrb[8].mxu1 %vm330_vm2, %v2274_v61 }
 0x199   : > { %v492_v62 = vpop.f32.mrb[0].mxu1 }
 0x19a   : > { %v494_v63 = vpop.f32.mrb[1].mxu1 }
 0x19b   : > { %v496_v0 = vpop.f32.mrb[2].mxu1 }
 0x19c   : > { %v498_v1 = vpop.f32.mrb[3].mxu1 }
 0x1a1   : > { %v502_v2 = vpop.f32.mrb[4].mxu1 }
 0x1a2   : > { %v504_v3 = vpop.f32.mrb[5].mxu1 }
 0x1a3   : > { %v506_v4 = vpop.f32.mrb[6].mxu1 }
 0x1a4   : > { %v508_v5 = vpop.f32.mrb[7].mxu1 }
 0x1e5   : > { %v1509_v15 = vpop.f32.mrb[0].mxu0 }
 0x1e6   : > { %v2111_v17 = vadd.f32 %v1509_v15, %v492_v62  ;;  %v1511_v18 = vpop.f32.mrb[1].mxu0  ;;  %v1667_v62 = vrot.slane %v1652_v60, %v1643_v10 }
 0x1e7   : > { %v2112_v19 = vadd.f32 %v1511_v18, %v494_v63  ;;  %v1513_v20 = vpop.f32.mrb[2].mxu0 }
 0x1e8   : > { %v1668_v21 = vmul.f32 %v2111_v17, %v1659_v14  ;;  %v2113_v22 = vadd.f32 %v1513_v20, %v496_v0  ;;  %v1515_v23 = vpop.f32.mrb[3].mxu0 }
 0x1e9   : > { %v2022_v24 = vpack.c.bf16 %v2112_v19, %v2111_v17  ;;  %v1669_v25 = vmul.f32 %v2112_v19, %v1663_v16  ;;  %v2114_v26 = vadd.f32 %v1515_v23, %v498_v1 }
 0x1ea   : > { %v1701_v27 = vmul.f32 %v2111_v17, %v1668_v21  ;;  %v1671_v28 = vmul.f32 %v2113_v22, %v1659_v14 }
 0x1eb   : > { %1629 = vst [vmem:[%s2605_s21] sm:$0xff] %v2022_v24  ;;  %v1702_v29 = vmul.f32 %v2112_v19, %v1669_v25  ;;  %v2024_v30 = vpack.c.bf16 %v2114_v26, %v2113_v22  ;;  %v1672_v31 = vmul.f32 %v2114_v26, %v1663_v16  ;;  %v2608_v32 = vadd.f32 %v1669_v25, %v1668_v21 }
 0x1ec   : > { %v1704_v33 = vmul.f32 %v2113_v22, %v1671_v28 }
 0x1ed   : > { %1632 = vst [vmem:[%s2605_s21 + $0xc] sm:$0xff] %v2024_v30  ;;  %v1705_v34 = vmul.f32 %v2114_v26, %v1672_v31  ;;  %v1519_v35 = vpop.f32.mrb[4].mxu0  ;;  %v1686_v36 = vadd.f32 %v1672_v31, %v1671_v28  ;;  %v1713_v37 = vadd.f32 %v1702_v29, %v1701_v27 }
 0x1ee   : > { %v2115_v38 = vadd.f32 %v1519_v35, %v502_v2  ;;  %v1521_v39 = vpop.f32.mrb[5].mxu0 }
 0x1ef   : > { %v2116_v40 = vadd.f32 %v1521_v39, %v504_v3  ;;  %v1523_v41 = vpop.f32.mrb[6].mxu0  ;;  %v1718_v42 = vadd.f32 %v1705_v34, %v1704_v33 }
 0x1f0   : > { %v1674_v43 = vmul.f32 %v2115_v38, %v1659_v14  ;;  %v2117_v44 = vadd.f32 %v1523_v41, %v506_v4  ;;  %v1525_v45 = vpop.f32.mrb[7].mxu0 }
 0x1f1   : > { %v2026_v46 = vpack.c.bf16 %v2116_v40, %v2115_v38  ;;  %v1675_v47 = vmul.f32 %v2116_v40, %v1663_v16  ;;  %v2118_v48 = vadd.f32 %v1525_v45, %v508_v5 }
 0x1f2   : > { %v1707_v49 = vmul.f32 %v2115_v38, %v1674_v43  ;;  %v1677_v50 = vmul.f32 %v2117_v44, %v1659_v14 }
 0x1f3   : > { %1634 = vst [vmem:[%s2605_s21 + $0x18] sm:$0xff] %v2026_v46  ;;  %v1708_v52 = vmul.f32 %v2116_v40, %v1675_v47  ;;  %v2028_v53 = vpack.c.bf16 %v2118_v48, %v2117_v44  ;;  %v1678_v54 = vmul.f32 %v2118_v48, %v1663_v16  ;;  %v1691_v55 = vadd.f32 %v1675_v47, %v1674_v43 }
 0x1f4   : > { %v1710_v56 = vmul.f32 %v2117_v44, %v1677_v50 }
 0x1f5   : > { %1636 = vst [vmem:[%s2605_s21 + $0x24] sm:$0xff] %v2028_v53  ;;  %v1711_v57 = vmul.f32 %v2118_v48, %v1678_v54  ;;  %v1696_v58 = vadd.f32 %v1678_v54, %v1677_v50  ;;  %v1723_v59 = vadd.f32 %v1708_v52, %v1707_v49 }
 0x1f7   : > { %v1728_v61 = vadd.f32 %v1711_v57, %v1710_v56 }
 0x1fd   : > { %v2109_v63 = vpop.f32.mrb[8].mxu1 }
 0x1fe   : > { %v2027_v0 = vpack.c.bf16 %v2109_v63, %v2109_v63  ;;  %v1676_v1 = vmul.f32 %v2109_v63, %v1667_v62  ;;  %v1562_v2 = vpop.f32.mrb[9].mxu1 }
 0x1ff   : > { %v2023_v3 = vpack.c.bf16 %v1562_v2, %v1562_v2  ;;  %v1670_v4 = vmul.f32 %v1667_v62, %v1562_v2  ;;  %v2110_v5 = vpop.f32.mrb[10].mxu1 }
 0x200   : > { %1635 = vst.msk [vmem:[%s2605_s21 + $0x20] sm:$0xf] %vm1630_vm9, %v2027_v0  ;;  %v1709_v6 = vmul.f32 %v2109_v63, %v1676_v1  ;;  %v2029_v7 = vpack.c.bf16 %v2110_v5, %v2110_v5  ;;  %v1679_v8 = vmul.f32 %v2110_v5, %v1667_v62  ;;  %v1565_v9 = vpop.f32.mrb[11].mxu1  ;;  %v1692_v10 = vsel %vm1681_vm10, %v1676_v1, 0.0 }
 0x201   : > { %1631 = vst.msk [vmem:[%s2605_s21 + $0x8] sm:$0xf] %vm1630_vm9, %v2023_v3  ;;  %v1703_v11 = vmul.f32 %v1670_v4, %v1562_v2  ;;  %v2025_v12 = vpack.c.bf16 %v1565_v9, %v1565_v9  ;;  %v1673_v13 = vmul.f32 %v1667_v62, %v1565_v9  ;;  %v1693_v14 = vadd.f32 %v1692_v10, %v1691_v55 }
 0x202   : > { %1637 = vst.msk [vmem:[%s2605_s21 + $0x2c] sm:$0xf] %vm1630_vm9, %v2029_v7  ;;  %v1712_v15 = vmul.f32 %v2110_v5, %v1679_v8  ;;  %v1682_v16 = vsel %vm1681_vm10, %v1670_v4, 0.0  ;;  %v1697_v17 = vsel %vm1681_vm10, %v1679_v8, 0.0  ;;  %v1724_v18 = vsel %vm1681_vm10, %v1709_v6, 0.0 }
 0x203   : > { %1633 = vst.msk [vmem:[%s2605_s21 + $0x14] sm:$0xf] %vm1630_vm9, %v2025_v12  ;;  %v1706_v19 = vmul.f32 %v1673_v13, %v1565_v9  ;;  %1694 = vadd.xlane.f32.xlu0 %v1693_v14  ;;  %v1687_v20 = vsel %vm1681_vm10, %v1673_v13, 0.0  ;;  %v1683_v21 = vadd.f32 %v1682_v16, %v2608_v32  ;;  %v1714_v22 = vsel %vm1681_vm10, %v1703_v11, 0.0 }
 0x204   : > { %v1688_v23 = vadd.f32 %v1687_v20, %v1686_v36  ;;  %v1715_v24 = vadd.f32 %v1714_v22, %v1713_v37  ;;  %v1698_v25 = vadd.f32 %v1697_v17, %v1696_v58  ;;  %v1725_v26 = vadd.f32 %v1724_v18, %v1723_v59 }
 0x205   : > { %v1719_v27 = vsel %vm1681_vm10, %v1706_v19, 0.0  ;;  %v1729_v28 = vsel %vm1681_vm10, %v1712_v15, 0.0 }
 0x206   : > { %1689 = vadd.xlane.f32.xlu1 %v1688_v23  ;;  %v1720_v29 = vadd.f32 %v1719_v27, %v1718_v42  ;;  %v1730_v30 = vadd.f32 %v1729_v28, %v1728_v61 }
 0x207   : > { %1684 = vadd.xlane.f32.xlu0 %v1683_v21 }
 0x20a   : > { %1716 = vadd.xlane.f32.xlu1 %v1715_v24 }
 0x20b   : > { %1699 = vadd.xlane.f32.xlu0 %v1698_v25 }
 0x20e   : > { %1726 = vadd.xlane.f32.xlu1 %v1725_v26 }
 0x20f   : > { %1721 = vadd.xlane.f32.xlu0 %v1720_v29 }
 0x213   : > { %1731 = vadd.xlane.f32.xlu0 %v1730_v30 }
 0x290   : > { %v1695_v31 = vpop.xlane.xlu0 %1694 }
 0x293   : > { %v1690_v32 = vpop.xlane.xlu1 %1689 }
 0x294   : > { %v1685_v33 = vpop.xlane.xlu0 %1684 }
 0x297   : > { %v1717_v34 = vpop.xlane.xlu1 %1716 }
 0x298   : > { %v1734_v35 = vsel %vm1733_vm11, %v1685_v33, %v1717_v34  ;;  %v1700_v36 = vpop.xlane.xlu0 %1699 }
 0x299   : > { %1739 = vst.msk [vmem:[%s280_s25] sm:$0xff] %vm1738_vm12, %v1734_v35 }
 0x29b   : > { %v1727_v37 = vpop.xlane.xlu1 %1726 }
 0x29c   : > { %v1736_v38 = vsel %vm1733_vm11, %v1695_v31, %v1727_v37  ;;  %v1722_v39 = vpop.xlane.xlu0 %1721 }
 0x29d   : > { %1741 = vst.msk [vmem:[%s280_s25 + $0x10] sm:$0xff] %vm1738_vm12, %v1736_v38  ;;  %v1735_v40 = vsel %vm1733_vm11, %v1690_v32, %v1722_v39 }
 0x29e   : > { %1740 = vst.msk [vmem:[%s280_s25 + $0x8] sm:$0xff] %vm1738_vm12, %v1735_v40 }
 0x2a0   : > { %v1732_v41 = vpop.xlane.xlu0 %1731 }
 0x2a1   : > { %v1737_v42 = vsel %vm1733_vm11, %v1700_v36, %v1732_v41 }
 0x2a2   : > { %1742 = vst.msk [vmem:[%s280_s25 + $0x18] sm:$0xff] %vm1738_vm12, %v1737_v42 }
 0x2a3 PF: > { %s16_s17 = sadd.s32 1, %s2329_s17   ;;  %s2656_s15 = smov %s2325_s16 }
 0x2a4   : > { %p13_p3 = scmp.ge.s32.totalorder %s16_s17, 4   ;;  %s2657_s16 = smov %s2659_s19 }
 0x2a6   :  { %15 = sbr.rel (!%p13_p3) target bundleno = 2 (0x2), region = 90 }
 0x2ad   :  { %1799 = vsyncpa [#allocation3], 1 }
 0x2ae   :  { %1801 = vsyncpa [#allocation3 + $0x1], 1 }

// kernel: squeeze.14
= control target key start
LH: loop header
LB: loop body
LE: loop exit
PB: predicated region body
PF: predicated region fallthrough
CT: control target
= control target key end

     0   :  { %s37_s8 = smov 116   ;;  %vm7_vm0 = vcmask 31744   ;;  %s38_s9 = smov 120   ;;  %s55_s0 = inlined_call_operand.vmem [shape: f32[16], index: 0, kind: input, shape index: {}]   ;;  %s56_s1 = inlined_call_operand.vmem [shape: f32[4,4], index: 1, kind: output, shape index: {}]  }
   0x1   :  { %v4_v0 = vld [vmem:[%s55_s0] sm:$0x1]  ;;  %s36_s0 = smov 124  }
   0x2   :  { %5 = vst [vmem:[#allocation1] sm:$0x1] %v4_v0 }
   0x9   :  { %v9_v1 = vld [vmem:[#allocation1] sm:$0x1]  }
   0xa   :  { %v21_v2 = vld [vmem:[#allocation1] sm:$0x1]   ;;  %10 = vrot.lane.b32.xlu0 %v9_v1, %s36_s0 }
   0xb   :  { %22 = vrot.lane.b32.xlu1 %v21_v2, %s37_s8  ;;  %v6_v3 = vld [vmem:[#allocation1] sm:$0x1]  }
   0xc   :  { %v15_v4 = vld [vmem:[#allocation1] sm:$0x1]   ;;  %8 = vst.msk [vmem:[#allocation0] sm:$0x1] %vm7_vm0, %v6_v3  }
   0xe   :  { %16 = vrot.lane.b32.xlu0 %v15_v4, %s38_s9 }
  0x7c   :  { %v11_v5 = vpop.permute.xlu0 %10  }
  0x7d   :  { %v23_v6 = vpop.permute.xlu1 %22   ;;  %14 = vst.msk [vmem:[#allocation0 + $0x1] sm:$0x1] %vm7_vm0, %v11_v5  }
  0x7e   :  { %26 = vst.msk [vmem:[#allocation0 + $0x3] sm:$0x1] %vm7_vm0, %v23_v6  }
  0x80   :  { %v17_v7 = vpop.permute.xlu0 %16  }
  0x81   :  { %20 = vst.msk [vmem:[#allocation0 + $0x2] sm:$0x1] %vm7_vm0, %v17_v7  }
  0x88   :  { %v30_v8 = vld [vmem:[#allocation0] sm:$0xf] }
  0x89   :  { %32 = vst [vmem:[%s56_s1] sm:$0xf] %v30_v8 }

// kernel: generator_forward.10
= control target key start
LH: loop header
LB: loop body
LE: loop exit
PB: predicated region body
PF: predicated region fallthrough
CT: control target
= control target key end

     0   :  { %10 = vsyncpa [#allocation3], 0  ;;  %s3874_s15 = smov 0   ;;  %s3876_s16 = smov 0   ;;  %s4581_s0 = inlined_call_operand.vmem [shape: bf16[2,8,1190], index: 0, kind: input, shape index: {}]   ;;  %s4582_s1 = inlined_call_operand.vmem [shape: bf16[9,16,8], index: 1, kind: input, shape index: {}]   ;;  %s4583_s2 = inlined_call_operand.hbm [shape: bf16[1,1088], index: 2, kind: input, shape index: {}]   ;;  %s4584_s3 = inlined_call_operand.vmem [shape: bf16[2,16,1088], index: 3, kind: output, shape index: {0}]   ;;  %s4585_s4 = inlined_call_operand.vmem [shape: f32[2,1,16,2], index: 4, kind: output, shape index: {1}]  }
   0x1   :  { %s3878_s17 = smov 0  }
   0x2 LB: > { %s3333_s18 = sadd.s32 4294967295, %s3835_s17   ;;  %s28_s19 = sadd.s32 1, %s3831_s16  ;;  %s3835_s17 = sphi %s3878_s17, %s16_s17   ;;  %s3831_s16 = sphi %s3876_s16, %s4595_s16   ;;  %s3827_s15 = sphi %s3874_s15, %s4594_s15  }
   0x3   : > { %p30_p0 = scmp.ge.s32.totalorder %s28_s19, 2  ;;  %p3335_p1 = scmp.ge.s32.totalorder %s3835_s17, 1 }
   0x4   : > { %p162_p2 = scmp.lt.s32.totalorder %s3835_s17, 3  ;;  %p3899_p4 = scmp.eq.s32.totalorder %s3333_s18, 0 }
   0x5   : > { %s4597_s19 = smov (%p30_p0, %s28_s19), 0  ;;  %s3837_s22 = smov [#allocation2]  }
   0x6   : > { %p3895_p3 = pnand %p3335_p1, %p162_p2  ;;  %s184_s23 = sshll.u32 %s3837_s22, 4  ;;  %s185_s23 = int_to_ptr.vmem [resolvable:$true] %s184_s23 }
   0x7   : > { %s4590_s21 = scalar_select %p3899_p4, 1, 0 }
   0x8   : > { %s4589_s20 = scalar_select %p3895_p3, 1, 0 }
   0x9   : > { %p3720_p5 = pneg %p3895_p3  ;;  %s3781_s27 = scalar_lea.hbm %s4583_s2, 144 }
   0xa   : > { %p3782_p7 = scmp.ne.s32.totalorder %s4583_s2, %s3781_s27  ;;  %p3788_p11 = scmp.lt.u32.totalorder %s3781_s27, %s4583_s2 }
   0xb   : > { %p3907_p6 = pnand %p3899_p4, %p3720_p5 }
   0xd   : > { %p3783_p8 = pneg %p3907_p6 }
   0xf   : > { %p3784_p9 = pnand %p3783_p8, %p3782_p7 }
  0x11   : > { %p3785_p10 = pneg %p3784_p9 }
  0x13   : > { %p3790_p12 = pnand %p3788_p11, %p3785_p10 }
  0x15   : > { %3793 = shalt.err (!%p3790_p12)
}
  0x16   : > { %s3794_s6 = scalar_lea.vmem %s185_s23, 144  ;;  %s3801_s7 = scalar_lea.vmem %s185_s23, 160 }
  0x17   : > { %p3795_p13 = scmp.ne.s32.totalorder %s185_s23, %s3794_s6  ;;  %p3802_p2 = scmp.lt.s32.totalorder %s185_s23, %s185_s23 }
  0x18   : > { %p3803_p5 = scmp.lt.s32.totalorder %s3801_s7, %s3794_s6 }
  0x19   : > { %p3797_p0 = pnand %p3795_p13, %p3783_p8 }
  0x1a   : > { %p3804_p4 = por %p3803_p5, %p3802_p2 }
  0x1b   : > { %p3798_p1 = pneg %p3797_p0 }
  0x1d   : > { %p3805_p3 = pnand %p3804_p4, %p3798_p1 }
  0x1f   : > { %3808 = shalt.err (!%p3805_p3)
}
  0x20   : > { %3723 = dma.hbm_to_vmem [thread:$0]  (!%p3907_p6), %s4583_s2, 144, %s185_s23, [#allocation3]  }
  0x21   : > { %p4592_p7 = scmp.ne.s32.totalorder %s4589_s20, 0 }
  0x22   : > { %p4593_p9 = scmp.ne.s32.totalorder (!%p4592_p7), %s4590_s21, 0 }
  0x23   : > { %205 = sbr.rel (%p4592_p7) target bundleno = 718 (0x2ce), region = 32 }
  0x2a   : > { %3822 = dma.done.wait (%p4593_p9), [#allocation3], 144  }
  0x2b   : > { %3824 = vsyncadd (%p4593_p9), [#allocation3], 4294967152  ;;  %p250_p8 = scmp.lt.s32.totalorder %s3827_s15, 1  ;;  %v3838_v0 = vmov 0   ;;  %vm351_vm0 = vcmask 1043456   ;;  %vm347_vm1 = vcmask 64512  }
  0x2c   : > { %745 = vmatprep.mubr.bf16.mxu0 %v3838_v0  ;;  %411 = vmatprep.mubr.bf16.mxu1 %v3838_v0  ;;  %s3839_s14 = smov 127   ;;  %v3978_v13 = vld [vmem:[%s4582_s1] sm:$0xff]   ;;  %v3840_v15 = vmov 0.0   ;;  %vm3841_vm2 = vmmov 0   ;;  %s3842_s21 = smov 126   ;;  %vm338_vm3 = vcmask 1039360  }
  0x2d   : > { %s4599_s15 = smov (!%p250_p8, %s3827_s15), 1  ;;  %s3843_s22 = smov 94   ;;  %v4085_v27 = vld [vmem:[%s4582_s1 + $0x8] sm:$0xff]   ;;  %vm866_vm4 = vcmask 1031168   ;;  %v4112_v38 = vld [vmem:[%s4582_s1 + $0x10] sm:$0xff]   ;;  %vm1162_vm5 = vcmask 769024  }
  0x2e   : > { %s3714_s10 = smul.u32 40, %s4599_s15  ;;  %s3844_s23 = smov 93   ;;  %vm1458_vm6 = vcmask 760832   ;;  %vm1754_vm7 = vcmask 752640   ;;  %vm2054_vm8 = vcmask 490496   ;;  %vm2353_vm9 = vcmask 482304  }
  0x2f   : > { %s3845_s24 = smov 92   ;;  %s3846_s25 = smov 60   ;;  %vm2652_vm10 = vcmask 474112   ;;  %vm2983_vm11 = vcmask 519168   ;;  %vm3104_vm12 = vcmask 523264   ;;  %vm3160_vm13 = vcmask 7168  }
  0x30   : > { %s3943_s13 = scalar_lea.vmem %s4581_s0, %s3714_s10  ;;  %s3847_s26 = smov 59   ;;  %vm3163_vm14 = vcmask 15360  }
  0x31   : > { %v283_v1 = vld [vmem:[%s3943_s13 + $0x8] sm:$0xff]  ;;  %v282_v2 = vld [vmem:[%s3943_s13] sm:$0xff]  ;;  %v284_v3 = vld [vmem:[%s3943_s13 + $0x10] sm:$0xff]  ;;  %s3848_s5 = smov 58  }
  0x32   : > { %v3948_v4 = vcombine.low %v283_v1, %v283_v1  ;;  %v3950_v5 = vcombine.low %v282_v2, %v282_v2  ;;  %v3953_v6 = vld [vmem:[%s3943_s13 + $0x20] sm:$0xff]  ;;  %v3955_v7 = vcombine.low %v284_v3, %v284_v3  ;;  %v3957_v8 = vcombine.high %v284_v3, %v284_v3  ;;  %v285_v16 = vld [vmem:[%s3943_s13 + $0x18] sm:$0xff] }
  0x33   : > { %v3963_v9 = vcombine.high %v283_v1, %v283_v1  ;;  %v3965_v10 = vcombine.high %v282_v2, %v282_v2  ;;  %v3969_v11 = vcombine.low %v3953_v6, %v3953_v6  ;;  %v4000_v17 = vcombine.low %v285_v16, %v285_v16 }
  0x34   : > { %324 = vrot.lane.b32.xlu1 %v3948_v4, %s3839_s14  ;;  %320 = vrot.lane.b32.xlu0 %v3950_v5, %s3839_s14  ;;  %v613_v12 = vsel %vm351_vm0, %v3955_v7, 0  ;;  %v4013_v18 = vcombine.high %v285_v16, %v285_v16  ;;  %v4063_v19 = vcombine.high %v3953_v6, %v3953_v6  ;;  %v601_v6 = vsel %vm351_vm0, %v3950_v5, 0 }
  0x35   : > { %3371 = vmatprep.subr.msk.bf16.mxu0 %vm351_vm0, %v3957_v8  ;;  %v625_v14 = vsel %vm351_vm0, %v3969_v11, 0  ;;  %v607_v16 = vsel %vm351_vm0, %v3948_v4, 0 }
  0x36   : > { %714 = vmatpush1.bf16.msra.mxu0 %v613_v12 }
  0x37   : > { %3508 = vmatprep.subr.bf16.mxu0 %v3840_v15 }
  0x38   : > { %326 = vrot.lane.b32.xlu1 %v3963_v9, %s3839_s14  ;;  %322 = vrot.lane.b32.xlu0 %v3965_v10, %s3839_s14 }
  0x39   : > { %3372 = vmatmul.mubr.msk.bf16.vlgmr.msra.gmra.mrb[0].mxu0 %vm347_vm1, %v3978_v13 }
  0x3a   : > { %3509 = vmatpush3.bf16.msra.mxu0 %v625_v14  ;;  %3510 = vmatprep.mubr.msk.bf16.mxu0 %vm3841_vm2, %v3840_v15 }
  0x3c   : > { %848 = vrot.lane.b32.xlu1 %v3950_v5, %s3842_s21  ;;  %328 = vrot.lane.b32.xlu0 %v3955_v7, %s3839_s14 }
  0x40   : > { %852 = vrot.lane.b32.xlu1 %v3948_v4, %s3842_s21  ;;  %850 = vrot.lane.b32.xlu0 %v3965_v10, %s3842_s21 }
  0x41   : > { %3511 = vmatmul.mubr.msk.bf16.vlgmr.msra.gmra.mrb[4].mxu0 %vm347_vm1, %v3978_v13 }
  0x42   : > { %937 = vmatprep.mubr.bf16.mxu0 %v3838_v0 }
  0x44   : > { %332 = vrot.lane.b32.xlu1 %v4000_v17, %s3839_s14  ;;  %330 = vrot.lane.b32.xlu0 %v3957_v8, %s3839_s14 }
  0x48   : > { %858 = vrot.lane.b32.xlu1 %v3957_v8, %s3842_s21  ;;  %856 = vrot.lane.b32.xlu0 %v3955_v7, %s3842_s21 }
  0x4c   : > { %334 = vrot.lane.b32.xlu1 %v4013_v18, %s3839_s14  ;;  %860 = vrot.lane.b32.xlu0 %v4000_v17, %s3842_s21 }
  0x50   : > { %336 = vrot.lane.b32.xlu0 %v3969_v11, %s3839_s14  ;;  %864 = vrot.lane.b32.xlu1 %v3969_v11, %s3842_s21 }
  0x54   : > { %1144 = vrot.lane.b32.xlu0 %v3950_v5, %s3843_s22  ;;  %1146 = vrot.lane.b32.xlu1 %v3965_v10, %s3843_s22 }
  0x58   : > { %1148 = vrot.lane.b32.xlu0 %v3948_v4, %s3843_s22  ;;  %1152 = vrot.lane.b32.xlu1 %v3955_v7, %s3843_s22 }
  0x5c   : > { %1154 = vrot.lane.b32.xlu0 %v3957_v8, %s3843_s22  ;;  %1156 = vrot.lane.b32.xlu1 %v4000_v17, %s3843_s22 }
  0x60   : > { %1160 = vrot.lane.b32.xlu0 %v3969_v11, %s3843_s22  ;;  %1440 = vrot.lane.b32.xlu1 %v3950_v5, %s3844_s23 }
  0x64   : > { %1442 = vrot.lane.b32.xlu0 %v3965_v10, %s3844_s23  ;;  %1444 = vrot.lane.b32.xlu1 %v3948_v4, %s3844_s23 }
  0x68   : > { %854 = vrot.lane.b32.xlu0 %v3963_v9, %s3842_s21  ;;  %1448 = vrot.lane.b32.xlu1 %v3955_v7, %s3844_s23 }
  0x6c   : > { %1450 = vrot.lane.b32.xlu0 %v3957_v8, %s3844_s23  ;;  %1452 = vrot.lane.b32.xlu1 %v4000_v17, %s3844_s23 }
  0x70   : > { %862 = vrot.lane.b32.xlu0 %v4013_v18, %s3842_s21  ;;  %1456 = vrot.lane.b32.xlu1 %v3969_v11, %s3844_s23 }
  0x74   : > { %1150 = vrot.lane.b32.xlu0 %v3963_v9, %s3843_s22  ;;  %1736 = vrot.lane.b32.xlu1 %v3950_v5, %s3845_s24 }
  0x78   : > { %1738 = vrot.lane.b32.xlu0 %v3965_v10, %s3845_s24  ;;  %1740 = vrot.lane.b32.xlu1 %v3948_v4, %s3845_s24 }
  0x7c   : > { %1158 = vrot.lane.b32.xlu0 %v4013_v18, %s3843_s22  ;;  %1744 = vrot.lane.b32.xlu1 %v3955_v7, %s3845_s24  ;;  %s3715_s22 = smul.u32 72, %s4599_s15 }
  0x80   : > { %1746 = vrot.lane.b32.xlu0 %v3957_v8, %s3845_s24  ;;  %1748 = vrot.lane.b32.xlu1 %v4000_v17, %s3845_s24 }
  0x84   : > { %1446 = vrot.lane.b32.xlu0 %v3963_v9, %s3844_s23  ;;  %1752 = vrot.lane.b32.xlu1 %v3969_v11, %s3845_s24 }
  0x88   : > { %1454 = vrot.lane.b32.xlu0 %v4013_v18, %s3844_s23  ;;  %2034 = vrot.lane.b32.xlu1 %v3950_v5, %s3846_s25 }
  0x8c   : > { %2036 = vrot.lane.b32.xlu0 %v3965_v10, %s3846_s25  ;;  %2038 = vrot.lane.b32.xlu1 %v3948_v4, %s3846_s25 }
  0x90   : > { %1742 = vrot.lane.b32.xlu0 %v3963_v9, %s3845_s24  ;;  %2042 = vrot.lane.b32.xlu1 %v3955_v7, %s3846_s25 }
  0x94   : > { %2044 = vrot.lane.b32.xlu0 %v3957_v8, %s3846_s25  ;;  %2046 = vrot.lane.b32.xlu1 %v4000_v17, %s3846_s25 }
  0x98   : > { %1750 = vrot.lane.b32.xlu0 %v4013_v18, %s3845_s24  ;;  %2050 = vrot.lane.b32.xlu1 %v3969_v11, %s3846_s25 }
  0x9c   : > { %2040 = vrot.lane.b32.xlu1 %v3963_v9, %s3846_s25  ;;  %2052 = vrot.lane.b32.xlu0 %v4063_v19, %s3846_s25 }
  0xa0   : > { %2335 = vrot.lane.b32.xlu1 %v3965_v10, %s3847_s26  ;;  %2333 = vrot.lane.b32.xlu0 %v3950_v5, %s3847_s26 }
  0xa4   : > { %2048 = vrot.lane.b32.xlu1 %v4013_v18, %s3846_s25  ;;  %2337 = vrot.lane.b32.xlu0 %v3948_v4, %s3847_s26  ;;  %s4526_s25 = scalar_lea.vmem %s4584_s3, %s3715_s22 }
  0xa6   : > { %v325_v20 = vpop.permute.xlu1 %324  ;;  %v321_v21 = vpop.permute.xlu0 %320 }
  0xa8   : > { %2343 = vrot.lane.b32.xlu1 %v3957_v8, %s3847_s26  ;;  %2341 = vrot.lane.b32.xlu0 %v3955_v7, %s3847_s26 }
  0xaa   : > { %v327_v22 = vpop.permute.xlu1 %326  ;;  %v323_v23 = vpop.permute.xlu0 %322 }
  0xab   : > { %v340_v24 = vsel %vm338_vm3, %v323_v23, %v325_v20  ;;  %v339_v25 = vsel %vm338_vm3, %v321_v21, %v323_v23  ;;  %v341_v28 = vsel %vm338_vm3, %v325_v20, %v327_v22  ;;  %v619_v23 = vsel %vm351_vm0, %v4000_v17, 0 }
  0xac   : > { %3357 = vmatprep.subr.msk.bf16.mxu1 %vm351_vm0, %v340_v24  ;;  %v353_v26 = vsel %vm351_vm0, %v339_v25, 0  ;;  %2339 = vrot.lane.b32.xlu1 %v3963_v9, %s3847_s26  ;;  %v359_v32 = vsel %vm351_vm0, %v341_v28, 0 }
  0xad   : > { %380 = vmatpush1.bf16.msra.mxu1 %v353_v26  ;;  %2345 = vrot.lane.b32.xlu0 %v4000_v17, %s3847_s26 }
  0xae   : > { %v849_v29 = vpop.permute.xlu1 %848  ;;  %v329_v30 = vpop.permute.xlu0 %328 }
  0xaf   : > { %v342_v31 = vsel %vm338_vm3, %v327_v22, %v329_v30 }
  0xb0   : > { %3358 = vmatmul.mubr.msk.bf16.vlgmr.msra.gmra.mrb[0].mxu1 %vm347_vm1, %v4085_v27  ;;  %3359 = vmatprep.subr.msk.bf16.mxu1 %vm351_vm0, %v342_v31 }
  0xb1   : > { %423 = vmatpush1.bf16.msra.mxu1 %v359_v32  ;;  %454 = vmatprep.mubr.bf16.mxu1 %v3838_v0 }
  0xb2   : > { %v4098_v33 = vpop.permute.xlu1 %852  ;;  %v851_v34 = vpop.permute.xlu0 %850  ;;  %2349 = vrot.lane.b32.xlu0 %v3969_v11, %s3847_s26  ;;  %2351 = vrot.lane.b32.xlu1 %v4063_v19, %s3847_s26 }
  0xb3   : > { %v867_v35 = vsel %vm866_vm4, %v849_v29, %v851_v34  ;;  %v868_v36 = vsel %vm866_vm4, %v851_v34, %v4098_v33 }
  0xb4   : > { %v879_v37 = vsel %vm351_vm0, %v867_v35, 0  ;;  %3379 = vmatprep.subr.msk.bf16.mxu0 %vm351_vm0, %v868_v36  ;;  %v4268_v35 = vld [vmem:[%s4582_s1 + $0x20] sm:$0xff]  }
  0xb5   : > { %906 = vmatpush1.bf16.msra.mxu0 %v879_v37 }
  0xb6   : > { %v333_v39 = vpop.permute.xlu1 %332  ;;  %v331_v40 = vpop.permute.xlu0 %330  ;;  %2347 = vrot.lane.b32.xlu0 %v4013_v18, %s3847_s26  ;;  %2632 = vrot.lane.b32.xlu1 %v3950_v5, %s3848_s5  ;;  %s3473_s26 = sshll.u32 %s4599_s15, 4 }
  0xb7   : > { %v343_v41 = vsel %vm338_vm3, %v329_v30, %v331_v40  ;;  %v344_v42 = vsel %vm338_vm3, %v331_v40, %v333_v39  ;;  %s280_s29 = scalar_lea.vmem %s4585_s4, %s3473_s26 }
  0xb8   : > { %v365_v43 = vsel %vm351_vm0, %v343_v41, 0  ;;  %3360 = vmatmul.mubr.msk.bf16.vlgmr.msra.gmra.mrb[4].mxu1 %vm347_vm1, %v4085_v27  ;;  %3361 = vmatprep.subr.msk.bf16.mxu1 %vm351_vm0, %v344_v42 }
  0xb9   : > { %466 = vmatpush1.bf16.msra.mxu1 %v365_v43  ;;  %3380 = vmatmul.mubr.msk.bf16.vlgmr.msra.gmra.mrb[8].mxu0 %vm347_vm1, %v4112_v38 }
  0xba   : > { %v859_v44 = vpop.permute.xlu1 %858  ;;  %v4126_v45 = vpop.permute.xlu0 %856  ;;  %497 = vmatprep.mubr.bf16.mxu1 %v3838_v0  ;;  %1023 = vmatprep.mubr.bf16.mxu0 %v3838_v0 }
  0xbb   : > { %2636 = vrot.lane.b32.xlu1 %v3948_v4, %s3848_s5  ;;  %2634 = vrot.lane.b32.xlu0 %v3965_v10, %s3848_s5  ;;  %v871_v46 = vsel %vm866_vm4, %v4126_v45, %v859_v44 }
  0xbc   : > { %v891_v50 = vsel %vm351_vm0, %v871_v46, 0 }
  0xbe   : > { %v335_v47 = vpop.permute.xlu1 %334  ;;  %v4136_v48 = vpop.permute.xlu0 %860 }
  0xbf   : > { %v872_v49 = vsel %vm866_vm4, %v859_v44, %v4136_v48  ;;  %2640 = vrot.lane.b32.xlu1 %v3955_v7, %s3848_s5  ;;  %2638 = vrot.lane.b32.xlu0 %v3963_v9, %s3848_s5  ;;  %v345_v51 = vsel %vm338_vm3, %v333_v39, %v335_v47 }
  0xc0   : > { %3362 = vmatmul.mubr.msk.bf16.vlgmr.msra.gmra.mrb[8].mxu1 %vm347_vm1, %v4085_v27  ;;  %3383 = vmatprep.subr.msk.bf16.mxu0 %vm351_vm0, %v872_v49  ;;  %v371_v56 = vsel %vm351_vm0, %v345_v51, 0 }
  0xc1   : > { %992 = vmatpush1.bf16.msra.mxu0 %v891_v50  ;;  %540 = vmatprep.mubr.bf16.mxu1 %v3838_v0 }
  0xc2   : > { %v337_v52 = vpop.permute.xlu0 %336  ;;  %v4150_v53 = vpop.permute.xlu1 %864  ;;  %3514 = vmatprep.subr.bf16.mxu0 %v3840_v15 }
  0xc3   : > { %v346_v54 = vsel %vm338_vm3, %v335_v47, %v337_v52  ;;  %v903_v55 = vsel %vm351_vm0, %v4150_v53, 0  ;;  %2644 = vrot.lane.b32.xlu1 %v4000_v17, %s3848_s5  ;;  %2642 = vrot.lane.b32.xlu0 %v3957_v8, %s3848_s5  ;;  %v377_v60 = vsel %vm351_vm0, %v337_v52, 0 }
  0xc4   : > { %3363 = vmatprep.subr.msk.bf16.mxu1 %vm351_vm0, %v346_v54  ;;  %3384 = vmatmul.mubr.msk.bf16.vlgmr.msra.gmra.mrb[0].mxu0 %vm347_vm1, %v4112_v38 }
  0xc5   : > { %509 = vmatpush1.bf16.msra.mxu1 %v371_v56  ;;  %3515 = vmatpush3.bf16.msra.mxu0 %v903_v55 }
  0xc6   : > { %v1145_v57 = vpop.permute.xlu0 %1144  ;;  %3502 = vmatprep.subr.bf16.mxu1 %v3840_v15  ;;  %v1147_v58 = vpop.permute.xlu1 %1146  ;;  %3516 = vmatprep.mubr.msk.bf16.mxu0 %vm3841_vm2, %v3840_v15 }
  0xc7   : > { %v1163_v59 = vsel %vm1162_vm5, %v1145_v57, %v1147_v58  ;;  %2648 = vrot.lane.b32.xlu1 %v3969_v11, %s3848_s5  ;;  %2646 = vrot.lane.b32.xlu0 %v4013_v18, %s3848_s5 }
  0xc8   : > { %3364 = vmatmul.mubr.msk.bf16.vlgmr.msra.gmra.mrb[12].mxu1 %vm347_vm1, %v4085_v27  ;;  %v1175_v61 = vsel %vm351_vm0, %v1163_v59, 0 }
  0xc9   : > { %3503 = vmatpush3.bf16.msra.mxu1 %v377_v60  ;;  %3504 = vmatprep.mubr.msk.bf16.mxu1 %vm3841_vm2, %v3840_v15 }
  0xca   : > { %v4178_v62 = vpop.permute.xlu0 %1148  ;;  %v4180_v63 = vpop.permute.xlu1 %1152  ;;  %3367 = vmatprep.subr.msk.bf16.mxu1 %vm351_vm0, %v3965_v10  ;;  %v4205_v10 = vld [vmem:[%s4582_s1 + $0x18] sm:$0xff]  }
  0xcb   : > { %v1164_v1 = vsel %vm1162_vm5, %v1147_v58, %v4178_v62  ;;  %2650 = vrot.lane.b32.xlu0 %v4063_v19, %s3848_s5 }
  0xcc   : > { %3517 = vmatmul.mubr.msk.bf16.vlgmr.msra.gmra.mrb[4].mxu0 %vm347_vm1, %v4112_v38  ;;  %3391 = vmatprep.subr.msk.bf16.mxu0 %vm351_vm0, %v1164_v1 }
  0xcd   : > { %1202 = vmatpush1.bf16.msra.mxu0 %v1175_v61  ;;  %1233 = vmatprep.mubr.bf16.mxu0 %v3838_v0 }
  0xce   : > { %v1155_v2 = vpop.permute.xlu0 %1154  ;;  %v4192_v3 = vpop.permute.xlu1 %1156 }
  0xcf   : > { %v1167_v7 = vsel %vm1162_vm5, %v4180_v63, %v1155_v2  ;;  %v1168_v8 = vsel %vm1162_vm5, %v1155_v2, %v4192_v3 }
  0xd0   : > { %3505 = vmatmul.mubr.msk.bf16.vlgmr.msra.gmra.mrb[16].mxu1 %vm347_vm1, %v4085_v27  ;;  %3395 = vmatprep.subr.msk.bf16.mxu0 %vm351_vm0, %v1168_v8  ;;  %v1187_v5 = vsel %vm351_vm0, %v1167_v7, 0 }
  0xd1   : > { %628 = vmatpush1.bf16.msra.mxu1 %v601_v6  ;;  %659 = vmatprep.mubr.bf16.mxu1 %v3838_v0 }
  0xd2   : > { %v4210_v11 = vpop.permute.xlu0 %1160  ;;  %v1441_v12 = vpop.permute.xlu1 %1440  ;;  %3369 = vmatprep.subr.msk.bf16.mxu1 %vm351_vm0, %v3963_v9 }
  0xd3   : > { %v1199_v9 = vsel %vm351_vm0, %v4210_v11, 0 }
  0xd4   : > { %3392 = vmatmul.mubr.msk.bf16.vlgmr.msra.gmra.mrb[8].mxu0 %vm347_vm1, %v4205_v10 }
  0xd5   : > { %1288 = vmatpush1.bf16.msra.mxu0 %v1187_v5  ;;  %1319 = vmatprep.mubr.bf16.mxu0 %v3838_v0 }
  0xd6   : > { %v1443_v14 = vpop.permute.xlu0 %1442  ;;  %v4219_v19 = vpop.permute.xlu1 %1444  ;;  %3520 = vmatprep.subr.bf16.mxu0 %v3840_v15 }
  0xd7   : > { %v1460_v4 = vsel %vm1458_vm6, %v1443_v14, %v4219_v19 }
  0xd8   : > { %3368 = vmatmul.mubr.msk.bf16.vlgmr.msra.gmra.mrb[0].mxu1 %vm347_vm1, %v3978_v13 }
  0xd9   : > { %671 = vmatpush1.bf16.msra.mxu1 %v607_v16  ;;  %702 = vmatprep.mubr.bf16.mxu1 %v3838_v0 }
  0xda   : > { %v855_v20 = vpop.permute.xlu0 %854  ;;  %3373 = vmatprep.subr.msk.bf16.mxu1 %vm351_vm0, %v4013_v18  ;;  %v4229_v21 = vpop.permute.xlu1 %1448  ;;  %v1459_v18 = vsel %vm1458_vm6, %v1441_v12, %v1443_v14 }
  0xdb   : > { %v870_v25 = vsel %vm866_vm4, %v855_v20, %v4126_v45  ;;  %v1471_v26 = vsel %vm351_vm0, %v1459_v18, 0  ;;  %v869_v29 = vsel %vm866_vm4, %v4098_v33, %v855_v20 }
  0xdc   : > { %3396 = vmatmul.mubr.msk.bf16.vlgmr.msra.gmra.mrb[0].mxu0 %vm347_vm1, %v4205_v10  ;;  %v885_v34 = vsel %vm351_vm0, %v869_v29, 0  ;;  %v4396_v29 = vld [vmem:[%s4582_s1 + $0x30] sm:$0xff]  }
  0xdd   : > { %3521 = vmatpush3.bf16.msra.mxu0 %v1199_v9  ;;  %3522 = vmatprep.mubr.msk.bf16.mxu0 %vm3841_vm2, %v3840_v15 }
  0xde   : > { %v1451_v22 = vpop.permute.xlu0 %1450  ;;  %3403 = vmatprep.subr.msk.bf16.mxu0 %vm351_vm0, %v1460_v4  ;;  %v4240_v24 = vpop.permute.xlu1 %1452 }
  0xdf   : > { %v1464_v28 = vsel %vm1458_vm6, %v1451_v22, %v4240_v24  ;;  %v1463_v32 = vsel %vm1458_vm6, %v4229_v21, %v1451_v22 }
  0xe0   : > { %3370 = vmatmul.mubr.msk.bf16.vlgmr.msra.gmra.mrb[4].mxu1 %vm347_vm1, %v3978_v13  ;;  %v1483_v36 = vsel %vm351_vm0, %v1463_v32, 0 }
  0xe1   : > { %757 = vmatpush1.bf16.msra.mxu1 %v619_v23  ;;  %788 = vmatprep.mubr.bf16.mxu1 %v3838_v0 }
  0xe2   : > { %3381 = vmatprep.subr.msk.bf16.mxu1 %vm351_vm0, %v870_v25  ;;  %v863_v17 = vpop.permute.xlu0 %862  ;;  %v4250_v27 = vpop.permute.xlu1 %1456 }
  0xe3   : > { %v874_v33 = vsel %vm866_vm4, %v863_v17, %v4150_v53  ;;  %v1495_v44 = vsel %vm351_vm0, %v4250_v27, 0 }
  0xe4   : > { %3523 = vmatmul.mubr.msk.bf16.vlgmr.msra.gmra.mrb[4].mxu0 %vm347_vm1, %v4205_v10 }
  0xe5   : > { %1498 = vmatpush1.bf16.msra.mxu0 %v1471_v26  ;;  %1529 = vmatprep.mubr.bf16.mxu0 %v3838_v0 }
  0xe6   : > { %v1151_v30 = vpop.permute.xlu0 %1150  ;;  %3407 = vmatprep.subr.msk.bf16.mxu0 %vm351_vm0, %v1464_v28  ;;  %v1737_v31 = vpop.permute.xlu1 %1736 }
  0xe7   : > { %v1166_v43 = vsel %vm1162_vm5, %v1151_v30, %v4180_v63 }
  0xe8   : > { %3374 = vmatmul.mubr.msk.bf16.vlgmr.msra.gmra.mrb[12].mxu1 %vm347_vm1, %v3978_v13  ;;  %v873_v13 = vsel %vm866_vm4, %v4136_v48, %v863_v17  ;;  %v1165_v48 = vsel %vm1162_vm5, %v4178_v62, %v1151_v30  ;;  %v4334_v62 = vld [vmem:[%s4582_s1 + $0x28] sm:$0xff]  }
  0xe9   : > { %949 = vmatpush1.bf16.msra.mxu1 %v885_v34  ;;  %980 = vmatprep.mubr.bf16.mxu1 %v3838_v0  ;;  %v897_v42 = vsel %vm351_vm0, %v873_v13, 0  ;;  %v1181_v52 = vsel %vm351_vm0, %v1165_v48, 0 }
  0xea   : > { %3385 = vmatprep.subr.msk.bf16.mxu1 %vm351_vm0, %v874_v33  ;;  %v1739_v37 = vpop.permute.xlu0 %1738  ;;  %v4275_v39 = vpop.permute.xlu1 %1740 }
  0xeb   : > { %v1756_v47 = vsel %vm1754_vm7, %v1739_v37, %v4275_v39  ;;  %v1755_v51 = vsel %vm1754_vm7, %v1737_v31, %v1739_v37 }
  0xec   : > { %3404 = vmatmul.mubr.msk.bf16.vlgmr.msra.gmra.mrb[8].mxu0 %vm347_vm1, %v4268_v35  ;;  %v1767_v54 = vsel %vm351_vm0, %v1755_v51, 0 }
  0xed   : > { %1584 = vmatpush1.bf16.msra.mxu0 %v1483_v36  ;;  %1615 = vmatprep.mubr.bf16.mxu0 %v3838_v0 }
  0xee   : > { %v1159_v40 = vpop.permute.xlu0 %1158  ;;  %v4282_v41 = vpop.permute.xlu1 %1744  ;;  %3526 = vmatprep.subr.bf16.mxu0 %v3840_v15 }
  0xef   : > { %v1170_v53 = vsel %vm1162_vm5, %v1159_v40, %v4210_v11 }
  0xf0   : > { %3382 = vmatmul.mubr.msk.bf16.vlgmr.msra.gmra.mrb[4].mxu1 %vm347_vm1, %v4112_v38 }
  0xf1   : > { %1035 = vmatpush1.bf16.msra.mxu1 %v897_v42  ;;  %1066 = vmatprep.mubr.bf16.mxu1 %v3838_v0 }
  0xf2   : > { %3393 = vmatprep.subr.msk.bf16.mxu1 %vm351_vm0, %v1166_v43  ;;  %v1747_v45 = vpop.permute.xlu0 %1746  ;;  %v4294_v46 = vpop.permute.xlu1 %1748 }
  0xf3   : > { %v1760_v57 = vsel %vm1754_vm7, %v1747_v45, %v4294_v46  ;;  %v1759_v60 = vsel %vm1754_vm7, %v4282_v41, %v1747_v45 }
  0xf4   : > { %3408 = vmatmul.mubr.msk.bf16.vlgmr.msra.gmra.mrb[0].mxu0 %vm347_vm1, %v4268_v35  ;;  %v1779_v1 = vsel %vm351_vm0, %v1759_v60, 0 }
  0xf5   : > { %3527 = vmatpush3.bf16.msra.mxu0 %v1495_v44  ;;  %3528 = vmatprep.mubr.msk.bf16.mxu0 %vm3841_vm2, %v3840_v15 }
  0xf6   : > { %v1447_v49 = vpop.permute.xlu0 %1446  ;;  %3415 = vmatprep.subr.msk.bf16.mxu0 %vm351_vm0, %v1756_v47  ;;  %v4305_v50 = vpop.permute.xlu1 %1752 }
  0xf7   : > { %v1462_v63 = vsel %vm1458_vm6, %v1447_v49, %v4229_v21  ;;  %v1461_v6 = vsel %vm1458_vm6, %v4219_v19, %v1447_v49  ;;  %v1791_v12 = vsel %vm351_vm0, %v4305_v50, 0 }
  0xf8   : > { %3386 = vmatmul.mubr.msk.bf16.vlgmr.msra.gmra.mrb[12].mxu1 %vm347_vm1, %v4112_v38  ;;  %v1169_v38 = vsel %vm1162_vm5, %v4192_v3, %v1159_v40  ;;  %v1477_v5 = vsel %vm351_vm0, %v1461_v6, 0 }
  0xf9   : > { %1245 = vmatpush1.bf16.msra.mxu1 %v1181_v52  ;;  %1276 = vmatprep.mubr.bf16.mxu1 %v3838_v0  ;;  %v1193_v61 = vsel %vm351_vm0, %v1169_v38, 0 }
  0xfa   : > { %3397 = vmatprep.subr.msk.bf16.mxu1 %vm351_vm0, %v1170_v53  ;;  %v1455_v55 = vpop.permute.xlu0 %1454  ;;  %v2035_v56 = vpop.permute.xlu1 %2034 }
  0xfb   : > { %v1466_v11 = vsel %vm1458_vm6, %v1455_v55, %v4250_v27 }
  0xfc   : > { %3529 = vmatmul.mubr.msk.bf16.vlgmr.msra.gmra.mrb[4].mxu0 %vm347_vm1, %v4268_v35 }
  0xfd   : > { %1794 = vmatpush1.bf16.msra.mxu0 %v1767_v54  ;;  %1825 = vmatprep.mubr.bf16.mxu0 %v3838_v0 }
  0xfe   : > { %v2037_v58 = vpop.permute.xlu0 %2036  ;;  %3419 = vmatprep.subr.msk.bf16.mxu0 %vm351_vm0, %v1760_v57  ;;  %v4324_v59 = vpop.permute.xlu1 %2038  ;;  %v3779_v57 = vld [vmem:[%s4582_s1 + $0x38] sm:$0xff]  }
  0xff   : > { %v2056_v19 = vsel %vm2054_vm8, %v2037_v58, %v4324_v59  ;;  %v2055_v21 = vsel %vm2054_vm8, %v2035_v56, %v2037_v58 }
 0x100   : > { %3394 = vmatmul.mubr.msk.bf16.vlgmr.msra.gmra.mrb[4].mxu1 %vm347_vm1, %v4205_v10  ;;  %v2068_v23 = vsel %vm351_vm0, %v2055_v21, 0 }
 0x101   : > { %1331 = vmatpush1.bf16.msra.mxu1 %v1193_v61  ;;  %1362 = vmatprep.mubr.bf16.mxu1 %v3838_v0 }
 0x102   : > { %3405 = vmatprep.subr.msk.bf16.mxu1 %vm351_vm0, %v1462_v63  ;;  %v1743_v2 = vpop.permute.xlu0 %1742  ;;  %v4341_v3 = vpop.permute.xlu1 %2042 }
 0x103   : > { %v1758_v22 = vsel %vm1754_vm7, %v1743_v2, %v4282_v41  ;;  %v1757_v26 = vsel %vm1754_vm7, %v4275_v39, %v1743_v2 }
 0x104   : > { %3416 = vmatmul.mubr.msk.bf16.vlgmr.msra.gmra.mrb[8].mxu0 %vm347_vm1, %v4334_v62  ;;  %v1773_v28 = vsel %vm351_vm0, %v1757_v26, 0 }
 0x105   : > { %1880 = vmatpush1.bf16.msra.mxu0 %v1779_v1  ;;  %1911 = vmatprep.mubr.bf16.mxu0 %v3838_v0 }
 0x106   : > { %v2045_v7 = vpop.permute.xlu0 %2044  ;;  %v4348_v8 = vpop.permute.xlu1 %2046  ;;  %3532 = vmatprep.subr.bf16.mxu0 %v3840_v15 }
 0x107   : > { %v2060_v25 = vsel %vm2054_vm8, %v2045_v7, %v4348_v8  ;;  %v2059_v27 = vsel %vm2054_vm8, %v4341_v3, %v2045_v7 }
 0x108   : > { %3398 = vmatmul.mubr.msk.bf16.vlgmr.msra.gmra.mrb[12].mxu1 %vm347_vm1, %v4205_v10  ;;  %v1465_v10 = vsel %vm1458_vm6, %v4240_v24, %v1455_v55  ;;  %v2080_v32 = vsel %vm351_vm0, %v2059_v27, 0 }
 0x109   : > { %1541 = vmatpush1.bf16.msra.mxu1 %v1477_v5  ;;  %1572 = vmatprep.mubr.bf16.mxu1 %v3838_v0  ;;  %v1489_v4 = vsel %vm351_vm0, %v1465_v10, 0 }
 0x10a   : > { %3409 = vmatprep.subr.msk.bf16.mxu1 %vm351_vm0, %v1466_v11  ;;  %v1751_v14 = vpop.permute.xlu0 %1750  ;;  %v2051_v16 = vpop.permute.xlu1 %2050 }
 0x10b   : > { %v1762_v31 = vsel %vm1754_vm7, %v1751_v14, %v4305_v50  ;;  %v1761_v33 = vsel %vm1754_vm7, %v4294_v46, %v1751_v14 }
 0x10c   : > { %3420 = vmatmul.mubr.msk.bf16.vlgmr.msra.gmra.mrb[0].mxu0 %vm347_vm1, %v4334_v62  ;;  %v1785_v37 = vsel %vm351_vm0, %v1761_v33, 0 }
 0x10d   : > { %3533 = vmatpush3.bf16.msra.mxu0 %v1791_v12  ;;  %3534 = vmatprep.mubr.msk.bf16.mxu0 %vm3841_vm2, %v3840_v15 }
 0x10e   : > { %3428 = vmatprep.subr.msk.bf16.mxu0 %vm351_vm0, %v2056_v19  ;;  %v2041_v9 = vpop.permute.xlu1 %2040  ;;  %v2053_v20 = vpop.permute.xlu0 %2052 }
 0x10f   : > { %v2063_v36 = vsel %vm2054_vm8, %v2051_v16, %v2053_v20  ;;  %v2058_v39 = vsel %vm2054_vm8, %v2041_v9, %v4341_v3  ;;  %v2057_v43 = vsel %vm2054_vm8, %v4324_v59, %v2041_v9 }
 0x110   : > { %3406 = vmatmul.mubr.msk.bf16.vlgmr.msra.gmra.mrb[4].mxu1 %vm347_vm1, %v4268_v35  ;;  %v2092_v13 = vsel %vm351_vm0, %v2063_v36, 0  ;;  %v2074_v47 = vsel %vm351_vm0, %v2057_v43, 0 }
 0x111   : > { %1627 = vmatpush1.bf16.msra.mxu1 %v1489_v4  ;;  %1658 = vmatprep.mubr.bf16.mxu1 %v3838_v0 }
 0x112   : > { %3417 = vmatprep.subr.msk.bf16.mxu1 %vm351_vm0, %v1758_v22  ;;  %v2336_v24 = vpop.permute.xlu1 %2335  ;;  %v2334_v18 = vpop.permute.xlu0 %2333 }
 0x113   : > { %v2354_v46 = vsel %vm2353_vm9, %v2334_v18, %v2336_v24 }
 0x114   : > { %3535 = vmatmul.mubr.msk.bf16.vlgmr.msra.gmra.mrb[4].mxu0 %vm347_vm1, %v4334_v62  ;;  %v2367_v49 = vsel %vm351_vm0, %v2354_v46, 0 }
 0x115   : > { %2095 = vmatpush1.bf16.msra.mxu0 %v2068_v23  ;;  %2126 = vmatprep.mubr.bf16.mxu0 %v3838_v0  ;;  %v3780_v23 = vld [vmem:[%s4582_s1 + $0x40] sm:$0xff]  }
 0x116   : > { %3432 = vmatprep.subr.msk.bf16.mxu0 %vm351_vm0, %v2060_v25  ;;  %v4386_v17 = vpop.permute.xlu0 %2337  ;;  %v2049_v30 = vpop.permute.xlu1 %2048 }
 0x117   : > { %v2355_v42 = vsel %vm2353_vm9, %v2336_v24, %v4386_v17  ;;  %v2062_v45 = vsel %vm2054_vm8, %v2049_v30, %v2051_v16  ;;  %v2061_v52 = vsel %vm2054_vm8, %v4348_v8, %v2049_v30 }
 0x118   : > { %3410 = vmatmul.mubr.msk.bf16.vlgmr.msra.gmra.mrb[12].mxu1 %vm347_vm1, %v4268_v35  ;;  %v2086_v56 = vsel %vm351_vm0, %v2061_v52, 0 }
 0x119   : > { %1837 = vmatpush1.bf16.msra.mxu1 %v1773_v28  ;;  %1868 = vmatprep.mubr.bf16.mxu1 %v3838_v0 }
 0x11a   : > { %3421 = vmatprep.subr.msk.bf16.mxu1 %vm351_vm0, %v1762_v31  ;;  %v2344_v34 = vpop.permute.xlu1 %2343  ;;  %v2342_v35 = vpop.permute.xlu0 %2341 }
 0x11b   : > { %v2358_v54 = vsel %vm2353_vm9, %v2342_v35, %v2344_v34 }
 0x11c   : > { %3429 = vmatmul.mubr.msk.bf16.vlgmr.msra.gmra.mrb[8].mxu0 %vm347_vm1, %v4396_v29  ;;  %v2379_v38 = vsel %vm351_vm0, %v2358_v54, 0 }
 0x11d   : > { %2181 = vmatpush1.bf16.msra.mxu0 %v2080_v32  ;;  %2212 = vmatprep.mubr.bf16.mxu0 %v3838_v0 }
 0x11e   : > { %3538 = vmatprep.subr.bf16.mxu0 %v3840_v15  ;;  %v2340_v40 = vpop.permute.xlu1 %2339 }
 0x11f   : > { %v2346_v41 = vpop.permute.xlu0 %2345  ;;  %v2357_v55 = vsel %vm2353_vm9, %v2340_v40, %v2342_v35  ;;  %v2356_v60 = vsel %vm2353_vm9, %v4386_v17, %v2340_v40  ;;  %v2990_v40 = vld [vmem:[#allocation2] sm:$0xff] }
 0x120   : > { %3418 = vmatmul.mubr.msk.bf16.vlgmr.msra.gmra.mrb[4].mxu1 %vm347_vm1, %v4334_v62  ;;  %v2359_v50 = vsel %vm2353_vm9, %v2344_v34, %v2346_v41  ;;  %v2373_v63 = vsel %vm351_vm0, %v2356_v60, 0  ;;  %v2993_v46 = vunpack.c.h.bf16 %v2990_v40 }
 0x121   : > { %1923 = vmatpush1.bf16.msra.mxu1 %v1785_v37  ;;  %1954 = vmatprep.mubr.bf16.mxu1 %v3838_v0 }
 0x122   : > { %3430 = vmatprep.subr.msk.bf16.mxu1 %vm351_vm0, %v2058_v39  ;;  %v2998_v39 = vlaneseq }
 0x124   : > { %3433 = vmatmul.mubr.msk.bf16.vlgmr.msra.gmra.mrb[0].mxu0 %vm347_vm1, %v4396_v29  ;;  %v2352_v44 = vpop.permute.xlu1 %2351  ;;  %v2350_v48 = vpop.permute.xlu0 %2349 }
 0x125   : > { %3539 = vmatpush3.bf16.msra.mxu0 %v2092_v13  ;;  %3540 = vmatprep.mubr.msk.bf16.mxu0 %vm3841_vm2, %v3840_v15  ;;  %v2999_v13 = vshrl.u32 %v2998_v39, 7 }
 0x126   : > { %3440 = vmatprep.subr.msk.bf16.mxu0 %vm351_vm0, %v2355_v42 }
 0x127   : > { %v3000_v42 = vsub.s32 0, %v2999_v13  ;;  %v3004_v43 = vsub.s32 2, %v2999_v13 }
 0x128   : > { %3422 = vmatmul.mubr.msk.bf16.vlgmr.msra.gmra.mrb[12].mxu1 %vm347_vm1, %v4334_v62  ;;  %v2633_v51 = vpop.permute.xlu1 %2632  ;;  %v2348_v53 = vpop.permute.xlu0 %2347  ;;  %v2362_v62 = vsel %vm2353_vm9, %v2350_v48, %v2352_v44  ;;  %v3008_v44 = vsub.s32 4, %v2999_v13 }
 0x129   : > { %2138 = vmatpush1.bf16.msra.mxu1 %v2074_v47  ;;  %2169 = vmatprep.mubr.bf16.mxu1 %v3838_v0  ;;  %v2361_v61 = vsel %vm2353_vm9, %v2348_v53, %v2350_v48  ;;  %v2391_v3 = vsel %vm351_vm0, %v2362_v62, 0  ;;  %v2360_v7 = vsel %vm2353_vm9, %v2346_v41, %v2348_v53  ;;  %v2992_v41 = vunpack.c.l.bf16 %v2990_v40  ;;  %v2991_v47 = vld [vmem:[#allocation2 + $0x8] sm:$0x1] }
 0x12a   : > { %3434 = vmatprep.subr.msk.bf16.mxu1 %vm351_vm0, %v2062_v45  ;;  %v2385_v14 = vsel %vm351_vm0, %v2360_v7, 0  ;;  %v3012_v45 = vsub.s32 6, %v2999_v13  ;;  %v3017_v53 = vrot.slane %v2993_v46, %v3000_v42 }
 0x12b   : > { %v3001_v48 = vrot.slane %v2992_v41, %v3000_v42 }
 0x12c   : > { %3541 = vmatmul.mubr.msk.bf16.vlgmr.msra.gmra.mrb[4].mxu0 %vm347_vm1, %v4396_v29  ;;  %v3013_v52 = vrot.slane %v2992_v41, %v3012_v45 }
 0x12d   : > { %2394 = vmatpush1.bf16.msra.mxu0 %v2367_v49  ;;  %2425 = vmatprep.mubr.bf16.mxu0 %v3838_v0  ;;  %v2637_v58 = vpop.permute.xlu1 %2636  ;;  %v2635_v59 = vpop.permute.xlu0 %2634  ;;  %v3005_v49 = vrot.slane %v2992_v41, %v3004_v43  ;;  %v3046_v54 = vrot.slane %v3001_v48, %v3000_v42 }
 0x12e   : > { %3444 = vmatprep.subr.msk.bf16.mxu0 %vm351_vm0, %v2359_v50  ;;  %v2654_v6 = vsel %vm2652_vm10, %v2635_v59, %v2637_v58  ;;  %v2653_v11 = vsel %vm2652_vm10, %v2633_v51, %v2635_v59  ;;  %v3009_v50 = vrot.slane %v2992_v41, %v3008_v44  ;;  %v2994_v51 = vunpack.c.l.bf16 %v2991_v47 }
 0x12f   : > { %v2666_v16 = vsel %vm351_vm0, %v2653_v11, 0 }
 0x130   : > { %3431 = vmatmul.mubr.msk.bf16.vlgmr.msra.gmra.mrb[4].mxu1 %vm347_vm1, %v4396_v29  ;;  %v3033_v62 = vrot.slane %v2994_v51, %v3000_v42 }
 0x131   : > { %2224 = vmatpush1.bf16.msra.mxu1 %v2086_v56  ;;  %2255 = vmatprep.mubr.bf16.mxu1 %v3838_v0  ;;  %v2641_v1 = vpop.permute.xlu1 %2640  ;;  %v2639_v2 = vpop.permute.xlu0 %2638  ;;  %v3025_v56 = vrot.slane %v2993_v46, %v3008_v44 }
 0x132   : > { %3442 = vmatprep.subr.msk.bf16.mxu1 %vm351_vm0, %v2357_v55  ;;  %v2656_v12 = vsel %vm2652_vm10, %v2639_v2, %v2641_v1  ;;  %v2655_v19 = vsel %vm2652_vm10, %v2637_v58, %v2639_v2  ;;  %v3021_v55 = vrot.slane %v2993_v46, %v3004_v43  ;;  %v3029_v58 = vrot.slane %v2993_v46, %v3012_v45 }
 0x133   : > { %v2672_v21 = vsel %vm351_vm0, %v2655_v19, 0  ;;  %v3058_v2 = vrot.slane %v3013_v52, %v3000_v42  ;;  %v4530_v11 = vrot.slane %v3025_v56, %v3000_v42 }
 0x134   : > { %3441 = vmatmul.mubr.msk.bf16.vlgmr.msra.gmra.mrb[8].mxu0 %vm347_vm1, %v3779_v57 }
 0x135   : > { %2480 = vmatpush1.bf16.msra.mxu0 %v2379_v38  ;;  %2511 = vmatprep.mubr.bf16.mxu0 %v3838_v0  ;;  %v2645_v8 = vpop.permute.xlu1 %2644  ;;  %v2643_v5 = vpop.permute.xlu0 %2642  ;;  %v3050_v38 = vrot.slane %v3005_v49, %v3000_v42 }
 0x136   : > { %3544 = vmatprep.subr.bf16.mxu0 %v3840_v15  ;;  %v2658_v10 = vsel %vm2652_vm10, %v2643_v5, %v2645_v8  ;;  %v2657_v4 = vsel %vm2652_vm10, %v2641_v1, %v2643_v5  ;;  %v4528_v5 = vrot.slane %v3021_v55, %v3000_v42 }
 0x137   : > { %v2678_v24 = vsel %vm351_vm0, %v2657_v4, 0 }
 0x138   : > { %3435 = vmatmul.mubr.msk.bf16.vlgmr.msra.gmra.mrb[12].mxu1 %vm347_vm1, %v4396_v29 }
 0x139   : > { %2437 = vmatpush1.bf16.msra.mxu1 %v2373_v63  ;;  %2468 = vmatprep.mubr.bf16.mxu1 %v3838_v0  ;;  %v2649_v9 = vpop.permute.xlu1 %2648  ;;  %v2647_v20 = vpop.permute.xlu0 %2646 }
 0x13a   : > { %3446 = vmatprep.subr.msk.bf16.mxu1 %vm351_vm0, %v2361_v61  ;;  %v2660_v22 = vsel %vm2652_vm10, %v2647_v20, %v2649_v9  ;;  %v2659_v18 = vsel %vm2652_vm10, %v2645_v8, %v2647_v20  ;;  %v3054_v61 = vrot.slane %v3009_v50, %v3000_v42 }
 0x13b   : > { %v2684_v26 = vsel %vm351_vm0, %v2659_v18, 0 }
 0x13c   : > { %3445 = vmatmul.mubr.msk.bf16.vlgmr.msra.gmra.mrb[0].mxu0 %vm347_vm1, %v3779_v57 }
 0x13d   : > { %3545 = vmatpush3.bf16.msra.mxu0 %v2391_v3  ;;  %3546 = vmatprep.mubr.msk.bf16.mxu0 %vm3841_vm2, %v3840_v15  ;;  %v2651_v25 = vpop.permute.xlu0 %2650  ;;  %v4521_v3 = vrot.slane %v3017_v53, %v3000_v42 }
 0x13e   : > { %3452 = vmatprep.subr.msk.bf16.mxu0 %vm351_vm0, %v2654_v6  ;;  %v2661_v17 = vsel %vm2652_vm10, %v2649_v9, %v2651_v25 }
 0x13f   : > { %v2690_v27 = vsel %vm351_vm0, %v2661_v17, 0 }
 0x140   : > { %3443 = vmatmul.mubr.msk.bf16.vlgmr.msra.gmra.mrb[4].mxu1 %vm347_vm1, %v3779_v57 }
 0x141   : > { %2523 = vmatpush1.bf16.msra.mxu1 %v2385_v14  ;;  %2554 = vmatprep.mubr.bf16.mxu1 %v3838_v0 }
 0x142   : > { %3454 = vmatprep.subr.msk.bf16.mxu1 %vm351_vm0, %v2656_v12 }
 0x144   : > { %3547 = vmatmul.mubr.msk.bf16.vlgmr.msra.gmra.mrb[4].mxu0 %vm347_vm1, %v3779_v57 }
 0x145   : > { %2693 = vmatpush1.bf16.msra.mxu0 %v2666_v16  ;;  %2724 = vmatprep.mubr.bf16.mxu0 %v3838_v0 }
 0x146   : > { %3456 = vmatprep.subr.msk.bf16.mxu0 %vm351_vm0, %v2658_v10  ;;  %v4532_v10 = vrot.slane %v3029_v58, %v3000_v42 }
 0x148   : > { %3447 = vmatmul.mubr.msk.bf16.vlgmr.msra.gmra.mrb[12].mxu1 %vm347_vm1, %v3779_v57 }
 0x149   : > { %2736 = vmatpush1.bf16.msra.mxu1 %v2672_v21  ;;  %2767 = vmatprep.mubr.bf16.mxu1 %v3838_v0 }
 0x14a   : > { %3458 = vmatprep.subr.msk.bf16.mxu1 %vm351_vm0, %v2660_v22  ;;  %v4534_v22 = vrot.slane %v3033_v62, %v3000_v42 }
 0x14c   : > { %3453 = vmatmul.mubr.msk.bf16.vlgmr.msra.gmra.mrb[8].mxu0 %vm347_vm1, %v3780_v23 }
 0x14d   : > { %2779 = vmatpush1.bf16.msra.mxu0 %v2678_v24  ;;  %2810 = vmatprep.mubr.bf16.mxu0 %v3838_v0 }
 0x14e   : > { %3550 = vmatprep.subr.bf16.mxu0 %v3840_v15 }
 0x150   : > { %3455 = vmatmul.mubr.msk.bf16.vlgmr.msra.gmra.mrb[4].mxu1 %vm347_vm1, %v3780_v23 }
 0x151   : > { %2822 = vmatpush1.bf16.msra.mxu1 %v2684_v26  ;;  %2853 = vmatprep.mubr.bf16.mxu1 %v3838_v0 }
 0x154   : > { %3457 = vmatmul.mubr.msk.bf16.vlgmr.msra.gmra.mrb[0].mxu0 %vm347_vm1, %v3780_v23 }
 0x155   : > { %3551 = vmatpush3.bf16.msra.mxu0 %v2690_v27  ;;  %3552 = vmatprep.mubr.msk.bf16.mxu0 %vm3841_vm2, %v3840_v15 }
 0x158   : > { %3459 = vmatmul.mubr.msk.bf16.vlgmr.msra.gmra.mrb[12].mxu1 %vm347_vm1, %v3780_v23 }
 0x15c   : > { %3553 = vmatmul.mubr.msk.bf16.vlgmr.msra.gmra.mrb[4].mxu0 %vm347_vm1, %v3780_v23 }
 0x193   : > { %v4508_v28 = vpop.f32.mrb[8].mxu1 }
 0x194   : > { %v4510_v29 = vpop.f32.mrb[9].mxu1 }
 0x195   : > { %v4512_v30 = vpop.f32.mrb[10].mxu1 }
 0x196   : > { %v4514_v31 = vpop.f32.mrb[11].mxu1 }
 0x1a3   : > { %v4516_v0 = vpop.f32.mrb[16].mxu1 }
 0x1a4   : > { %v3506_v32 = vpop.f32.mrb[17].mxu1 }
 0x1a5   : > { %v4518_v34 = vpop.f32.mrb[18].mxu1 }
 0x1a6   : > { %v3507_v35 = vpop.f32.mrb[19].mxu1 }
 0x1ab   : > { %v661_v33 = vpop.f32.mrb[0].mxu1 }
 0x1ac   : > { %v663_v15 = vpop.f32.mrb[1].mxu1 }
 0x1ad   : > { %v665_v36 = vpop.f32.mrb[2].mxu1 }
 0x1ae   : > { %v667_v37 = vpop.f32.mrb[3].mxu1 }
 0x21f   : > { %v2726_v57 = vpop.f32.mrb[8].mxu0 }
 0x220   : > { %v3556_v59 = vadd.f32 %v2726_v57, %v661_v33  ;;  %v2728_v60 = vpop.f32.mrb[9].mxu0 }
 0x221   : > { %v3557_v63 = vadd.f32 %v2728_v60, %v663_v15  ;;  %v2730_v1 = vpop.f32.mrb[10].mxu0 }
 0x222   : > { %v3079_v6 = vmul.f32 %v3556_v59, %v3046_v54  ;;  %v3558_v7 = vadd.f32 %v2730_v1, %v665_v36  ;;  %v2732_v8 = vpop.f32.mrb[11].mxu0 }
 0x223   : > { %v3474_v12 = vpack.c.bf16 %v3557_v63, %v3556_v59  ;;  %v3080_v14 = vmul.f32 %v3557_v63, %v3050_v38  ;;  %v3559_v16 = vadd.f32 %v2732_v8, %v667_v37  ;;  %v2769_v19 = vpop.f32.mrb[4].mxu1 }
 0x224   : > { %v3120_v9 = vmul.f32 %v3556_v59, %v3079_v6  ;;  %v3088_v20 = vmul.f32 %v3558_v7, %v3046_v54  ;;  %v3081_v21 = vmul.f32 %v3054_v61, %v2769_v19  ;;  %v2771_v4 = vpop.f32.mrb[5].mxu1 }
 0x225   : > { %2979 = vst [vmem:[%s4526_s25] sm:$0xff] %v3474_v12  ;;  %v3097_v23 = vadd.f32 %v3080_v14, %v3079_v6  ;;  %v3121_v24 = vmul.f32 %v3557_v63, %v3080_v14  ;;  %v3479_v18 = vpack.c.bf16 %v3559_v16, %v3558_v7  ;;  %v3089_v25 = vmul.f32 %v3559_v16, %v3050_v38  ;;  %v2773_v26 = vpop.f32.mrb[6].mxu1 }
 0x226   : > { %v3129_v17 = vmul.f32 %v3558_v7, %v3088_v20  ;;  %v3122_v27 = vmul.f32 %v3081_v21, %v2769_v19  ;;  %v3475_v32 = vpack.c.bf16 %v2771_v4, %v2769_v19  ;;  %v3082_v35 = vmul.f32 %v3058_v2, %v2771_v4  ;;  %v2775_v33 = vpop.f32.mrb[7].mxu1 }
 0x227   : > { %v3138_v15 = vadd.f32 %v3121_v24, %v3120_v9  ;;  %2985 = vst [vmem:[%s4526_s25 + $0x24] sm:$0xff] %v3479_v18  ;;  %v3109_v36 = vadd.f32 %v3089_v25, %v3088_v20  ;;  %v3130_v37 = vmul.f32 %v3559_v16, %v3089_v25  ;;  %v3098_v39 = vadd.f32 %v3097_v23, %v3081_v21  ;;  %v2812_v13 = vpop.f32.mrb[0].mxu0 }
 0x228   : > { %2980 = vst [vmem:[%s4526_s25 + $0x8] sm:$0xff] %v3475_v32  ;;  %v3123_v40 = vmul.f32 %v3082_v35, %v2771_v4  ;;  %v3090_v41 = vmul.f32 %v3054_v61, %v2773_v26  ;;  %v3480_v42 = vpack.c.bf16 %v2775_v33, %v2773_v26  ;;  %v3091_v43 = vmul.f32 %v3058_v2, %v2775_v33  ;;  %v2814_v44 = vpop.f32.mrb[1].mxu0 }
 0x229   : > { %v3149_v45 = vadd.f32 %v3130_v37, %v3129_v17  ;;  %v3139_v46 = vadd.f32 %v3138_v15, %v3122_v27  ;;  %v3099_v47 = vadd.f32 %v3098_v39, %v3082_v35  ;;  %v3560_v48 = vadd.f32 %v2812_v13, %v4508_v28  ;;  %v2816_v49 = vpop.f32.mrb[2].mxu0 }
 0x22a   : > { %v3110_v50 = vadd.f32 %v3109_v36, %v3090_v41  ;;  %v3131_v51 = vmul.f32 %v3090_v41, %v2773_v26  ;;  %2986 = vst [vmem:[%s4526_s25 + $0x2c] sm:$0xff] %v3480_v42  ;;  %v3132_v52 = vmul.f32 %v3091_v43, %v2775_v33  ;;  %v3561_v53 = vadd.f32 %v2814_v44, %v4510_v29  ;;  %v2818_v54 = vpop.f32.mrb[3].mxu0 }
 0x22b   : > { %v3140_v55 = vadd.f32 %v3139_v46, %v3123_v40  ;;  %v3083_v56 = vmul.f32 %v3560_v48, %v4521_v3  ;;  %v3562_v57 = vadd.f32 %v2816_v49, %v4512_v30  ;;  %v3563_v38 = vadd.f32 %v2818_v54, %v4514_v31  ;;  %v2855_v58 = vpop.f32.mrb[12].mxu1 }
 0x22c   : > { %v3150_v28 = vadd.f32 %v3149_v45, %v3131_v51  ;;  %v3111_v59 = vadd.f32 %v3110_v50, %v3091_v43  ;;  %v3476_v60 = vpack.c.bf16 %v3561_v53, %v3560_v48  ;;  %v3084_v61 = vmul.f32 %v3561_v53, %v4528_v5  ;;  %v2857_v62 = vpop.f32.mrb[13].mxu1 }
 0x22d   : > { %v3100_v29 = vadd.f32 %v3099_v47, %v3083_v56  ;;  %v3124_v63 = vmul.f32 %v3560_v48, %v3083_v56  ;;  %v3092_v1 = vmul.f32 %v3562_v57, %v4521_v3  ;;  %v3481_v2 = vpack.c.bf16 %v3563_v38, %v3562_v57  ;;  %v2859_v6 = vpop.f32.mrb[14].mxu1 }
 0x22e   : > { %v3151_v30 = vadd.f32 %v3150_v28, %v3132_v52  ;;  %2981 = vst [vmem:[%s4526_s25 + $0x10] sm:$0xff] %v3476_v60  ;;  %v3125_v7 = vmul.f32 %v3561_v53, %v3084_v61  ;;  %v3093_v31 = vmul.f32 %v3563_v38, %v4528_v5  ;;  %v3085_v8 = vmul.f32 %v4530_v11, %v2855_v58  ;;  %v2861_v12 = vpop.f32.mrb[15].mxu1 }
 0x22f   : > { %v3141_v14 = vadd.f32 %v3140_v55, %v3124_v63  ;;  %v3101_v16 = vadd.f32 %v3100_v29, %v3084_v61  ;;  %v3112_v19 = vadd.f32 %v3111_v59, %v3092_v1  ;;  %v3133_v9 = vmul.f32 %v3562_v57, %v3092_v1  ;;  %2987 = vst [vmem:[%s4526_s25 + $0x34] sm:$0xff] %v3481_v2  ;;  %v2898_v20 = vpop.f32.mrb[4].mxu0 }
 0x230   : > { %v3134_v21 = vmul.f32 %v3563_v38, %v3093_v31  ;;  %v3126_v4 = vmul.f32 %v3085_v8, %v2855_v58  ;;  %v3477_v3 = vpack.c.bf16 %v2857_v62, %v2855_v58  ;;  %v3086_v23 = vmul.f32 %v4532_v10, %v2857_v62  ;;  %v3554_v24 = vpop.f32.mrb[5].mxu0 }
 0x231   : > { %v3142_v18 = vadd.f32 %v3141_v14, %v3125_v7  ;;  %v3152_v25 = vadd.f32 %v3151_v30, %v3133_v9  ;;  %v3113_v5 = vadd.f32 %v3112_v19, %v3093_v31  ;;  %v3094_v26 = vmul.f32 %v4530_v11, %v2859_v6  ;;  %v2901_v17 = vpop.f32.mrb[6].mxu0 }
 0x232   : > { %2982 = vst [vmem:[%s4526_s25 + $0x18] sm:$0xff] %v3477_v3  ;;  %v3127_v27 = vmul.f32 %v3086_v23, %v2857_v62  ;;  %v3482_v32 = vpack.c.bf16 %v2861_v12, %v2859_v6  ;;  %v3095_v35 = vmul.f32 %v4532_v10, %v2861_v12  ;;  %v3564_v33 = vadd.f32 %v2898_v20, %v4516_v0  ;;  %v3555_v15 = vpop.f32.mrb[7].mxu0 }
 0x233   : > { %v3153_v36 = vadd.f32 %v3152_v25, %v3134_v21  ;;  %v3135_v37 = vmul.f32 %v3094_v26, %v2859_v6  ;;  %v3565_v39 = vadd.f32 %v2901_v17, %v4518_v34  ;;  %v3102_v13 = vadd.f32 %v3101_v16, %v3085_v8 }
 0x234   : > { %2988 = vst [vmem:[%s4526_s25 + $0x3c] sm:$0xff] %v3482_v32  ;;  %v3136_v40 = vmul.f32 %v3095_v35, %v2861_v12  ;;  %v3478_v41 = vpack.c.bf16 %v3564_v33, %v3564_v33  ;;  %v3087_v11 = vmul.f32 %v3564_v33, %v4534_v22  ;;  %v3114_v42 = vadd.f32 %v3113_v5, %v3094_v26 }
 0x235   : > { %v3483_v43 = vpack.c.bf16 %v3565_v39, %v3565_v39  ;;  %v3103_v44 = vadd.f32 %v3102_v13, %v3086_v23  ;;  %v3096_v10 = vmul.f32 %v3565_v39, %v4534_v22  ;;  %v3154_v45 = vadd.f32 %v3153_v36, %v3135_v37 }
 0x236   : > { %2984 = vst.msk [vmem:[%s4526_s25 + $0x20] sm:$0xf] %vm2983_vm11, %v3478_v41  ;;  %v3105_v0 = vsel %vm3104_vm12, %v3087_v11, 0.0  ;;  %v3115_v46 = vadd.f32 %v3114_v42, %v3095_v35  ;;  %v3128_v47 = vmul.f32 %v3564_v33, %v3087_v11  ;;  %v3143_v34 = vadd.f32 %v3142_v18, %v3126_v4 }
 0x237   : > { %2989 = vst.msk [vmem:[%s4526_s25 + $0x44] sm:$0xf] %vm2983_vm11, %v3483_v43  ;;  %v3106_v48 = vadd.f32 %v3105_v0, %v3103_v44  ;;  %v3116_v49 = vsel %vm3104_vm12, %v3096_v10, 0.0  ;;  %v3137_v50 = vmul.f32 %v3565_v39, %v3096_v10  ;;  %v3155_v51 = vadd.f32 %v3154_v45, %v3136_v40 }
 0x238   : > { %v3117_v52 = vadd.f32 %v3116_v49, %v3115_v46  ;;  %v3144_v53 = vadd.f32 %v3143_v34, %v3127_v27  ;;  %v3145_v22 = vsel %vm3104_vm12, %v3128_v47, 0.0 }
 0x239   : > { %3107 = vadd.xlane.f32.xlu1 %v3106_v48  ;;  %v3156_v54 = vsel %vm3104_vm12, %v3137_v50, 0.0 }
 0x23a   : > { %3118 = vadd.xlane.f32.xlu0 %v3117_v52  ;;  %v3157_v55 = vadd.f32 %v3156_v54, %v3155_v51  ;;  %v3146_v56 = vadd.f32 %v3145_v22, %v3144_v53 }
 0x23d   : > { %3158 = vadd.xlane.f32.xlu1 %v3157_v55 }
 0x23e   : > { %3147 = vadd.xlane.f32.xlu0 %v3146_v56 }
 0x2c6   : > { %v3108_v57 = vpop.xlane.xlu1 %3107 }
 0x2c7   : > { %v3119_v38 = vpop.xlane.xlu0 %3118 }
 0x2ca   : > { %v3159_v58 = vpop.xlane.xlu1 %3158 }
 0x2cb   : > { %v3162_v28 = vsel %vm3160_vm13, %v3119_v38, %v3159_v58  ;;  %v3148_v59 = vpop.xlane.xlu0 %3147 }
 0x2cc   : > { %3165 = vst.msk [vmem:[%s280_s29 + $0x8] sm:$0xff] %vm3163_vm14, %v3162_v28  ;;  %v3161_v60 = vsel %vm3160_vm13, %v3108_v57, %v3148_v59 }
 0x2cd   : > { %3164 = vst.msk [vmem:[%s280_s29] sm:$0xff] %vm3163_vm14, %v3161_v60 }
 0x2ce PF: > { %s16_s17 = sadd.s32 1, %s3835_s17   ;;  %s4594_s15 = smov %s3831_s16 }
 0x2cf   : > { %p13_p3 = scmp.ge.s32.totalorder %s16_s17, 4   ;;  %s4595_s16 = smov %s4597_s19 }
 0x2d1   :  { %15 = sbr.rel (!%p13_p3) target bundleno = 2 (0x2), region = 90 }
 0x2d8   :  { %3222 = vsyncpa [#allocation3], 1 }
 0x2d9   :  { %3224 = vsyncpa [#allocation3 + $0x1], 1 }

// kernel: generator_forward.11
= control target key start
LH: loop header
LB: loop body
LE: loop exit
PB: predicated region body
PF: predicated region fallthrough
CT: control target
= control target key end

     0   :  { %s10969_s12 = smov 0   ;;  %s10971_s13 = smov 0   ;;  %s13239_s0 = inlined_call_operand.vmem [shape: bf16[2,4,4422], index: 0, kind: input, shape index: {}]   ;;  %s13240_s1 = inlined_call_operand.vmem [shape: bf16[9,12,4], index: 1, kind: input, shape index: {}]   ;;  %s13241_s2 = inlined_call_operand.vmem [shape: f32[12,1], index: 2, kind: input, shape index: {}]   ;;  %s13242_s3 = inlined_call_operand.vmem [shape: bf16[2,12,4224], index: 3, kind: output, shape index: {}]  }
   0x1   :  { %s10973_s14 = smov 0  }
   0x2 LB: > { %s25_s15 = sadd.s32 1, %s10931_s13  ;;  %p9742_p0 = scmp.ge.s32.totalorder %s10935_s14, 1  ;;  %s10935_s14 = sphi %s10973_s14, %s13_s14   ;;  %s10931_s13 = sphi %s10971_s13, %s13296_s13   ;;  %s10927_s12 = sphi %s10969_s12, %s13295_s12  }
   0x3   : > { %p27_p1 = scmp.ge.s32.totalorder %s25_s15, 2  ;;  %p173_p2 = scmp.lt.s32.totalorder %s10935_s14, 3 }
   0x5   : > { %s13298_s15 = smov (%p27_p1, %s25_s15), 0  ;;  %p174_p3 = pnand %p9742_p0, %p173_p2 }
   0x7   : > { %177 = sbr.rel (%p174_p3) target bundleno = 991 (0x3df), region = 32 }
   0xe   : > { %p212_p4 = scmp.lt.s32.totalorder %s10927_s12, 1  ;;  %v273_v0 = vlaneseq  ;;  %v10937_v1 = vmov 1983009808   ;;  %v13245_v6 = vmov 0   ;;  %s10939_s20 = smov 127   ;;  %vm481_vm0 = vcmask 1039360  }
   0xf   : > { %v271_v2 = vunpack.c.l.s4 %v10937_v1  ;;  %651 = vmatprep.mubr.bf16.mxu0 %v13245_v6  ;;  %694 = vmatprep.mubr.bf16.mxu1 %v13245_v6  ;;  %s10940_s21 = smov 126   ;;  %vm519_vm1 = vcmask 1041408   ;;  %vm515_vm2 = vcmask 31744   ;;  %s10941_s24 = smov 62   ;;  %vm10943_vm3 = vmmov 0  }
  0x10   : > { %s13300_s12 = smov (!%p212_p4, %s10927_s12), 1  ;;  %v274_v3 = vshrl.u32 %v273_v0, 7  ;;  %10759 = vset.pattern.permute.xlu0 %v13245_v6  ;;  %10760 = vset.pattern.permute.xlu1 %v13245_v6  ;;  %v11255_v0 = vld [vmem:[%s13240_s1 + $0x8] sm:$0x3f]   ;;  %s10944_s27 = smov 61   ;;  %vm2260_vm4 = vcmask 1031168  }
  0x11   : > { %v272_v4 = vunpack.c.0.s8 %v271_v2  ;;  %s10721_s16 = smul.u32 70, %s13300_s12  ;;  %vm3267_vm5 = vcmask 506880   ;;  %s10945_s30 = smov 60   ;;  %vm4274_vm6 = vcmask 498688   ;;  %vm5281_vm7 = vcmask 490496  }
  0x12   : > { %s10946_s8 = smov 124   ;;  %s10947_s9 = smov 123   ;;  %vm6296_vm8 = vcmask 1014784   ;;  %vm7303_vm9 = vcmask 1006592   ;;  %vm8310_vm10 = vcmask 998400  }
  0x13   : > { %v10990_v5 = vsub.s32 %v272_v4, %v274_v3  ;;  %s10997_s19 = scalar_lea.vmem %s13239_s0, %s10721_s16  ;;  %s10948_s18 = smov 122  }
  0x14   : > { %v241_v7 = vld [vmem:[%s10997_s19] sm:$0xff]  ;;  %v242_v8 = vld [vmem:[%s10997_s19 + $0x8] sm:$0xff]  ;;  %v243_v16 = vld [vmem:[%s10997_s19 + $0x10] sm:$0xff] }
  0x15   : > { %13269 = vst [vmem:[#allocation2_spill] sm:$0xff] %v10990_v5  ;;  %v11004_v9 = vrot.slane %v241_v7, %v10990_v5  ;;  %v269_v10 = vcombine.high %v241_v7, %v241_v7  ;;  %v11016_v13 = vrot.slane %v242_v8, %v10990_v5  ;;  %v286_v14 = vcombine.high %v242_v8, %v242_v8  ;;  %v244_v22 = vld [vmem:[%s10997_s19 + $0x18] sm:$0xff]  ;;  %v245_v28 = vld [vmem:[%s10997_s19 + $0x20] sm:$0xff]  ;;  %v246_v34 = vld [vmem:[%s10997_s19 + $0x28] sm:$0xff] }
  0x16   : > { %v11039_v19 = vrot.slane %v243_v16, %v10990_v5  ;;  %v303_v20 = vcombine.high %v243_v16, %v243_v16  ;;  %v11062_v25 = vrot.slane %v244_v22, %v10990_v5  ;;  %v320_v26 = vcombine.high %v244_v22, %v244_v22  ;;  %v247_v40 = vld [vmem:[%s10997_s19 + $0x30] sm:$0xff]  ;;  %v248_v46 = vld [vmem:[%s10997_s19 + $0x38] sm:$0xff]  ;;  %v11165_v52 = vld.sshfl [vmem:[%s10997_s19 + $0x40] sm:$0x3f pattern:$0x76325410] }
  0x17   : > { %13270 = vst [vmem:[#allocation3_spill] sm:$0xff] %v11004_v9  ;;  %413 = vrot.lane.b32.xlu0 %v11004_v9, %s10939_s20  ;;  %v11009_v11 = vrot.slane %v269_v10, %v10990_v5  ;;  %v11013_v12 = vcombine.high %v11004_v9, %v11004_v9  ;;  %13273 = vst [vmem:[#allocation6_spill] sm:$0xff] %v11016_v13  ;;  %v11024_v15 = vcombine.high %v11016_v13, %v11016_v13 }
  0x18   : > { %v11030_v17 = vrot.slane %v286_v14, %v10990_v5  ;;  %v11047_v21 = vcombine.high %v11039_v19, %v11039_v19  ;;  %v11053_v23 = vrot.slane %v303_v20, %v10990_v5  ;;  %v11070_v27 = vcombine.high %v11062_v25, %v11062_v25 }
  0x19   : > { %13271 = vst [vmem:[#allocation4_spill] sm:$0xff] %v11009_v11  ;;  %13272 = vst [vmem:[#allocation5_spill] sm:$0xff] %v11013_v12  ;;  %417 = vrot.lane.b32.xlu1 %v11009_v11, %s10939_s20  ;;  %v11036_v18 = vcombine.high %v11009_v11, %v11009_v11  ;;  %v11076_v29 = vrot.slane %v320_v26, %v10990_v5  ;;  %v11085_v31 = vrot.slane %v245_v28, %v10990_v5 }
  0x1a   : > { %13274 = vst [vmem:[#allocation7_spill] sm:$0xff] %v11030_v17  ;;  %v11059_v24 = vcombine.high %v11030_v17, %v11030_v17  ;;  %v11082_v30 = vcombine.high %v11053_v23, %v11053_v23  ;;  %v337_v32 = vcombine.high %v245_v28, %v245_v28  ;;  %v11108_v37 = vrot.slane %v246_v34, %v10990_v5 }
  0x1b   : > { %415 = vrot.lane.b32.xlu0 %v11013_v12, %s10939_s20  ;;  %v11093_v33 = vcombine.high %v11085_v31, %v11085_v31  ;;  %v11105_v36 = vcombine.high %v11076_v29, %v11076_v29  ;;  %v354_v38 = vcombine.high %v246_v34, %v246_v34  ;;  %v11131_v43 = vrot.slane %v247_v40, %v10990_v5 }
  0x1c   : > { %v11099_v35 = vrot.slane %v337_v32, %v10990_v5  ;;  %v11116_v39 = vcombine.high %v11108_v37, %v11108_v37  ;;  %v371_v44 = vcombine.high %v247_v40, %v247_v40  ;;  %v11154_v49 = vrot.slane %v248_v46, %v10990_v5 }
  0x1d   : > { %421 = vrot.lane.b32.xlu1 %v11016_v13, %s10939_s20  ;;  %v11122_v41 = vrot.slane %v354_v38, %v10990_v5  ;;  %v11139_v45 = vcombine.high %v11131_v43, %v11131_v43  ;;  %v388_v50 = vcombine.high %v248_v46, %v248_v46  ;;  %v11184_v55 = vcombine.high %v11165_v52, %v11165_v52 }
  0x1e   : > { %v11128_v42 = vcombine.high %v11099_v35, %v11099_v35  ;;  %v11145_v47 = vrot.slane %v371_v44, %v10990_v5  ;;  %13275 = vst [vmem:[#allocation8_spill] sm:$0xff] %v11154_v49  ;;  %v11162_v51 = vcombine.high %v11154_v49, %v11154_v49 }
  0x1f   : > { %423 = vrot.lane.b32.xlu0 %v11024_v15, %s10939_s20  ;;  %v11151_v48 = vcombine.high %v11122_v41, %v11122_v41  ;;  %v11170_v53 = vrot.slane %v388_v50, %v10990_v5  ;;  %13279 = vst [vmem:[#allocation12_spill] sm:$0xff] %v11184_v55 }
  0x20   : > { %13276 = vst [vmem:[#allocation9_spill] sm:$0xff] %v11162_v51  ;;  %v11176_v54 = vcombine.high %v11145_v47, %v11145_v47 }
  0x21   : > { %425 = vrot.lane.b32.xlu1 %v11030_v17, %s10939_s20  ;;  %13277 = vst [vmem:[#allocation10_spill] sm:$0xff] %v11170_v53  ;;  %v11190_v56 = vcombine.high %v11170_v53, %v11170_v53 }
  0x22   : > { %13278 = vst [vmem:[#allocation11_spill] sm:$0xff] %v11176_v54 }
  0x23   : > { %419 = vrot.lane.b32.xlu0 %v11036_v18, %s10939_s20  ;;  %13280 = vst [vmem:[#allocation13_spill] sm:$0xff] %v11190_v56 }
  0x25   : > { %429 = vrot.lane.b32.xlu1 %v11039_v19, %s10939_s20 }
  0x27   : > { %431 = vrot.lane.b32.xlu0 %v11047_v21, %s10939_s20 }
  0x29   : > { %433 = vrot.lane.b32.xlu1 %v11053_v23, %s10939_s20 }
  0x2b   : > { %427 = vrot.lane.b32.xlu0 %v11059_v24, %s10939_s20 }
  0x2d   : > { %437 = vrot.lane.b32.xlu1 %v11062_v25, %s10939_s20 }
  0x2f   : > { %439 = vrot.lane.b32.xlu0 %v11070_v27, %s10939_s20 }
  0x31   : > { %441 = vrot.lane.b32.xlu1 %v11076_v29, %s10939_s20 }
  0x33   : > { %435 = vrot.lane.b32.xlu0 %v11082_v30, %s10939_s20 }
  0x35   : > { %445 = vrot.lane.b32.xlu1 %v11085_v31, %s10939_s20 }
  0x37   : > { %447 = vrot.lane.b32.xlu0 %v11093_v33, %s10939_s20 }
  0x39   : > { %449 = vrot.lane.b32.xlu1 %v11099_v35, %s10939_s20 }
  0x3b   : > { %443 = vrot.lane.b32.xlu0 %v11105_v36, %s10939_s20 }
  0x3d   : > { %453 = vrot.lane.b32.xlu1 %v11108_v37, %s10939_s20 }
  0x3f   : > { %455 = vrot.lane.b32.xlu0 %v11116_v39, %s10939_s20 }
  0x41   : > { %457 = vrot.lane.b32.xlu1 %v11122_v41, %s10939_s20 }
  0x43   : > { %451 = vrot.lane.b32.xlu0 %v11128_v42, %s10939_s20 }
  0x45   : > { %461 = vrot.lane.b32.xlu1 %v11131_v43, %s10939_s20 }
  0x47   : > { %463 = vrot.lane.b32.xlu0 %v11139_v45, %s10939_s20 }
  0x49   : > { %465 = vrot.lane.b32.xlu1 %v11145_v47, %s10939_s20 }
  0x4b   : > { %459 = vrot.lane.b32.xlu0 %v11151_v48, %s10939_s20 }
  0x4d   : > { %469 = vrot.lane.b32.xlu1 %v11154_v49, %s10939_s20 }
  0x4f   : > { %471 = vrot.lane.b32.xlu0 %v11162_v51, %s10939_s20 }
  0x51   : > { %473 = vrot.lane.b32.xlu1 %v11170_v53, %s10939_s20 }
  0x53   : > { %467 = vrot.lane.b32.xlu0 %v11176_v54, %s10939_s20 }
  0x55   : > { %477 = vrot.lane.b32.xlu1 %v11165_v52, %s10939_s20 }
  0x57   : > { %479 = vrot.lane.b32.xlu0 %v11184_v55, %s10939_s20 }
  0x59   : > { %475 = vrot.lane.b32.xlu1 %v11190_v56, %s10939_s20 }
  0x5b   : > { %2192 = vrot.lane.b32.xlu0 %v11004_v9, %s10940_s21 }
  0x5d   : > { %2194 = vrot.lane.b32.xlu1 %v11013_v12, %s10940_s21 }
  0x5f   : > { %2196 = vrot.lane.b32.xlu0 %v11009_v11, %s10940_s21 }
  0x61   : > { %2200 = vrot.lane.b32.xlu1 %v11016_v13, %s10940_s21 }
  0x63   : > { %2202 = vrot.lane.b32.xlu0 %v11024_v15, %s10940_s21 }
  0x65   : > { %2204 = vrot.lane.b32.xlu1 %v11030_v17, %s10940_s21 }
  0x67   : > { %2198 = vrot.lane.b32.xlu0 %v11036_v18, %s10940_s21 }
  0x69   : > { %2208 = vrot.lane.b32.xlu1 %v11039_v19, %s10940_s21 }
  0x6b   : > { %2210 = vrot.lane.b32.xlu0 %v11047_v21, %s10940_s21 }
  0x6d   : > { %2212 = vrot.lane.b32.xlu1 %v11053_v23, %s10940_s21 }
  0x6f   : > { %2206 = vrot.lane.b32.xlu0 %v11059_v24, %s10940_s21 }
  0x71   : > { %2216 = vrot.lane.b32.xlu1 %v11062_v25, %s10940_s21 }
  0x73   : > { %2218 = vrot.lane.b32.xlu0 %v11070_v27, %s10940_s21 }
  0x75   : > { %2220 = vrot.lane.b32.xlu1 %v11076_v29, %s10940_s21 }
  0x77   : > { %2214 = vrot.lane.b32.xlu0 %v11082_v30, %s10940_s21 }
  0x79   : > { %2224 = vrot.lane.b32.xlu1 %v11085_v31, %s10940_s21 }
  0x7b   : > { %2226 = vrot.lane.b32.xlu0 %v11093_v33, %s10940_s21 }
  0x7d   : > { %2228 = vrot.lane.b32.xlu1 %v11099_v35, %s10940_s21 }
  0x7f   : > { %2222 = vrot.lane.b32.xlu0 %v11105_v36, %s10940_s21 }
  0x81   : > { %2232 = vrot.lane.b32.xlu1 %v11108_v37, %s10940_s21 }
  0x83   : > { %2234 = vrot.lane.b32.xlu0 %v11116_v39, %s10940_s21 }
  0x85   : > { %2236 = vrot.lane.b32.xlu1 %v11122_v41, %s10940_s21 }
  0x87   : > { %2230 = vrot.lane.b32.xlu0 %v11128_v42, %s10940_s21 }
  0x89   : > { %v414_v57 = vpop.permute.xlu0 %413  ;;  %2240 = vrot.lane.b32.xlu1 %v11131_v43, %s10940_s21 }
  0x8b   : > { %v418_v58 = vpop.permute.xlu1 %417  ;;  %2242 = vrot.lane.b32.xlu0 %v11139_v45, %s10940_s21 }
  0x8d   : > { %v416_v59 = vpop.permute.xlu0 %415  ;;  %2244 = vrot.lane.b32.xlu1 %v11145_v47, %s10940_s21 }
  0x8e   : > { %v483_v60 = vsel %vm481_vm0, %v416_v59, %v418_v58  ;;  %v482_v61 = vsel %vm481_vm0, %v414_v57, %v416_v59 }
  0x8f   : > { %9748 = vmatprep.subr.msk.bf16.mxu0 %vm519_vm1, %v483_v60  ;;  %v422_v62 = vpop.permute.xlu1 %421  ;;  %v521_v63 = vsel %vm519_vm1, %v482_v61, 0  ;;  %2238 = vrot.lane.b32.xlu0 %v11151_v48, %s10940_s21 }
  0x90   : > { %620 = vmatpush1.bf16.msra.mxu0 %v521_v63 }
  0x91   : > { %v424_v1 = vpop.permute.xlu0 %423  ;;  %2248 = vrot.lane.b32.xlu1 %v11154_v49, %s10940_s21 }
  0x92   : > { %v486_v2 = vsel %vm481_vm0, %v422_v62, %v424_v1 }
  0x93   : > { %9749 = vmatmul.mubr.msk.bf16.vlgmr.msra.gmra.mrb[0].mxu0 %vm515_vm2, %v11255_v0  ;;  %v426_v3 = vpop.permute.xlu1 %425  ;;  %2250 = vrot.lane.b32.xlu0 %v11162_v51, %s10940_s21  ;;  %v533_v8 = vsel %vm519_vm1, %v486_v2, 0 }
  0x94   : > { %v487_v4 = vsel %vm481_vm0, %v424_v1, %v426_v3  ;;  %737 = vmatprep.mubr.bf16.mxu0 %v13245_v6 }
  0x95   : > { %9752 = vmatprep.subr.msk.bf16.mxu0 %vm519_vm1, %v487_v4  ;;  %v420_v7 = vpop.permute.xlu0 %419  ;;  %2252 = vrot.lane.b32.xlu1 %v11170_v53, %s10940_s21 }
  0x96   : > { %706 = vmatpush1.bf16.msra.mxu0 %v533_v8  ;;  %v485_v10 = vsel %vm481_vm0, %v420_v7, %v422_v62  ;;  %v484_v14 = vsel %vm481_vm0, %v418_v58, %v420_v7 }
  0x97   : > { %v430_v16 = vpop.permute.xlu1 %429  ;;  %9750 = vmatprep.subr.msk.bf16.mxu1 %vm519_vm1, %v485_v10  ;;  %v527_v20 = vsel %vm519_vm1, %v484_v14, 0  ;;  %2246 = vrot.lane.b32.xlu0 %v11176_v54, %s10940_s21 }
  0x98   : > { %663 = vmatpush1.bf16.msra.mxu1 %v527_v20 }
  0x99   : > { %v432_v22 = vpop.permute.xlu0 %431  ;;  %2256 = vrot.lane.b32.xlu1 %v11165_v52, %s10940_s21 }
  0x9a   : > { %v490_v26 = vsel %vm481_vm0, %v430_v16, %v432_v22 }
  0x9b   : > { %9753 = vmatmul.mubr.msk.bf16.vlgmr.msra.gmra.mrb[4].mxu0 %vm515_vm2, %v11255_v0  ;;  %v434_v28 = vpop.permute.xlu1 %433  ;;  %9751 = vmatmul.mubr.msk.bf16.vlgmr.msra.gmra.mrb[0].mxu1 %vm515_vm2, %v11255_v0  ;;  %v545_v38 = vsel %vm519_vm1, %v490_v26, 0 }
  0x9c   : > { %v491_v32 = vsel %vm481_vm0, %v432_v22, %v434_v28  ;;  %823 = vmatprep.mubr.bf16.mxu0 %v13245_v6  ;;  %780 = vmatprep.mubr.bf16.mxu1 %v13245_v6 }
  0x9d   : > { %9756 = vmatprep.subr.msk.bf16.mxu0 %vm519_vm1, %v491_v32  ;;  %v428_v34 = vpop.permute.xlu0 %427  ;;  %2258 = vrot.lane.b32.xlu0 %v11184_v55, %s10940_s21 }
  0x9e   : > { %v488_v40 = vsel %vm481_vm0, %v426_v3, %v428_v34  ;;  %792 = vmatpush1.bf16.msra.mxu0 %v545_v38  ;;  %v489_v44 = vsel %vm481_vm0, %v428_v34, %v430_v16  ;;  %2254 = vrot.lane.b32.xlu1 %v11190_v56, %s10940_s21 }
  0x9f   : > { %v438_v46 = vpop.permute.xlu1 %437  ;;  %9754 = vmatprep.subr.msk.bf16.mxu1 %vm519_vm1, %v489_v44  ;;  %v539_v50 = vsel %vm519_vm1, %v488_v40, 0 }
  0xa0   : > { %749 = vmatpush1.bf16.msra.mxu1 %v539_v50 }
  0xa1   : > { %v440_v57 = vpop.permute.xlu0 %439  ;;  %3199 = vrot.lane.b32.xlu0 %v11004_v9, %s10941_s24 }
  0xa2   : > { %v494_v58 = vsel %vm481_vm0, %v438_v46, %v440_v57  ;;  %3201 = vrot.lane.b32.xlu1 %v11013_v12, %s10941_s24 }
  0xa3   : > { %v442_v59 = vpop.permute.xlu1 %441  ;;  %9755 = vmatmul.mubr.msk.bf16.vlgmr.msra.gmra.mrb[4].mxu1 %vm515_vm2, %v11255_v0  ;;  %9757 = vmatmul.mubr.msk.bf16.vlgmr.msra.gmra.mrb[8].mxu0 %vm515_vm2, %v11255_v0  ;;  %v557_v62 = vsel %vm519_vm1, %v494_v58, 0 }
  0xa4   : > { %v495_v60 = vsel %vm481_vm0, %v440_v57, %v442_v59  ;;  %866 = vmatprep.mubr.bf16.mxu1 %v13245_v6  ;;  %909 = vmatprep.mubr.bf16.mxu0 %v13245_v6 }
  0xa5   : > { %9760 = vmatprep.subr.msk.bf16.mxu0 %vm519_vm1, %v495_v60  ;;  %v436_v61 = vpop.permute.xlu0 %435  ;;  %3203 = vrot.lane.b32.xlu0 %v11009_v11, %s10941_s24 }
  0xa6   : > { %v492_v63 = vsel %vm481_vm0, %v434_v28, %v436_v61  ;;  %878 = vmatpush1.bf16.msra.mxu0 %v557_v62  ;;  %v493_v1 = vsel %vm481_vm0, %v436_v61, %v438_v46  ;;  %3205 = vrot.lane.b32.xlu1 %v11036_v18, %s10941_s24 }
  0xa7   : > { %v446_v2 = vpop.permute.xlu1 %445  ;;  %9758 = vmatprep.subr.msk.bf16.mxu1 %vm519_vm1, %v493_v1  ;;  %v551_v3 = vsel %vm519_vm1, %v492_v63, 0 }
  0xa8   : > { %835 = vmatpush1.bf16.msra.mxu1 %v551_v3 }
  0xa9   : > { %v448_v4 = vpop.permute.xlu0 %447  ;;  %3207 = vrot.lane.b32.xlu0 %v11016_v13, %s10941_s24 }
  0xaa   : > { %v498_v7 = vsel %vm481_vm0, %v446_v2, %v448_v4  ;;  %3209 = vrot.lane.b32.xlu1 %v11024_v15, %s10941_s24 }
  0xab   : > { %v450_v8 = vpop.permute.xlu1 %449  ;;  %9759 = vmatmul.mubr.msk.bf16.vlgmr.msra.gmra.mrb[8].mxu1 %vm515_vm2, %v11255_v0  ;;  %9761 = vmatmul.mubr.msk.bf16.vlgmr.msra.gmra.mrb[12].mxu0 %vm515_vm2, %v11255_v0  ;;  %v569_v16 = vsel %vm519_vm1, %v498_v7, 0 }
  0xac   : > { %v499_v10 = vsel %vm481_vm0, %v448_v4, %v450_v8  ;;  %952 = vmatprep.mubr.bf16.mxu1 %v13245_v6  ;;  %995 = vmatprep.mubr.bf16.mxu0 %v13245_v6 }
  0xad   : > { %9764 = vmatprep.subr.msk.bf16.mxu0 %vm519_vm1, %v499_v10  ;;  %v444_v14 = vpop.permute.xlu0 %443  ;;  %3211 = vrot.lane.b32.xlu0 %v11030_v17, %s10941_s24 }
  0xae   : > { %v496_v20 = vsel %vm481_vm0, %v442_v59, %v444_v14  ;;  %964 = vmatpush1.bf16.msra.mxu0 %v569_v16  ;;  %v497_v22 = vsel %vm481_vm0, %v444_v14, %v446_v2  ;;  %3213 = vrot.lane.b32.xlu1 %v11059_v24, %s10941_s24 }
  0xaf   : > { %v454_v26 = vpop.permute.xlu1 %453  ;;  %9762 = vmatprep.subr.msk.bf16.mxu1 %vm519_vm1, %v497_v22  ;;  %v563_v28 = vsel %vm519_vm1, %v496_v20, 0 }
  0xb0   : > { %921 = vmatpush1.bf16.msra.mxu1 %v563_v28 }
  0xb1   : > { %v456_v32 = vpop.permute.xlu0 %455  ;;  %3215 = vrot.lane.b32.xlu0 %v11039_v19, %s10941_s24 }
  0xb2   : > { %v502_v34 = vsel %vm481_vm0, %v454_v26, %v456_v32  ;;  %3217 = vrot.lane.b32.xlu1 %v11047_v21, %s10941_s24 }
  0xb3   : > { %v458_v38 = vpop.permute.xlu1 %457  ;;  %9763 = vmatmul.mubr.msk.bf16.vlgmr.msra.gmra.mrb[12].mxu1 %vm515_vm2, %v11255_v0  ;;  %9765 = vmatmul.mubr.msk.bf16.vlgmr.msra.gmra.mrb[16].mxu0 %vm515_vm2, %v11255_v0  ;;  %v581_v46 = vsel %vm519_vm1, %v502_v34, 0 }
  0xb4   : > { %v503_v40 = vsel %vm481_vm0, %v456_v32, %v458_v38  ;;  %1038 = vmatprep.mubr.bf16.mxu1 %v13245_v6  ;;  %1081 = vmatprep.mubr.bf16.mxu0 %v13245_v6 }
  0xb5   : > { %9768 = vmatprep.subr.msk.bf16.mxu0 %vm519_vm1, %v503_v40  ;;  %v452_v44 = vpop.permute.xlu0 %451  ;;  %3219 = vrot.lane.b32.xlu0 %v11053_v23, %s10941_s24  ;;  %v13243_v40 = vmov 0.0  }
  0xb6   : > { %v500_v50 = vsel %vm481_vm0, %v450_v8, %v452_v44  ;;  %1050 = vmatpush1.bf16.msra.mxu0 %v581_v46  ;;  %v501_v57 = vsel %vm481_vm0, %v452_v44, %v454_v26  ;;  %3221 = vrot.lane.b32.xlu1 %v11082_v30, %s10941_s24 }
  0xb7   : > { %v462_v58 = vpop.permute.xlu1 %461  ;;  %9766 = vmatprep.subr.msk.bf16.mxu1 %vm519_vm1, %v501_v57  ;;  %v575_v59 = vsel %vm519_vm1, %v500_v50, 0 }
  0xb8   : > { %1007 = vmatpush1.bf16.msra.mxu1 %v575_v59 }
  0xb9   : > { %v464_v60 = vpop.permute.xlu0 %463  ;;  %3223 = vrot.lane.b32.xlu0 %v11062_v25, %s10941_s24 }
  0xba   : > { %v506_v61 = vsel %vm481_vm0, %v462_v58, %v464_v60  ;;  %3225 = vrot.lane.b32.xlu1 %v11070_v27, %s10941_s24 }
  0xbb   : > { %v466_v62 = vpop.permute.xlu1 %465  ;;  %9767 = vmatmul.mubr.msk.bf16.vlgmr.msra.gmra.mrb[16].mxu1 %vm515_vm2, %v11255_v0  ;;  %9769 = vmatmul.mubr.msk.bf16.vlgmr.msra.gmra.mrb[20].mxu0 %vm515_vm2, %v11255_v0  ;;  %v593_v2 = vsel %vm519_vm1, %v506_v61, 0 }
  0xbc   : > { %v507_v63 = vsel %vm481_vm0, %v464_v60, %v466_v62  ;;  %1124 = vmatprep.mubr.bf16.mxu1 %v13245_v6  ;;  %1167 = vmatprep.mubr.bf16.mxu0 %v13245_v6 }
  0xbd   : > { %9772 = vmatprep.subr.msk.bf16.mxu0 %vm519_vm1, %v507_v63  ;;  %v460_v1 = vpop.permute.xlu0 %459  ;;  %3227 = vrot.lane.b32.xlu0 %v11076_v29, %s10941_s24  ;;  %v1357_v63 = vsel %vm519_vm1, %v11004_v9, 0 }
  0xbe   : > { %v504_v3 = vsel %vm481_vm0, %v458_v38, %v460_v1  ;;  %1136 = vmatpush1.bf16.msra.mxu0 %v593_v2  ;;  %v505_v4 = vsel %vm481_vm0, %v460_v1, %v462_v58  ;;  %3229 = vrot.lane.b32.xlu1 %v11105_v36, %s10941_s24  ;;  %v1363_v1 = vsel %vm519_vm1, %v11009_v11, 0 }
  0xbf   : > { %v470_v7 = vpop.permute.xlu1 %469  ;;  %9770 = vmatprep.subr.msk.bf16.mxu1 %vm519_vm1, %v505_v4  ;;  %v587_v8 = vsel %vm519_vm1, %v504_v3, 0 }
  0xc0   : > { %1093 = vmatpush1.bf16.msra.mxu1 %v587_v8  ;;  %v1369_v8 = vsel %vm519_vm1, %v11016_v13, 0 }
  0xc1   : > { %v472_v10 = vpop.permute.xlu0 %471  ;;  %3231 = vrot.lane.b32.xlu0 %v11085_v31, %s10941_s24 }
  0xc2   : > { %v510_v14 = vsel %vm481_vm0, %v470_v7, %v472_v10  ;;  %3233 = vrot.lane.b32.xlu1 %v11093_v33, %s10941_s24 }
  0xc3   : > { %v474_v16 = vpop.permute.xlu1 %473  ;;  %9771 = vmatmul.mubr.msk.bf16.vlgmr.msra.gmra.mrb[20].mxu1 %vm515_vm2, %v11255_v0  ;;  %9773 = vmatmul.mubr.msk.bf16.vlgmr.msra.gmra.mrb[24].mxu0 %vm515_vm2, %v11255_v0  ;;  %v605_v26 = vsel %vm519_vm1, %v510_v14, 0 }
  0xc4   : > { %v511_v20 = vsel %vm481_vm0, %v472_v10, %v474_v16  ;;  %1210 = vmatprep.mubr.bf16.mxu1 %v13245_v6  ;;  %1253 = vmatprep.mubr.bf16.mxu0 %v13245_v6  ;;  %v1375_v10 = vsel %vm519_vm1, %v11030_v17, 0 }
  0xc5   : > { %9776 = vmatprep.subr.msk.bf16.mxu0 %vm519_vm1, %v511_v20  ;;  %v468_v22 = vpop.permute.xlu0 %467  ;;  %3235 = vrot.lane.b32.xlu0 %v11099_v35, %s10941_s24 }
  0xc6   : > { %v508_v28 = vsel %vm481_vm0, %v466_v62, %v468_v22  ;;  %1222 = vmatpush1.bf16.msra.mxu0 %v605_v26  ;;  %v509_v32 = vsel %vm481_vm0, %v468_v22, %v470_v7  ;;  %3237 = vrot.lane.b32.xlu1 %v11128_v42, %s10941_s24  ;;  %v1381_v26 = vsel %vm519_vm1, %v11039_v19, 0 }
  0xc7   : > { %v478_v34 = vpop.permute.xlu1 %477  ;;  %9774 = vmatprep.subr.msk.bf16.mxu1 %vm519_vm1, %v509_v32  ;;  %v599_v38 = vsel %vm519_vm1, %v508_v28, 0  ;;  %10155 = vmatprep.subr.bf16.mxu0 %v13243_v40  ;;  %v1387_v28 = vsel %vm519_vm1, %v11053_v23, 0 }
  0xc8   : > { %1179 = vmatpush1.bf16.msra.mxu1 %v599_v38 }
  0xc9   : > { %v480_v44 = vpop.permute.xlu0 %479  ;;  %3239 = vrot.lane.b32.xlu0 %v11108_v37, %s10941_s24 }
  0xca   : > { %v514_v46 = vsel %vm481_vm0, %v478_v34, %v480_v44  ;;  %3241 = vrot.lane.b32.xlu1 %v11116_v39, %s10941_s24 }
  0xcb   : > { %v617_v50 = vsel %vm519_vm1, %v514_v46, 0  ;;  %v476_v57 = vpop.permute.xlu1 %475  ;;  %9775 = vmatmul.mubr.msk.bf16.vlgmr.msra.gmra.mrb[24].mxu1 %vm515_vm2, %v11255_v0  ;;  %9777 = vmatmul.mubr.msk.bf16.vlgmr.msra.gmra.mrb[28].mxu0 %vm515_vm2, %v11255_v0  ;;  %v1393_v46 = vsel %vm519_vm1, %v11062_v25, 0 }
  0xcc   : > { %v512_v58 = vsel %vm481_vm0, %v474_v16, %v476_v57  ;;  %10156 = vmatpush3.bf16.msra.mxu0 %v617_v50  ;;  %v513_v59 = vsel %vm481_vm0, %v476_v57, %v478_v34  ;;  %1296 = vmatprep.mubr.bf16.mxu1 %v13245_v6  ;;  %v1399_v50 = vsel %vm519_vm1, %v11076_v29, 0 }
  0xcd   : > { %9778 = vmatprep.subr.msk.bf16.mxu1 %vm519_vm1, %v513_v59  ;;  %v611_v60 = vsel %vm519_vm1, %v512_v58, 0  ;;  %10157 = vmatprep.mubr.msk.bf16.mxu0 %vm10943_vm3, %v13243_v40  ;;  %v11426_v61 = vpop.permute.xlu0 %2192 }
  0xce   : > { %1265 = vmatpush1.bf16.msra.mxu1 %v611_v60  ;;  %9782 = vmatprep.subr.msk.bf16.mxu0 %vm519_vm1, %v11013_v12 }
  0xcf   : > { %9784 = vmatprep.subr.msk.bf16.mxu1 %vm519_vm1, %v11036_v18  ;;  %3243 = vrot.lane.b32.xlu0 %v11122_v41, %s10941_s24  ;;  %v11434_v62 = vpop.permute.xlu1 %2194 }
  0xd0   : > { %3245 = vrot.lane.b32.xlu1 %v11151_v48, %s10941_s24 }
  0xd1   : > { %v11442_v2 = vpop.permute.xlu0 %2196 }
  0xd3   : > { %9779 = vmatmul.mubr.msk.bf16.vlgmr.msra.gmra.mrb[28].mxu1 %vm515_vm2, %v11255_v0  ;;  %10158 = vmatmul.mubr.msk.bf16.vlgmr.msra.gmra.mrb[32].mxu0 %vm515_vm2, %v11255_v0  ;;  %v11448_v3 = vpop.permute.xlu1 %2200  ;;  %v11461_v0 = vld [vmem:[%s13240_s1] sm:$0x3f]  }
  0xd4   : > { %1456 = vmatpush1.bf16.msra.mxu0 %v1357_v63  ;;  %1499 = vmatpush1.bf16.msra.mxu1 %v1363_v1  ;;  %v1405_v63 = vsel %vm519_vm1, %v11085_v31, 0  ;;  %v1411_v1 = vsel %vm519_vm1, %v11099_v35, 0 }
  0xd5   : > { %1487 = vmatprep.mubr.bf16.mxu0 %v13245_v6  ;;  %1530 = vmatprep.mubr.bf16.mxu1 %v13245_v6  ;;  %v11452_v4 = vpop.permute.xlu0 %2202 }
  0xd6   : > { %9786 = vmatprep.subr.msk.bf16.mxu0 %vm519_vm1, %v11024_v15  ;;  %9788 = vmatprep.subr.msk.bf16.mxu1 %vm519_vm1, %v11059_v24 }
  0xd7   : > { %3247 = vrot.lane.b32.xlu0 %v11131_v43, %s10941_s24  ;;  %3249 = vrot.lane.b32.xlu1 %v11139_v45, %s10941_s24  ;;  %v11467_v7 = vpop.permute.xlu1 %2204 }
  0xd9   : > { %v11473_v14 = vpop.permute.xlu0 %2198 }
  0xdb   : > { %9783 = vmatmul.mubr.msk.bf16.vlgmr.msra.gmra.mrb[0].mxu0 %vm515_vm2, %v11461_v0  ;;  %9785 = vmatmul.mubr.msk.bf16.vlgmr.msra.gmra.mrb[0].mxu1 %vm515_vm2, %v11461_v0  ;;  %v11479_v16 = vpop.permute.xlu1 %2208 }
  0xdc   : > { %1542 = vmatpush1.bf16.msra.mxu0 %v1369_v8  ;;  %1585 = vmatpush1.bf16.msra.mxu1 %v1375_v10 }
  0xdd   : > { %1573 = vmatprep.mubr.bf16.mxu0 %v13245_v6  ;;  %1616 = vmatprep.mubr.bf16.mxu1 %v13245_v6  ;;  %v11483_v20 = vpop.permute.xlu0 %2210 }
  0xde   : > { %9790 = vmatprep.subr.msk.bf16.mxu0 %vm519_vm1, %v11047_v21  ;;  %9792 = vmatprep.subr.msk.bf16.mxu1 %vm519_vm1, %v11082_v30 }
  0xdf   : > { %3251 = vrot.lane.b32.xlu0 %v11145_v47, %s10941_s24  ;;  %3253 = vrot.lane.b32.xlu1 %v11176_v54, %s10941_s24  ;;  %v11493_v22 = vpop.permute.xlu1 %2212 }
  0xe1   : > { %v11499_v32 = vpop.permute.xlu0 %2206 }
  0xe3   : > { %9787 = vmatmul.mubr.msk.bf16.vlgmr.msra.gmra.mrb[4].mxu0 %vm515_vm2, %v11461_v0  ;;  %9789 = vmatmul.mubr.msk.bf16.vlgmr.msra.gmra.mrb[4].mxu1 %vm515_vm2, %v11461_v0  ;;  %v11505_v34 = vpop.permute.xlu1 %2216 }
  0xe4   : > { %1628 = vmatpush1.bf16.msra.mxu0 %v1381_v26  ;;  %1671 = vmatpush1.bf16.msra.mxu1 %v1387_v28 }
  0xe5   : > { %1659 = vmatprep.mubr.bf16.mxu0 %v13245_v6  ;;  %1702 = vmatprep.mubr.bf16.mxu1 %v13245_v6  ;;  %v11509_v38 = vpop.permute.xlu0 %2218 }
  0xe6   : > { %9794 = vmatprep.subr.msk.bf16.mxu0 %vm519_vm1, %v11070_v27  ;;  %9796 = vmatprep.subr.msk.bf16.mxu1 %vm519_vm1, %v11105_v36 }
  0xe7   : > { %3255 = vrot.lane.b32.xlu0 %v11154_v49, %s10941_s24  ;;  %3257 = vrot.lane.b32.xlu1 %v11162_v51, %s10941_s24  ;;  %v11519_v44 = vpop.permute.xlu1 %2220 }
  0xe9   : > { %v11525_v57 = vpop.permute.xlu0 %2214 }
  0xeb   : > { %9791 = vmatmul.mubr.msk.bf16.vlgmr.msra.gmra.mrb[8].mxu0 %vm515_vm2, %v11461_v0  ;;  %9793 = vmatmul.mubr.msk.bf16.vlgmr.msra.gmra.mrb[8].mxu1 %vm515_vm2, %v11461_v0  ;;  %v11531_v58 = vpop.permute.xlu1 %2224 }
  0xec   : > { %1714 = vmatpush1.bf16.msra.mxu0 %v1393_v46  ;;  %1757 = vmatpush1.bf16.msra.mxu1 %v1399_v50  ;;  %v1417_v46 = vsel %vm519_vm1, %v11108_v37, 0  ;;  %v1423_v50 = vsel %vm519_vm1, %v11122_v41, 0 }
  0xed   : > { %1745 = vmatprep.mubr.bf16.mxu0 %v13245_v6  ;;  %1788 = vmatprep.mubr.bf16.mxu1 %v13245_v6  ;;  %v11535_v59 = vpop.permute.xlu0 %2226 }
  0xee   : > { %9798 = vmatprep.subr.msk.bf16.mxu0 %vm519_vm1, %v11093_v33  ;;  %9800 = vmatprep.subr.msk.bf16.mxu1 %vm519_vm1, %v11128_v42 }
  0xef   : > { %3259 = vrot.lane.b32.xlu0 %v11170_v53, %s10941_s24  ;;  %3261 = vrot.lane.b32.xlu1 %v11190_v56, %s10941_s24  ;;  %v11545_v60 = vpop.permute.xlu1 %2228 }
  0xf1   : > { %v11551_v8 = vpop.permute.xlu0 %2222 }
  0xf3   : > { %9795 = vmatmul.mubr.msk.bf16.vlgmr.msra.gmra.mrb[12].mxu0 %vm515_vm2, %v11461_v0  ;;  %9797 = vmatmul.mubr.msk.bf16.vlgmr.msra.gmra.mrb[12].mxu1 %vm515_vm2, %v11461_v0  ;;  %v11557_v10 = vpop.permute.xlu1 %2232 }
  0xf4   : > { %1800 = vmatpush1.bf16.msra.mxu0 %v1405_v63  ;;  %1843 = vmatpush1.bf16.msra.mxu1 %v1411_v1 }
  0xf5   : > { %1831 = vmatprep.mubr.bf16.mxu0 %v13245_v6  ;;  %1874 = vmatprep.mubr.bf16.mxu1 %v13245_v6  ;;  %v11561_v26 = vpop.permute.xlu0 %2234 }
  0xf6   : > { %9802 = vmatprep.subr.msk.bf16.mxu0 %vm519_vm1, %v11116_v39  ;;  %9804 = vmatprep.subr.msk.bf16.mxu1 %vm519_vm1, %v11151_v48 }
  0xf7   : > { %3263 = vrot.lane.b32.xlu0 %v11165_v52, %s10941_s24  ;;  %4206 = vrot.lane.b32.xlu1 %v11004_v9, %s10944_s27  ;;  %v11571_v28 = vpop.permute.xlu1 %2236 }
  0xf9   : > { %v11577_v63 = vpop.permute.xlu0 %2230 }
  0xfb   : > { %9799 = vmatmul.mubr.msk.bf16.vlgmr.msra.gmra.mrb[16].mxu0 %vm515_vm2, %v11461_v0  ;;  %9801 = vmatmul.mubr.msk.bf16.vlgmr.msra.gmra.mrb[16].mxu1 %vm515_vm2, %v11461_v0  ;;  %v11583_v1 = vpop.permute.xlu1 %2240 }
  0xfc   : > { %1886 = vmatpush1.bf16.msra.mxu0 %v1417_v46  ;;  %1929 = vmatpush1.bf16.msra.mxu1 %v1423_v50  ;;  %v1429_v50 = vsel %vm519_vm1, %v11131_v43, 0 }
  0xfd   : > { %1917 = vmatprep.mubr.bf16.mxu0 %v13245_v6  ;;  %1960 = vmatprep.mubr.bf16.mxu1 %v13245_v6  ;;  %v11587_v40 = vpop.permute.xlu0 %2242  ;;  %v1435_v6 = vsel %vm519_vm1, %v11145_v47, 0 }
  0xfe   : > { %9806 = vmatprep.subr.msk.bf16.mxu0 %vm519_vm1, %v11139_v45  ;;  %9808 = vmatprep.subr.msk.bf16.mxu1 %vm519_vm1, %v11176_v54  ;;  %v1447_v54 = vsel %vm519_vm1, %v11170_v53, 0  ;;  %v2261_v53 = vsel %vm2260_vm4, %v11426_v61, %v11434_v62  ;;  %v2266_v61 = vsel %vm2260_vm4, %v11452_v4, %v11467_v7 }
  0xff   : > { %4208 = vrot.lane.b32.xlu0 %v11013_v12, %s10944_s27  ;;  %4210 = vrot.lane.b32.xlu1 %v11009_v11, %s10944_s27  ;;  %v11597_v46 = vpop.permute.xlu1 %2244  ;;  %v13281_v11 = vmov 0  }
 0x101   : > { %v11603_v5 = vpop.permute.xlu0 %2238 }
 0x103   : > { %9803 = vmatmul.mubr.msk.bf16.vlgmr.msra.gmra.mrb[20].mxu0 %vm515_vm2, %v11461_v0  ;;  %9805 = vmatmul.mubr.msk.bf16.vlgmr.msra.gmra.mrb[20].mxu1 %vm515_vm2, %v11461_v0  ;;  %v11609_v12 = vpop.permute.xlu1 %2248 }
 0x104   : > { %1972 = vmatpush1.bf16.msra.mxu0 %v1429_v50  ;;  %2015 = vmatpush1.bf16.msra.mxu1 %v1435_v6  ;;  %v1441_v6 = vsel %vm519_vm1, %v11154_v49, 0 }
 0x105   : > { %2003 = vmatprep.mubr.bf16.mxu0 %v13281_v11  ;;  %2046 = vmatprep.mubr.bf16.mxu1 %v13281_v11  ;;  %v11613_v9 = vpop.permute.xlu0 %2250 }
 0x106   : > { %9810 = vmatprep.subr.msk.bf16.mxu0 %vm519_vm1, %v11162_v51  ;;  %9812 = vmatprep.subr.msk.bf16.mxu1 %vm519_vm1, %v11190_v56  ;;  %v2262_v56 = vsel %vm2260_vm4, %v11434_v62, %v11442_v2  ;;  %v13282_v51 = vmov 0.0   ;;  %v2265_v62 = vsel %vm2260_vm4, %v11448_v3, %v11452_v4 }
 0x107   : > { %3265 = vrot.lane.b32.xlu0 %v11184_v55, %s10941_s24  ;;  %4214 = vrot.lane.b32.xlu1 %v11016_v13, %s10944_s27  ;;  %v11623_v50 = vpop.permute.xlu1 %2252  ;;  %v2310_v4 = vsel %vm519_vm1, %v2265_v62, 0 }
 0x109   : > { %v11636_v13 = vpop.permute.xlu0 %2246 }
 0x10b   : > { %9807 = vmatmul.mubr.msk.bf16.vlgmr.msra.gmra.mrb[24].mxu0 %vm515_vm2, %v11461_v0  ;;  %9809 = vmatmul.mubr.msk.bf16.vlgmr.msra.gmra.mrb[24].mxu1 %vm515_vm2, %v11461_v0  ;;  %v11640_v55 = vpop.permute.xlu1 %2256 }
 0x10c   : > { %2058 = vmatpush1.bf16.msra.mxu0 %v1441_v6  ;;  %2101 = vmatpush1.bf16.msra.mxu1 %v1447_v54  ;;  %v2298_v54 = vsel %vm519_vm1, %v2261_v53, 0  ;;  %v1453_v6 = vsel %vm519_vm1, %v11165_v52, 0 }
 0x10d   : > { %2089 = vmatprep.mubr.bf16.mxu0 %v13281_v11  ;;  %2132 = vmatprep.mubr.bf16.mxu1 %v13281_v11 }
 0x10e   : > { %9818 = vmatprep.subr.msk.bf16.mxu0 %vm519_vm1, %v2262_v56  ;;  %10161 = vmatprep.subr.bf16.mxu1 %v13282_v51  ;;  %v2264_v56 = vsel %vm2260_vm4, %v11473_v14, %v11448_v3  ;;  %v2263_v3 = vsel %vm2260_vm4, %v11442_v2, %v11473_v14  ;;  %v2270_v2 = vsel %vm2260_vm4, %v11483_v20, %v11493_v22 }
 0x10f   : > { %4216 = vrot.lane.b32.xlu0 %v11024_v15, %s10944_s27  ;;  %4218 = vrot.lane.b32.xlu1 %v11030_v17, %s10944_s27  ;;  %v11654_v49 = vpop.permute.xlu0 %2258  ;;  %v11679_v17 = vld [vmem:[%s13240_s1 + $0x10] sm:$0x3f]   ;;  %v2269_v14 = vsel %vm2260_vm4, %v11479_v16, %v11483_v20  ;;  %v2272_v20 = vsel %vm2260_vm4, %v11525_v57, %v11505_v34 }
 0x110   : > { %v11666_v53 = vpop.permute.xlu1 %2254 }
 0x113   : > { %9811 = vmatmul.mubr.msk.bf16.vlgmr.msra.gmra.mrb[28].mxu0 %vm515_vm2, %v11461_v0  ;;  %9813 = vmatmul.mubr.msk.bf16.vlgmr.msra.gmra.mrb[28].mxu1 %vm515_vm2, %v11461_v0 }
 0x114   : > { %2397 = vmatpush1.bf16.msra.mxu0 %v2298_v54  ;;  %10162 = vmatpush3.bf16.msra.mxu1 %v1453_v6  ;;  %v11685_v54 = vpop.permute.xlu0 %3199  ;;  %v11691_v6 = vpop.permute.xlu1 %3201 }
 0x115   : > { %10163 = vmatprep.mubr.msk.bf16.mxu1 %vm10943_vm3, %v13282_v51  ;;  %2428 = vmatprep.mubr.bf16.mxu0 %v13281_v11 }
 0x116   : > { %9820 = vmatprep.subr.msk.bf16.mxu1 %vm519_vm1, %v2264_v56  ;;  %9822 = vmatprep.subr.msk.bf16.mxu0 %vm519_vm1, %v2266_v61  ;;  %v2304_v56 = vsel %vm519_vm1, %v2263_v3, 0  ;;  %v2268_v61 = vsel %vm2260_vm4, %v11499_v32, %v11479_v16  ;;  %v2267_v3 = vsel %vm2260_vm4, %v11467_v7, %v11499_v32  ;;  %v2273_v32 = vsel %vm2260_vm4, %v11505_v34, %v11509_v38 }
 0x117   : > { %4212 = vrot.lane.b32.xlu0 %v11036_v18, %s10944_s27  ;;  %4222 = vrot.lane.b32.xlu1 %v11039_v19, %s10944_s27  ;;  %v2316_v16 = vsel %vm519_vm1, %v2267_v3, 0 }
 0x118   : > { %v11717_v62 = vpop.permute.xlu1 %3205 }
 0x11b   : > { %10164 = vmatmul.mubr.msk.bf16.vlgmr.msra.gmra.mrb[32].mxu1 %vm515_vm2, %v11461_v0  ;;  %9819 = vmatmul.mubr.msk.bf16.vlgmr.msra.gmra.mrb[0].mxu0 %vm515_vm2, %v11679_v17  ;;  %v11706_v0 = vpop.permute.xlu0 %3203 }
 0x11c   : > { %2440 = vmatpush1.bf16.msra.mxu1 %v2304_v56  ;;  %2483 = vmatpush1.bf16.msra.mxu0 %v2310_v4  ;;  %v2322_v4 = vsel %vm519_vm1, %v2269_v14, 0  ;;  %v2274_v56 = vsel %vm2260_vm4, %v11509_v38, %v11519_v44  ;;  %v11738_v7 = vpop.permute.xlu1 %3209  ;;  %v2334_v14 = vsel %vm519_vm1, %v2273_v32, 0  ;;  %v2276_v38 = vsel %vm2260_vm4, %v11551_v8, %v11531_v58 }
 0x11d   : > { %2471 = vmatprep.mubr.bf16.mxu1 %v13281_v11  ;;  %2514 = vmatprep.mubr.bf16.mxu0 %v13281_v11 }
 0x11e   : > { %9824 = vmatprep.subr.msk.bf16.mxu1 %vm519_vm1, %v2268_v61  ;;  %9826 = vmatprep.subr.msk.bf16.mxu0 %vm519_vm1, %v2270_v2  ;;  %v2271_v2 = vsel %vm2260_vm4, %v11493_v22, %v11525_v57  ;;  %v2278_v22 = vsel %vm2260_vm4, %v11535_v59, %v11545_v60 }
 0x11f   : > { %4224 = vrot.lane.b32.xlu0 %v11047_v21, %s10944_s27  ;;  %4226 = vrot.lane.b32.xlu1 %v11053_v23, %s10944_s27  ;;  %v11734_v61 = vpop.permute.xlu0 %3207  ;;  %v2328_v34 = vsel %vm519_vm1, %v2271_v2, 0  ;;  %v2281_v2 = vsel %vm2260_vm4, %v11557_v10, %v11561_v26 }
 0x120   : > { %v11766_v57 = vpop.permute.xlu1 %3213 }
 0x123   : > { %9821 = vmatmul.mubr.msk.bf16.vlgmr.msra.gmra.mrb[0].mxu1 %vm515_vm2, %v11679_v17  ;;  %9823 = vmatmul.mubr.msk.bf16.vlgmr.msra.gmra.mrb[4].mxu0 %vm515_vm2, %v11679_v17  ;;  %v11753_v3 = vpop.permute.xlu0 %3211 }
 0x124   : > { %2526 = vmatpush1.bf16.msra.mxu1 %v2316_v16  ;;  %2569 = vmatpush1.bf16.msra.mxu0 %v2322_v4  ;;  %v2277_v4 = vsel %vm2260_vm4, %v11531_v58, %v11535_v59  ;;  %v11785_v32 = vpop.permute.xlu1 %3217  ;;  %v2280_v59 = vsel %vm2260_vm4, %v11577_v63, %v11557_v10 }
 0x125   : > { %2557 = vmatprep.mubr.bf16.mxu1 %v13281_v11  ;;  %2600 = vmatprep.mubr.bf16.mxu0 %v13281_v11 }
 0x126   : > { %9828 = vmatprep.subr.msk.bf16.mxu1 %vm519_vm1, %v2272_v20  ;;  %9830 = vmatprep.subr.msk.bf16.mxu0 %vm519_vm1, %v2274_v56  ;;  %v2275_v20 = vsel %vm2260_vm4, %v11519_v44, %v11551_v8  ;;  %v2346_v56 = vsel %vm519_vm1, %v2277_v4, 0  ;;  %v2282_v44 = vsel %vm2260_vm4, %v11561_v26, %v11571_v28  ;;  %v2285_v4 = vsel %vm2260_vm4, %v11583_v1, %v11587_v40 }
 0x127   : > { %4220 = vrot.lane.b32.xlu0 %v11059_v24, %s10944_s27  ;;  %4230 = vrot.lane.b32.xlu1 %v11062_v25, %s10944_s27  ;;  %v11779_v16 = vpop.permute.xlu0 %3215  ;;  %v2340_v58 = vsel %vm519_vm1, %v2275_v20, 0  ;;  %v2283_v20 = vsel %vm2260_vm4, %v11571_v28, %v11603_v5  ;;  %v2290_v28 = vsel %vm2260_vm4, %v11613_v9, %v11623_v50 }
 0x12b   : > { %9825 = vmatmul.mubr.msk.bf16.vlgmr.msra.gmra.mrb[4].mxu1 %vm515_vm2, %v11679_v17  ;;  %9827 = vmatmul.mubr.msk.bf16.vlgmr.msra.gmra.mrb[8].mxu0 %vm515_vm2, %v11679_v17  ;;  %v11801_v8 = vpop.permute.xlu0 %3219 }
 0x12c   : > { %2612 = vmatpush1.bf16.msra.mxu1 %v2328_v34  ;;  %2655 = vmatpush1.bf16.msra.mxu0 %v2334_v14  ;;  %v11811_v14 = vpop.permute.xlu1 %3221  ;;  %v2279_v34 = vsel %vm2260_vm4, %v11545_v60, %v11577_v63  ;;  %v2284_v60 = vsel %vm2260_vm4, %v11603_v5, %v11583_v1  ;;  %v2286_v63 = vsel %vm2260_vm4, %v11587_v40, %v11597_v46  ;;  %v2364_v1 = vsel %vm519_vm1, %v2283_v20, 0 }
 0x12d   : > { %2643 = vmatprep.mubr.bf16.mxu1 %v13281_v11  ;;  %2686 = vmatprep.mubr.bf16.mxu0 %v13281_v11  ;;  %v2352_v10 = vsel %vm519_vm1, %v2279_v34, 0  ;;  %v2288_v5 = vsel %vm2260_vm4, %v11636_v13, %v11609_v12 }
 0x12e   : > { %9832 = vmatprep.subr.msk.bf16.mxu1 %vm519_vm1, %v2276_v38  ;;  %9834 = vmatprep.subr.msk.bf16.mxu0 %vm519_vm1, %v2278_v22  ;;  %v2358_v38 = vsel %vm519_vm1, %v2281_v2, 0  ;;  %v2287_v2 = vsel %vm2260_vm4, %v11597_v46, %v11636_v13  ;;  %v2292_v13 = vsel %vm2260_vm4, %v11666_v53, %v11640_v55 }
 0x12f   : > { %4232 = vrot.lane.b32.xlu0 %v11070_v27, %s10944_s27  ;;  %4234 = vrot.lane.b32.xlu1 %v11076_v29, %s10944_s27  ;;  %v11824_v26 = vpop.permute.xlu0 %3223 }
 0x130   : > { %v11836_v22 = vpop.permute.xlu1 %3225 }
 0x133   : > { %9829 = vmatmul.mubr.msk.bf16.vlgmr.msra.gmra.mrb[8].mxu1 %vm515_vm2, %v11679_v17  ;;  %9831 = vmatmul.mubr.msk.bf16.vlgmr.msra.gmra.mrb[12].mxu0 %vm515_vm2, %v11679_v17  ;;  %v11853_v40 = vpop.permute.xlu0 %3227 }
 0x134   : > { %2698 = vmatpush1.bf16.msra.mxu1 %v2340_v58  ;;  %2741 = vmatpush1.bf16.msra.mxu0 %v2346_v56  ;;  %v2370_v56 = vsel %vm519_vm1, %v2285_v4, 0  ;;  %v11860_v58 = vpop.permute.xlu1 %3229  ;;  %v13283_v4 = vld [vmem:[#allocation8_spill] sm:$0xff] }
 0x135   : > { %4228 = vrot.lane.b32.xlu0 %v11082_v30, %s10944_s27  ;;  %2729 = vmatprep.mubr.bf16.mxu1 %v13281_v11 }
 0x136   : > { %2772 = vmatprep.mubr.bf16.mxu0 %v13281_v11  ;;  %9836 = vmatprep.subr.msk.bf16.mxu1 %vm519_vm1, %v2280_v59  ;;  %v2289_v59 = vsel %vm2260_vm4, %v11609_v12, %v11613_v9  ;;  %v2376_v12 = vsel %vm519_vm1, %v2287_v2, 0 }
 0x137   : > { %9838 = vmatprep.subr.msk.bf16.mxu0 %vm519_vm1, %v2282_v44  ;;  %4238 = vrot.lane.b32.xlu1 %v11085_v31, %s10944_s27  ;;  %v11879_v44 = vpop.permute.xlu0 %3231  ;;  %v2382_v34 = vsel %vm519_vm1, %v2289_v59, 0  ;;  %v3268_v59 = vsel %vm3267_vm5, %v11685_v54, %v11691_v6  ;;  %v3273_v54 = vsel %vm3267_vm5, %v11738_v7, %v11753_v3 }
 0x138   : > { %v11889_v9 = vpop.permute.xlu1 %3233 }
 0x139   : > { %4240 = vrot.lane.b32.xlu0 %v11093_v33, %s10944_s27 }
 0x13b   : > { %9833 = vmatmul.mubr.msk.bf16.vlgmr.msra.gmra.mrb[12].mxu1 %vm515_vm2, %v11679_v17  ;;  %9835 = vmatmul.mubr.msk.bf16.vlgmr.msra.gmra.mrb[16].mxu0 %vm515_vm2, %v11679_v17  ;;  %v11903_v46 = vpop.permute.xlu0 %3235 }
 0x13c   : > { %2784 = vmatpush1.bf16.msra.mxu1 %v2352_v10  ;;  %2827 = vmatpush1.bf16.msra.mxu0 %v2358_v38  ;;  %v2293_v38 = vsel %vm2260_vm4, %v11640_v55, %v11654_v49  ;;  %v11912_v10 = vpop.permute.xlu1 %3237  ;;  %v13284_v49 = vld [vmem:[#allocation9_spill] sm:$0xff] }
 0x13d   : > { %4242 = vrot.lane.b32.xlu1 %v11099_v35, %s10944_s27  ;;  %4236 = vrot.lane.b32.xlu0 %v11105_v36, %s10944_s27 }
 0x13e   : > { %2815 = vmatprep.mubr.bf16.mxu1 %v13281_v11  ;;  %2858 = vmatprep.mubr.bf16.mxu0 %v13281_v11 }
 0x13f   : > { %9840 = vmatprep.subr.msk.bf16.mxu1 %vm519_vm1, %v2284_v60  ;;  %9842 = vmatprep.subr.msk.bf16.mxu0 %vm519_vm1, %v2286_v63  ;;  %v2291_v60 = vsel %vm2260_vm4, %v11623_v50, %v11666_v53  ;;  %v2394_v63 = vsel %vm519_vm1, %v2293_v38, 0  ;;  %v11927_v20 = vpop.permute.xlu0 %3239  ;;  %v3269_v50 = vsel %vm3267_vm5, %v11691_v6, %v11706_v0  ;;  %v3271_v53 = vsel %vm3267_vm5, %v11717_v62, %v11734_v61 }
 0x140   : > { %v2388_v55 = vsel %vm519_vm1, %v2291_v60, 0  ;;  %v3275_v6 = vsel %vm3267_vm5, %v11766_v57, %v11779_v16  ;;  %v3274_v38 = vsel %vm3267_vm5, %v11753_v3, %v11766_v57  ;;  %v11985_v60 = vld [vmem:[%s13240_s1 + $0x18] sm:$0x3f]   ;;  %v13290_v57 = vld [vmem:[#allocation5_spill] sm:$0xff] }
 0x141   : > { %4246 = vrot.lane.b32.xlu1 %v11108_v37, %s10944_s27  ;;  %4248 = vrot.lane.b32.xlu0 %v11116_v39, %s10944_s27  ;;  %v3323_v3 = vsel %vm519_vm1, %v3274_v38, 0 }
 0x143   : > { %9837 = vmatmul.mubr.msk.bf16.vlgmr.msra.gmra.mrb[16].mxu1 %vm515_vm2, %v11679_v17  ;;  %9839 = vmatmul.mubr.msk.bf16.vlgmr.msra.gmra.mrb[20].mxu0 %vm515_vm2, %v11679_v17 }
 0x144   : > { %2870 = vmatpush1.bf16.msra.mxu1 %v2364_v1  ;;  %2913 = vmatpush1.bf16.msra.mxu0 %v2370_v56  ;;  %v13285_v56 = vld [vmem:[#allocation10_spill] sm:$0xff]  ;;  %v13286_v1 = vld [vmem:[#allocation11_spill] sm:$0xff] }
 0x145   : > { %4250 = vrot.lane.b32.xlu1 %v11122_v41, %s10944_s27  ;;  %4244 = vrot.lane.b32.xlu0 %v11128_v42, %s10944_s27 }
 0x146   : > { %2901 = vmatprep.mubr.bf16.mxu1 %v13281_v11  ;;  %2944 = vmatprep.mubr.bf16.mxu0 %v13281_v11 }
 0x147   : > { %9844 = vmatprep.subr.msk.bf16.mxu1 %vm519_vm1, %v2288_v5  ;;  %9846 = vmatprep.subr.msk.bf16.mxu0 %vm519_vm1, %v2290_v28  ;;  %v11939_v5 = vpop.permute.xlu1 %3241  ;;  %v3270_v28 = vsel %vm3267_vm5, %v11706_v0, %v11717_v62  ;;  %v13287_v0 = vld [vmem:[#allocation12_spill] sm:$0xff]  ;;  %v11957_v62 = vpop.permute.xlu0 %3243 }
 0x148   : > { %v3311_v2 = vsel %vm519_vm1, %v3270_v28, 0 }
 0x149   : > { %4254 = vrot.lane.b32.xlu1 %v11131_v43, %s10944_s27  ;;  %4256 = vrot.lane.b32.xlu0 %v11139_v45, %s10944_s27 }
 0x14b   : > { %9841 = vmatmul.mubr.msk.bf16.vlgmr.msra.gmra.mrb[20].mxu1 %vm515_vm2, %v11679_v17  ;;  %9843 = vmatmul.mubr.msk.bf16.vlgmr.msra.gmra.mrb[24].mxu0 %vm515_vm2, %v11679_v17 }
 0x14c   : > { %2956 = vmatpush1.bf16.msra.mxu1 %v2376_v12  ;;  %2999 = vmatpush1.bf16.msra.mxu0 %v2382_v34  ;;  %v3305_v34 = vsel %vm519_vm1, %v3268_v59, 0  ;;  %v11964_v12 = vpop.permute.xlu1 %3245  ;;  %v13292_v59 = vld [vmem:[#allocation6_spill] sm:$0xff] }
 0x14d   : > { %4258 = vrot.lane.b32.xlu1 %v11145_v47, %s10944_s27  ;;  %4252 = vrot.lane.b32.xlu0 %v11151_v48, %s10944_s27 }
 0x14e   : > { %2987 = vmatprep.mubr.bf16.mxu1 %v13281_v11  ;;  %3030 = vmatprep.mubr.bf16.mxu0 %v13281_v11 }
 0x14f   : > { %9848 = vmatprep.subr.msk.bf16.mxu1 %vm519_vm1, %v2292_v13  ;;  %10167 = vmatprep.subr.bf16.mxu0 %v13282_v51  ;;  %v13288_v13 = vld [vmem:[#allocation13_spill] sm:$0xff] }
 0x151   : > { %4262 = vrot.lane.b32.xlu1 %v13283_v4, %s10944_s27  ;;  %4264 = vrot.lane.b32.xlu0 %v13284_v49, %s10944_s27 }
 0x153   : > { %9845 = vmatmul.mubr.msk.bf16.vlgmr.msra.gmra.mrb[24].mxu1 %vm515_vm2, %v11679_v17  ;;  %9847 = vmatmul.mubr.msk.bf16.vlgmr.msra.gmra.mrb[28].mxu0 %vm515_vm2, %v11679_v17 }
 0x154   : > { %3042 = vmatpush1.bf16.msra.mxu1 %v2388_v55  ;;  %10168 = vmatpush3.bf16.msra.mxu0 %v2394_v63  ;;  %v11988_v63 = vpop.permute.xlu0 %3247  ;;  %v3272_v55 = vsel %vm3267_vm5, %v11734_v61, %v11738_v7  ;;  %v3277_v61 = vsel %vm3267_vm5, %v11785_v32, %v11801_v8  ;;  %v3279_v7 = vsel %vm3267_vm5, %v11811_v14, %v11824_v26 }
 0x155   : > { %4266 = vrot.lane.b32.xlu1 %v13285_v56, %s10944_s27  ;;  %4260 = vrot.lane.b32.xlu0 %v13286_v1, %s10944_s27  ;;  %v3317_v28 = vsel %vm519_vm1, %v3272_v55, 0 }
 0x156   : > { %3073 = vmatprep.mubr.bf16.mxu1 %v13281_v11  ;;  %10169 = vmatprep.mubr.msk.bf16.mxu0 %vm10943_vm3, %v13282_v51 }
 0x157   : > { %9854 = vmatprep.subr.msk.bf16.mxu0 %vm519_vm1, %v3269_v50  ;;  %9856 = vmatprep.subr.msk.bf16.mxu1 %vm519_vm1, %v3271_v53  ;;  %v13291_v50 = vld [vmem:[#allocation4_spill] sm:$0xff]  ;;  %v11998_v53 = vpop.permute.xlu1 %3249 }
 0x159   : > { %4270 = vrot.lane.b32.xlu1 %v11165_v52, %s10944_s27  ;;  %4272 = vrot.lane.b32.xlu0 %v13287_v0, %s10944_s27 }
 0x15b   : > { %9849 = vmatmul.mubr.msk.bf16.vlgmr.msra.gmra.mrb[28].mxu1 %vm515_vm2, %v11679_v17  ;;  %10170 = vmatmul.mubr.msk.bf16.vlgmr.msra.gmra.mrb[36].mxu0 %vm515_vm2, %v11679_v17  ;;  %v13289_v17 = vld [vmem:[#allocation3_spill] sm:$0xff] }
 0x15c   : > { %3404 = vmatpush1.bf16.msra.mxu0 %v3305_v34  ;;  %3447 = vmatpush1.bf16.msra.mxu1 %v3311_v2  ;;  %v12015_v2 = vpop.permute.xlu0 %3251  ;;  %v3278_v34 = vsel %vm3267_vm5, %v11801_v8, %v11811_v14  ;;  %v13293_v8 = vld [vmem:[#allocation7_spill] sm:$0xff] }
 0x15d   : > { %4268 = vrot.lane.b32.xlu1 %v13288_v13, %s10944_s27  ;;  %5213 = vrot.lane.b32.xlu0 %v13289_v17, %s10945_s30  ;;  %v3335_v17 = vsel %vm519_vm1, %v3278_v34, 0  ;;  %v3286_v34 = vsel %vm3267_vm5, %v11903_v46, %v11912_v10  ;;  %s10722_s27 = smul.u32 264, %s13300_s12 }
 0x15e   : > { %3435 = vmatprep.mubr.bf16.mxu0 %v13281_v11  ;;  %3478 = vmatprep.mubr.bf16.mxu1 %v13281_v11 }
 0x15f   : > { %9858 = vmatprep.subr.msk.bf16.mxu0 %vm519_vm1, %v3273_v54  ;;  %9860 = vmatprep.subr.msk.bf16.mxu1 %vm519_vm1, %v3275_v6  ;;  %v12024_v54 = vpop.permute.xlu1 %3253  ;;  %v3276_v6 = vsel %vm3267_vm5, %v11779_v16, %v11785_v32  ;;  %v3281_v16 = vsel %vm3267_vm5, %v11836_v22, %v11853_v40  ;;  %v3283_v32 = vsel %vm3267_vm5, %v11860_v58, %v11879_v44  ;;  %s13137_s29 = scalar_lea.vmem %s13242_s3, %s10722_s27 }
 0x160   : > { %v3329_v14 = vsel %vm519_vm1, %v3276_v6, 0  ;;  %v12039_v38 = vpop.permute.xlu0 %3255 }
 0x161   : > { %5215 = vrot.lane.b32.xlu1 %v13290_v57, %s10945_s30  ;;  %5217 = vrot.lane.b32.xlu0 %v13291_v50, %s10945_s30 }
 0x163   : > { %9855 = vmatmul.mubr.msk.bf16.vlgmr.msra.gmra.mrb[0].mxu0 %vm515_vm2, %v11985_v60  ;;  %9857 = vmatmul.mubr.msk.bf16.vlgmr.msra.gmra.mrb[0].mxu1 %vm515_vm2, %v11985_v60  ;;  %v12051_v55 = vpop.permute.xlu1 %3257 }
 0x164   : > { %3490 = vmatpush1.bf16.msra.mxu0 %v3317_v28  ;;  %3533 = vmatpush1.bf16.msra.mxu1 %v3323_v3  ;;  %v3282_v3 = vsel %vm3267_vm5, %v11853_v40, %v11860_v58  ;;  %v3280_v28 = vsel %vm3267_vm5, %v11824_v26, %v11836_v22  ;;  %v12068_v40 = vpop.permute.xlu0 %3259  ;;  %v3285_v26 = vsel %vm3267_vm5, %v11889_v9, %v11903_v46 }
 0x165   : > { %5219 = vrot.lane.b32.xlu1 %v11036_v18, %s10945_s30  ;;  %5221 = vrot.lane.b32.xlu0 %v13292_v59, %s10945_s30  ;;  %v3341_v58 = vsel %vm519_vm1, %v3280_v28, 0  ;;  %v3287_v22 = vsel %vm3267_vm5, %v11912_v10, %v11927_v20  ;;  %v3288_v28 = vsel %vm3267_vm5, %v11927_v20, %v11939_v5  ;;  %v3293_v20 = vsel %vm3267_vm5, %v11998_v53, %v12015_v2 }
 0x166   : > { %3521 = vmatprep.mubr.bf16.mxu0 %v13281_v11  ;;  %3564 = vmatprep.mubr.bf16.mxu1 %v13281_v11 }
 0x167   : > { %9862 = vmatprep.subr.msk.bf16.mxu0 %vm519_vm1, %v3277_v61  ;;  %9864 = vmatprep.subr.msk.bf16.mxu1 %vm519_vm1, %v3279_v7  ;;  %v3347_v61 = vsel %vm519_vm1, %v3282_v3, 0  ;;  %v12075_v7 = vpop.permute.xlu1 %3261 }
 0x169   : > { %5223 = vrot.lane.b32.xlu1 %v11024_v15, %s10945_s30  ;;  %5225 = vrot.lane.b32.xlu0 %v13293_v8, %s10945_s30  ;;  %v12094_v6 = vpop.permute.xlu0 %3263 }
 0x16b   : > { %9859 = vmatmul.mubr.msk.bf16.vlgmr.msra.gmra.mrb[4].mxu0 %vm515_vm2, %v11985_v60  ;;  %9861 = vmatmul.mubr.msk.bf16.vlgmr.msra.gmra.mrb[4].mxu1 %vm515_vm2, %v11985_v60  ;;  %v12104_v46 = vpop.permute.xlu1 %4206 }
 0x16c   : > { %3576 = vmatpush1.bf16.msra.mxu0 %v3329_v14  ;;  %3619 = vmatpush1.bf16.msra.mxu1 %v3335_v17  ;;  %v3284_v17 = vsel %vm3267_vm5, %v11879_v44, %v11889_v9  ;;  %v3359_v14 = vsel %vm519_vm1, %v3286_v34, 0  ;;  %v3289_v44 = vsel %vm3267_vm5, %v11939_v5, %v11957_v62  ;;  %v3291_v9 = vsel %vm3267_vm5, %v11964_v12, %v11988_v63 }
 0x16d   : > { %5227 = vrot.lane.b32.xlu1 %v11059_v24, %s10945_s30  ;;  %5229 = vrot.lane.b32.xlu0 %v11039_v19, %s10945_s30  ;;  %v3353_v10 = vsel %vm519_vm1, %v3284_v17, 0  ;;  %v3295_v5 = vsel %vm3267_vm5, %v12024_v54, %v12039_v38 }
 0x16e   : > { %3607 = vmatprep.mubr.bf16.mxu0 %v13281_v11  ;;  %3650 = vmatprep.mubr.bf16.mxu1 %v13281_v11 }
 0x16f   : > { %9866 = vmatprep.subr.msk.bf16.mxu0 %vm519_vm1, %v3281_v16  ;;  %9868 = vmatprep.subr.msk.bf16.mxu1 %vm519_vm1, %v3283_v32  ;;  %v3290_v32 = vsel %vm3267_vm5, %v11957_v62, %v11964_v12  ;;  %v3365_v62 = vsel %vm519_vm1, %v3288_v28, 0 }
 0x171   : > { %5231 = vrot.lane.b32.xlu1 %v11047_v21, %s10945_s30  ;;  %5233 = vrot.lane.b32.xlu0 %v11053_v23, %s10945_s30  ;;  %v12121_v16 = vpop.permute.xlu0 %4208  ;;  %v12130_v3 = vpop.permute.xlu1 %4210 }
 0x173   : > { %9863 = vmatmul.mubr.msk.bf16.vlgmr.msra.gmra.mrb[8].mxu0 %vm515_vm2, %v11985_v60  ;;  %9865 = vmatmul.mubr.msk.bf16.vlgmr.msra.gmra.mrb[8].mxu1 %vm515_vm2, %v11985_v60 }
 0x174   : > { %3662 = vmatpush1.bf16.msra.mxu0 %v3341_v58  ;;  %3705 = vmatpush1.bf16.msra.mxu1 %v3347_v61  ;;  %v3371_v61 = vsel %vm519_vm1, %v3290_v32, 0  ;;  %v4275_v32 = vsel %vm4274_vm6, %v12104_v46, %v12121_v16 }
 0x175   : > { %5235 = vrot.lane.b32.xlu1 %v11082_v30, %s10945_s30  ;;  %5237 = vrot.lane.b32.xlu0 %v11062_v25, %s10945_s30 }
 0x176   : > { %3693 = vmatprep.mubr.bf16.mxu0 %v13281_v11  ;;  %3736 = vmatprep.mubr.bf16.mxu1 %v13281_v11 }
 0x177   : > { %9870 = vmatprep.subr.msk.bf16.mxu0 %vm519_vm1, %v3285_v26  ;;  %9872 = vmatprep.subr.msk.bf16.mxu1 %vm519_vm1, %v3287_v22  ;;  %v3294_v26 = vsel %vm3267_vm5, %v12015_v2, %v12024_v54  ;;  %v3292_v22 = vsel %vm3267_vm5, %v11988_v63, %v11998_v53  ;;  %v3297_v63 = vsel %vm3267_vm5, %v12051_v55, %v12068_v40 }
 0x178   : > { %v3383_v34 = vsel %vm519_vm1, %v3294_v26, 0  ;;  %v3377_v54 = vsel %vm519_vm1, %v3292_v22, 0  ;;  %v3299_v53 = vsel %vm3267_vm5, %v12075_v7, %v12094_v6  ;;  %v12255_v26 = vld [vmem:[%s13240_s1 + $0x20] sm:$0x3f]  }
 0x179   : > { %5239 = vrot.lane.b32.xlu1 %v11070_v27, %s10945_s30  ;;  %5241 = vrot.lane.b32.xlu0 %v11076_v29, %s10945_s30  ;;  %v3266_v12 = vpop.permute.xlu0 %3265  ;;  %v12155_v58 = vpop.permute.xlu1 %4214 }
 0x17b   : > { %9867 = vmatmul.mubr.msk.bf16.vlgmr.msra.gmra.mrb[12].mxu0 %vm515_vm2, %v11985_v60  ;;  %9869 = vmatmul.mubr.msk.bf16.vlgmr.msra.gmra.mrb[12].mxu1 %vm515_vm2, %v11985_v60 }
 0x17c   : > { %3748 = vmatpush1.bf16.msra.mxu0 %v3353_v10  ;;  %3791 = vmatpush1.bf16.msra.mxu1 %v3359_v14  ;;  %v3298_v14 = vsel %vm3267_vm5, %v12068_v40, %v12075_v7 }
 0x17d   : > { %5243 = vrot.lane.b32.xlu1 %v11105_v36, %s10945_s30  ;;  %5245 = vrot.lane.b32.xlu0 %v11085_v31, %s10945_s30 }
 0x17e   : > { %3779 = vmatprep.mubr.bf16.mxu0 %v13281_v11  ;;  %3822 = vmatprep.mubr.bf16.mxu1 %v13281_v11 }
 0x17f   : > { %9874 = vmatprep.subr.msk.bf16.mxu0 %vm519_vm1, %v3289_v44  ;;  %9876 = vmatprep.subr.msk.bf16.mxu1 %vm519_vm1, %v3291_v9  ;;  %v3296_v44 = vsel %vm3267_vm5, %v12039_v38, %v12051_v55  ;;  %v3395_v9 = vsel %vm519_vm1, %v3298_v14, 0  ;;  %v4276_v38 = vsel %vm4274_vm6, %v12121_v16, %v12130_v3 }
 0x180   : > { %v3389_v7 = vsel %vm519_vm1, %v3296_v44, 0 }
 0x181   : > { %5247 = vrot.lane.b32.xlu1 %v11093_v33, %s10945_s30  ;;  %5249 = vrot.lane.b32.xlu0 %v11099_v35, %s10945_s30  ;;  %v4217_v2 = vpop.permute.xlu0 %4216  ;;  %v12177_v17 = vpop.permute.xlu1 %4218 }
 0x183   : > { %9871 = vmatmul.mubr.msk.bf16.vlgmr.msra.gmra.mrb[16].mxu0 %vm515_vm2, %v11985_v60  ;;  %9873 = vmatmul.mubr.msk.bf16.vlgmr.msra.gmra.mrb[16].mxu1 %vm515_vm2, %v11985_v60 }
 0x184   : > { %3834 = vmatpush1.bf16.msra.mxu0 %v3365_v62  ;;  %3877 = vmatpush1.bf16.msra.mxu1 %v3371_v61  ;;  %v3300_v61 = vsel %vm3267_vm5, %v12094_v6, %v3266_v12  ;;  %v4312_v62 = vsel %vm519_vm1, %v4275_v32, 0  ;;  %v4280_v12 = vsel %vm4274_vm6, %v4217_v2, %v12177_v17 }
 0x185   : > { %5251 = vrot.lane.b32.xlu1 %v11128_v42, %s10945_s30  ;;  %5253 = vrot.lane.b32.xlu0 %v11108_v37, %s10945_s30  ;;  %v3401_v46 = vsel %vm519_vm1, %v3300_v61, 0 }
 0x186   : > { %3865 = vmatprep.mubr.bf16.mxu0 %v13281_v11  ;;  %3908 = vmatprep.mubr.bf16.mxu1 %v13281_v11 }
 0x187   : > { %9878 = vmatprep.subr.msk.bf16.mxu0 %vm519_vm1, %v3293_v20  ;;  %9880 = vmatprep.subr.msk.bf16.mxu1 %vm519_vm1, %v3295_v5  ;;  %v4279_v5 = vsel %vm4274_vm6, %v12155_v58, %v4217_v2 }
 0x189   : > { %5255 = vrot.lane.b32.xlu1 %v11116_v39, %s10945_s30  ;;  %5257 = vrot.lane.b32.xlu0 %v11122_v41, %s10945_s30  ;;  %v4213_v10 = vpop.permute.xlu0 %4212  ;;  %v4223_v40 = vpop.permute.xlu1 %4222 }
 0x18a   : > { %v4278_v6 = vsel %vm4274_vm6, %v4213_v10, %v12155_v58  ;;  %v4277_v22 = vsel %vm4274_vm6, %v12130_v3, %v4213_v10 }
 0x18b   : > { %9875 = vmatmul.mubr.msk.bf16.vlgmr.msra.gmra.mrb[20].mxu0 %vm515_vm2, %v11985_v60  ;;  %9877 = vmatmul.mubr.msk.bf16.vlgmr.msra.gmra.mrb[20].mxu1 %vm515_vm2, %v11985_v60  ;;  %v4318_v2 = vsel %vm519_vm1, %v4277_v22, 0 }
 0x18c   : > { %3920 = vmatpush1.bf16.msra.mxu0 %v3377_v54  ;;  %3963 = vmatpush1.bf16.msra.mxu1 %v3383_v34  ;;  %v4324_v34 = vsel %vm519_vm1, %v4279_v5, 0 }
 0x18d   : > { %5259 = vrot.lane.b32.xlu1 %v11151_v48, %s10945_s30  ;;  %5261 = vrot.lane.b32.xlu0 %v11131_v43, %s10945_s30 }
 0x18e   : > { %3951 = vmatprep.mubr.bf16.mxu0 %v13281_v11  ;;  %3994 = vmatprep.mubr.bf16.mxu1 %v13281_v11 }
 0x18f   : > { %9882 = vmatprep.subr.msk.bf16.mxu0 %vm519_vm1, %v3297_v63  ;;  %9884 = vmatprep.subr.msk.bf16.mxu1 %vm519_vm1, %v3299_v53 }
 0x191   : > { %5263 = vrot.lane.b32.xlu1 %v11139_v45, %s10945_s30  ;;  %5265 = vrot.lane.b32.xlu0 %v11145_v47, %s10945_s30  ;;  %v4225_v55 = vpop.permute.xlu0 %4224  ;;  %v12223_v28 = vpop.permute.xlu1 %4226 }
 0x192   : > { %v4284_v63 = vsel %vm4274_vm6, %v4225_v55, %v12223_v28 }
 0x193   : > { %9879 = vmatmul.mubr.msk.bf16.vlgmr.msra.gmra.mrb[24].mxu0 %vm515_vm2, %v11985_v60  ;;  %9881 = vmatmul.mubr.msk.bf16.vlgmr.msra.gmra.mrb[24].mxu1 %vm515_vm2, %v11985_v60 }
 0x194   : > { %4006 = vmatpush1.bf16.msra.mxu0 %v3389_v7  ;;  %4049 = vmatpush1.bf16.msra.mxu1 %v3395_v9 }
 0x195   : > { %5267 = vrot.lane.b32.xlu1 %v13286_v1, %s10945_s30  ;;  %5269 = vrot.lane.b32.xlu0 %v13283_v4, %s10945_s30 }
 0x196   : > { %4037 = vmatprep.mubr.bf16.mxu0 %v13281_v11  ;;  %4080 = vmatprep.mubr.bf16.mxu1 %v13281_v11 }
 0x197   : > { %10173 = vmatprep.subr.bf16.mxu1 %v13282_v51  ;;  %9890 = vmatprep.subr.msk.bf16.mxu0 %vm519_vm1, %v4276_v38 }
 0x199   : > { %5271 = vrot.lane.b32.xlu1 %v13284_v49, %s10945_s30  ;;  %5273 = vrot.lane.b32.xlu0 %v13285_v56, %s10945_s30  ;;  %v4221_v16 = vpop.permute.xlu0 %4220  ;;  %v4231_v20 = vpop.permute.xlu1 %4230 }
 0x19a   : > { %v4282_v3 = vsel %vm4274_vm6, %v4221_v16, %v4223_v40  ;;  %v4281_v44 = vsel %vm4274_vm6, %v12177_v17, %v4221_v16 }
 0x19b   : > { %9883 = vmatmul.mubr.msk.bf16.vlgmr.msra.gmra.mrb[28].mxu0 %vm515_vm2, %v11985_v60  ;;  %9885 = vmatmul.mubr.msk.bf16.vlgmr.msra.gmra.mrb[28].mxu1 %vm515_vm2, %v11985_v60  ;;  %v4330_v17 = vsel %vm519_vm1, %v4281_v44, 0 }
 0x19c   : > { %10174 = vmatpush3.bf16.msra.mxu1 %v3401_v46  ;;  %4411 = vmatpush1.bf16.msra.mxu0 %v4312_v62 }
 0x19d   : > { %5275 = vrot.lane.b32.xlu1 %v13288_v13, %s10945_s30  ;;  %5277 = vrot.lane.b32.xlu0 %v11165_v52, %s10945_s30 }
 0x19e   : > { %10175 = vmatprep.mubr.msk.bf16.mxu1 %vm10943_vm3, %v13282_v51  ;;  %4442 = vmatprep.mubr.bf16.mxu0 %v13281_v11 }
 0x19f   : > { %9892 = vmatprep.subr.msk.bf16.mxu1 %vm519_vm1, %v4278_v6  ;;  %9894 = vmatprep.subr.msk.bf16.mxu0 %vm519_vm1, %v4280_v12 }
 0x1a1   : > { %6228 = vrot.lane.b32.xlu1 %v13290_v57, %s10946_s8  ;;  %6230 = vrot.lane.b32.xlu0 %v13291_v50, %s10946_s8  ;;  %v4233_v58 = vpop.permute.xlu0 %4232  ;;  %v4235_v54 = vpop.permute.xlu1 %4234 }
 0x1a2   : > { %v4288_v61 = vsel %vm4274_vm6, %v4233_v58, %v4235_v54  ;;  %v4287_v62 = vsel %vm4274_vm6, %v4231_v20, %v4233_v58 }
 0x1a3   : > { %10176 = vmatmul.mubr.msk.bf16.vlgmr.msra.gmra.mrb[36].mxu1 %vm515_vm2, %v11985_v60  ;;  %9891 = vmatmul.mubr.msk.bf16.vlgmr.msra.gmra.mrb[0].mxu0 %vm515_vm2, %v12255_v26  ;;  %v4283_v60 = vsel %vm4274_vm6, %v4223_v40, %v4225_v55  ;;  %v4348_v12 = vsel %vm519_vm1, %v4287_v62, 0 }
 0x1a4   : > { %4454 = vmatpush1.bf16.msra.mxu1 %v4318_v2  ;;  %4497 = vmatpush1.bf16.msra.mxu0 %v4324_v34  ;;  %v4336_v40 = vsel %vm519_vm1, %v4283_v60, 0 }
 0x1a5   : > { %6232 = vrot.lane.b32.xlu1 %v11036_v18, %s10946_s8  ;;  %5279 = vrot.lane.b32.xlu0 %v13287_v0, %s10945_s30 }
 0x1a6   : > { %v12277_v53 = vpop.f32.mrb[32].mxu0  ;;  %4485 = vmatprep.mubr.bf16.mxu1 %v13281_v11  ;;  %4528 = vmatprep.mubr.bf16.mxu0 %v13281_v11 }
 0x1a7   : > { %v10159_v14 = vpop.f32.mrb[33].mxu0  ;;  %9896 = vmatprep.subr.msk.bf16.mxu1 %vm519_vm1, %v4282_v3  ;;  %9898 = vmatprep.subr.msk.bf16.mxu0 %vm519_vm1, %v4284_v63  ;;  %v4229_v10 = vpop.permute.xlu0 %4228 }
 0x1a8   : > { %v12285_v9 = vpop.f32.mrb[34].mxu0  ;;  %v4286_v32 = vsel %vm4274_vm6, %v4229_v10, %v4231_v20  ;;  %v4285_v6 = vsel %vm4274_vm6, %v12223_v28, %v4229_v10 }
 0x1a9   : > { %v10160_v7 = vpop.f32.mrb[35].mxu0  ;;  %6236 = vrot.lane.b32.xlu1 %v11024_v15, %s10946_s8  ;;  %6238 = vrot.lane.b32.xlu0 %v13293_v8, %s10946_s8  ;;  %v4239_v38 = vpop.permute.xlu1 %4238  ;;  %v4342_v20 = vsel %vm519_vm1, %v4285_v6, 0 }
 0x1ab   : > { %9893 = vmatmul.mubr.msk.bf16.vlgmr.msra.gmra.mrb[0].mxu1 %vm515_vm2, %v12255_v26  ;;  %9895 = vmatmul.mubr.msk.bf16.vlgmr.msra.gmra.mrb[4].mxu0 %vm515_vm2, %v12255_v26  ;;  %v4241_v55 = vpop.permute.xlu0 %4240 }
 0x1ac   : > { %4540 = vmatpush1.bf16.msra.mxu1 %v4330_v17  ;;  %4583 = vmatpush1.bf16.msra.mxu0 %v4336_v40  ;;  %v4291_v58 = vsel %vm4274_vm6, %v4239_v38, %v4241_v55 }
 0x1ad   : > { %6240 = vrot.lane.b32.xlu1 %v11059_v24, %s10946_s8  ;;  %6234 = vrot.lane.b32.xlu0 %v13292_v59, %s10946_s8  ;;  %v4360_v60 = vsel %vm519_vm1, %v4291_v58, 0 }
 0x1ae   : > { %4571 = vmatprep.mubr.bf16.mxu1 %v13281_v11  ;;  %4614 = vmatprep.mubr.bf16.mxu0 %v13281_v11 }
 0x1af   : > { %9900 = vmatprep.subr.msk.bf16.mxu1 %vm519_vm1, %v4286_v32  ;;  %9902 = vmatprep.subr.msk.bf16.mxu0 %vm519_vm1, %v4288_v61  ;;  %v4243_v46 = vpop.permute.xlu1 %4242  ;;  %v4237_v16 = vpop.permute.xlu0 %4236 }
 0x1b0   : > { %v4290_v28 = vsel %vm4274_vm6, %v4237_v16, %v4239_v38  ;;  %v4292_v34 = vsel %vm4274_vm6, %v4241_v55, %v4243_v46  ;;  %v4289_v63 = vsel %vm4274_vm6, %v4235_v54, %v4237_v16 }
 0x1b1   : > { %6244 = vrot.lane.b32.xlu1 %v11047_v21, %s10946_s8  ;;  %6246 = vrot.lane.b32.xlu0 %v11053_v23, %s10946_s8  ;;  %v4354_v14 = vsel %vm519_vm1, %v4289_v63, 0 }
 0x1b3   : > { %9897 = vmatmul.mubr.msk.bf16.vlgmr.msra.gmra.mrb[4].mxu1 %vm515_vm2, %v12255_v26  ;;  %9899 = vmatmul.mubr.msk.bf16.vlgmr.msra.gmra.mrb[8].mxu0 %vm515_vm2, %v12255_v26  ;;  %v4247_v5 = vpop.permute.xlu1 %4246  ;;  %v4249_v22 = vpop.permute.xlu0 %4248 }
 0x1b4   : > { %4626 = vmatpush1.bf16.msra.mxu1 %v4342_v20  ;;  %4669 = vmatpush1.bf16.msra.mxu0 %v4348_v12  ;;  %v4295_v40 = vsel %vm4274_vm6, %v4247_v5, %v4249_v22 }
 0x1b5   : > { %6248 = vrot.lane.b32.xlu1 %v11082_v30, %s10946_s8  ;;  %6242 = vrot.lane.b32.xlu0 %v11039_v19, %s10946_s8  ;;  %v4372_v32 = vsel %vm519_vm1, %v4295_v40, 0 }
 0x1b6   : > { %4657 = vmatprep.mubr.bf16.mxu1 %v13281_v11  ;;  %4700 = vmatprep.mubr.bf16.mxu0 %v13281_v11 }
 0x1b7   : > { %9904 = vmatprep.subr.msk.bf16.mxu1 %vm519_vm1, %v4290_v28  ;;  %9906 = vmatprep.subr.msk.bf16.mxu0 %vm519_vm1, %v4292_v34  ;;  %v4251_v2 = vpop.permute.xlu1 %4250  ;;  %v4245_v3 = vpop.permute.xlu0 %4244 }
 0x1b8   : > { %v4294_v54 = vsel %vm4274_vm6, %v4245_v3, %v4247_v5  ;;  %v4296_v7 = vsel %vm4274_vm6, %v4249_v22, %v4251_v2  ;;  %v4293_v55 = vsel %vm4274_vm6, %v4243_v46, %v4245_v3 }
 0x1b9   : > { %6252 = vrot.lane.b32.xlu1 %v11070_v27, %s10946_s8  ;;  %6254 = vrot.lane.b32.xlu0 %v11076_v29, %s10946_s8  ;;  %v4366_v61 = vsel %vm519_vm1, %v4293_v55, 0 }
 0x1bb   : > { %9901 = vmatmul.mubr.msk.bf16.vlgmr.msra.gmra.mrb[8].mxu1 %vm515_vm2, %v12255_v26  ;;  %9903 = vmatmul.mubr.msk.bf16.vlgmr.msra.gmra.mrb[12].mxu0 %vm515_vm2, %v12255_v26  ;;  %v4255_v10 = vpop.permute.xlu1 %4254  ;;  %v4257_v44 = vpop.permute.xlu0 %4256 }
 0x1bc   : > { %4712 = vmatpush1.bf16.msra.mxu1 %v4354_v14  ;;  %4755 = vmatpush1.bf16.msra.mxu0 %v4360_v60  ;;  %v4299_v12 = vsel %vm4274_vm6, %v4255_v10, %v4257_v44 }
 0x1bd   : > { %6256 = vrot.lane.b32.xlu1 %v11105_v36, %s10946_s8  ;;  %6250 = vrot.lane.b32.xlu0 %v11062_v25, %s10946_s8  ;;  %v4384_v28 = vsel %vm519_vm1, %v4299_v12, 0 }
 0x1be   : > { %4743 = vmatprep.mubr.bf16.mxu1 %v13281_v11  ;;  %4786 = vmatprep.mubr.bf16.mxu0 %v13281_v11 }
 0x1bf   : > { %9908 = vmatprep.subr.msk.bf16.mxu1 %vm519_vm1, %v4294_v54  ;;  %9910 = vmatprep.subr.msk.bf16.mxu0 %vm519_vm1, %v4296_v7  ;;  %v4259_v38 = vpop.permute.xlu1 %4258  ;;  %v4253_v17 = vpop.permute.xlu0 %4252 }
 0x1c0   : > { %v4298_v46 = vsel %vm4274_vm6, %v4253_v17, %v4255_v10  ;;  %v4300_v6 = vsel %vm4274_vm6, %v4257_v44, %v4259_v38  ;;  %v4297_v22 = vsel %vm4274_vm6, %v4251_v2, %v4253_v17 }
 0x1c1   : > { %6260 = vrot.lane.b32.xlu1 %v11093_v33, %s10946_s8  ;;  %6262 = vrot.lane.b32.xlu0 %v11099_v35, %s10946_s8  ;;  %v4378_v34 = vsel %vm519_vm1, %v4297_v22, 0 }
 0x1c3   : > { %9905 = vmatmul.mubr.msk.bf16.vlgmr.msra.gmra.mrb[12].mxu1 %vm515_vm2, %v12255_v26  ;;  %9907 = vmatmul.mubr.msk.bf16.vlgmr.msra.gmra.mrb[16].mxu0 %vm515_vm2, %v12255_v26  ;;  %v4263_v62 = vpop.permute.xlu1 %4262  ;;  %v4265_v16 = vpop.permute.xlu0 %4264 }
 0x1c4   : > { %4798 = vmatpush1.bf16.msra.mxu1 %v4366_v61  ;;  %4841 = vmatpush1.bf16.msra.mxu0 %v4372_v32  ;;  %v4303_v60 = vsel %vm4274_vm6, %v4263_v62, %v4265_v16 }
 0x1c5   : > { %6264 = vrot.lane.b32.xlu1 %v11128_v42, %s10946_s8  ;;  %6258 = vrot.lane.b32.xlu0 %v11085_v31, %s10946_s8  ;;  %v4396_v54 = vsel %vm519_vm1, %v4303_v60, 0 }
 0x1c6   : > { %4829 = vmatprep.mubr.bf16.mxu1 %v13281_v11  ;;  %4872 = vmatprep.mubr.bf16.mxu0 %v13281_v11 }
 0x1c7   : > { %9912 = vmatprep.subr.msk.bf16.mxu1 %vm519_vm1, %v4298_v46  ;;  %9914 = vmatprep.subr.msk.bf16.mxu0 %vm519_vm1, %v4300_v6  ;;  %v4267_v20 = vpop.permute.xlu1 %4266  ;;  %v4261_v5 = vpop.permute.xlu0 %4260  ;;  %v10911_v46 = vld [vmem:[%s10997_s19 + $0x40] sm:$0x3f] }
 0x1c8   : > { %v4302_v2 = vsel %vm4274_vm6, %v4261_v5, %v4263_v62  ;;  %v4304_v63 = vsel %vm4274_vm6, %v4265_v16, %v4267_v20  ;;  %v4301_v44 = vsel %vm4274_vm6, %v4259_v38, %v4261_v5  ;;  %v6220_v6 = vcombine.high %v10911_v46, %v10911_v46 }
 0x1c9   : > { %6268 = vrot.lane.b32.xlu1 %v11116_v39, %s10946_s8  ;;  %6270 = vrot.lane.b32.xlu0 %v11122_v41, %s10946_s8  ;;  %v4390_v7 = vsel %vm519_vm1, %v4301_v44, 0 }
 0x1cb   : > { %9909 = vmatmul.mubr.msk.bf16.vlgmr.msra.gmra.mrb[16].mxu1 %vm515_vm2, %v12255_v26  ;;  %9911 = vmatmul.mubr.msk.bf16.vlgmr.msra.gmra.mrb[20].mxu0 %vm515_vm2, %v12255_v26  ;;  %v4271_v58 = vpop.permute.xlu1 %4270  ;;  %v4273_v3 = vpop.permute.xlu0 %4272 }
 0x1cc   : > { %4884 = vmatpush1.bf16.msra.mxu1 %v4378_v34  ;;  %4927 = vmatpush1.bf16.msra.mxu0 %v4384_v28  ;;  %v4307_v55 = vsel %vm4274_vm6, %v4271_v58, %v4273_v3  ;;  %v13294_v34 = vld [vmem:[#allocation2_spill] sm:$0xff] }
 0x1cd   : > { %6272 = vrot.lane.b32.xlu1 %v11151_v48, %s10946_s8  ;;  %6266 = vrot.lane.b32.xlu0 %v11108_v37, %s10946_s8  ;;  %v4408_v16 = vsel %vm519_vm1, %v4307_v55, 0 }
 0x1ce   : > { %4915 = vmatprep.mubr.bf16.mxu1 %v13281_v11  ;;  %4958 = vmatprep.mubr.bf16.mxu0 %v13281_v11 }
 0x1cf   : > { %9916 = vmatprep.subr.msk.bf16.mxu1 %vm519_vm1, %v4302_v2  ;;  %9918 = vmatprep.subr.msk.bf16.mxu0 %vm519_vm1, %v4304_v63  ;;  %v4269_v14 = vpop.permute.xlu1 %4268  ;;  %v5214_v10 = vpop.permute.xlu0 %5213 }
 0x1d0   : > { %v4306_v38 = vsel %vm4274_vm6, %v4269_v14, %v4271_v58  ;;  %v4305_v62 = vsel %vm4274_vm6, %v4267_v20, %v4269_v14  ;;  %v12437_v58 = vrot.slane %v6220_v6, %v13294_v34 }
 0x1d1   : > { %6276 = vrot.lane.b32.xlu1 %v11139_v45, %s10946_s8  ;;  %6278 = vrot.lane.b32.xlu0 %v11145_v47, %s10946_s8  ;;  %v4402_v12 = vsel %vm519_vm1, %v4305_v62, 0 }
 0x1d3   : > { %9913 = vmatmul.mubr.msk.bf16.vlgmr.msra.gmra.mrb[20].mxu1 %vm515_vm2, %v12255_v26  ;;  %9915 = vmatmul.mubr.msk.bf16.vlgmr.msra.gmra.mrb[24].mxu0 %vm515_vm2, %v12255_v26  ;;  %v5216_v40 = vpop.permute.xlu1 %5215  ;;  %v5218_v17 = vpop.permute.xlu0 %5217 }
 0x1d4   : > { %4970 = vmatpush1.bf16.msra.mxu1 %v4390_v7  ;;  %5013 = vmatpush1.bf16.msra.mxu0 %v4396_v54  ;;  %v5283_v22 = vsel %vm5281_vm7, %v5216_v40, %v5218_v17  ;;  %v5282_v60 = vsel %vm5281_vm7, %v5214_v10, %v5216_v40 }
 0x1d5   : > { %6280 = vrot.lane.b32.xlu1 %v13286_v1, %s10946_s8  ;;  %6274 = vrot.lane.b32.xlu0 %v11131_v43, %s10946_s8  ;;  %v5319_v44 = vsel %vm519_vm1, %v5282_v60, 0 }
 0x1d6   : > { %5001 = vmatprep.mubr.bf16.mxu1 %v13281_v11  ;;  %5044 = vmatprep.mubr.bf16.mxu0 %v13281_v11 }
 0x1d7   : > { %9920 = vmatprep.subr.msk.bf16.mxu1 %vm519_vm1, %v4306_v38  ;;  %10179 = vmatprep.subr.bf16.mxu0 %v13282_v51  ;;  %v5220_v32 = vpop.permute.xlu1 %5219  ;;  %v5222_v61 = vpop.permute.xlu0 %5221 }
 0x1d8   : > { %v5285_v28 = vsel %vm5281_vm7, %v5220_v32, %v5222_v61  ;;  %v5284_v3 = vsel %vm5281_vm7, %v5218_v17, %v5220_v32 }
 0x1d9   : > { %6284 = vrot.lane.b32.xlu1 %v13284_v49, %s10946_s8  ;;  %6286 = vrot.lane.b32.xlu0 %v13285_v56, %s10946_s8  ;;  %v5325_v14 = vsel %vm519_vm1, %v5284_v3, 0 }
 0x1db   : > { %9917 = vmatmul.mubr.msk.bf16.vlgmr.msra.gmra.mrb[24].mxu1 %vm515_vm2, %v12255_v26  ;;  %9919 = vmatmul.mubr.msk.bf16.vlgmr.msra.gmra.mrb[28].mxu0 %vm515_vm2, %v12255_v26  ;;  %v5224_v20 = vpop.permute.xlu1 %5223  ;;  %v5226_v5 = vpop.permute.xlu0 %5225 }
 0x1dc   : > { %5056 = vmatpush1.bf16.msra.mxu1 %v4402_v12  ;;  %10180 = vmatpush3.bf16.msra.mxu0 %v4408_v16  ;;  %v5287_v10 = vsel %vm5281_vm7, %v5224_v20, %v5226_v5  ;;  %v5286_v32 = vsel %vm5281_vm7, %v5222_v61, %v5224_v20 }
 0x1dd   : > { %6288 = vrot.lane.b32.xlu1 %v13288_v13, %s10946_s8  ;;  %6282 = vrot.lane.b32.xlu0 %v13283_v4, %s10946_s8  ;;  %v5331_v16 = vsel %vm519_vm1, %v5286_v32, 0 }
 0x1de   : > { %5087 = vmatprep.mubr.bf16.mxu1 %v13281_v11  ;;  %10181 = vmatprep.mubr.msk.bf16.mxu0 %vm10943_vm3, %v13282_v51 }
 0x1df   : > { %9926 = vmatprep.subr.msk.bf16.mxu0 %vm519_vm1, %v5283_v22  ;;  %9928 = vmatprep.subr.msk.bf16.mxu1 %vm519_vm1, %v5285_v28  ;;  %v5228_v2 = vpop.permute.xlu1 %5227  ;;  %v5230_v63 = vpop.permute.xlu0 %5229 }
 0x1e0   : > { %v5289_v40 = vsel %vm5281_vm7, %v5228_v2, %v5230_v63  ;;  %v5288_v17 = vsel %vm5281_vm7, %v5226_v5, %v5228_v2 }
 0x1e1   : > { %6292 = vrot.lane.b32.xlu1 %v13287_v0, %s10946_s8  ;;  %6294 = vrot.lane.b32.xlu0 %v12437_v58, %s10946_s8  ;;  %v5337_v62 = vsel %vm519_vm1, %v5288_v17, 0 }
 0x1e3   : > { %9921 = vmatmul.mubr.msk.bf16.vlgmr.msra.gmra.mrb[28].mxu1 %vm515_vm2, %v12255_v26  ;;  %10182 = vmatmul.mubr.msk.bf16.vlgmr.msra.gmra.mrb[40].mxu0 %vm515_vm2, %v12255_v26  ;;  %v5232_v54 = vpop.permute.xlu1 %5231  ;;  %v5234_v7 = vpop.permute.xlu0 %5233  ;;  %v12469_v26 = vld [vmem:[%s13240_s1 + $0x28] sm:$0x3f]  }
 0x1e4   : > { %5418 = vmatpush1.bf16.msra.mxu0 %v5319_v44  ;;  %5461 = vmatpush1.bf16.msra.mxu1 %v5325_v14  ;;  %v5291_v61 = vsel %vm5281_vm7, %v5232_v54, %v5234_v7  ;;  %v5290_v3 = vsel %vm5281_vm7, %v5230_v63, %v5232_v54 }
 0x1e5   : > { %6290 = vrot.lane.b32.xlu1 %v11165_v52, %s10946_s8  ;;  %7235 = vrot.lane.b32.xlu0 %v13290_v57, %s10947_s9 }
 0x1e6   : > { %5449 = vmatprep.mubr.bf16.mxu0 %v13281_v11  ;;  %5492 = vmatprep.mubr.bf16.mxu1 %v13281_v11 }
 0x1e7   : > { %9930 = vmatprep.subr.msk.bf16.mxu0 %vm519_vm1, %v5287_v10  ;;  %9932 = vmatprep.subr.msk.bf16.mxu1 %vm519_vm1, %v5289_v40  ;;  %v5236_v38 = vpop.permute.xlu1 %5235  ;;  %v5238_v55 = vpop.permute.xlu0 %5237 }
 0x1e8   : > { %v5293_v12 = vsel %vm5281_vm7, %v5236_v38, %v5238_v55  ;;  %v5292_v20 = vsel %vm5281_vm7, %v5234_v7, %v5236_v38 }
 0x1e9   : > { %7237 = vrot.lane.b32.xlu1 %v13291_v50, %s10947_s9  ;;  %7239 = vrot.lane.b32.xlu0 %v11036_v18, %s10947_s9  ;;  %v5349_v7 = vsel %vm519_vm1, %v5292_v20, 0 }
 0x1eb   : > { %9927 = vmatmul.mubr.msk.bf16.vlgmr.msra.gmra.mrb[0].mxu0 %vm515_vm2, %v12469_v26  ;;  %9929 = vmatmul.mubr.msk.bf16.vlgmr.msra.gmra.mrb[0].mxu1 %vm515_vm2, %v12469_v26  ;;  %v5240_v46 = vpop.permute.xlu1 %5239  ;;  %v5242_v6 = vpop.permute.xlu0 %5241 }
 0x1ec   : > { %5504 = vmatpush1.bf16.msra.mxu0 %v5331_v16  ;;  %5547 = vmatpush1.bf16.msra.mxu1 %v5337_v62  ;;  %v5295_v54 = vsel %vm5281_vm7, %v5240_v46, %v5242_v6  ;;  %v5294_v38 = vsel %vm5281_vm7, %v5238_v55, %v5240_v46 }
 0x1ed   : > { %7241 = vrot.lane.b32.xlu1 %v13292_v59, %s10947_s9  ;;  %7243 = vrot.lane.b32.xlu0 %v11024_v15, %s10947_s9  ;;  %v5355_v16 = vsel %vm519_vm1, %v5294_v38, 0 }
 0x1ee   : > { %v2177_v5 = vpop.f32.mrb[32].mxu1  ;;  %5535 = vmatprep.mubr.bf16.mxu0 %v13281_v11  ;;  %5578 = vmatprep.mubr.bf16.mxu1 %v13281_v11 }
 0x1ef   : > { %v12493_v22 = vadd.f32 %v2177_v5, %v12277_v53  ;;  %v10165_v28 = vpop.f32.mrb[33].mxu1  ;;  %9934 = vmatprep.subr.msk.bf16.mxu0 %vm519_vm1, %v5291_v61  ;;  %9936 = vmatprep.subr.msk.bf16.mxu1 %vm519_vm1, %v5293_v12  ;;  %v5244_v34 = vpop.permute.xlu1 %5243  ;;  %v5343_v53 = vsel %vm519_vm1, %v5290_v3, 0 }
 0x1f0   : > { %v2180_v2 = vpop.f32.mrb[34].mxu1  ;;  %v5246_v60 = vpop.permute.xlu0 %5245  ;;  %v5296_v40 = vsel %vm5281_vm7, %v5242_v6, %v5244_v34 }
 0x1f1   : > { %v12499_v14 = vadd.f32 %v2180_v2, %v12285_v9  ;;  %v10166_v44 = vpop.f32.mrb[35].mxu1  ;;  %7245 = vrot.lane.b32.xlu1 %v13293_v8, %s10947_s9  ;;  %7247 = vrot.lane.b32.xlu0 %v11059_v24, %s10947_s9  ;;  %v5297_v10 = vsel %vm5281_vm7, %v5244_v34, %v5246_v60  ;;  %v5361_v62 = vsel %vm519_vm1, %v5296_v40, 0 }
 0x1f3   : > { %9931 = vmatmul.mubr.msk.bf16.vlgmr.msra.gmra.mrb[4].mxu0 %vm515_vm2, %v12469_v26  ;;  %9933 = vmatmul.mubr.msk.bf16.vlgmr.msra.gmra.mrb[4].mxu1 %vm515_vm2, %v12469_v26  ;;  %v5248_v63 = vpop.permute.xlu1 %5247 }
 0x1f4   : > { %5590 = vmatpush1.bf16.msra.mxu0 %v5343_v53  ;;  %5633 = vmatpush1.bf16.msra.mxu1 %v5349_v7  ;;  %v5250_v9 = vpop.permute.xlu0 %5249  ;;  %v5298_v5 = vsel %vm5281_vm7, %v5246_v60, %v5248_v63 }
 0x1f5   : > { %7249 = vrot.lane.b32.xlu1 %v11039_v19, %s10947_s9  ;;  %7251 = vrot.lane.b32.xlu0 %v11047_v21, %s10947_s9  ;;  %v5299_v46 = vsel %vm5281_vm7, %v5248_v63, %v5250_v9  ;;  %v5367_v3 = vsel %vm519_vm1, %v5298_v5, 0 }
 0x1f6   : > { %5621 = vmatprep.mubr.bf16.mxu0 %v13281_v11  ;;  %5664 = vmatprep.mubr.bf16.mxu1 %v13281_v11 }
 0x1f7   : > { %9938 = vmatprep.subr.msk.bf16.mxu0 %vm519_vm1, %v5295_v54  ;;  %9940 = vmatprep.subr.msk.bf16.mxu1 %vm519_vm1, %v5297_v10  ;;  %v5252_v17 = vpop.permute.xlu1 %5251 }
 0x1f8   : > { %v5254_v32 = vpop.permute.xlu0 %5253  ;;  %v5300_v12 = vsel %vm5281_vm7, %v5250_v9, %v5252_v17 }
 0x1f9   : > { %7253 = vrot.lane.b32.xlu1 %v11053_v23, %s10947_s9  ;;  %7255 = vrot.lane.b32.xlu0 %v11082_v30, %s10947_s9  ;;  %v5301_v61 = vsel %vm5281_vm7, %v5252_v17, %v5254_v32  ;;  %v5373_v34 = vsel %vm519_vm1, %v5300_v12, 0 }
 0x1fb   : > { %9935 = vmatmul.mubr.msk.bf16.vlgmr.msra.gmra.mrb[8].mxu0 %vm515_vm2, %v12469_v26  ;;  %9937 = vmatmul.mubr.msk.bf16.vlgmr.msra.gmra.mrb[8].mxu1 %vm515_vm2, %v12469_v26  ;;  %v5256_v6 = vpop.permute.xlu1 %5255 }
 0x1fc   : > { %5676 = vmatpush1.bf16.msra.mxu0 %v5355_v16  ;;  %5719 = vmatpush1.bf16.msra.mxu1 %v5361_v62  ;;  %v5258_v55 = vpop.permute.xlu0 %5257  ;;  %v5302_v9 = vsel %vm5281_vm7, %v5254_v32, %v5256_v6 }
 0x1fd   : > { %7257 = vrot.lane.b32.xlu1 %v11062_v25, %s10947_s9  ;;  %7259 = vrot.lane.b32.xlu0 %v11070_v27, %s10947_s9  ;;  %v5303_v44 = vsel %vm5281_vm7, %v5256_v6, %v5258_v55  ;;  %v5379_v40 = vsel %vm519_vm1, %v5302_v9, 0 }
 0x1fe   : > { %5707 = vmatprep.mubr.bf16.mxu0 %v13281_v11  ;;  %5750 = vmatprep.mubr.bf16.mxu1 %v13281_v11 }
 0x1ff   : > { %9942 = vmatprep.subr.msk.bf16.mxu0 %vm519_vm1, %v5299_v46  ;;  %9944 = vmatprep.subr.msk.bf16.mxu1 %vm519_vm1, %v5301_v61  ;;  %v5260_v20 = vpop.permute.xlu1 %5259 }
 0x200   : > { %v5262_v28 = vpop.permute.xlu0 %5261  ;;  %v5304_v53 = vsel %vm5281_vm7, %v5258_v55, %v5260_v20 }
 0x201   : > { %7261 = vrot.lane.b32.xlu1 %v11076_v29, %s10947_s9  ;;  %7263 = vrot.lane.b32.xlu0 %v11105_v36, %s10947_s9  ;;  %v5305_v7 = vsel %vm5281_vm7, %v5260_v20, %v5262_v28  ;;  %v5385_v10 = vsel %vm519_vm1, %v5304_v53, 0 }
 0x203   : > { %9939 = vmatmul.mubr.msk.bf16.vlgmr.msra.gmra.mrb[12].mxu0 %vm515_vm2, %v12469_v26  ;;  %9941 = vmatmul.mubr.msk.bf16.vlgmr.msra.gmra.mrb[12].mxu1 %vm515_vm2, %v12469_v26  ;;  %v5264_v2 = vpop.permute.xlu1 %5263 }
 0x204   : > { %5762 = vmatpush1.bf16.msra.mxu0 %v5367_v3  ;;  %5805 = vmatpush1.bf16.msra.mxu1 %v5373_v34  ;;  %v5266_v60 = vpop.permute.xlu0 %5265  ;;  %v5306_v55 = vsel %vm5281_vm7, %v5262_v28, %v5264_v2 }
 0x205   : > { %7265 = vrot.lane.b32.xlu1 %v11085_v31, %s10947_s9  ;;  %7267 = vrot.lane.b32.xlu0 %v11093_v33, %s10947_s9  ;;  %v5307_v32 = vsel %vm5281_vm7, %v5264_v2, %v5266_v60  ;;  %v5391_v12 = vsel %vm519_vm1, %v5306_v55, 0 }
 0x206   : > { %5793 = vmatprep.mubr.bf16.mxu0 %v13281_v11  ;;  %5836 = vmatprep.mubr.bf16.mxu1 %v13281_v11 }
 0x207   : > { %9946 = vmatprep.subr.msk.bf16.mxu0 %vm519_vm1, %v5303_v44  ;;  %9948 = vmatprep.subr.msk.bf16.mxu1 %vm519_vm1, %v5305_v7  ;;  %v5268_v63 = vpop.permute.xlu1 %5267 }
 0x208   : > { %v5270_v54 = vpop.permute.xlu0 %5269  ;;  %v5308_v16 = vsel %vm5281_vm7, %v5266_v60, %v5268_v63 }
 0x209   : > { %7269 = vrot.lane.b32.xlu1 %v11099_v35, %s10947_s9  ;;  %7271 = vrot.lane.b32.xlu0 %v11128_v42, %s10947_s9  ;;  %v5309_v62 = vsel %vm5281_vm7, %v5268_v63, %v5270_v54  ;;  %v5397_v61 = vsel %vm519_vm1, %v5308_v16, 0 }
 0x20b   : > { %9943 = vmatmul.mubr.msk.bf16.vlgmr.msra.gmra.mrb[16].mxu0 %vm515_vm2, %v12469_v26  ;;  %9945 = vmatmul.mubr.msk.bf16.vlgmr.msra.gmra.mrb[16].mxu1 %vm515_vm2, %v12469_v26  ;;  %v5272_v17 = vpop.permute.xlu1 %5271 }
 0x20c   : > { %5848 = vmatpush1.bf16.msra.mxu0 %v5379_v40  ;;  %5891 = vmatpush1.bf16.msra.mxu1 %v5385_v10  ;;  %v5274_v38 = vpop.permute.xlu0 %5273  ;;  %v5310_v60 = vsel %vm5281_vm7, %v5270_v54, %v5272_v17 }
 0x20d   : > { %7273 = vrot.lane.b32.xlu1 %v11108_v37, %s10947_s9  ;;  %7275 = vrot.lane.b32.xlu0 %v11116_v39, %s10947_s9  ;;  %v5311_v28 = vsel %vm5281_vm7, %v5272_v17, %v5274_v38  ;;  %v5403_v53 = vsel %vm519_vm1, %v5310_v60, 0 }
 0x20e   : > { %5879 = vmatprep.mubr.bf16.mxu0 %v13281_v11  ;;  %5922 = vmatprep.mubr.bf16.mxu1 %v13281_v11 }
 0x20f   : > { %9950 = vmatprep.subr.msk.bf16.mxu0 %vm519_vm1, %v5307_v32  ;;  %9952 = vmatprep.subr.msk.bf16.mxu1 %vm519_vm1, %v5309_v62  ;;  %v5276_v6 = vpop.permute.xlu1 %5275 }
 0x210   : > { %v5278_v46 = vpop.permute.xlu0 %5277  ;;  %v5312_v3 = vsel %vm5281_vm7, %v5274_v38, %v5276_v6 }
 0x211   : > { %7277 = vrot.lane.b32.xlu1 %v11122_v41, %s10947_s9  ;;  %7279 = vrot.lane.b32.xlu0 %v11151_v48, %s10947_s9  ;;  %v5313_v34 = vsel %vm5281_vm7, %v5276_v6, %v5278_v46  ;;  %v5409_v7 = vsel %vm519_vm1, %v5312_v3, 0 }
 0x213   : > { %9947 = vmatmul.mubr.msk.bf16.vlgmr.msra.gmra.mrb[20].mxu0 %vm515_vm2, %v12469_v26  ;;  %9949 = vmatmul.mubr.msk.bf16.vlgmr.msra.gmra.mrb[20].mxu1 %vm515_vm2, %v12469_v26  ;;  %v6229_v20 = vpop.permute.xlu1 %6228 }
 0x214   : > { %5934 = vmatpush1.bf16.msra.mxu0 %v5391_v12  ;;  %5977 = vmatpush1.bf16.msra.mxu1 %v5397_v61  ;;  %v6231_v5 = vpop.permute.xlu0 %6230  ;;  %v12657_v12 = vld [vmem:[%s13240_s1 + $0x30] sm:$0x3f]  }
 0x215   : > { %7281 = vrot.lane.b32.xlu1 %v11131_v43, %s10947_s9  ;;  %7283 = vrot.lane.b32.xlu0 %v11139_v45, %s10947_s9  ;;  %v6297_v10 = vsel %vm6296_vm8, %v6229_v20, %v6231_v5 }
 0x216   : > { %5965 = vmatprep.mubr.bf16.mxu0 %v13281_v11  ;;  %6008 = vmatprep.mubr.bf16.mxu1 %v13281_v11  ;;  %v6334_v32 = vsel %vm519_vm1, %v6297_v10, 0 }
 0x217   : > { %9954 = vmatprep.subr.msk.bf16.mxu0 %vm519_vm1, %v5311_v28  ;;  %9956 = vmatprep.subr.msk.bf16.mxu1 %vm519_vm1, %v5313_v34  ;;  %v6233_v2 = vpop.permute.xlu1 %6232 }
 0x218   : > { %v5280_v44 = vpop.permute.xlu0 %5279  ;;  %v6298_v54 = vsel %vm6296_vm8, %v6231_v5, %v6233_v2 }
 0x219   : > { %7285 = vrot.lane.b32.xlu1 %v11145_v47, %s10947_s9  ;;  %7287 = vrot.lane.b32.xlu0 %v13286_v1, %s10947_s9  ;;  %v5314_v17 = vsel %vm5281_vm7, %v5278_v46, %v5280_v44 }
 0x21a   : > { %v5415_v62 = vsel %vm519_vm1, %v5314_v17, 0 }
 0x21b   : > { %9951 = vmatmul.mubr.msk.bf16.vlgmr.msra.gmra.mrb[24].mxu0 %vm515_vm2, %v12469_v26  ;;  %9953 = vmatmul.mubr.msk.bf16.vlgmr.msra.gmra.mrb[24].mxu1 %vm515_vm2, %v12469_v26  ;;  %v6237_v63 = vpop.permute.xlu1 %6236 }
 0x21c   : > { %6020 = vmatpush1.bf16.msra.mxu0 %v5403_v53  ;;  %6063 = vmatpush1.bf16.msra.mxu1 %v5409_v7  ;;  %v6239_v9 = vpop.permute.xlu0 %6238 }
 0x21d   : > { %7289 = vrot.lane.b32.xlu1 %v13283_v4, %s10947_s9  ;;  %7291 = vrot.lane.b32.xlu0 %v13284_v49, %s10947_s9  ;;  %v6301_v61 = vsel %vm6296_vm8, %v6237_v63, %v6239_v9 }
 0x21e   : > { %6051 = vmatprep.mubr.bf16.mxu0 %v13281_v11  ;;  %6094 = vmatprep.mubr.bf16.mxu1 %v13281_v11  ;;  %v6346_v34 = vsel %vm519_vm1, %v6301_v61, 0 }
 0x21f   : > { %10185 = vmatprep.subr.bf16.mxu1 %v13282_v51  ;;  %9962 = vmatprep.subr.msk.bf16.mxu0 %vm519_vm1, %v6298_v54  ;;  %v6241_v40 = vpop.permute.xlu1 %6240 }
 0x220   : > { %v6235_v38 = vpop.permute.xlu0 %6234  ;;  %v6302_v46 = vsel %vm6296_vm8, %v6239_v9, %v6241_v40 }
 0x221   : > { %7293 = vrot.lane.b32.xlu1 %v13285_v56, %s10947_s9  ;;  %7295 = vrot.lane.b32.xlu0 %v13288_v13, %s10947_s9  ;;  %v6300_v6 = vsel %vm6296_vm8, %v6235_v38, %v6237_v63  ;;  %v6299_v5 = vsel %vm6296_vm8, %v6233_v2, %v6235_v38 }
 0x222   : > { %v6340_v3 = vsel %vm519_vm1, %v6299_v5, 0 }
 0x223   : > { %9955 = vmatmul.mubr.msk.bf16.vlgmr.msra.gmra.mrb[28].mxu0 %vm515_vm2, %v12469_v26  ;;  %9957 = vmatmul.mubr.msk.bf16.vlgmr.msra.gmra.mrb[28].mxu1 %vm515_vm2, %v12469_v26  ;;  %v6245_v16 = vpop.permute.xlu1 %6244 }
 0x224   : > { %10186 = vmatpush3.bf16.msra.mxu1 %v5415_v62  ;;  %6433 = vmatpush1.bf16.msra.mxu0 %v6334_v32  ;;  %v6247_v55 = vpop.permute.xlu0 %6246 }
 0x225   : > { %7297 = vrot.lane.b32.xlu1 %v11165_v52, %s10947_s9  ;;  %7299 = vrot.lane.b32.xlu0 %v13287_v0, %s10947_s9 }
 0x226   : > { %10187 = vmatprep.mubr.msk.bf16.mxu1 %vm10943_vm3, %v13282_v51  ;;  %6464 = vmatprep.mubr.bf16.mxu0 %v13281_v11 }
 0x227   : > { %9964 = vmatprep.subr.msk.bf16.mxu1 %vm519_vm1, %v6300_v6  ;;  %9966 = vmatprep.subr.msk.bf16.mxu0 %vm519_vm1, %v6302_v46  ;;  %v6249_v20 = vpop.permute.xlu1 %6248 }
 0x228   : > { %v6243_v28 = vpop.permute.xlu0 %6242  ;;  %v6306_v2 = vsel %vm6296_vm8, %v6247_v55, %v6249_v20 }
 0x229   : > { %8242 = vrot.lane.b32.xlu1 %v13290_v57, %s10948_s18  ;;  %8244 = vrot.lane.b32.xlu0 %v13291_v50, %s10948_s18  ;;  %v6304_v44 = vsel %vm6296_vm8, %v6243_v28, %v6245_v16  ;;  %v6305_v57 = vsel %vm6296_vm8, %v6245_v16, %v6247_v55 }
 0x22a   : > { %v6358_v10 = vsel %vm519_vm1, %v6305_v57, 0 }
 0x22b   : > { %10188 = vmatmul.mubr.msk.bf16.vlgmr.msra.gmra.mrb[40].mxu1 %vm515_vm2, %v12469_v26  ;;  %9963 = vmatmul.mubr.msk.bf16.vlgmr.msra.gmra.mrb[0].mxu0 %vm515_vm2, %v12657_v12  ;;  %v6253_v60 = vpop.permute.xlu1 %6252 }
 0x22c   : > { %6476 = vmatpush1.bf16.msra.mxu1 %v6340_v3  ;;  %6519 = vmatpush1.bf16.msra.mxu0 %v6346_v34  ;;  %v6255_v7 = vpop.permute.xlu0 %6254 }
 0x22d   : > { %8246 = vrot.lane.b32.xlu1 %v11036_v18, %s10948_s18  ;;  %7301 = vrot.lane.b32.xlu0 %v12437_v58, %s10947_s9  ;;  %v6303_v18 = vsel %vm6296_vm8, %v6241_v40, %v6243_v28 }
 0x22e   : > { %v3118_v50 = vpop.f32.mrb[36].mxu0  ;;  %6507 = vmatprep.mubr.bf16.mxu1 %v13281_v11  ;;  %6550 = vmatprep.mubr.bf16.mxu0 %v13281_v11 }
 0x22f   : > { %v12680_v26 = vadd.f32 %v3118_v50, %v12493_v22  ;;  %v10171_v53 = vpop.f32.mrb[37].mxu0  ;;  %9968 = vmatprep.subr.msk.bf16.mxu1 %vm519_vm1, %v6304_v44  ;;  %9970 = vmatprep.subr.msk.bf16.mxu0 %vm519_vm1, %v6306_v2  ;;  %v6257_v63 = vpop.permute.xlu1 %6256  ;;  %v6352_v22 = vsel %vm519_vm1, %v6303_v18, 0 }
 0x230   : > { %v3121_v9 = vpop.f32.mrb[38].mxu0  ;;  %v6251_v54 = vpop.permute.xlu0 %6250 }
 0x231   : > { %v12687_v17 = vadd.f32 %v3121_v9, %v12499_v14  ;;  %v10172_v38 = vpop.f32.mrb[39].mxu0  ;;  %8250 = vrot.lane.b32.xlu1 %v11024_v15, %s10948_s18  ;;  %8252 = vrot.lane.b32.xlu0 %v13293_v8, %s10948_s18  ;;  %v6310_v14 = vsel %vm6296_vm8, %v6255_v7, %v6257_v63  ;;  %v6308_v32 = vsel %vm6296_vm8, %v6251_v54, %v6253_v60 }
 0x232   : > { %v6309_v15 = vsel %vm6296_vm8, %v6253_v60, %v6255_v7  ;;  %v6307_v16 = vsel %vm6296_vm8, %v6249_v20, %v6251_v54 }
 0x233   : > { %9965 = vmatmul.mubr.msk.bf16.vlgmr.msra.gmra.mrb[0].mxu1 %vm515_vm2, %v12657_v12  ;;  %9967 = vmatmul.mubr.msk.bf16.vlgmr.msra.gmra.mrb[4].mxu0 %vm515_vm2, %v12657_v12  ;;  %v6261_v40 = vpop.permute.xlu1 %6260  ;;  %v6370_v55 = vsel %vm519_vm1, %v6309_v15, 0 }
 0x234   : > { %6562 = vmatpush1.bf16.msra.mxu1 %v6352_v22  ;;  %6605 = vmatpush1.bf16.msra.mxu0 %v6358_v10  ;;  %v6263_v62 = vpop.permute.xlu0 %6262 }
 0x235   : > { %8254 = vrot.lane.b32.xlu1 %v11059_v24, %s10948_s18  ;;  %8248 = vrot.lane.b32.xlu0 %v13292_v59, %s10948_s18  ;;  %v6364_v24 = vsel %vm519_vm1, %v6307_v16, 0 }
 0x236   : > { %6593 = vmatprep.mubr.bf16.mxu1 %v13281_v11  ;;  %6636 = vmatprep.mubr.bf16.mxu0 %v13281_v11 }
 0x237   : > { %9972 = vmatprep.subr.msk.bf16.mxu1 %vm519_vm1, %v6308_v32  ;;  %9974 = vmatprep.subr.msk.bf16.mxu0 %vm519_vm1, %v6310_v14  ;;  %v6265_v8 = vpop.permute.xlu1 %6264 }
 0x238   : > { %v6259_v6 = vpop.permute.xlu0 %6258  ;;  %v6314_v46 = vsel %vm6296_vm8, %v6263_v62, %v6265_v8 }
 0x239   : > { %8258 = vrot.lane.b32.xlu1 %v11047_v21, %s10948_s18  ;;  %8260 = vrot.lane.b32.xlu0 %v11053_v23, %s10948_s18  ;;  %v6312_v61 = vsel %vm6296_vm8, %v6259_v6, %v6261_v40  ;;  %v6313_v21 = vsel %vm6296_vm8, %v6261_v40, %v6263_v62  ;;  %v6311_v5 = vsel %vm6296_vm8, %v6257_v63, %v6259_v6 }
 0x23a   : > { %v6382_v34 = vsel %vm519_vm1, %v6313_v21, 0 }
 0x23b   : > { %9969 = vmatmul.mubr.msk.bf16.vlgmr.msra.gmra.mrb[4].mxu1 %vm515_vm2, %v12657_v12  ;;  %9971 = vmatmul.mubr.msk.bf16.vlgmr.msra.gmra.mrb[8].mxu0 %vm515_vm2, %v12657_v12  ;;  %v6269_v59 = vpop.permute.xlu1 %6268 }
 0x23c   : > { %6648 = vmatpush1.bf16.msra.mxu1 %v6364_v24  ;;  %6691 = vmatpush1.bf16.msra.mxu0 %v6370_v55  ;;  %v6271_v20 = vpop.permute.xlu0 %6270 }
 0x23d   : > { %8262 = vrot.lane.b32.xlu1 %v11082_v30, %s10948_s18  ;;  %8256 = vrot.lane.b32.xlu0 %v11039_v19, %s10948_s18  ;;  %v6376_v19 = vsel %vm519_vm1, %v6311_v5, 0 }
 0x23e   : > { %6679 = vmatprep.mubr.bf16.mxu1 %v13281_v11  ;;  %6722 = vmatprep.mubr.bf16.mxu0 %v13281_v11 }
 0x23f   : > { %9976 = vmatprep.subr.msk.bf16.mxu1 %vm519_vm1, %v6312_v61  ;;  %9978 = vmatprep.subr.msk.bf16.mxu0 %vm519_vm1, %v6314_v46  ;;  %v6273_v23 = vpop.permute.xlu1 %6272 }
 0x240   : > { %v6267_v28 = vpop.permute.xlu0 %6266  ;;  %v6318_v3 = vsel %vm6296_vm8, %v6271_v20, %v6273_v23 }
 0x241   : > { %8266 = vrot.lane.b32.xlu1 %v11070_v27, %s10948_s18  ;;  %8268 = vrot.lane.b32.xlu0 %v11076_v29, %s10948_s18  ;;  %v6316_v60 = vsel %vm6296_vm8, %v6267_v28, %v6269_v59  ;;  %v6317_v27 = vsel %vm6296_vm8, %v6269_v59, %v6271_v20  ;;  %v6315_v44 = vsel %vm6296_vm8, %v6265_v8, %v6267_v28 }
 0x242   : > { %v6394_v57 = vsel %vm519_vm1, %v6317_v27, 0 }
 0x243   : > { %9973 = vmatmul.mubr.msk.bf16.vlgmr.msra.gmra.mrb[8].mxu1 %vm515_vm2, %v12657_v12  ;;  %9975 = vmatmul.mubr.msk.bf16.vlgmr.msra.gmra.mrb[12].mxu0 %vm515_vm2, %v12657_v12  ;;  %v6277_v30 = vpop.permute.xlu1 %6276 }
 0x244   : > { %6734 = vmatpush1.bf16.msra.mxu1 %v6376_v19  ;;  %6777 = vmatpush1.bf16.msra.mxu0 %v6382_v34  ;;  %v6279_v2 = vpop.permute.xlu0 %6278 }
 0x245   : > { %8270 = vrot.lane.b32.xlu1 %v11105_v36, %s10948_s18  ;;  %8264 = vrot.lane.b32.xlu0 %v11062_v25, %s10948_s18  ;;  %v6388_v25 = vsel %vm519_vm1, %v6315_v44, 0 }
 0x246   : > { %6765 = vmatprep.mubr.bf16.mxu1 %v13281_v11  ;;  %6808 = vmatprep.mubr.bf16.mxu0 %v13281_v11 }
 0x247   : > { %9980 = vmatprep.subr.msk.bf16.mxu1 %vm519_vm1, %v6316_v60  ;;  %9982 = vmatprep.subr.msk.bf16.mxu0 %vm519_vm1, %v6318_v3  ;;  %v6281_v29 = vpop.permute.xlu1 %6280 }
 0x248   : > { %v6275_v7 = vpop.permute.xlu0 %6274  ;;  %v6322_v50 = vsel %vm6296_vm8, %v6279_v2, %v6281_v29 }
 0x249   : > { %8274 = vrot.lane.b32.xlu1 %v11093_v33, %s10948_s18  ;;  %8276 = vrot.lane.b32.xlu0 %v11099_v35, %s10948_s18  ;;  %v6320_v53 = vsel %vm6296_vm8, %v6275_v7, %v6277_v30  ;;  %v6321_v33 = vsel %vm6296_vm8, %v6277_v30, %v6279_v2  ;;  %v6319_v18 = vsel %vm6296_vm8, %v6273_v23, %v6275_v7 }
 0x24a   : > { %v6406_v54 = vsel %vm519_vm1, %v6321_v33, 0 }
 0x24b   : > { %9977 = vmatmul.mubr.msk.bf16.vlgmr.msra.gmra.mrb[12].mxu1 %vm515_vm2, %v12657_v12  ;;  %9979 = vmatmul.mubr.msk.bf16.vlgmr.msra.gmra.mrb[16].mxu0 %vm515_vm2, %v12657_v12  ;;  %v6285_v36 = vpop.permute.xlu1 %6284 }
 0x24c   : > { %6820 = vmatpush1.bf16.msra.mxu1 %v6388_v25  ;;  %6863 = vmatpush1.bf16.msra.mxu0 %v6394_v57  ;;  %v6287_v63 = vpop.permute.xlu0 %6286 }
 0x24d   : > { %8278 = vrot.lane.b32.xlu1 %v11128_v42, %s10948_s18  ;;  %8272 = vrot.lane.b32.xlu0 %v11085_v31, %s10948_s18  ;;  %v6400_v31 = vsel %vm519_vm1, %v6319_v18, 0 }
 0x24e   : > { %6851 = vmatprep.mubr.bf16.mxu1 %v13281_v11  ;;  %6894 = vmatprep.mubr.bf16.mxu0 %v13281_v11 }
 0x24f   : > { %9984 = vmatprep.subr.msk.bf16.mxu1 %vm519_vm1, %v6320_v53  ;;  %9986 = vmatprep.subr.msk.bf16.mxu0 %vm519_vm1, %v6322_v50  ;;  %v6289_v35 = vpop.permute.xlu1 %6288 }
 0x250   : > { %v6283_v9 = vpop.permute.xlu0 %6282  ;;  %v6326_v10 = vsel %vm6296_vm8, %v6287_v63, %v6289_v35 }
 0x251   : > { %8282 = vrot.lane.b32.xlu1 %v11116_v39, %s10948_s18  ;;  %8284 = vrot.lane.b32.xlu0 %v11122_v41, %s10948_s18  ;;  %v6324_v38 = vsel %vm6296_vm8, %v6283_v9, %v6285_v36  ;;  %v6325_v39 = vsel %vm6296_vm8, %v6285_v36, %v6287_v63  ;;  %v6323_v40 = vsel %vm6296_vm8, %v6281_v29, %v6283_v9 }
 0x252   : > { %v6418_v32 = vsel %vm519_vm1, %v6325_v39, 0  ;;  %v9242_v39 = vld [vmem:[%s13241_s2 + $0x8] sm:$0xf] }
 0x253   : > { %9981 = vmatmul.mubr.msk.bf16.vlgmr.msra.gmra.mrb[16].mxu1 %vm515_vm2, %v12657_v12  ;;  %9983 = vmatmul.mubr.msk.bf16.vlgmr.msra.gmra.mrb[20].mxu0 %vm515_vm2, %v12657_v12  ;;  %v6293_v42 = vpop.permute.xlu1 %6292 }
 0x254   : > { %6906 = vmatpush1.bf16.msra.mxu1 %v6400_v31  ;;  %6949 = vmatpush1.bf16.msra.mxu0 %v6406_v54  ;;  %v6295_v22 = vpop.permute.xlu0 %6294 }
 0x255   : > { %8286 = vrot.lane.b32.xlu1 %v11151_v48, %s10948_s18  ;;  %8280 = vrot.lane.b32.xlu0 %v11108_v37, %s10948_s18  ;;  %v6412_v37 = vsel %vm519_vm1, %v6323_v40, 0 }
 0x256   : > { %6937 = vmatprep.mubr.bf16.mxu1 %v13281_v11  ;;  %6980 = vmatprep.mubr.bf16.mxu0 %v13281_v11 }
 0x257   : > { %9988 = vmatprep.subr.msk.bf16.mxu1 %vm519_vm1, %v6324_v38  ;;  %9990 = vmatprep.subr.msk.bf16.mxu0 %vm519_vm1, %v6326_v10  ;;  %v6291_v41 = vpop.permute.xlu1 %6290 }
 0x258   : > { %v7236_v14 = vpop.permute.xlu0 %7235  ;;  %v6328_v62 = vsel %vm6296_vm8, %v6291_v41, %v6293_v42  ;;  %v6327_v8 = vsel %vm6296_vm8, %v6289_v35, %v6291_v41 }
 0x259   : > { %8290 = vrot.lane.b32.xlu1 %v11139_v45, %s10948_s18  ;;  %8292 = vrot.lane.b32.xlu0 %v11145_v47, %s10948_s18  ;;  %v6329_v45 = vsel %vm6296_vm8, %v6293_v42, %v6295_v22  ;;  %v9241_v22 = vld [vmem:[%s13241_s2] sm:$0xff] }
 0x25a   : > { %v6430_v6 = vsel %vm519_vm1, %v6329_v45, 0 }
 0x25b   : > { %9985 = vmatmul.mubr.msk.bf16.vlgmr.msra.gmra.mrb[20].mxu1 %vm515_vm2, %v12657_v12  ;;  %9987 = vmatmul.mubr.msk.bf16.vlgmr.msra.gmra.mrb[24].mxu0 %vm515_vm2, %v12657_v12  ;;  %v7238_v48 = vpop.permute.xlu1 %7237 }
 0x25c   : > { %6992 = vmatpush1.bf16.msra.mxu1 %v6412_v37  ;;  %7035 = vmatpush1.bf16.msra.mxu0 %v6418_v32  ;;  %v7240_v15 = vpop.permute.xlu0 %7239  ;;  %v7304_v46 = vsel %vm7303_vm9, %v7236_v14, %v7238_v48 }
 0x25d   : > { %8294 = vrot.lane.b32.xlu1 %v13286_v1, %s10948_s18  ;;  %8288 = vrot.lane.b32.xlu0 %v11131_v43, %s10948_s18  ;;  %v6424_v43 = vsel %vm519_vm1, %v6327_v8, 0  ;;  %v7305_v55 = vsel %vm7303_vm9, %v7238_v48, %v7240_v15 }
 0x25e   : > { %7023 = vmatprep.mubr.bf16.mxu1 %v13281_v11  ;;  %7066 = vmatprep.mubr.bf16.mxu0 %v13281_v11 }
 0x25f   : > { %9992 = vmatprep.subr.msk.bf16.mxu1 %vm519_vm1, %v6328_v62  ;;  %10191 = vmatprep.subr.bf16.mxu0 %v13282_v51  ;;  %v7242_v47 = vpop.permute.xlu1 %7241 }
 0x260   : > { %v7244_v16 = vpop.permute.xlu0 %7243 }
 0x261   : > { %8298 = vrot.lane.b32.xlu1 %v13284_v49, %s10948_s18  ;;  %8300 = vrot.lane.b32.xlu0 %v13285_v56, %s10948_s18  ;;  %v7307_v24 = vsel %vm7303_vm9, %v7242_v47, %v7244_v16  ;;  %v7306_v56 = vsel %vm7303_vm9, %v7240_v15, %v7242_v47 }
 0x263   : > { %9989 = vmatmul.mubr.msk.bf16.vlgmr.msra.gmra.mrb[24].mxu1 %vm515_vm2, %v12657_v12  ;;  %9991 = vmatmul.mubr.msk.bf16.vlgmr.msra.gmra.mrb[28].mxu0 %vm515_vm2, %v12657_v12  ;;  %v7246_v1 = vpop.permute.xlu1 %7245 }
 0x264   : > { %7078 = vmatpush1.bf16.msra.mxu1 %v6424_v43  ;;  %10192 = vmatpush3.bf16.msra.mxu0 %v6430_v6  ;;  %v7248_v49 = vpop.permute.xlu0 %7247  ;;  %v7308_v28 = vsel %vm7303_vm9, %v7244_v16, %v7246_v1 }
 0x265   : > { %8302 = vrot.lane.b32.xlu1 %v13288_v13, %s10948_s18  ;;  %8296 = vrot.lane.b32.xlu0 %v13283_v4, %s10948_s18  ;;  %v7347_v13 = vsel %vm519_vm1, %v7306_v56, 0  ;;  %v7341_v4 = vsel %vm519_vm1, %v7304_v46, 0  ;;  %v7309_v20 = vsel %vm7303_vm9, %v7246_v1, %v7248_v49  ;;  %v7353_v19 = vsel %vm519_vm1, %v7308_v28, 0 }
 0x266   : > { %7109 = vmatprep.mubr.bf16.mxu1 %v13281_v11  ;;  %10193 = vmatprep.mubr.msk.bf16.mxu0 %vm10943_vm3, %v13282_v51 }
 0x267   : > { %9998 = vmatprep.subr.msk.bf16.mxu0 %vm519_vm1, %v7305_v55  ;;  %10000 = vmatprep.subr.msk.bf16.mxu1 %vm519_vm1, %v7307_v24  ;;  %v7250_v59 = vpop.permute.xlu1 %7249 }
 0x268   : > { %v7252_v61 = vpop.permute.xlu0 %7251 }
 0x269   : > { %8306 = vrot.lane.b32.xlu1 %v13287_v0, %s10948_s18  ;;  %8308 = vrot.lane.b32.xlu0 %v12437_v58, %s10948_s18  ;;  %v7311_v23 = vsel %vm7303_vm9, %v7250_v59, %v7252_v61  ;;  %v7310_v0 = vsel %vm7303_vm9, %v7248_v49, %v7250_v59  ;;  %v12863_v58 = vld [vmem:[%s13240_s1 + $0x38] sm:$0x3f]  }
 0x26b   : > { %9993 = vmatmul.mubr.msk.bf16.vlgmr.msra.gmra.mrb[28].mxu1 %vm515_vm2, %v12657_v12  ;;  %10194 = vmatmul.mubr.msk.bf16.vlgmr.msra.gmra.mrb[44].mxu0 %vm515_vm2, %v12657_v12  ;;  %v7254_v21 = vpop.permute.xlu1 %7253 }
 0x26c   : > { %7440 = vmatpush1.bf16.msra.mxu0 %v7341_v4  ;;  %7483 = vmatpush1.bf16.msra.mxu1 %v7347_v13  ;;  %v7256_v5 = vpop.permute.xlu0 %7255  ;;  %v7312_v25 = vsel %vm7303_vm9, %v7252_v61, %v7254_v21 }
 0x26d   : > { %8304 = vrot.lane.b32.xlu1 %v11165_v52, %s10948_s18  ;;  %7471 = vmatprep.mubr.bf16.mxu0 %v13281_v11  ;;  %v7359_v52 = vsel %vm519_vm1, %v7310_v0, 0  ;;  %v7313_v30 = vsel %vm7303_vm9, %v7254_v21, %v7256_v5  ;;  %v7365_v35 = vsel %vm519_vm1, %v7312_v25, 0 }
 0x26e   : > { %7514 = vmatprep.mubr.bf16.mxu1 %v13281_v11  ;;  %10002 = vmatprep.subr.msk.bf16.mxu0 %vm519_vm1, %v7309_v20 }
 0x26f   : > { %10004 = vmatprep.subr.msk.bf16.mxu1 %vm519_vm1, %v7311_v23  ;;  %v7258_v12 = vpop.permute.xlu1 %7257  ;;  %9245 = vperm.xlu0 %10759, %v9241_v22  }
 0x270   : > { %v7260_v34 = vpop.permute.xlu0 %7259  ;;  %v7314_v27 = vsel %vm7303_vm9, %v7256_v5, %v7258_v12 }
 0x271   : > { %v7315_v3 = vsel %vm7303_vm9, %v7258_v12, %v7260_v34  ;;  %v7371_v53 = vsel %vm519_vm1, %v7314_v27, 0  ;;  %9250 = vperm.xlu1 %10760, %v9242_v39  }
 0x273   : > { %9999 = vmatmul.mubr.msk.bf16.vlgmr.msra.gmra.mrb[0].mxu0 %vm515_vm2, %v12863_v58  ;;  %10001 = vmatmul.mubr.msk.bf16.vlgmr.msra.gmra.mrb[0].mxu1 %vm515_vm2, %v12863_v58  ;;  %v7262_v60 = vpop.permute.xlu1 %7261 }
 0x274   : > { %7526 = vmatpush1.bf16.msra.mxu0 %v7353_v19  ;;  %7569 = vmatpush1.bf16.msra.mxu1 %v7359_v52  ;;  %v7264_v2 = vpop.permute.xlu0 %7263  ;;  %v7316_v42 = vsel %vm7303_vm9, %v7260_v34, %v7262_v60 }
 0x275   : > { %7557 = vmatprep.mubr.bf16.mxu0 %v13281_v11  ;;  %7600 = vmatprep.mubr.bf16.mxu1 %v13281_v11  ;;  %v7317_v18 = vsel %vm7303_vm9, %v7262_v60, %v7264_v2  ;;  %v7377_v41 = vsel %vm519_vm1, %v7316_v42, 0 }
 0x276   : > { %v4125_v29 = vpop.f32.mrb[36].mxu1  ;;  %10006 = vmatprep.subr.msk.bf16.mxu0 %vm519_vm1, %v7313_v30  ;;  %10008 = vmatprep.subr.msk.bf16.mxu1 %vm519_vm1, %v7315_v3 }
 0x277   : > { %v12881_v44 = vadd.f32 %v4125_v29, %v12680_v26  ;;  %v10177_v7 = vpop.f32.mrb[37].mxu1  ;;  %v7266_v57 = vpop.permute.xlu1 %7265 }
 0x278   : > { %v4128_v36 = vpop.f32.mrb[38].mxu1  ;;  %v7268_v50 = vpop.permute.xlu0 %7267 }
 0x279   : > { %v12886_v63 = vadd.f32 %v4128_v36, %v12687_v17  ;;  %v10178_v33 = vpop.f32.mrb[39].mxu1  ;;  %v7319_v26 = vsel %vm7303_vm9, %v7266_v57, %v7268_v50  ;;  %v7318_v17 = vsel %vm7303_vm9, %v7264_v2, %v7266_v57 }
 0x27a   : > { %v7383_v38 = vsel %vm519_vm1, %v7318_v17, 0 }
 0x27b   : > { %10003 = vmatmul.mubr.msk.bf16.vlgmr.msra.gmra.mrb[4].mxu0 %vm515_vm2, %v12863_v58  ;;  %10005 = vmatmul.mubr.msk.bf16.vlgmr.msra.gmra.mrb[4].mxu1 %vm515_vm2, %v12863_v58  ;;  %v7270_v9 = vpop.permute.xlu1 %7269 }
 0x27c   : > { %7612 = vmatpush1.bf16.msra.mxu0 %v7365_v35  ;;  %7655 = vmatpush1.bf16.msra.mxu1 %v7371_v53  ;;  %v7272_v54 = vpop.permute.xlu0 %7271  ;;  %v7320_v15 = vsel %vm7303_vm9, %v7268_v50, %v7270_v9 }
 0x27d   : > { %7643 = vmatprep.mubr.bf16.mxu0 %v13281_v11  ;;  %7686 = vmatprep.mubr.bf16.mxu1 %v13281_v11  ;;  %v7321_v40 = vsel %vm7303_vm9, %v7270_v9, %v7272_v54  ;;  %v7389_v8 = vsel %vm519_vm1, %v7320_v15, 0 }
 0x27e   : > { %10010 = vmatprep.subr.msk.bf16.mxu0 %vm519_vm1, %v7317_v18  ;;  %10012 = vmatprep.subr.msk.bf16.mxu1 %vm519_vm1, %v7319_v26 }
 0x27f   : > { %v7274_v31 = vpop.permute.xlu1 %7273 }
 0x280   : > { %v7276_v10 = vpop.permute.xlu0 %7275  ;;  %v7322_v48 = vsel %vm7303_vm9, %v7272_v54, %v7274_v31 }
 0x281   : > { %v7323_v14 = vsel %vm7303_vm9, %v7274_v31, %v7276_v10  ;;  %v7395_v47 = vsel %vm519_vm1, %v7322_v48, 0 }
 0x283   : > { %10007 = vmatmul.mubr.msk.bf16.vlgmr.msra.gmra.mrb[8].mxu0 %vm515_vm2, %v12863_v58  ;;  %10009 = vmatmul.mubr.msk.bf16.vlgmr.msra.gmra.mrb[8].mxu1 %vm515_vm2, %v12863_v58  ;;  %v7278_v32 = vpop.permute.xlu1 %7277 }
 0x284   : > { %7698 = vmatpush1.bf16.msra.mxu0 %v7377_v41  ;;  %7741 = vmatpush1.bf16.msra.mxu1 %v7383_v38  ;;  %v7280_v37 = vpop.permute.xlu0 %7279  ;;  %v7324_v49 = vsel %vm7303_vm9, %v7276_v10, %v7278_v32  ;;  %v12993_v10 = vld [vmem:[%s13240_s1 + $0x40] sm:$0x3f]  }
 0x285   : > { %7729 = vmatprep.mubr.bf16.mxu0 %v13281_v11  ;;  %7772 = vmatprep.mubr.bf16.mxu1 %v13281_v11  ;;  %v7325_v16 = vsel %vm7303_vm9, %v7278_v32, %v7280_v37  ;;  %v7401_v46 = vsel %vm519_vm1, %v7324_v49, 0 }
 0x286   : > { %10014 = vmatprep.subr.msk.bf16.mxu0 %vm519_vm1, %v7321_v40  ;;  %10016 = vmatprep.subr.msk.bf16.mxu1 %vm519_vm1, %v7323_v14 }
 0x287   : > { %v7282_v62 = vpop.permute.xlu1 %7281 }
 0x288   : > { %v7284_v45 = vpop.permute.xlu0 %7283  ;;  %v7326_v55 = vsel %vm7303_vm9, %v7280_v37, %v7282_v62 }
 0x289   : > { %v7327_v6 = vsel %vm7303_vm9, %v7282_v62, %v7284_v45  ;;  %v7407_v59 = vsel %vm519_vm1, %v7326_v55, 0 }
 0x28b   : > { %10011 = vmatmul.mubr.msk.bf16.vlgmr.msra.gmra.mrb[12].mxu0 %vm515_vm2, %v12863_v58  ;;  %10013 = vmatmul.mubr.msk.bf16.vlgmr.msra.gmra.mrb[12].mxu1 %vm515_vm2, %v12863_v58  ;;  %v7286_v43 = vpop.permute.xlu1 %7285 }
 0x28c   : > { %7784 = vmatpush1.bf16.msra.mxu0 %v7389_v8  ;;  %7827 = vmatpush1.bf16.msra.mxu1 %v7395_v47  ;;  %v7288_v1 = vpop.permute.xlu0 %7287  ;;  %v7328_v5 = vsel %vm7303_vm9, %v7284_v45, %v7286_v43 }
 0x28d   : > { %7815 = vmatprep.mubr.bf16.mxu0 %v13281_v11  ;;  %7858 = vmatprep.mubr.bf16.mxu1 %v13281_v11  ;;  %v7329_v61 = vsel %vm7303_vm9, %v7286_v43, %v7288_v1  ;;  %v7413_v28 = vsel %vm519_vm1, %v7328_v5, 0 }
 0x28e   : > { %10018 = vmatprep.subr.msk.bf16.mxu0 %vm519_vm1, %v7325_v16  ;;  %10020 = vmatprep.subr.msk.bf16.mxu1 %vm519_vm1, %v7327_v6 }
 0x28f   : > { %v7290_v24 = vpop.permute.xlu1 %7289 }
 0x290   : > { %v7292_v56 = vpop.permute.xlu0 %7291  ;;  %v7330_v21 = vsel %vm7303_vm9, %v7288_v1, %v7290_v24 }
 0x291   : > { %v7331_v13 = vsel %vm7303_vm9, %v7290_v24, %v7292_v56  ;;  %v7419_v12 = vsel %vm519_vm1, %v7330_v21, 0 }
 0x293   : > { %10015 = vmatmul.mubr.msk.bf16.vlgmr.msra.gmra.mrb[16].mxu0 %vm515_vm2, %v12863_v58  ;;  %10017 = vmatmul.mubr.msk.bf16.vlgmr.msra.gmra.mrb[16].mxu1 %vm515_vm2, %v12863_v58  ;;  %v7294_v4 = vpop.permute.xlu1 %7293 }
 0x294   : > { %7870 = vmatpush1.bf16.msra.mxu0 %v7401_v46  ;;  %7913 = vmatpush1.bf16.msra.mxu1 %v7407_v59  ;;  %v7296_v20 = vpop.permute.xlu0 %7295  ;;  %v7332_v2 = vsel %vm7303_vm9, %v7292_v56, %v7294_v4 }
 0x295   : > { %7901 = vmatprep.mubr.bf16.mxu0 %v13281_v11  ;;  %7944 = vmatprep.mubr.bf16.mxu1 %v13281_v11  ;;  %v7333_v34 = vsel %vm7303_vm9, %v7294_v4, %v7296_v20  ;;  %v7425_v7 = vsel %vm519_vm1, %v7332_v2, 0 }
 0x296   : > { %10022 = vmatprep.subr.msk.bf16.mxu0 %vm519_vm1, %v7329_v61  ;;  %10024 = vmatprep.subr.msk.bf16.mxu1 %vm519_vm1, %v7331_v13 }
 0x297   : > { %v7298_v23 = vpop.permute.xlu1 %7297 }
 0x298   : > { %v7300_v0 = vpop.permute.xlu0 %7299  ;;  %v7334_v3 = vsel %vm7303_vm9, %v7296_v20, %v7298_v23 }
 0x299   : > { %v7335_v52 = vsel %vm7303_vm9, %v7298_v23, %v7300_v0  ;;  %v7431_v29 = vsel %vm519_vm1, %v7334_v3, 0 }
 0x29b   : > { %10019 = vmatmul.mubr.msk.bf16.vlgmr.msra.gmra.mrb[20].mxu0 %vm515_vm2, %v12863_v58  ;;  %10021 = vmatmul.mubr.msk.bf16.vlgmr.msra.gmra.mrb[20].mxu1 %vm515_vm2, %v12863_v58  ;;  %v8243_v19 = vpop.permute.xlu1 %8242 }
 0x29c   : > { %7956 = vmatpush1.bf16.msra.mxu0 %v7413_v28  ;;  %7999 = vmatpush1.bf16.msra.mxu1 %v7419_v12  ;;  %v8245_v30 = vpop.permute.xlu0 %8244 }
 0x29d   : > { %7987 = vmatprep.mubr.bf16.mxu0 %v13281_v11  ;;  %8030 = vmatprep.mubr.bf16.mxu1 %v13281_v11  ;;  %v8311_v50 = vsel %vm8310_vm10, %v8243_v19, %v8245_v30 }
 0x29e   : > { %10026 = vmatprep.subr.msk.bf16.mxu0 %vm519_vm1, %v7333_v34  ;;  %10028 = vmatprep.subr.msk.bf16.mxu1 %vm519_vm1, %v7335_v52  ;;  %v8348_v18 = vsel %vm519_vm1, %v8311_v50, 0 }
 0x29f   : > { %v8247_v60 = vpop.permute.xlu1 %8246 }
 0x2a0   : > { %v7302_v27 = vpop.permute.xlu0 %7301  ;;  %v8312_v57 = vsel %vm8310_vm10, %v8245_v30, %v8247_v60 }
 0x2a1   : > { %v7336_v33 = vsel %vm7303_vm9, %v7300_v0, %v7302_v27 }
 0x2a2   : > { %v7437_v26 = vsel %vm519_vm1, %v7336_v33, 0 }
 0x2a3   : > { %10023 = vmatmul.mubr.msk.bf16.vlgmr.msra.gmra.mrb[24].mxu0 %vm515_vm2, %v12863_v58  ;;  %10025 = vmatmul.mubr.msk.bf16.vlgmr.msra.gmra.mrb[24].mxu1 %vm515_vm2, %v12863_v58  ;;  %v8251_v25 = vpop.permute.xlu1 %8250 }
 0x2a4   : > { %8042 = vmatpush1.bf16.msra.mxu0 %v7425_v7  ;;  %8085 = vmatpush1.bf16.msra.mxu1 %v7431_v29  ;;  %v8253_v36 = vpop.permute.xlu0 %8252 }
 0x2a5   : > { %8073 = vmatprep.mubr.bf16.mxu0 %v13281_v11  ;;  %8116 = vmatprep.mubr.bf16.mxu1 %v13281_v11  ;;  %v8315_v42 = vsel %vm8310_vm10, %v8251_v25, %v8253_v36 }
 0x2a6   : > { %10197 = vmatprep.subr.bf16.mxu1 %v13282_v51  ;;  %10034 = vmatprep.subr.msk.bf16.mxu0 %vm519_vm1, %v8312_v57  ;;  %v8360_v41 = vsel %vm519_vm1, %v8315_v42, 0 }
 0x2a7   : > { %v8255_v53 = vpop.permute.xlu1 %8254 }
 0x2a8   : > { %v8249_v35 = vpop.permute.xlu0 %8248  ;;  %v8316_v9 = vsel %vm8310_vm10, %v8253_v36, %v8255_v53 }
 0x2a9   : > { %v8314_v54 = vsel %vm8310_vm10, %v8249_v35, %v8251_v25  ;;  %v8313_v22 = vsel %vm8310_vm10, %v8247_v60, %v8249_v35 }
 0x2aa   : > { %v8354_v40 = vsel %vm519_vm1, %v8313_v22, 0 }
 0x2ab   : > { %10027 = vmatmul.mubr.msk.bf16.vlgmr.msra.gmra.mrb[28].mxu0 %vm515_vm2, %v12863_v58  ;;  %10029 = vmatmul.mubr.msk.bf16.vlgmr.msra.gmra.mrb[28].mxu1 %vm515_vm2, %v12863_v58  ;;  %v8259_v17 = vpop.permute.xlu1 %8258 }
 0x2ac   : > { %10198 = vmatpush3.bf16.msra.mxu1 %v7437_v26  ;;  %8447 = vmatpush1.bf16.msra.mxu0 %v8348_v18  ;;  %v8261_v31 = vpop.permute.xlu0 %8260 }
 0x2ad   : > { %10199 = vmatprep.mubr.msk.bf16.mxu1 %vm10943_vm3, %v13282_v51  ;;  %8478 = vmatprep.mubr.bf16.mxu0 %v13281_v11  ;;  %v8319_v62 = vsel %vm8310_vm10, %v8259_v17, %v8261_v31 }
 0x2ae   : > { %10036 = vmatprep.subr.msk.bf16.mxu1 %vm519_vm1, %v8314_v54  ;;  %10038 = vmatprep.subr.msk.bf16.mxu0 %vm519_vm1, %v8316_v9  ;;  %v8372_v43 = vsel %vm519_vm1, %v8319_v62, 0 }
 0x2af   : > { %v8263_v38 = vpop.permute.xlu1 %8262 }
 0x2b0   : > { %v8257_v39 = vpop.permute.xlu0 %8256  ;;  %v8320_v14 = vsel %vm8310_vm10, %v8261_v31, %v8263_v38 }
 0x2b1   : > { %v8318_v32 = vsel %vm8310_vm10, %v8257_v39, %v8259_v17  ;;  %v8317_v8 = vsel %vm8310_vm10, %v8255_v53, %v8257_v39 }
 0x2b2   : > { %v8366_v24 = vsel %vm519_vm1, %v8317_v8, 0 }
 0x2b3   : > { %10200 = vmatmul.mubr.msk.bf16.vlgmr.msra.gmra.mrb[44].mxu1 %vm515_vm2, %v12863_v58  ;;  %10035 = vmatmul.mubr.msk.bf16.vlgmr.msra.gmra.mrb[0].mxu0 %vm515_vm2, %v12993_v10  ;;  %v8267_v37 = vpop.permute.xlu1 %8266 }
 0x2b4   : > { %8490 = vmatpush1.bf16.msra.mxu1 %v8354_v40  ;;  %8533 = vmatpush1.bf16.msra.mxu0 %v8360_v41  ;;  %v8269_v48 = vpop.permute.xlu0 %8268 }
 0x2b5   : > { %8521 = vmatprep.mubr.bf16.mxu1 %v13281_v11  ;;  %8564 = vmatprep.mubr.bf16.mxu0 %v13281_v11 }
 0x2b6   : > { %v5132_v15 = vpop.f32.mrb[40].mxu0  ;;  %10040 = vmatprep.subr.msk.bf16.mxu1 %vm519_vm1, %v8318_v32  ;;  %10042 = vmatprep.subr.msk.bf16.mxu0 %vm519_vm1, %v8320_v14 }
 0x2b7   : > { %v13010_v58 = vadd.f32 %v5132_v15, %v12881_v44  ;;  %v10183_v45 = vpop.f32.mrb[41].mxu0  ;;  %v8271_v47 = vpop.permute.xlu1 %8270 }
 0x2b8   : > { %v5135_v16 = vpop.f32.mrb[42].mxu0  ;;  %v8265_v6 = vpop.permute.xlu0 %8264  ;;  %v8324_v44 = vsel %vm8310_vm10, %v8269_v48, %v8271_v47 }
 0x2b9   : > { %v13015_v1 = vadd.f32 %v5135_v16, %v12886_v63  ;;  %v10184_v55 = vpop.f32.mrb[43].mxu0  ;;  %v8322_v49 = vsel %vm8310_vm10, %v8265_v6, %v8267_v37  ;;  %v8323_v63 = vsel %vm8310_vm10, %v8267_v37, %v8269_v48  ;;  %v8321_v61 = vsel %vm8310_vm10, %v8263_v38, %v8265_v6 }
 0x2ba   : > { %v8384_v4 = vsel %vm519_vm1, %v8323_v63, 0  ;;  %v8378_v20 = vsel %vm519_vm1, %v8321_v61, 0 }
 0x2bb   : > { %10037 = vmatmul.mubr.msk.bf16.vlgmr.msra.gmra.mrb[0].mxu1 %vm515_vm2, %v12993_v10  ;;  %10039 = vmatmul.mubr.msk.bf16.vlgmr.msra.gmra.mrb[4].mxu0 %vm515_vm2, %v12993_v10  ;;  %v8275_v56 = vpop.permute.xlu1 %8274 }
 0x2bc   : > { %8576 = vmatpush1.bf16.msra.mxu1 %v8366_v24  ;;  %8619 = vmatpush1.bf16.msra.mxu0 %v8372_v43  ;;  %v8277_v59 = vpop.permute.xlu0 %8276 }
 0x2bd   : > { %8607 = vmatprep.mubr.bf16.mxu1 %v13281_v11  ;;  %8650 = vmatprep.mubr.bf16.mxu0 %v13281_v11  ;;  %v8327_v12 = vsel %vm8310_vm10, %v8275_v56, %v8277_v59 }
 0x2be   : > { %10044 = vmatprep.subr.msk.bf16.mxu1 %vm519_vm1, %v8322_v49  ;;  %10046 = vmatprep.subr.msk.bf16.mxu0 %vm519_vm1, %v8324_v44  ;;  %v8396_v19 = vsel %vm519_vm1, %v8327_v12, 0 }
 0x2bf   : > { %v8279_v46 = vpop.permute.xlu1 %8278 }
 0x2c0   : > { %v8273_v13 = vpop.permute.xlu0 %8272  ;;  %v8328_v21 = vsel %vm8310_vm10, %v8277_v59, %v8279_v46 }
 0x2c1   : > { %v8326_v23 = vsel %vm8310_vm10, %v8273_v13, %v8275_v56  ;;  %v8325_v34 = vsel %vm8310_vm10, %v8271_v47, %v8273_v13 }
 0x2c2   : > { %v8390_v30 = vsel %vm519_vm1, %v8325_v34, 0 }
 0x2c3   : > { %10041 = vmatmul.mubr.msk.bf16.vlgmr.msra.gmra.mrb[4].mxu1 %vm515_vm2, %v12993_v10  ;;  %10043 = vmatmul.mubr.msk.bf16.vlgmr.msra.gmra.mrb[8].mxu0 %vm515_vm2, %v12993_v10  ;;  %v8283_v5 = vpop.permute.xlu1 %8282 }
 0x2c4   : > { %8662 = vmatpush1.bf16.msra.mxu1 %v8378_v20  ;;  %8705 = vmatpush1.bf16.msra.mxu0 %v8384_v4  ;;  %v8285_v0 = vpop.permute.xlu0 %8284 }
 0x2c5   : > { %8693 = vmatprep.mubr.bf16.mxu1 %v13281_v11  ;;  %8736 = vmatprep.mubr.bf16.mxu0 %v13281_v11  ;;  %v8331_v29 = vsel %vm8310_vm10, %v8283_v5, %v8285_v0 }
 0x2c6   : > { %10048 = vmatprep.subr.msk.bf16.mxu1 %vm519_vm1, %v8326_v23  ;;  %10050 = vmatprep.subr.msk.bf16.mxu0 %vm519_vm1, %v8328_v21  ;;  %v8408_v36 = vsel %vm519_vm1, %v8331_v29, 0 }
 0x2c7   : > { %v8287_v28 = vpop.permute.xlu1 %8286 }
 0x2c8   : > { %v8281_v52 = vpop.permute.xlu0 %8280  ;;  %v8332_v3 = vsel %vm8310_vm10, %v8285_v0, %v8287_v28 }
 0x2c9   : > { %v8330_v60 = vsel %vm8310_vm10, %v8281_v52, %v8283_v5  ;;  %v8329_v57 = vsel %vm8310_vm10, %v8279_v46, %v8281_v52 }
 0x2ca   : > { %v8402_v50 = vsel %vm519_vm1, %v8329_v57, 0 }
 0x2cb   : > { %10045 = vmatmul.mubr.msk.bf16.vlgmr.msra.gmra.mrb[8].mxu1 %vm515_vm2, %v12993_v10  ;;  %10047 = vmatmul.mubr.msk.bf16.vlgmr.msra.gmra.mrb[12].mxu0 %vm515_vm2, %v12993_v10  ;;  %v8291_v2 = vpop.permute.xlu1 %8290 }
 0x2cc   : > { %8748 = vmatpush1.bf16.msra.mxu1 %v8390_v30  ;;  %8791 = vmatpush1.bf16.msra.mxu0 %v8396_v19  ;;  %v8293_v27 = vpop.permute.xlu0 %8292 }
 0x2cd   : > { %8779 = vmatprep.mubr.bf16.mxu1 %v13281_v11  ;;  %8822 = vmatprep.mubr.bf16.mxu0 %v13281_v11  ;;  %v8335_v26 = vsel %vm8310_vm10, %v8291_v2, %v8293_v27 }
 0x2ce   : > { %10052 = vmatprep.subr.msk.bf16.mxu1 %vm519_vm1, %v8330_v60  ;;  %10054 = vmatprep.subr.msk.bf16.mxu0 %vm519_vm1, %v8332_v3  ;;  %v8420_v17 = vsel %vm519_vm1, %v8335_v26, 0 }
 0x2cf   : > { %v8295_v7 = vpop.permute.xlu1 %8294 }
 0x2d0   : > { %v8289_v25 = vpop.permute.xlu0 %8288  ;;  %v8336_v53 = vsel %vm8310_vm10, %v8293_v27, %v8295_v7 }
 0x2d1   : > { %v8334_v33 = vsel %vm8310_vm10, %v8289_v25, %v8291_v2  ;;  %v8333_v54 = vsel %vm8310_vm10, %v8287_v28, %v8289_v25 }
 0x2d2   : > { %v8414_v42 = vsel %vm519_vm1, %v8333_v54, 0 }
 0x2d3   : > { %10049 = vmatmul.mubr.msk.bf16.vlgmr.msra.gmra.mrb[12].mxu1 %vm515_vm2, %v12993_v10  ;;  %10051 = vmatmul.mubr.msk.bf16.vlgmr.msra.gmra.mrb[16].mxu0 %vm515_vm2, %v12993_v10  ;;  %v8299_v35 = vpop.permute.xlu1 %8298 }
 0x2d4   : > { %8834 = vmatpush1.bf16.msra.mxu1 %v8402_v50  ;;  %8877 = vmatpush1.bf16.msra.mxu0 %v8408_v36  ;;  %v8301_v18 = vpop.permute.xlu0 %8300 }
 0x2d5   : > { %8865 = vmatprep.mubr.bf16.mxu1 %v13281_v11  ;;  %8908 = vmatprep.mubr.bf16.mxu0 %v13281_v11  ;;  %v8339_v41 = vsel %vm8310_vm10, %v8299_v35, %v8301_v18 }
 0x2d6   : > { %10056 = vmatprep.subr.msk.bf16.mxu1 %vm519_vm1, %v8334_v33  ;;  %10058 = vmatprep.subr.msk.bf16.mxu0 %vm519_vm1, %v8336_v53  ;;  %v8432_v14 = vsel %vm519_vm1, %v8339_v41, 0 }
 0x2d7   : > { %v8303_v9 = vpop.permute.xlu1 %8302 }
 0x2d8   : > { %v8297_v31 = vpop.permute.xlu0 %8296  ;;  %v8340_v38 = vsel %vm8310_vm10, %v8301_v18, %v8303_v9 }
 0x2d9   : > { %v8338_v22 = vsel %vm8310_vm10, %v8297_v31, %v8299_v35  ;;  %v8337_v40 = vsel %vm8310_vm10, %v8295_v7, %v8297_v31 }
 0x2da   : > { %v8426_v37 = vsel %vm519_vm1, %v8337_v40, 0 }
 0x2db   : > { %10053 = vmatmul.mubr.msk.bf16.vlgmr.msra.gmra.mrb[16].mxu1 %vm515_vm2, %v12993_v10  ;;  %10055 = vmatmul.mubr.msk.bf16.vlgmr.msra.gmra.mrb[20].mxu0 %vm515_vm2, %v12993_v10  ;;  %v8307_v39 = vpop.permute.xlu1 %8306 }
 0x2dc   : > { %8920 = vmatpush1.bf16.msra.mxu1 %v8414_v42  ;;  %8963 = vmatpush1.bf16.msra.mxu0 %v8420_v17  ;;  %v8309_v62 = vpop.permute.xlu0 %8308 }
 0x2dd   : > { %8951 = vmatprep.mubr.bf16.mxu1 %v13281_v11  ;;  %8994 = vmatprep.mubr.bf16.mxu0 %v13281_v11  ;;  %v8343_v15 = vsel %vm8310_vm10, %v8307_v39, %v8309_v62 }
 0x2de   : > { %10060 = vmatprep.subr.msk.bf16.mxu1 %vm519_vm1, %v8338_v22  ;;  %10062 = vmatprep.subr.msk.bf16.mxu0 %vm519_vm1, %v8340_v38  ;;  %v8444_v47 = vsel %vm519_vm1, %v8343_v15, 0 }
 0x2df   : > { %v8305_v32 = vpop.permute.xlu1 %8304 }
 0x2e0   : > { %v8342_v48 = vsel %vm8310_vm10, %v8305_v32, %v8307_v39  ;;  %v8341_v45 = vsel %vm8310_vm10, %v8303_v9, %v8305_v32 }
 0x2e1   : > { %v8438_v8 = vsel %vm519_vm1, %v8341_v45, 0 }
 0x2e3   : > { %10057 = vmatmul.mubr.msk.bf16.vlgmr.msra.gmra.mrb[20].mxu1 %vm515_vm2, %v12993_v10  ;;  %10059 = vmatmul.mubr.msk.bf16.vlgmr.msra.gmra.mrb[24].mxu0 %vm515_vm2, %v12993_v10 }
 0x2e4   : > { %9006 = vmatpush1.bf16.msra.mxu1 %v8426_v37  ;;  %9049 = vmatpush1.bf16.msra.mxu0 %v8432_v14 }
 0x2e5   : > { %9037 = vmatprep.mubr.bf16.mxu1 %v13281_v11  ;;  %9080 = vmatprep.mubr.bf16.mxu0 %v13281_v11 }
 0x2e6   : > { %10064 = vmatprep.subr.msk.bf16.mxu1 %vm519_vm1, %v8342_v48  ;;  %10203 = vmatprep.subr.bf16.mxu0 %v13282_v51 }
 0x2eb   : > { %10061 = vmatmul.mubr.msk.bf16.vlgmr.msra.gmra.mrb[24].mxu1 %vm515_vm2, %v12993_v10  ;;  %10063 = vmatmul.mubr.msk.bf16.vlgmr.msra.gmra.mrb[28].mxu0 %vm515_vm2, %v12993_v10 }
 0x2ec   : > { %9092 = vmatpush1.bf16.msra.mxu1 %v8438_v8  ;;  %10204 = vmatpush3.bf16.msra.mxu0 %v8444_v47 }
 0x2ed   : > { %9123 = vmatprep.mubr.bf16.mxu1 %v13281_v11  ;;  %10205 = vmatprep.mubr.msk.bf16.mxu0 %vm10943_vm3, %v13282_v51 }
 0x2ee   : > { %v13114_v46 = vpop.permute.xlu0 %9245 }
 0x2f0   : > { %v13116_v61 = vpop.permute.xlu1 %9250 }
 0x2f3   : > { %10065 = vmatmul.mubr.msk.bf16.vlgmr.msra.gmra.mrb[28].mxu1 %vm515_vm2, %v12993_v10  ;;  %10206 = vmatmul.mubr.msk.bf16.vlgmr.msra.gmra.mrb[48].mxu0 %vm515_vm2, %v12993_v10 }
 0x2fe   : > { %v6139_v16 = vpop.f32.mrb[40].mxu1 }
 0x2ff   : > { %v6178_v6 = vadd.f32 %v6139_v16, %v13010_v58  ;;  %v10189_v43 = vpop.f32.mrb[41].mxu1 }
 0x300   : > { %v6142_v55 = vpop.f32.mrb[42].mxu1 }
 0x301   : > { %v6211_v24 = vadd.f32 %v6142_v55, %v13015_v1  ;;  %v10190_v44 = vpop.f32.mrb[43].mxu1 }
 0x33e   : > { %v7154_v49 = vpop.f32.mrb[44].mxu0 }
 0x33f   : > { %v7193_v56 = vadd.f32 %v7154_v49, %v6178_v6  ;;  %v10195_v11 = vpop.f32.mrb[45].mxu0 }
 0x340   : > { %v7157_v59 = vpop.f32.mrb[46].mxu0 }
 0x341   : > { %v7226_v63 = vadd.f32 %v7157_v59, %v6211_v24  ;;  %v10196_v51 = vpop.f32.mrb[47].mxu0 }
 0x386   : > { %v8161_v13 = vpop.f32.mrb[44].mxu1  ;;  %v8480_v10 = vpop.f32.mrb[0].mxu0 }
 0x387   : > { %v13118_v4 = vadd.f32 %v8161_v13, %v7193_v56  ;;  %v10201_v58 = vpop.f32.mrb[45].mxu1  ;;  %v8482_v20 = vpop.f32.mrb[1].mxu0  ;;  %v9253_v21 = vadd.f32 %v13114_v46, %v8480_v10 }
 0x388   : > { %v9254_v1 = vadd.f32 %v13114_v46, %v8482_v20  ;;  %v8164_v23 = vpop.f32.mrb[46].mxu1  ;;  %v8484_v5 = vpop.f32.mrb[2].mxu0 }
 0x389   : > { %10779 = vtanh.f32 %v9253_v21  ;;  %v13122_v0 = vadd.f32 %v8164_v23, %v7226_v63  ;;  %v9286_v12 = vadd.f32 %v13116_v61, %v8484_v5  ;;  %v8486_v28 = vpop.f32.mrb[3].mxu0  ;;  %v10202_v34 = vpop.f32.mrb[47].mxu1 }
 0x38a   : > { %10781 = vtanh.f32 %v9254_v1  ;;  %v9287_v52 = vadd.f32 %v13116_v61, %v8486_v28 }
 0x38b   : > { %10783 = vtanh.f32 %v9286_v12 }
 0x38c   : > { %10785 = vtanh.f32 %v9287_v52 }
 0x38e   : > { %v8523_v19 = vpop.f32.mrb[0].mxu1  ;;  %v8566_v30 = vpop.f32.mrb[4].mxu0 }
 0x38f   : > { %v9255_v3 = vadd.f32 %v13114_v46, %v8523_v19  ;;  %v9257_v60 = vadd.f32 %v13114_v46, %v8566_v30  ;;  %v8525_v2 = vpop.f32.mrb[1].mxu1  ;;  %v8568_v27 = vpop.f32.mrb[5].mxu0 }
 0x390   : > { %v9256_v29 = vadd.f32 %v13114_v46, %v8525_v2  ;;  %v9258_v7 = vadd.f32 %v13114_v46, %v8568_v27  ;;  %v8527_v57 = vpop.f32.mrb[2].mxu1  ;;  %v8570_v25 = vpop.f32.mrb[6].mxu0 }
 0x391   : > { %10787 = vtanh.f32 %v9255_v3  ;;  %v9288_v36 = vadd.f32 %v13116_v61, %v8527_v57  ;;  %v8529_v50 = vpop.f32.mrb[3].mxu1  ;;  %v8572_v53 = vpop.f32.mrb[7].mxu0  ;;  %v9290_v33 = vadd.f32 %v13116_v61, %v8570_v25 }
 0x392   : > { %10789 = vtanh.f32 %v9257_v60  ;;  %v9289_v18 = vadd.f32 %v13116_v61, %v8529_v50  ;;  %v9291_v9 = vadd.f32 %v13116_v61, %v8572_v53 }
 0x393   : > { %v10780_v35 = vpop.eup %10779  ;;  %10791 = vtanh.f32 %v9256_v29 }
 0x394   : > { %v10782_v26 = vpop.eup %10781  ;;  %10793 = vtanh.f32 %v9258_v7 }
 0x395   : > { %v10784_v54 = vpop.eup %10783  ;;  %v10103_v17 = vpack.c.bf16 %v10782_v26, %v10780_v35  ;;  %10795 = vtanh.f32 %v9288_v36 }
 0x396   : > { %v10786_v31 = vpop.eup %10785  ;;  %10797 = vtanh.f32 %v9290_v33  ;;  %v8609_v42 = vpop.f32.mrb[4].mxu1 }
 0x397   : > { %v8652_v38 = vpop.f32.mrb[8].mxu0  ;;  %9585 = vst [vmem:[%s13137_s29] sm:$0xff] %v10103_v17  ;;  %v10120_v22 = vpack.c.bf16 %v10786_v31, %v10784_v54  ;;  %10799 = vtanh.f32 %v9289_v18  ;;  %v9259_v39 = vadd.f32 %v13114_v46, %v8609_v42  ;;  %v8611_v40 = vpop.f32.mrb[5].mxu1 }
 0x398   : > { %v9261_v41 = vadd.f32 %v13114_v46, %v8652_v38  ;;  %v8654_v14 = vpop.f32.mrb[9].mxu0  ;;  %10801 = vtanh.f32 %v9291_v9  ;;  %v9260_v32 = vadd.f32 %v13114_v46, %v8611_v40  ;;  %v8613_v48 = vpop.f32.mrb[6].mxu1 }
 0x399   : > { %v9262_v37 = vadd.f32 %v13114_v46, %v8654_v14  ;;  %v8656_v62 = vpop.f32.mrb[10].mxu0  ;;  %9602 = vst [vmem:[%s13137_s29 + $0x84] sm:$0x33] %v10120_v22  ;;  %10803 = vtanh.f32 %v9259_v39  ;;  %v9292_v15 = vadd.f32 %v13116_v61, %v8613_v48  ;;  %v8615_v45 = vpop.f32.mrb[7].mxu1 }
 0x39a   : > { %v8658_v47 = vpop.f32.mrb[11].mxu0  ;;  %10805 = vtanh.f32 %v9261_v41  ;;  %v9294_v8 = vadd.f32 %v13116_v61, %v8656_v62  ;;  %v9293_v6 = vadd.f32 %v13116_v61, %v8615_v45 }
 0x39b   : > { %v10788_v16 = vpop.eup %10787  ;;  %10807 = vtanh.f32 %v9260_v32  ;;  %v9295_v55 = vadd.f32 %v13116_v61, %v8658_v47 }
 0x39c   : > { %v10790_v43 = vpop.eup %10789  ;;  %10809 = vtanh.f32 %v9262_v37 }
 0x39d   : > { %v10792_v24 = vpop.eup %10791  ;;  %10811 = vtanh.f32 %v9292_v15 }
 0x39e   : > { %v10794_v44 = vpop.eup %10793  ;;  %v10104_v49 = vpack.c.bf16 %v10792_v24, %v10788_v16  ;;  %10813 = vtanh.f32 %v9294_v8  ;;  %v8695_v56 = vpop.f32.mrb[8].mxu1 }
 0x39f   : > { %v8738_v11 = vpop.f32.mrb[12].mxu0  ;;  %v10796_v59 = vpop.eup %10795  ;;  %v10105_v63 = vpack.c.bf16 %v10794_v44, %v10790_v43  ;;  %10815 = vtanh.f32 %v9293_v6  ;;  %v9263_v51 = vadd.f32 %v13114_v46, %v8695_v56 }
 0x3a0   : > { %v9265_v13 = vadd.f32 %v13114_v46, %v8738_v11  ;;  %v8697_v10 = vpop.f32.mrb[9].mxu1  ;;  %v8740_v58 = vpop.f32.mrb[13].mxu0  ;;  %9586 = vst [vmem:[%s13137_s29 + $0x8] sm:$0xff] %v10104_v49  ;;  %10817 = vtanh.f32 %v9295_v55 }
 0x3a1   : > { %v10798_v20 = vpop.eup %10797  ;;  %v9264_v21 = vadd.f32 %v13114_v46, %v8697_v10  ;;  %v9266_v1 = vadd.f32 %v13114_v46, %v8740_v58  ;;  %v8699_v23 = vpop.f32.mrb[10].mxu1  ;;  %9587 = vst [vmem:[%s13137_s29 + $0x10] sm:$0xff] %v10105_v63  ;;  %10819 = vtanh.f32 %v9263_v51 }
 0x3a2   : > { %v8742_v5 = vpop.f32.mrb[14].mxu0  ;;  %v10800_v12 = vpop.eup %10799  ;;  %v9296_v28 = vadd.f32 %v13116_v61, %v8699_v23  ;;  %10821 = vtanh.f32 %v9265_v13 }
 0x3a3   : > { %v8701_v34 = vpop.f32.mrb[11].mxu1  ;;  %v8744_v52 = vpop.f32.mrb[15].mxu0  ;;  %v10121_v30 = vpack.c.bf16 %v10800_v12, %v10796_v59  ;;  %v9298_v3 = vadd.f32 %v13116_v61, %v8742_v5  ;;  %10823 = vtanh.f32 %v9264_v21 }
 0x3a4   : > { %v10802_v19 = vpop.eup %10801  ;;  %v9297_v27 = vadd.f32 %v13116_v61, %v8701_v34  ;;  %10825 = vtanh.f32 %v9266_v1  ;;  %v9299_v7 = vadd.f32 %v13116_v61, %v8744_v52 }
 0x3a5   : > { %v10804_v60 = vpop.eup %10803  ;;  %v10122_v2 = vpack.c.bf16 %v10802_v19, %v10798_v20  ;;  %9603 = vst [vmem:[%s13137_s29 + $0x8c] sm:$0x33] %v10121_v30  ;;  %10827 = vtanh.f32 %v9296_v28 }
 0x3a6   : > { %v10806_v29 = vpop.eup %10805  ;;  %10829 = vtanh.f32 %v9298_v3  ;;  %v8781_v50 = vpop.f32.mrb[12].mxu1 }
 0x3a7   : > { %v10808_v57 = vpop.eup %10807  ;;  %9604 = vst [vmem:[%s13137_s29 + $0x94] sm:$0x33] %v10122_v2  ;;  %v8824_v53 = vpop.f32.mrb[16].mxu0  ;;  %10831 = vtanh.f32 %v9297_v27  ;;  %v9267_v18 = vadd.f32 %v13114_v46, %v8781_v50 }
 0x3a8   : > { %v10810_v25 = vpop.eup %10809  ;;  %v10106_v36 = vpack.c.bf16 %v10808_v57, %v10804_v60  ;;  %v9269_v26 = vadd.f32 %v13114_v46, %v8824_v53  ;;  %v8783_v9 = vpop.f32.mrb[13].mxu1  ;;  %10833 = vtanh.f32 %v9299_v7 }
 0x3a9   : > { %v10812_v33 = vpop.eup %10811  ;;  %v10107_v35 = vpack.c.bf16 %v10810_v25, %v10806_v29  ;;  %v8826_v54 = vpop.f32.mrb[17].mxu0  ;;  %v9268_v31 = vadd.f32 %v13114_v46, %v8783_v9  ;;  %10835 = vtanh.f32 %v9267_v18 }
 0x3aa   : > { %v10814_v17 = vpop.eup %10813  ;;  %9588 = vst [vmem:[%s13137_s29 + $0x18] sm:$0xff] %v10106_v36  ;;  %v9270_v42 = vadd.f32 %v13114_v46, %v8826_v54  ;;  %v8785_v38 = vpop.f32.mrb[14].mxu1  ;;  %10837 = vtanh.f32 %v9269_v26 }
 0x3ab   : > { %v8828_v22 = vpop.f32.mrb[18].mxu0  ;;  %v10816_v39 = vpop.eup %10815  ;;  %9589 = vst [vmem:[%s13137_s29 + $0x20] sm:$0xff] %v10107_v35  ;;  %v9300_v41 = vadd.f32 %v13116_v61, %v8785_v38  ;;  %10839 = vtanh.f32 %v9268_v31 }
 0x3ac   : > { %v8787_v40 = vpop.f32.mrb[15].mxu1  ;;  %v8830_v14 = vpop.f32.mrb[19].mxu0  ;;  %v10123_v37 = vpack.c.bf16 %v10816_v39, %v10812_v33  ;;  %v9302_v48 = vadd.f32 %v13116_v61, %v8828_v22  ;;  %10841 = vtanh.f32 %v9270_v42 }
 0x3ad   : > { %v10818_v32 = vpop.eup %10817  ;;  %v9301_v45 = vadd.f32 %v13116_v61, %v8787_v40  ;;  %v9303_v8 = vadd.f32 %v13116_v61, %v8830_v14  ;;  %10843 = vtanh.f32 %v9300_v41 }
 0x3ae   : > { %v10820_v62 = vpop.eup %10819  ;;  %v10124_v15 = vpack.c.bf16 %v10818_v32, %v10814_v17  ;;  %9605 = vst [vmem:[%s13137_s29 + $0x9c] sm:$0x33] %v10123_v37  ;;  %10845 = vtanh.f32 %v9302_v48  ;;  %v8867_v55 = vpop.f32.mrb[16].mxu1 }
 0x3af   : > { %v10822_v47 = vpop.eup %10821  ;;  %v8910_v24 = vpop.f32.mrb[20].mxu0  ;;  %10847 = vtanh.f32 %v9301_v45  ;;  %v9271_v56 = vadd.f32 %v13114_v46, %v8867_v55 }
 0x3b0   : > { %v10824_v16 = vpop.eup %10823  ;;  %9606 = vst [vmem:[%s13137_s29 + $0xa4] sm:$0x33] %v10124_v15  ;;  %v9273_v11 = vadd.f32 %v13114_v46, %v8910_v24  ;;  %v8869_v59 = vpop.f32.mrb[17].mxu1  ;;  %10849 = vtanh.f32 %v9303_v8 }
 0x3b1   : > { %v10826_v6 = vpop.eup %10825  ;;  %v10108_v43 = vpack.c.bf16 %v10824_v16, %v10820_v62  ;;  %v8912_v63 = vpop.f32.mrb[21].mxu0  ;;  %v9272_v13 = vadd.f32 %v13114_v46, %v8869_v59  ;;  %10851 = vtanh.f32 %v9271_v56 }
 0x3b2   : > { %v10828_v44 = vpop.eup %10827  ;;  %v10109_v49 = vpack.c.bf16 %v10826_v6, %v10822_v47  ;;  %v9274_v10 = vadd.f32 %v13114_v46, %v8912_v63  ;;  %v8871_v58 = vpop.f32.mrb[18].mxu1  ;;  %10853 = vtanh.f32 %v9273_v11 }
 0x3b3   : > { %v10830_v51 = vpop.eup %10829  ;;  %9590 = vst [vmem:[%s13137_s29 + $0x28] sm:$0xff] %v10108_v43  ;;  %v8914_v20 = vpop.f32.mrb[22].mxu0  ;;  %v9304_v1 = vadd.f32 %v13116_v61, %v8871_v58  ;;  %10855 = vtanh.f32 %v9272_v13 }
 0x3b4   : > { %v10832_v21 = vpop.eup %10831  ;;  %9591 = vst [vmem:[%s13137_s29 + $0x30] sm:$0xff] %v10109_v49  ;;  %v8873_v23 = vpop.f32.mrb[19].mxu1  ;;  %v9306_v34 = vadd.f32 %v13116_v61, %v8914_v20  ;;  %10857 = vtanh.f32 %v9274_v10 }
 0x3b5   : > { %v8916_v5 = vpop.f32.mrb[23].mxu0  ;;  %v10834_v12 = vpop.eup %10833  ;;  %v10125_v28 = vpack.c.bf16 %v10832_v21, %v10828_v44  ;;  %v9305_v30 = vadd.f32 %v13116_v61, %v8873_v23  ;;  %10859 = vtanh.f32 %v9304_v1 }
 0x3b6   : > { %v10836_v52 = vpop.eup %10835  ;;  %v10126_v19 = vpack.c.bf16 %v10834_v12, %v10830_v51  ;;  %v9307_v60 = vadd.f32 %v13116_v61, %v8916_v5  ;;  %10861 = vtanh.f32 %v9306_v34  ;;  %v8953_v7 = vpop.f32.mrb[20].mxu1 }
 0x3b7   : > { %v10838_v3 = vpop.eup %10837  ;;  %9607 = vst [vmem:[%s13137_s29 + $0xac] sm:$0x33] %v10125_v28  ;;  %v8996_v57 = vpop.f32.mrb[24].mxu0  ;;  %10863 = vtanh.f32 %v9305_v30  ;;  %v9275_v50 = vadd.f32 %v13114_v46, %v8953_v7 }
 0x3b8   : > { %v10840_v2 = vpop.eup %10839  ;;  %9608 = vst [vmem:[%s13137_s29 + $0xb4] sm:$0x33] %v10126_v19  ;;  %v9277_v53 = vadd.f32 %v13114_v46, %v8996_v57  ;;  %v8955_v33 = vpop.f32.mrb[21].mxu1  ;;  %10865 = vtanh.f32 %v9307_v60 }
 0x3b9   : > { %v10842_v27 = vpop.eup %10841  ;;  %v10110_v29 = vpack.c.bf16 %v10840_v2, %v10836_v52  ;;  %v8998_v35 = vpop.f32.mrb[25].mxu0  ;;  %v9276_v26 = vadd.f32 %v13114_v46, %v8955_v33  ;;  %10867 = vtanh.f32 %v9275_v50 }
 0x3ba   : > { %v10844_v25 = vpop.eup %10843  ;;  %v10111_v36 = vpack.c.bf16 %v10842_v27, %v10838_v3  ;;  %v9278_v9 = vadd.f32 %v13114_v46, %v8998_v35  ;;  %v8957_v54 = vpop.f32.mrb[22].mxu1  ;;  %10869 = vtanh.f32 %v9277_v53 }
 0x3bb   : > { %v10846_v18 = vpop.eup %10845  ;;  %9592 = vst [vmem:[%s13137_s29 + $0x38] sm:$0xff] %v10110_v29  ;;  %v9000_v17 = vpop.f32.mrb[26].mxu0  ;;  %v9308_v42 = vadd.f32 %v13116_v61, %v8957_v54  ;;  %10871 = vtanh.f32 %v9276_v26 }
 0x3bc   : > { %v10848_v31 = vpop.eup %10847  ;;  %9593 = vst [vmem:[%s13137_s29 + $0x40] sm:$0xff] %v10111_v36  ;;  %v8959_v38 = vpop.f32.mrb[23].mxu1  ;;  %v9310_v40 = vadd.f32 %v13116_v61, %v9000_v17  ;;  %10873 = vtanh.f32 %v9278_v9 }
 0x3bd   : > { %v9002_v22 = vpop.f32.mrb[27].mxu0  ;;  %v10850_v39 = vpop.eup %10849  ;;  %v10127_v41 = vpack.c.bf16 %v10848_v31, %v10844_v25  ;;  %v9309_v37 = vadd.f32 %v13116_v61, %v8959_v38  ;;  %10875 = vtanh.f32 %v9308_v42 }
 0x3be   : > { %v10852_v14 = vpop.eup %10851  ;;  %v10128_v32 = vpack.c.bf16 %v10850_v39, %v10846_v18  ;;  %v9311_v62 = vadd.f32 %v13116_v61, %v9002_v22  ;;  %10877 = vtanh.f32 %v9310_v40  ;;  %v9039_v8 = vpop.f32.mrb[24].mxu1 }
 0x3bf   : > { %v10854_v48 = vpop.eup %10853  ;;  %9609 = vst [vmem:[%s13137_s29 + $0xbc] sm:$0x33] %v10127_v41  ;;  %v9082_v16 = vpop.f32.mrb[28].mxu0  ;;  %10879 = vtanh.f32 %v9309_v37  ;;  %v9279_v55 = vadd.f32 %v13114_v46, %v9039_v8 }
 0x3c0   : > { %v10856_v15 = vpop.eup %10855  ;;  %9610 = vst [vmem:[%s13137_s29 + $0xc4] sm:$0x33] %v10128_v32  ;;  %v9281_v24 = vadd.f32 %v13114_v46, %v9082_v16  ;;  %v9041_v44 = vpop.f32.mrb[25].mxu1  ;;  %10881 = vtanh.f32 %v9311_v62 }
 0x3c1   : > { %v10858_v45 = vpop.eup %10857  ;;  %v10112_v47 = vpack.c.bf16 %v10856_v15, %v10852_v14  ;;  %v9084_v49 = vpop.f32.mrb[29].mxu0  ;;  %v9280_v11 = vadd.f32 %v13114_v46, %v9041_v44  ;;  %10883 = vtanh.f32 %v9279_v55 }
 0x3c2   : > { %v10860_v6 = vpop.eup %10859  ;;  %v10113_v43 = vpack.c.bf16 %v10858_v45, %v10854_v48  ;;  %v9282_v59 = vadd.f32 %v13114_v46, %v9084_v49  ;;  %v9043_v63 = vpop.f32.mrb[26].mxu1  ;;  %10885 = vtanh.f32 %v9281_v24 }
 0x3c3   : > { %v10862_v56 = vpop.eup %10861  ;;  %9594 = vst [vmem:[%s13137_s29 + $0x48] sm:$0xff] %v10112_v47  ;;  %v9086_v51 = vpop.f32.mrb[30].mxu0  ;;  %v9312_v10 = vadd.f32 %v13116_v61, %v9043_v63  ;;  %10887 = vtanh.f32 %v9280_v11 }
 0x3c4   : > { %v10864_v13 = vpop.eup %10863  ;;  %9595 = vst [vmem:[%s13137_s29 + $0x50] sm:$0xff] %v10113_v43  ;;  %v9045_v58 = vpop.f32.mrb[27].mxu1  ;;  %v9314_v23 = vadd.f32 %v13116_v61, %v9086_v51  ;;  %10889 = vtanh.f32 %v9282_v59 }
 0x3c5   : > { %v9088_v20 = vpop.f32.mrb[31].mxu0  ;;  %v10866_v21 = vpop.eup %10865  ;;  %v10129_v1 = vpack.c.bf16 %v10864_v13, %v10860_v6  ;;  %v9313_v28 = vadd.f32 %v13116_v61, %v9045_v58  ;;  %10891 = vtanh.f32 %v9312_v10 }
 0x3c6   : > { %v10868_v5 = vpop.eup %10867  ;;  %v10130_v12 = vpack.c.bf16 %v10866_v21, %v10862_v56  ;;  %v9315_v52 = vadd.f32 %v13116_v61, %v9088_v20  ;;  %10893 = vtanh.f32 %v9314_v23  ;;  %v9125_v60 = vpop.f32.mrb[28].mxu1 }
 0x3c7   : > { %v10870_v34 = vpop.eup %10869  ;;  %9611 = vst [vmem:[%s13137_s29 + $0xcc] sm:$0x33] %v10129_v1  ;;  %v9168_v2 = vpop.f32.mrb[48].mxu0  ;;  %10895 = vtanh.f32 %v9313_v28  ;;  %v9283_v7 = vadd.f32 %v13114_v46, %v9125_v60 }
 0x3c8   : > { %v10872_v19 = vpop.eup %10871  ;;  %9612 = vst [vmem:[%s13137_s29 + $0xd4] sm:$0x33] %v10130_v12  ;;  %v9207_v57 = vadd.f32 %v9168_v2, %v13118_v4  ;;  %v9127_v25 = vpop.f32.mrb[29].mxu1  ;;  %10897 = vtanh.f32 %v9315_v52 }
 0x3c9   : > { %v10874_v30 = vpop.eup %10873  ;;  %v10114_v3 = vpack.c.bf16 %v10872_v19, %v10868_v5  ;;  %v10207_v36 = vpop.f32.mrb[49].mxu0  ;;  %v9284_v53 = vadd.f32 %v13114_v46, %v9127_v25  ;;  %10899 = vtanh.f32 %v9283_v7 }
 0x3ca   : > { %v10876_v27 = vpop.eup %10875  ;;  %v10115_v29 = vpack.c.bf16 %v10874_v30, %v10870_v34  ;;  %v9129_v33 = vpop.f32.mrb[30].mxu1  ;;  %v9285_v26 = vadd.f32 %v13114_v46, %v9207_v57 }
 0x3cb   : > { %v10878_v50 = vpop.eup %10877  ;;  %9596 = vst [vmem:[%s13137_s29 + $0x58] sm:$0xff] %v10114_v3  ;;  %v9171_v35 = vpop.f32.mrb[50].mxu0  ;;  %v9316_v9 = vadd.f32 %v13116_v61, %v9129_v33  ;;  %10901 = vtanh.f32 %v9284_v53 }
 0x3cc   : > { %v10880_v18 = vpop.eup %10879  ;;  %9597 = vst [vmem:[%s13137_s29 + $0x60] sm:$0xff] %v10115_v29  ;;  %v9240_v4 = vadd.f32 %v9171_v35, %v13122_v0  ;;  %v9131_v54 = vpop.f32.mrb[31].mxu1  ;;  %10903 = vtanh.f32 %v9285_v26 }
 0x3cd   : > { %v10208_v17 = vpop.f32.mrb[51].mxu0  ;;  %v10882_v31 = vpop.eup %10881  ;;  %v10131_v42 = vpack.c.bf16 %v10880_v18, %v10876_v27  ;;  %v9317_v38 = vadd.f32 %v13116_v61, %v9131_v54  ;;  %10905 = vtanh.f32 %v9316_v9 }
 0x3ce   : > { %v10884_v22 = vpop.eup %10883  ;;  %v10132_v39 = vpack.c.bf16 %v10882_v31, %v10878_v50  ;;  %v9318_v41 = vadd.f32 %v13116_v61, %v9240_v4 }
 0x3cf   : > { %v10886_v46 = vpop.eup %10885  ;;  %9613 = vst [vmem:[%s13137_s29 + $0xdc] sm:$0x33] %v10131_v42 }
 0x3d0   : > { %v10888_v40 = vpop.eup %10887  ;;  %9614 = vst [vmem:[%s13137_s29 + $0xe4] sm:$0x33] %v10132_v39  ;;  %10907 = vtanh.f32 %v9318_v41 }
 0x3d1   : > { %v10890_v0 = vpop.eup %10889  ;;  %v10116_v14 = vpack.c.bf16 %v10888_v40, %v10884_v22  ;;  %10909 = vtanh.f32 %v9317_v38 }
 0x3d2   : > { %v10892_v32 = vpop.eup %10891  ;;  %v10117_v37 = vpack.c.bf16 %v10890_v0, %v10886_v46 }
 0x3d3   : > { %v10894_v48 = vpop.eup %10893  ;;  %9598 = vst [vmem:[%s13137_s29 + $0x68] sm:$0xff] %v10116_v14 }
 0x3d4   : > { %v10896_v62 = vpop.eup %10895  ;;  %9599 = vst [vmem:[%s13137_s29 + $0x70] sm:$0xff] %v10117_v37 }
 0x3d5   : > { %v10898_v61 = vpop.eup %10897  ;;  %v10133_v15 = vpack.c.bf16 %v10896_v62, %v10892_v32 }
 0x3d6   : > { %v10900_v45 = vpop.eup %10899  ;;  %v10134_v47 = vpack.c.bf16 %v10898_v61, %v10894_v48 }
 0x3d7   : > { %v10902_v8 = vpop.eup %10901  ;;  %9615 = vst [vmem:[%s13137_s29 + $0xec] sm:$0x33] %v10133_v15 }
 0x3d8   : > { %v10904_v16 = vpop.eup %10903  ;;  %9616 = vst [vmem:[%s13137_s29 + $0xf4] sm:$0x33] %v10134_v47  ;;  %v10118_v6 = vpack.c.bf16 %v10902_v8, %v10900_v45 }
 0x3d9   : > { %v10906_v43 = vpop.eup %10905  ;;  %v10119_v55 = vpack.c.bf16 %v10904_v16, %v10904_v16 }
 0x3da   : > { %v10908_v24 = vpop.eup %10907  ;;  %9600 = vst [vmem:[%s13137_s29 + $0x78] sm:$0xff] %v10118_v6 }
 0x3db   : > { %v10910_v44 = vpop.eup %10909  ;;  %9601 = vst [vmem:[%s13137_s29 + $0x80] sm:$0xf] %v10119_v55  ;;  %v10136_v49 = vpack.c.bf16 %v10908_v24, %v10908_v24 }
 0x3dc   : > { %v10135_v56 = vpack.c.bf16 %v10910_v44, %v10906_v43 }
 0x3dd   : > { %9618 = vst [vmem:[%s13137_s29 + $0x104] sm:$0x3] %v10136_v49 }
 0x3de   : > { %9617 = vst [vmem:[%s13137_s29 + $0xfc] sm:$0x33] %v10135_v56 }
 0x3df PF: > { %s13_s14 = sadd.s32 1, %s10935_s14   ;;  %s13295_s12 = smov %s10931_s13 }
 0x3e0   : > { %p10_p5 = scmp.ge.s32.totalorder %s13_s14, 4   ;;  %s13296_s13 = smov %s13298_s15 }
 0x3e2   :  { %12 = sbr.rel (!%p10_p5) target bundleno = 2 (0x2), region = 76 }

</bundles_post_ra>
